<compile_context>
chip_gen: v7x
topology: tpu7x:2x2x1
jax: 0.10.0
libtpu: 0.0.40
codegen_flags: <defaults>
</compile_context>

<pallas_src>
import jax
import jax.numpy as jnp
from jax.experimental import pallas as pl
from jax.experimental.pallas import tpu as pltpu

CIN, C_STEM, C_PROJ, C_HEAD, C_SE, N_CLASSES = 3, 32, 16, 64, 8, 7


# ----------------------------------------------------------------------------
# Fused forward kernel: one grid step == B_blk images.
# ----------------------------------------------------------------------------
def _facemodel_kernel(planes_ref, labels_ref,
                      stem_w_ref, stem_b_ref,
                      dw_w_ref, dw_scale_ref, dw_shift_ref,
                      se_w1_ref, se_b1_ref, se_w2_ref, se_b2_ref,
                      w_fused_ref, b_fused_ref,
                      fc_w_ref, fc_b_ref,
                      logits_ref, loss_ref,
                      col_ref, pad_ref):
    B, HP, WP, CP = planes_ref.shape          # CP = 4 * Cin = 12
    Ho, Wo = HP - 1, WP - 1
    M = Ho * Wo
    BM = B * M
    C = stem_b_ref.shape[1]                   # 32
    CH = b_fused_ref.shape[1]                 # 64

    # ---- Stem 3x3 stride-2 conv as ONE K=48 MXU matmul (+ bias + SiLU).
    #      Gather the four spatial-offset slabs of the merged parity planes into
    #      a bf16 (BM, 48) column scratch; zero weight rows kill the taps that a
    #      3x3 kernel can never reach. ----
    for t, (ay, ax) in enumerate(((0, 0), (0, 1), (1, 0), (1, 1))):
        piece = planes_ref[:, ay:ay + Ho, ax:ax + Wo, :]        # (B, Ho, Wo, CP) bf16
        col_ref[:, CP * t:CP * (t + 1)] = piece.reshape(BM, CP)
    acc = jnp.dot(col_ref[...], stem_w_ref[...],
                  preferred_element_type=jnp.float32)
    acc = acc + stem_b_ref[...]
    h = acc * jax.nn.sigmoid(acc)                                # SiLU, (BM, C) f32

    # ---- Depthwise 3x3 (stride 1, pad 1) + BN(scale/shift) + SiLU.
    #      Only the 1-pixel border ring of the halo scratch is zeroed each step
    #      (interior is fully overwritten; never gated on program_id). ----
    hh = h.reshape(B, Ho, Wo, C)
    zrow = jnp.zeros((B, 1, Wo + 2, C), jnp.float32)
    zcol = jnp.zeros((B, Ho + 2, 1, C), jnp.float32)
    pad_ref[:, 0:1, :, :] = zrow
    pad_ref[:, Ho + 1:Ho + 2, :, :] = zrow
    pad_ref[:, :, 0:1, :] = zcol
    pad_ref[:, :, Wo + 1:Wo + 2, :] = zcol
    pad_ref[:, 1:Ho + 1, 1:Wo + 1, :] = hh

    dacc = pad_ref[:, 0:Ho, 0:Wo, :] * dw_w_ref[0]
    for k in range(1, 9):
        dy, dx = k // 3, k % 3
        dacc = dacc + pad_ref[:, dy:dy + Ho, dx:dx + Wo, :] * dw_w_ref[k]
    dacc = dacc * dw_scale_ref[...] + dw_shift_ref[...]
    d = (dacc * jax.nn.sigmoid(dacc)).reshape(BM, C)             # (BM, C) f32

    # ---- Squeeze-and-excite: per-image GAP + two tiny matmuls (f32). ----
    pooled = jnp.concatenate(
        [jnp.sum(d[i * M:(i + 1) * M], axis=0, keepdims=True) for i in range(B)],
        axis=0) * (1.0 / M)                                      # (B, C)
    s1 = jnp.dot(pooled, se_w1_ref[...],
                 preferred_element_type=jnp.float32) + se_b1_ref[...]
    s1 = s1 * jax.nn.sigmoid(s1)
    s2 = jnp.dot(s1, se_w2_ref[...],
                 preferred_element_type=jnp.float32) + se_b2_ref[...]
    se = jax.nn.sigmoid(s2)                                      # (B, C)

    # ---- SE channel-scale + fused (project . head) 1x1 conv + SiLU. ----
    scaled = (d.reshape(B, M, C) * se[:, None, :]).reshape(BM, C).astype(jnp.bfloat16)
    hd = jnp.dot(scaled, w_fused_ref[...],
                 preferred_element_type=jnp.float32) + b_fused_ref[...]
    hd = hd * jax.nn.sigmoid(hd)                                 # (BM, CH) f32

    # ---- Global average pool -> classifier -> per-image cross entropy. ----
    feat = jnp.concatenate(
        [jnp.sum(hd[i * M:(i + 1) * M], axis=0, keepdims=True) for i in range(B)],
        axis=0) * (1.0 / M)                                      # (B, CH)
    logits = jnp.dot(feat, fc_w_ref[...],
                     preferred_element_type=jnp.float32) + fc_b_ref[...]
    logits_ref[...] = logits                                     # (B, 7)

    labels = labels_ref[...]                                     # (B, 1) int32
    mx = jnp.max(logits, axis=-1, keepdims=True)
    lse = mx + jnp.log(jnp.sum(jnp.exp(logits - mx), axis=-1, keepdims=True))
    classes = jax.lax.broadcasted_iota(jnp.int32, logits.shape, 1)
    # NOTE: labels outside [0, 6] silently yield picked = 0 (no runtime check).
    picked = jnp.sum(jnp.where(classes == labels, logits, 0.0),
                     axis=-1, keepdims=True)
    loss_ref[...] = lse - picked                                 # (B, 1)


# ----------------------------------------------------------------------------
# Parameters (deterministic, synthetic — no checkpoint load).
# ----------------------------------------------------------------------------
def init_params(key):
    ks = jax.random.split(key, 12)

    def w(k, shape, scale=0.05):
        return scale * jax.random.normal(k, shape, jnp.float32)

    return {
        # NOTE: real PyTorch conv weights (Cout, Cin, kH, kW) must be permuted to
        # this (kH*kW, Cin, Cout) tap ordering before use.
        "stem_w": w(ks[0], (9, CIN, C_STEM)),
        "stem_b": w(ks[1], (C_STEM,)),
        "dw_w": w(ks[2], (9, C_STEM)),
        "dw_scale": 1.0 + w(ks[3], (1, C_STEM)),
        "dw_shift": w(ks[4], (1, C_STEM)),
        "se_w1": w(ks[5], (C_STEM, C_SE)),
        "se_b1": jnp.zeros((C_SE,), jnp.float32),
        "se_w2": w(ks[6], (C_SE, C_STEM)),
        "se_b2": jnp.zeros((C_STEM,), jnp.float32),
        "proj_w": w(ks[7], (C_STEM, C_PROJ)),
        "proj_b": w(ks[8], (C_PROJ,)),
        "head_w": w(ks[9], (C_PROJ, C_HEAD)),
        "head_b": w(ks[10], (C_HEAD,)),
        "fc_w": w(ks[11], (C_HEAD, N_CLASSES)),
        "fc_b": jnp.zeros((N_CLASSES,), jnp.float32),
    }


# ----------------------------------------------------------------------------
# FaceModel.forward
# ----------------------------------------------------------------------------
def face_model_forward(images_nchw, params, labels=None):
    # PyTorch NCHW -> NHWC (channels on the 128-lane dim).
    x = jnp.transpose(images_nchw, (0, 2, 3, 1)).astype(jnp.float32)
    N, H, W, Cin = x.shape
    assert H % 2 == 0 and W % 2 == 0, "even spatial dims expected"
    Ho, Wo = H // 2, W // 2
    HP, WP = Ho + 1, Wo + 1
    M = Ho * Wo

    # Images per grid step (amortizes per-step pipeline overhead; must divide N).
    B_blk = 1
    for cand in (8, 4, 2):
        if N % cand == 0:
            B_blk = cand
            break

    # Merged bf16 parity planes of the zero-padded input; channel = 3*(2*py+px)+c.
    xp = jnp.pad(x, ((0, 0), (1, 1), (1, 1), (0, 0)))
    merged = jnp.concatenate(
        [xp[:, py::2, px::2, :] for py in (0, 1) for px in (0, 1)],
        axis=-1).astype(jnp.bfloat16)                            # (N, HP, WP, 12)

    # Stem weight expanded to the K=48 column layout used in-kernel:
    # row = 12*(2*ay+ax) + 3*(2*py+px) + c  <->  conv tap (dy,dx)=(2ay+py, 2ax+px);
    # taps with dy==3 or dx==3 cannot occur in a 3x3 kernel -> zero rows.
    zero_tap = jnp.zeros((Cin, C_STEM), jnp.float32)
    rows = []
    for ay in (0, 1):
        for ax in (0, 1):
            for py in (0, 1):
                for px in (0, 1):
                    dy, dx = 2 * ay + py, 2 * ax + px
                    rows.append(params["stem_w"][dy * 3 + dx]
                                if (dy < 3 and dx < 3) else zero_tap)
    stem_w48 = jnp.concatenate(rows, axis=0).astype(jnp.bfloat16)  # (48, C_STEM)

    # Fold the linear 1x1 "project" into the head conv (exact: no BN/activation
    # between them in this pipeline).
    w_fused = (params["proj_w"] @ params["head_w"]).astype(jnp.bfloat16)
    b_fused = (params["proj_b"] @ params["head_w"]
               + params["head_b"]).reshape(1, C_HEAD)

    have_labels = labels is not None
    labels2 = (labels.reshape(N, 1).astype(jnp.int32) if have_labels
               else jnp.zeros((N, 1), jnp.int32))

    # VMEM budget: ~75% of physical (48 MiB on v7x, 96 MiB on v5e/v6e).
    try:
        vmem_cap = int(pltpu.get_tpu_info().vmem_capacity_bytes)
    except Exception:
        vmem_cap = 64 * 1024 * 1024
    vmem_limit = min((3 * vmem_cap) // 4, 112 * 1024 * 1024)

    def _const_spec(shape):
        nd = len(shape)
        return pl.BlockSpec(tuple(shape), lambda i, _nd=nd: (0,) * _nd)

    cost = pl.CostEstimate(
        flops=2 * N * M * (48 * C_STEM + 9 * C_STEM + C_STEM * C_HEAD)
              + 2 * N * (2 * C_STEM * C_SE + C_HEAD * N_CLASSES),
        transcendentals=N * M * (2 * C_STEM + C_HEAD)
                        + N * (C_SE + C_STEM + N_CLASSES),
        bytes_accessed=N * HP * WP * 4 * Cin * 2 + N * (N_CLASSES + 1) * 4
                       + (48 * C_STEM + C_STEM * C_HEAD) * 2
                       + (15 * C_STEM + 2 * C_STEM * C_SE + C_SE
                          + C_HEAD + C_HEAD * N_CLASSES + N_CLASSES) * 4,
    )

    logits, loss_pi = pl.pallas_call(
        _facemodel_kernel,
        grid=(N // B_blk,),
        out_shape=(jax.ShapeDtypeStruct((N, N_CLASSES), jnp.float32),
                   jax.ShapeDtypeStruct((N, 1), jnp.float32)),
        in_specs=[
            pl.BlockSpec((B_blk, HP, WP, 4 * Cin), lambda i: (i, 0, 0, 0)),
            pl.BlockSpec((B_blk, 1), lambda i: (i, 0)),
            _const_spec((48, C_STEM)),
            _const_spec((1, C_STEM)),
            _const_spec((9, C_STEM)),
            _const_spec((1, C_STEM)),
            _const_spec((1, C_STEM)),
            _const_spec((C_STEM, C_SE)),
            _const_spec((1, C_SE)),
            _const_spec((C_SE, C_STEM)),
            _const_spec((1, C_STEM)),
            _const_spec((C_STEM, C_HEAD)),
            _const_spec((1, C_HEAD)),
            _const_spec((C_HEAD, N_CLASSES)),
            _const_spec((1, N_CLASSES)),
        ],
        out_specs=(pl.BlockSpec((B_blk, N_CLASSES), lambda i: (i, 0)),
                   pl.BlockSpec((B_blk, 1), lambda i: (i, 0))),
        scratch_shapes=[
            pltpu.VMEM((B_blk * M, 4 * 4 * Cin), jnp.bfloat16),   # im2col columns
            pltpu.VMEM((B_blk, Ho + 2, Wo + 2, C_STEM), jnp.float32),  # dw halo
        ],
        compiler_params=pltpu.CompilerParams(
            dimension_semantics=("parallel",),
            vmem_limit_bytes=vmem_limit),
        cost_estimate=cost,
    )(merged, labels2,
      stem_w48,
      params["stem_b"].reshape(1, C_STEM),
      params["dw_w"],
      params["dw_scale"].reshape(1, C_STEM),
      params["dw_shift"].reshape(1, C_STEM),
      params["se_w1"],
      params["se_b1"].reshape(1, C_SE),
      params["se_w2"],
      params["se_b2"].reshape(1, C_STEM),
      w_fused, b_fused,
      params["fc_w"],
      params["fc_b"].reshape(1, N_CLASSES))

    if not have_labels:
        return logits
    return logits, jnp.mean(loss_pi)


if __name__ == "__main__":
    key = jax.random.PRNGKey(0)
    k_img, k_par = jax.random.split(key)

    images = jax.random.normal(k_img, (2, 3, 32, 32), jnp.float32)  # NCHW
    labels = jnp.array([1, 5], dtype=jnp.int32)
    params = init_params(k_par)

    fwd = jax.jit(face_model_forward)
    logits, loss = fwd(images, params, labels)
    logits_only = fwd(images, params, None)

    jax.block_until_ready((logits, loss, logits_only))
    assert logits.shape == (2, 7)
    assert logits_only.shape == (2, 7)
    assert loss.shape == ()
    print("KERNEL_OK")
</pallas_src>

<mosaic_0001>
module attributes {stable_mosaic.version = 11 : i64} {
  func.func @_facemodel_kernel(%arg0: i32, %arg1: memref<2x17x17x12xbf16, #tpu.memory_space<vmem>>, %arg2: memref<2x1xi32, #tpu.memory_space<vmem>>, %arg3: memref<48x32xbf16, #tpu.memory_space<vmem>>, %arg4: memref<1x32xf32, #tpu.memory_space<vmem>>, %arg5: memref<9x32xf32, #tpu.memory_space<vmem>>, %arg6: memref<1x32xf32, #tpu.memory_space<vmem>>, %arg7: memref<1x32xf32, #tpu.memory_space<vmem>>, %arg8: memref<32x8xf32, #tpu.memory_space<vmem>>, %arg9: memref<1x8xf32, #tpu.memory_space<vmem>>, %arg10: memref<8x32xf32, #tpu.memory_space<vmem>>, %arg11: memref<1x32xf32, #tpu.memory_space<vmem>>, %arg12: memref<32x64xbf16, #tpu.memory_space<vmem>>, %arg13: memref<1x64xf32, #tpu.memory_space<vmem>>, %arg14: memref<64x7xf32, #tpu.memory_space<vmem>>, %arg15: memref<1x7xf32, #tpu.memory_space<vmem>>, %arg16: memref<2x7xf32, #tpu.memory_space<vmem>>, %arg17: memref<2x1xf32, #tpu.memory_space<vmem>>, %arg18: memref<512x48xbf16, #tpu.memory_space<vmem>>, %arg19: memref<2x18x18x32xf32, #tpu.memory_space<vmem>>) attributes {dimension_semantics = [#tpu.dimension_semantics<parallel>], iteration_bounds = array<i64: 1>, scalar_prefetch = 0 : i64, scratch_operands = 2 : i64, tpu.core_type = #tpu.core_type<tc>, window_params = [{transform_indices = @transform_0, window_bounds = array<i64: 2, 17, 17, 12>}, {transform_indices = @transform_1, window_bounds = array<i64: 2, 1>}, {pipeline_mode = #tpu.pipeline_mode<synchronous>, transform_indices = @transform_2, window_bounds = array<i64: 48, 32>}, {pipeline_mode = #tpu.pipeline_mode<synchronous>, transform_indices = @transform_3, window_bounds = array<i64: 1, 32>}, {pipeline_mode = #tpu.pipeline_mode<synchronous>, transform_indices = @transform_4, window_bounds = array<i64: 9, 32>}, {pipeline_mode = #tpu.pipeline_mode<synchronous>, transform_indices = @transform_5, window_bounds = array<i64: 1, 32>}, {pipeline_mode = #tpu.pipeline_mode<synchronous>, transform_indices = @transform_6, window_bounds = array<i64: 1, 32>}, {pipeline_mode = #tpu.pipeline_mode<synchronous>, transform_indices = @transform_7, window_bounds = array<i64: 32, 8>}, {pipeline_mode = #tpu.pipeline_mode<synchronous>, transform_indices = @transform_8, window_bounds = array<i64: 1, 8>}, {pipeline_mode = #tpu.pipeline_mode<synchronous>, transform_indices = @transform_9, window_bounds = array<i64: 8, 32>}, {pipeline_mode = #tpu.pipeline_mode<synchronous>, transform_indices = @transform_10, window_bounds = array<i64: 1, 32>}, {pipeline_mode = #tpu.pipeline_mode<synchronous>, transform_indices = @transform_11, window_bounds = array<i64: 32, 64>}, {pipeline_mode = #tpu.pipeline_mode<synchronous>, transform_indices = @transform_12, window_bounds = array<i64: 1, 64>}, {pipeline_mode = #tpu.pipeline_mode<synchronous>, transform_indices = @transform_13, window_bounds = array<i64: 64, 7>}, {pipeline_mode = #tpu.pipeline_mode<synchronous>, transform_indices = @transform_14, window_bounds = array<i64: 1, 7>}, {transform_indices = @transform_15, window_bounds = array<i64: 2, 7>}, {transform_indices = @transform_16, window_bounds = array<i64: 2, 1>}]} {
    %c0 = arith.constant 0 : index
    %c0_0 = arith.constant 0 : index
    %c0_1 = arith.constant 0 : index
    %c0_2 = arith.constant 0 : index
    %0 = vector.load %arg1[%c0, %c0_0, %c0_1, %c0_2] : memref<2x17x17x12xbf16, #tpu.memory_space<vmem>>, vector<2x16x16x12xbf16>
    %1 = vector.shape_cast %0 : vector<2x16x16x12xbf16> to vector<512x12xbf16>
    %c0_3 = arith.constant 0 : index
    %c0_4 = arith.constant 0 : index
    %2 = vector.load %arg18[%c0_3, %c0_4] : memref<512x48xbf16, #tpu.memory_space<vmem>>, vector<512x12xbf16>
    tpu.vector_store %arg18[%c0_3, %c0_4], %1 {strides = array<i32>} : memref<512x48xbf16, #tpu.memory_space<vmem>>, vector<512x12xbf16>,
    %c0_5 = arith.constant 0 : index
    %c0_6 = arith.constant 0 : index
    %c1 = arith.constant 1 : index
    %c0_7 = arith.constant 0 : index
    %3 = vector.load %arg1[%c0_5, %c0_6, %c1, %c0_7] : memref<2x17x17x12xbf16, #tpu.memory_space<vmem>>, vector<2x16x16x12xbf16>
    %4 = vector.shape_cast %3 : vector<2x16x16x12xbf16> to vector<512x12xbf16>
    %c0_8 = arith.constant 0 : index
    %c12 = arith.constant 12 : index
    %5 = vector.load %arg18[%c0_8, %c12] : memref<512x48xbf16, #tpu.memory_space<vmem>>, vector<512x12xbf16>
    tpu.vector_store %arg18[%c0_8, %c12], %4 {strides = array<i32>} : memref<512x48xbf16, #tpu.memory_space<vmem>>, vector<512x12xbf16>,
    %c0_9 = arith.constant 0 : index
    %c1_10 = arith.constant 1 : index
    %c0_11 = arith.constant 0 : index
    %c0_12 = arith.constant 0 : index
    %6 = vector.load %arg1[%c0_9, %c1_10, %c0_11, %c0_12] : memref<2x17x17x12xbf16, #tpu.memory_space<vmem>>, vector<2x16x16x12xbf16>
    %7 = vector.shape_cast %6 : vector<2x16x16x12xbf16> to vector<512x12xbf16>
    %c0_13 = arith.constant 0 : index
    %c24 = arith.constant 24 : index
    %8 = vector.load %arg18[%c0_13, %c24] : memref<512x48xbf16, #tpu.memory_space<vmem>>, vector<512x12xbf16>
    tpu.vector_store %arg18[%c0_13, %c24], %7 {strides = array<i32>} : memref<512x48xbf16, #tpu.memory_space<vmem>>, vector<512x12xbf16>,
    %c0_14 = arith.constant 0 : index
    %c1_15 = arith.constant 1 : index
    %c1_16 = arith.constant 1 : index
    %c0_17 = arith.constant 0 : index
    %9 = vector.load %arg1[%c0_14, %c1_15, %c1_16, %c0_17] : memref<2x17x17x12xbf16, #tpu.memory_space<vmem>>, vector<2x16x16x12xbf16>
    %10 = vector.shape_cast %9 : vector<2x16x16x12xbf16> to vector<512x12xbf16>
    %c0_18 = arith.constant 0 : index
    %c36 = arith.constant 36 : index
    %11 = vector.load %arg18[%c0_18, %c36] : memref<512x48xbf16, #tpu.memory_space<vmem>>, vector<512x12xbf16>
    tpu.vector_store %arg18[%c0_18, %c36], %10 {strides = array<i32>} : memref<512x48xbf16, #tpu.memory_space<vmem>>, vector<512x12xbf16>,
    %c0_19 = arith.constant 0 : index
    %c0_20 = arith.constant 0 : index
    %12 = vector.load %arg18[%c0_19, %c0_20] : memref<512x48xbf16, #tpu.memory_space<vmem>>, vector<512x48xbf16>
    %c0_21 = arith.constant 0 : index
    %c0_22 = arith.constant 0 : index
    %13 = vector.load %arg3[%c0_21, %c0_22] : memref<48x32xbf16, #tpu.memory_space<vmem>>, vector<48x32xbf16>
    %cst = arith.constant dense<0.000000e+00> : vector<512x32xf32>
    %14 = tpu.matmul %12, %13, %cst {dimension_numbers = #tpu.dot_dimension_numbers<[1], [0], [0], [1], [0, 0, 1, 1], [], []>} : vector<512x48xbf16>, vector<48x32xbf16>, vector<512x32xf32> -> vector<512x32xf32>
    %c0_23 = arith.constant 0 : index
    %c0_24 = arith.constant 0 : index
    %15 = vector.load %arg4[%c0_23, %c0_24] : memref<1x32xf32, #tpu.memory_space<vmem>>, vector<1x32xf32>
    %16 = vector.broadcast %15 : vector<1x32xf32> to vector<512x32xf32>
    %17 = arith.addf %14, %16 : vector<512x32xf32>
    %18 = arith.negf %17 : vector<512x32xf32>
    %19 = math.exp %18 : vector<512x32xf32>
    %cst_25 = arith.constant 1.000000e+00 : f32
    %20 = vector.broadcast %cst_25 : f32 to vector<512x32xf32>
    %21 = arith.addf %20, %19 : vector<512x32xf32>
    %22 = arith.divf %20, %21 : vector<512x32xf32>
    %23 = arith.mulf %17, %22 : vector<512x32xf32>
    %24 = vector.shape_cast %23 : vector<512x32xf32> to vector<2x16x16x32xf32>
    %cst_26 = arith.constant 0.000000e+00 : f32
    %25 = vector.broadcast %cst_26 : f32 to vector<2x1x18x32xf32>
    %cst_27 = arith.constant 0.000000e+00 : f32
    %26 = vector.broadcast %cst_27 : f32 to vector<2x18x1x32xf32>
    %c0_28 = arith.constant 0 : index
    %c0_29 = arith.constant 0 : index
    %c0_30 = arith.constant 0 : index
    %c0_31 = arith.constant 0 : index
    %27 = vector.load %arg19[%c0_28, %c0_29, %c0_30, %c0_31] : memref<2x18x18x32xf32, #tpu.memory_space<vmem>>, vector<2x1x18x32xf32>
    tpu.vector_store %arg19[%c0_28, %c0_29, %c0_30, %c0_31], %25 {strides = array<i32>} : memref<2x18x18x32xf32, #tpu.memory_space<vmem>>, vector<2x1x18x32xf32>,
    %c0_32 = arith.constant 0 : index
    %c17 = arith.constant 17 : index
    %c0_33 = arith.constant 0 : index
    %c0_34 = arith.constant 0 : index
    %28 = vector.load %arg19[%c0_32, %c17, %c0_33, %c0_34] : memref<2x18x18x32xf32, #tpu.memory_space<vmem>>, vector<2x1x18x32xf32>
    tpu.vector_store %arg19[%c0_32, %c17, %c0_33, %c0_34], %25 {strides = array<i32>} : memref<2x18x18x32xf32, #tpu.memory_space<vmem>>, vector<2x1x18x32xf32>,
    %c0_35 = arith.constant 0 : index
    %c0_36 = arith.constant 0 : index
    %c0_37 = arith.constant 0 : index
    %c0_38 = arith.constant 0 : index
    %29 = vector.load %arg19[%c0_35, %c0_36, %c0_37, %c0_38] : memref<2x18x18x32xf32, #tpu.memory_space<vmem>>, vector<2x18x1x32xf32>
    tpu.vector_store %arg19[%c0_35, %c0_36, %c0_37, %c0_38], %26 {strides = array<i32>} : memref<2x18x18x32xf32, #tpu.memory_space<vmem>>, vector<2x18x1x32xf32>,
    %c0_39 = arith.constant 0 : index
    %c0_40 = arith.constant 0 : index
    %c17_41 = arith.constant 17 : index
    %c0_42 = arith.constant 0 : index
    %30 = vector.load %arg19[%c0_39, %c0_40, %c17_41, %c0_42] : memref<2x18x18x32xf32, #tpu.memory_space<vmem>>, vector<2x18x1x32xf32>
    tpu.vector_store %arg19[%c0_39, %c0_40, %c17_41, %c0_42], %26 {strides = array<i32>} : memref<2x18x18x32xf32, #tpu.memory_space<vmem>>, vector<2x18x1x32xf32>,
    %c0_43 = arith.constant 0 : index
    %c1_44 = arith.constant 1 : index
    %c1_45 = arith.constant 1 : index
    %c0_46 = arith.constant 0 : index
    %31 = vector.load %arg19[%c0_43, %c1_44, %c1_45, %c0_46] : memref<2x18x18x32xf32, #tpu.memory_space<vmem>>, vector<2x16x16x32xf32>
    tpu.vector_store %arg19[%c0_43, %c1_44, %c1_45, %c0_46], %24 {strides = array<i32>} : memref<2x18x18x32xf32, #tpu.memory_space<vmem>>, vector<2x16x16x32xf32>,
    %c0_47 = arith.constant 0 : index
    %c0_48 = arith.constant 0 : index
    %c0_49 = arith.constant 0 : index
    %c0_50 = arith.constant 0 : index
    %32 = vector.load %arg19[%c0_47, %c0_48, %c0_49, %c0_50] : memref<2x18x18x32xf32, #tpu.memory_space<vmem>>, vector<2x16x16x32xf32>
    %c0_51 = arith.constant 0 : index
    %c0_52 = arith.constant 0 : index
    %33 = vector.load %arg5[%c0_51, %c0_52] : memref<9x32xf32, #tpu.memory_space<vmem>>, vector<1x32xf32>
    %34 = vector.shape_cast %33 : vector<1x32xf32> to vector<32xf32>
    %35 = vector.shape_cast %34 : vector<32xf32> to vector<1x1x1x32xf32>
    %36 = vector.broadcast %35 : vector<1x1x1x32xf32> to vector<2x16x16x32xf32>
    %37 = arith.mulf %32, %36 : vector<2x16x16x32xf32>
    %c0_53 = arith.constant 0 : index
    %c0_54 = arith.constant 0 : index
    %c1_55 = arith.constant 1 : index
    %c0_56 = arith.constant 0 : index
    %38 = vector.load %arg19[%c0_53, %c0_54, %c1_55, %c0_56] : memref<2x18x18x32xf32, #tpu.memory_space<vmem>>, vector<2x16x16x32xf32>
    %c1_57 = arith.constant 1 : index
    %c0_58 = arith.constant 0 : index
    %39 = vector.load %arg5[%c1_57, %c0_58] : memref<9x32xf32, #tpu.memory_space<vmem>>, vector<1x32xf32>
    %40 = vector.shape_cast %39 : vector<1x32xf32> to vector<32xf32>
    %41 = vector.shape_cast %40 : vector<32xf32> to vector<1x1x1x32xf32>
    %42 = vector.broadcast %41 : vector<1x1x1x32xf32> to vector<2x16x16x32xf32>
    %43 = arith.mulf %38, %42 : vector<2x16x16x32xf32>
    %44 = arith.addf %37, %43 : vector<2x16x16x32xf32>
    %c0_59 = arith.constant 0 : index
    %c0_60 = arith.constant 0 : index
    %c2 = arith.constant 2 : index
    %c0_61 = arith.constant 0 : index
    %45 = vector.load %arg19[%c0_59, %c0_60, %c2, %c0_61] : memref<2x18x18x32xf32, #tpu.memory_space<vmem>>, vector<2x16x16x32xf32>
    %c2_62 = arith.constant 2 : index
    %c0_63 = arith.constant 0 : index
    %46 = vector.load %arg5[%c2_62, %c0_63] : memref<9x32xf32, #tpu.memory_space<vmem>>, vector<1x32xf32>
    %47 = vector.shape_cast %46 : vector<1x32xf32> to vector<32xf32>
    %48 = vector.shape_cast %47 : vector<32xf32> to vector<1x1x1x32xf32>
    %49 = vector.broadcast %48 : vector<1x1x1x32xf32> to vector<2x16x16x32xf32>
    %50 = arith.mulf %45, %49 : vector<2x16x16x32xf32>
    %51 = arith.addf %44, %50 : vector<2x16x16x32xf32>
    %c0_64 = arith.constant 0 : index
    %c1_65 = arith.constant 1 : index
    %c0_66 = arith.constant 0 : index
    %c0_67 = arith.constant 0 : index
    %52 = vector.load %arg19[%c0_64, %c1_65, %c0_66, %c0_67] : memref<2x18x18x32xf32, #tpu.memory_space<vmem>>, vector<2x16x16x32xf32>
    %c3 = arith.constant 3 : index
    %c0_68 = arith.constant 0 : index
    %53 = vector.load %arg5[%c3, %c0_68] : memref<9x32xf32, #tpu.memory_space<vmem>>, vector<1x32xf32>
    %54 = vector.shape_cast %53 : vector<1x32xf32> to vector<32xf32>
    %55 = vector.shape_cast %54 : vector<32xf32> to vector<1x1x1x32xf32>
    %56 = vector.broadcast %55 : vector<1x1x1x32xf32> to vector<2x16x16x32xf32>
    %57 = arith.mulf %52, %56 : vector<2x16x16x32xf32>
    %58 = arith.addf %51, %57 : vector<2x16x16x32xf32>
    %c0_69 = arith.constant 0 : index
    %c1_70 = arith.constant 1 : index
    %c1_71 = arith.constant 1 : index
    %c0_72 = arith.constant 0 : index
    %59 = vector.load %arg19[%c0_69, %c1_70, %c1_71, %c0_72] : memref<2x18x18x32xf32, #tpu.memory_space<vmem>>, vector<2x16x16x32xf32>
    %c4 = arith.constant 4 : index
    %c0_73 = arith.constant 0 : index
    %60 = vector.load %arg5[%c4, %c0_73] : memref<9x32xf32, #tpu.memory_space<vmem>>, vector<1x32xf32>
    %61 = vector.shape_cast %60 : vector<1x32xf32> to vector<32xf32>
    %62 = vector.shape_cast %61 : vector<32xf32> to vector<1x1x1x32xf32>
    %63 = vector.broadcast %62 : vector<1x1x1x32xf32> to vector<2x16x16x32xf32>
    %64 = arith.mulf %59, %63 : vector<2x16x16x32xf32>
    %65 = arith.addf %58, %64 : vector<2x16x16x32xf32>
    %c0_74 = arith.constant 0 : index
    %c1_75 = arith.constant 1 : index
    %c2_76 = arith.constant 2 : index
    %c0_77 = arith.constant 0 : index
    %66 = vector.load %arg19[%c0_74, %c1_75, %c2_76, %c0_77] : memref<2x18x18x32xf32, #tpu.memory_space<vmem>>, vector<2x16x16x32xf32>
    %c5 = arith.constant 5 : index
    %c0_78 = arith.constant 0 : index
    %67 = vector.load %arg5[%c5, %c0_78] : memref<9x32xf32, #tpu.memory_space<vmem>>, vector<1x32xf32>
    %68 = vector.shape_cast %67 : vector<1x32xf32> to vector<32xf32>
    %69 = vector.shape_cast %68 : vector<32xf32> to vector<1x1x1x32xf32>
    %70 = vector.broadcast %69 : vector<1x1x1x32xf32> to vector<2x16x16x32xf32>
    %71 = arith.mulf %66, %70 : vector<2x16x16x32xf32>
    %72 = arith.addf %65, %71 : vector<2x16x16x32xf32>
    %c0_79 = arith.constant 0 : index
    %c2_80 = arith.constant 2 : index
    %c0_81 = arith.constant 0 : index
    %c0_82 = arith.constant 0 : index
    %73 = vector.load %arg19[%c0_79, %c2_80, %c0_81, %c0_82] : memref<2x18x18x32xf32, #tpu.memory_space<vmem>>, vector<2x16x16x32xf32>
    %c6 = arith.constant 6 : index
    %c0_83 = arith.constant 0 : index
    %74 = vector.load %arg5[%c6, %c0_83] : memref<9x32xf32, #tpu.memory_space<vmem>>, vector<1x32xf32>
    %75 = vector.shape_cast %74 : vector<1x32xf32> to vector<32xf32>
    %76 = vector.shape_cast %75 : vector<32xf32> to vector<1x1x1x32xf32>
    %77 = vector.broadcast %76 : vector<1x1x1x32xf32> to vector<2x16x16x32xf32>
    %78 = arith.mulf %73, %77 : vector<2x16x16x32xf32>
    %79 = arith.addf %72, %78 : vector<2x16x16x32xf32>
    %c0_84 = arith.constant 0 : index
    %c2_85 = arith.constant 2 : index
    %c1_86 = arith.constant 1 : index
    %c0_87 = arith.constant 0 : index
    %80 = vector.load %arg19[%c0_84, %c2_85, %c1_86, %c0_87] : memref<2x18x18x32xf32, #tpu.memory_space<vmem>>, vector<2x16x16x32xf32>
    %c7 = arith.constant 7 : index
    %c0_88 = arith.constant 0 : index
    %81 = vector.load %arg5[%c7, %c0_88] : memref<9x32xf32, #tpu.memory_space<vmem>>, vector<1x32xf32>
    %82 = vector.shape_cast %81 : vector<1x32xf32> to vector<32xf32>
    %83 = vector.shape_cast %82 : vector<32xf32> to vector<1x1x1x32xf32>
    %84 = vector.broadcast %83 : vector<1x1x1x32xf32> to vector<2x16x16x32xf32>
    %85 = arith.mulf %80, %84 : vector<2x16x16x32xf32>
    %86 = arith.addf %79, %85 : vector<2x16x16x32xf32>
    %c0_89 = arith.constant 0 : index
    %c2_90 = arith.constant 2 : index
    %c2_91 = arith.constant 2 : index
    %c0_92 = arith.constant 0 : index
    %87 = vector.load %arg19[%c0_89, %c2_90, %c2_91, %c0_92] : memref<2x18x18x32xf32, #tpu.memory_space<vmem>>, vector<2x16x16x32xf32>
    %c8 = arith.constant 8 : index
    %c0_93 = arith.constant 0 : index
    %88 = vector.load %arg5[%c8, %c0_93] : memref<9x32xf32, #tpu.memory_space<vmem>>, vector<1x32xf32>
    %89 = vector.shape_cast %88 : vector<1x32xf32> to vector<32xf32>
    %90 = vector.shape_cast %89 : vector<32xf32> to vector<1x1x1x32xf32>
    %91 = vector.broadcast %90 : vector<1x1x1x32xf32> to vector<2x16x16x32xf32>
    %92 = arith.mulf %87, %91 : vector<2x16x16x32xf32>
    %93 = arith.addf %86, %92 : vector<2x16x16x32xf32>
    %c0_94 = arith.constant 0 : index
    %c0_95 = arith.constant 0 : index
    %94 = vector.load %arg6[%c0_94, %c0_95] : memref<1x32xf32, #tpu.memory_space<vmem>>, vector<1x32xf32>
    %95 = vector.shape_cast %94 : vector<1x32xf32> to vector<1x1x1x32xf32>
    %96 = vector.broadcast %95 : vector<1x1x1x32xf32> to vector<2x16x16x32xf32>
    %97 = arith.mulf %93, %96 : vector<2x16x16x32xf32>
    %c0_96 = arith.constant 0 : index
    %c0_97 = arith.constant 0 : index
    %98 = vector.load %arg7[%c0_96, %c0_97] : memref<1x32xf32, #tpu.memory_space<vmem>>, vector<1x32xf32>
    %99 = vector.shape_cast %98 : vector<1x32xf32> to vector<1x1x1x32xf32>
    %100 = vector.broadcast %99 : vector<1x1x1x32xf32> to vector<2x16x16x32xf32>
    %101 = arith.addf %97, %100 : vector<2x16x16x32xf32>
    %102 = arith.negf %101 : vector<2x16x16x32xf32>
    %103 = math.exp %102 : vector<2x16x16x32xf32>
    %cst_98 = arith.constant 1.000000e+00 : f32
    %104 = vector.broadcast %cst_98 : f32 to vector<2x16x16x32xf32>
    %105 = arith.addf %104, %103 : vector<2x16x16x32xf32>
    %106 = arith.divf %104, %105 : vector<2x16x16x32xf32>
    %107 = arith.mulf %101, %106 : vector<2x16x16x32xf32>
    %108 = vector.shape_cast %107 : vector<2x16x16x32xf32> to vector<512x32xf32>
    %109 = vector.extract_strided_slice %108 {offsets = [0, 0], sizes = [256, 32], strides = [1, 1]} : vector<512x32xf32> to vector<256x32xf32>
    %cst_99 = arith.constant dense<0.000000e+00> : vector<32xf32>
    %110 = vector.multi_reduction <add>, %109, %cst_99 [0] : vector<256x32xf32> to vector<32xf32>
    %111 = vector.shape_cast %110 : vector<32xf32> to vector<1x32xf32>
    %112 = vector.extract_strided_slice %108 {offsets = [256, 0], sizes = [256, 32], strides = [1, 1]} : vector<512x32xf32> to vector<256x32xf32>
    %cst_100 = arith.constant dense<0.000000e+00> : vector<32xf32>
    %113 = vector.multi_reduction <add>, %112, %cst_100 [0] : vector<256x32xf32> to vector<32xf32>
    %114 = vector.shape_cast %113 : vector<32xf32> to vector<1x32xf32>
    %115 = tpu.concatenate %111, %114 in 0 : vector<1x32xf32>, vector<1x32xf32> -> vector<2x32xf32>
    %cst_101 = arith.constant 3.906250e-03 : f32
    %116 = vector.broadcast %cst_101 : f32 to vector<2x32xf32>
    %117 = arith.mulf %115, %116 : vector<2x32xf32>
    %c0_102 = arith.constant 0 : index
    %c0_103 = arith.constant 0 : index
    %118 = vector.load %arg8[%c0_102, %c0_103] : memref<32x8xf32, #tpu.memory_space<vmem>>, vector<32x8xf32>
    %cst_104 = arith.constant dense<0.000000e+00> : vector<2x8xf32>
    %119 = tpu.matmul %117, %118, %cst_104 {dimension_numbers = #tpu.dot_dimension_numbers<[1], [0], [0], [1], [0, 0, 1, 1], [], []>} : vector<2x32xf32>, vector<32x8xf32>, vector<2x8xf32> -> vector<2x8xf32>
    %c0_105 = arith.constant 0 : index
    %c0_106 = arith.constant 0 : index
    %120 = vector.load %arg9[%c0_105, %c0_106] : memref<1x8xf32, #tpu.memory_space<vmem>>, vector<1x8xf32>
    %121 = vector.broadcast %120 : vector<1x8xf32> to vector<2x8xf32>
    %122 = arith.addf %119, %121 : vector<2x8xf32>
    %123 = arith.negf %122 : vector<2x8xf32>
    %124 = math.exp %123 : vector<2x8xf32>
    %cst_107 = arith.constant 1.000000e+00 : f32
    %125 = vector.broadcast %cst_107 : f32 to vector<2x8xf32>
    %126 = arith.addf %125, %124 : vector<2x8xf32>
    %127 = arith.divf %125, %126 : vector<2x8xf32>
    %128 = arith.mulf %122, %127 : vector<2x8xf32>
    %c0_108 = arith.constant 0 : index
    %c0_109 = arith.constant 0 : index
    %129 = vector.load %arg10[%c0_108, %c0_109] : memref<8x32xf32, #tpu.memory_space<vmem>>, vector<8x32xf32>
    %cst_110 = arith.constant dense<0.000000e+00> : vector<2x32xf32>
    %130 = tpu.matmul %128, %129, %cst_110 {dimension_numbers = #tpu.dot_dimension_numbers<[1], [0], [0], [1], [0, 0, 1, 1], [], []>} : vector<2x8xf32>, vector<8x32xf32>, vector<2x32xf32> -> vector<2x32xf32>
    %c0_111 = arith.constant 0 : index
    %c0_112 = arith.constant 0 : index
    %131 = vector.load %arg11[%c0_111, %c0_112] : memref<1x32xf32, #tpu.memory_space<vmem>>, vector<1x32xf32>
    %132 = vector.broadcast %131 : vector<1x32xf32> to vector<2x32xf32>
    %133 = arith.addf %130, %132 : vector<2x32xf32>
    %134 = arith.negf %133 : vector<2x32xf32>
    %135 = math.exp %134 : vector<2x32xf32>
    %cst_113 = arith.constant 1.000000e+00 : f32
    %136 = vector.broadcast %cst_113 : f32 to vector<2x32xf32>
    %137 = arith.addf %136, %135 : vector<2x32xf32>
    %138 = arith.divf %136, %137 : vector<2x32xf32>
    %139 = vector.shape_cast %108 : vector<512x32xf32> to vector<2x256x32xf32>
    %140 = vector.shape_cast %138 : vector<2x32xf32> to vector<2x1x32xf32>
    %141 = vector.broadcast %140 : vector<2x1x32xf32> to vector<2x256x32xf32>
    %142 = arith.mulf %139, %141 : vector<2x256x32xf32>
    %143 = vector.shape_cast %142 : vector<2x256x32xf32> to vector<512x32xf32>
    %144 = arith.truncf %143 : vector<512x32xf32> to vector<512x32xbf16>
    %c0_114 = arith.constant 0 : index
    %c0_115 = arith.constant 0 : index
    %145 = vector.load %arg12[%c0_114, %c0_115] : memref<32x64xbf16, #tpu.memory_space<vmem>>, vector<32x64xbf16>
    %cst_116 = arith.constant dense<0.000000e+00> : vector<512x64xf32>
    %146 = tpu.matmul %144, %145, %cst_116 {dimension_numbers = #tpu.dot_dimension_numbers<[1], [0], [0], [1], [0, 0, 1, 1], [], []>} : vector<512x32xbf16>, vector<32x64xbf16>, vector<512x64xf32> -> vector<512x64xf32>
    %c0_117 = arith.constant 0 : index
    %c0_118 = arith.constant 0 : index
    %147 = vector.load %arg13[%c0_117, %c0_118] : memref<1x64xf32, #tpu.memory_space<vmem>>, vector<1x64xf32>
    %148 = vector.broadcast %147 : vector<1x64xf32> to vector<512x64xf32>
    %149 = arith.addf %146, %148 : vector<512x64xf32>
    %150 = arith.negf %149 : vector<512x64xf32>
    %151 = math.exp %150 : vector<512x64xf32>
    %cst_119 = arith.constant 1.000000e+00 : f32
    %152 = vector.broadcast %cst_119 : f32 to vector<512x64xf32>
    %153 = arith.addf %152, %151 : vector<512x64xf32>
    %154 = arith.divf %152, %153 : vector<512x64xf32>
    %155 = arith.mulf %149, %154 : vector<512x64xf32>
    %156 = vector.extract_strided_slice %155 {offsets = [0, 0], sizes = [256, 64], strides = [1, 1]} : vector<512x64xf32> to vector<256x64xf32>
    %cst_120 = arith.constant dense<0.000000e+00> : vector<64xf32>
    %157 = vector.multi_reduction <add>, %156, %cst_120 [0] : vector<256x64xf32> to vector<64xf32>
    %158 = vector.shape_cast %157 : vector<64xf32> to vector<1x64xf32>
    %159 = vector.extract_strided_slice %155 {offsets = [256, 0], sizes = [256, 64], strides = [1, 1]} : vector<512x64xf32> to vector<256x64xf32>
    %cst_121 = arith.constant dense<0.000000e+00> : vector<64xf32>
    %160 = vector.multi_reduction <add>, %159, %cst_121 [0] : vector<256x64xf32> to vector<64xf32>
    %161 = vector.shape_cast %160 : vector<64xf32> to vector<1x64xf32>
    %162 = tpu.concatenate %158, %161 in 0 : vector<1x64xf32>, vector<1x64xf32> -> vector<2x64xf32>
    %cst_122 = arith.constant 3.906250e-03 : f32
    %163 = vector.broadcast %cst_122 : f32 to vector<2x64xf32>
    %164 = arith.mulf %162, %163 : vector<2x64xf32>
    %c0_123 = arith.constant 0 : index
    %c0_124 = arith.constant 0 : index
    %165 = vector.load %arg14[%c0_123, %c0_124] : memref<64x7xf32, #tpu.memory_space<vmem>>, vector<64x7xf32>
    %cst_125 = arith.constant dense<0.000000e+00> : vector<2x7xf32>
    %166 = tpu.matmul %164, %165, %cst_125 {dimension_numbers = #tpu.dot_dimension_numbers<[1], [0], [0], [1], [0, 0, 1, 1], [], []>} : vector<2x64xf32>, vector<64x7xf32>, vector<2x7xf32> -> vector<2x7xf32>
    %c0_126 = arith.constant 0 : index
    %c0_127 = arith.constant 0 : index
    %167 = vector.load %arg15[%c0_126, %c0_127] : memref<1x7xf32, #tpu.memory_space<vmem>>, vector<1x7xf32>
    %168 = vector.broadcast %167 : vector<1x7xf32> to vector<2x7xf32>
    %169 = arith.addf %166, %168 : vector<2x7xf32>
    %c0_128 = arith.constant 0 : index
    %c0_129 = arith.constant 0 : index
    %170 = vector.load %arg16[%c0_128, %c0_129] : memref<2x7xf32, #tpu.memory_space<vmem>>, vector<2x7xf32>
    tpu.vector_store %arg16[%c0_128, %c0_129], %169 {strides = array<i32>} : memref<2x7xf32, #tpu.memory_space<vmem>>, vector<2x7xf32>,
    %c0_130 = arith.constant 0 : index
    %c0_131 = arith.constant 0 : index
    %171 = vector.load %arg2[%c0_130, %c0_131] : memref<2x1xi32, #tpu.memory_space<vmem>>, vector<2x1xi32>
    %cst_132 = arith.constant dense<0xFF800000> : vector<2xf32>
    %172 = vector.multi_reduction <maximumf>, %169, %cst_132 [1] : vector<2x7xf32> to vector<2xf32>
    %173 = vector.shape_cast %172 : vector<2xf32> to vector<2x1xf32>
    %174 = vector.broadcast %173 : vector<2x1xf32> to vector<2x7xf32>
    %175 = arith.subf %169, %174 : vector<2x7xf32>
    %176 = math.exp %175 : vector<2x7xf32>
    %cst_133 = arith.constant dense<0.000000e+00> : vector<2xf32>
    %177 = vector.multi_reduction <add>, %176, %cst_133 [1] : vector<2x7xf32> to vector<2xf32>
    %178 = vector.shape_cast %177 : vector<2xf32> to vector<2x1xf32>
    %179 = math.log %178 : vector<2x1xf32>
    %180 = arith.addf %173, %179 : vector<2x1xf32>
    %181 = tpu.iota {dimensions = array<i32: 1>} : vector<2x7xi32>
    %182 = vector.broadcast %171 : vector<2x1xi32> to vector<2x7xi32>
    %183 = arith.cmpi eq, %181, %182 : vector<2x7xi32>
    %cst_134 = arith.constant 0.000000e+00 : f32
    %184 = vector.broadcast %cst_134 : f32 to vector<2x7xf32>
    %185 = arith.select %183, %169, %184 : vector<2x7xi1>, vector<2x7xf32>
    %cst_135 = arith.constant dense<0.000000e+00> : vector<2xf32>
    %186 = vector.multi_reduction <add>, %185, %cst_135 [1] : vector<2x7xf32> to vector<2xf32>
    %187 = vector.shape_cast %186 : vector<2xf32> to vector<2x1xf32>
    %188 = arith.subf %180, %187 : vector<2x1xf32>
    %c0_136 = arith.constant 0 : index
    %c0_137 = arith.constant 0 : index
    %189 = vector.load %arg17[%c0_136, %c0_137] : memref<2x1xf32, #tpu.memory_space<vmem>>, vector<2x1xf32>
    tpu.vector_store %arg17[%c0_136, %c0_137], %188 {strides = array<i32>} : memref<2x1xf32, #tpu.memory_space<vmem>>, vector<2x1xf32>,
    return
  }
  func.func @transform_0(%arg0: i32) -> (i32, i32, i32, i32) {
    %c0_i32 = arith.constant 0 : i32
    %c0_i32_0 = arith.constant 0 : i32
    %c0_i32_1 = arith.constant 0 : i32
    %c0_i32_2 = arith.constant 0 : i32
    return %arg0, %c0_i32, %c0_i32_0, %c0_i32_1 : i32, i32, i32, i32
  }
  func.func @transform_1(%arg0: i32) -> (i32, i32) {
    %c0_i32 = arith.constant 0 : i32
    %c0_i32_0 = arith.constant 0 : i32
    return %arg0, %c0_i32 : i32, i32
  }
  func.func @transform_2(%arg0: i32) -> (i32, i32) {
    %c0_i32 = arith.constant 0 : i32
    %c0_i32_0 = arith.constant 0 : i32
    %c0_i32_1 = arith.constant 0 : i32
    return %c0_i32, %c0_i32_0 : i32, i32
  }
  func.func @transform_3(%arg0: i32) -> (i32, i32) {
    %c0_i32 = arith.constant 0 : i32
    %c0_i32_0 = arith.constant 0 : i32
    %c0_i32_1 = arith.constant 0 : i32
    return %c0_i32, %c0_i32_0 : i32, i32
  }
  func.func @transform_4(%arg0: i32) -> (i32, i32) {
    %c0_i32 = arith.constant 0 : i32
    %c0_i32_0 = arith.constant 0 : i32
    %c0_i32_1 = arith.constant 0 : i32
    return %c0_i32, %c0_i32_0 : i32, i32
  }
  func.func @transform_5(%arg0: i32) -> (i32, i32) {
    %c0_i32 = arith.constant 0 : i32
    %c0_i32_0 = arith.constant 0 : i32
    %c0_i32_1 = arith.constant 0 : i32
    return %c0_i32, %c0_i32_0 : i32, i32
  }
  func.func @transform_6(%arg0: i32) -> (i32, i32) {
    %c0_i32 = arith.constant 0 : i32
    %c0_i32_0 = arith.constant 0 : i32
    %c0_i32_1 = arith.constant 0 : i32
    return %c0_i32, %c0_i32_0 : i32, i32
  }
  func.func @transform_7(%arg0: i32) -> (i32, i32) {
    %c0_i32 = arith.constant 0 : i32
    %c0_i32_0 = arith.constant 0 : i32
    %c0_i32_1 = arith.constant 0 : i32
    return %c0_i32, %c0_i32_0 : i32, i32
  }
  func.func @transform_8(%arg0: i32) -> (i32, i32) {
    %c0_i32 = arith.constant 0 : i32
    %c0_i32_0 = arith.constant 0 : i32
    %c0_i32_1 = arith.constant 0 : i32
    return %c0_i32, %c0_i32_0 : i32, i32
  }
  func.func @transform_9(%arg0: i32) -> (i32, i32) {
    %c0_i32 = arith.constant 0 : i32
    %c0_i32_0 = arith.constant 0 : i32
    %c0_i32_1 = arith.constant 0 : i32
    return %c0_i32, %c0_i32_0 : i32, i32
  }
  func.func @transform_10(%arg0: i32) -> (i32, i32) {
    %c0_i32 = arith.constant 0 : i32
    %c0_i32_0 = arith.constant 0 : i32
    %c0_i32_1 = arith.constant 0 : i32
    return %c0_i32, %c0_i32_0 : i32, i32
  }
  func.func @transform_11(%arg0: i32) -> (i32, i32) {
    %c0_i32 = arith.constant 0 : i32
    %c0_i32_0 = arith.constant 0 : i32
    %c0_i32_1 = arith.constant 0 : i32
    return %c0_i32, %c0_i32_0 : i32, i32
  }
  func.func @transform_12(%arg0: i32) -> (i32, i32) {
    %c0_i32 = arith.constant 0 : i32
    %c0_i32_0 = arith.constant 0 : i32
    %c0_i32_1 = arith.constant 0 : i32
    return %c0_i32, %c0_i32_0 : i32, i32
  }
  func.func @transform_13(%arg0: i32) -> (i32, i32) {
    %c0_i32 = arith.constant 0 : i32
    %c0_i32_0 = arith.constant 0 : i32
    %c0_i32_1 = arith.constant 0 : i32
    return %c0_i32, %c0_i32_0 : i32, i32
  }
  func.func @transform_14(%arg0: i32) -> (i32, i32) {
    %c0_i32 = arith.constant 0 : i32
    %c0_i32_0 = arith.constant 0 : i32
    %c0_i32_1 = arith.constant 0 : i32
    return %c0_i32, %c0_i32_0 : i32, i32
  }
  func.func @transform_15(%arg0: i32) -> (i32, i32) {
    %c0_i32 = arith.constant 0 : i32
    %c0_i32_0 = arith.constant 0 : i32
    return %arg0, %c0_i32 : i32, i32
  }
  func.func @transform_16(%arg0: i32) -> (i32, i32) {
    %c0_i32 = arith.constant 0 : i32
    %c0_i32_0 = arith.constant 0 : i32
    return %arg0, %c0_i32 : i32, i32
  }
}

</mosaic_0001>

<bundles_post_ra>
// kernel: face_model_forward.1
= control target key start
LH: loop header
LB: loop body
LE: loop exit
PB: predicated region body
PF: predicated region fallthrough
CT: control target
= control target key end

     0   :  { %s14924_s0 = inlined_call_operand.vmem [shape: bf16[2,17,17,12], index: 0, kind: input, shape index: {}]   ;;  %s14925_s1 = inlined_call_operand.vmem [shape: s32[2,1], index: 1, kind: input, shape index: {}]   ;;  %s14926_s2 = inlined_call_operand.vmem [shape: bf16[48,32], index: 2, kind: input, shape index: {}]   ;;  %s14927_s3 = inlined_call_operand.vmem [shape: f32[1,32], index: 3, kind: input, shape index: {}]   ;;  %s14928_s4 = inlined_call_operand.vmem [shape: f32[9,32], index: 4, kind: input, shape index: {}]   ;;  %s14929_s5 = inlined_call_operand.vmem [shape: f32[1,32], index: 5, kind: input, shape index: {}]   ;;  %s14930_s6 = inlined_call_operand.vmem [shape: f32[1,32], index: 6, kind: input, shape index: {}]   ;;  %s14931_s7 = inlined_call_operand.vmem [shape: f32[32,8], index: 7, kind: input, shape index: {}]   ;;  %s14932_s8 = inlined_call_operand.vmem [shape: f32[1,8], index: 8, kind: input, shape index: {}]   ;;  %s14933_s9 = inlined_call_operand.vmem [shape: f32[8,32], index: 9, kind: input, shape index: {}]   ;;  %s14934_s10 = inlined_call_operand.vmem [shape: f32[1,32], index: 10, kind: input, shape index: {}]   ;;  %s14935_s11 = inlined_call_operand.vmem [shape: bf16[32,64], index: 11, kind: input, shape index: {}]   ;;  %s14936_s12 = inlined_call_operand.vmem [shape: f32[1,64], index: 12, kind: input, shape index: {}]   ;;  %s14937_s13 = inlined_call_operand.vmem [shape: f32[64,7], index: 13, kind: input, shape index: {}]   ;;  %s14938_s14 = inlined_call_operand.vmem [shape: f32[1,7], index: 14, kind: input, shape index: {}]   ;;  %s14939_s15 = inlined_call_operand.hbm [shape: f32[2,7], index: 15, kind: output, shape index: {0}]   ;;  %s14940_s16 = inlined_call_operand.vmem [shape: f32[2,1], index: 16, kind: output, shape index: {1}]  }
   0x1   :  { %15047 = sst [smem:[#allocation89_spill]] %s14924_s0 }
   0x2   :  { %s15048_s23 = sld [smem:[#allocation89_spill]]  ;;  %vm439_vm0 = vsmask.f32 3328  ;;  %vm440_vm1 = vsmask.f32 7440  ;;  %s9585_s19 = smov 24  }
   0x3   :  { %vm9706_vm2 = vmor %vm439_vm0, %vm440_vm1  ;;  %s9586_s21 = smov 12   ;;  %s9587_s22 = smov 36   ;;  %vm1402_vm3 = vcmask 195680   ;;  %vm310_vm4 = vcmask 97280   ;;  %vm1756_vm5 = vcmask 294080   ;;  %vm2845_vm6 = vcmask 392480  }
   0x4   :  { %vm2941_vm7 = vcmask 392192  }
   0x8   :  { %v343_v0 = vld [vmem:[%s15048_s23] sm:$0xf]  ;;  %v344_v1 = vld [vmem:[%s15048_s23 + $0x4] sm:$0xf]  ;;  %v345_v2 = vld [vmem:[%s15048_s23 + $0x8] sm:$0x1] }
   0x9   :  { %v443_v3 = vshrl.u32 %v343_v0, 16  ;;  %v446_v4 = vshll.u32 %v343_v0, 16  ;;  %v452_v5 = vshll.u32 %v344_v1, 16  ;;  %v456_v6 = vshrl.u32 %v344_v1, 16  ;;  %v8665_v10 = vld [vmem:[%s15048_s23 + $0xc] sm:$0xff]   ;;  %v8666_v15 = vld [vmem:[%s15048_s23 + $0x18] sm:$0xff]  }
   0xa   :  { %v462_v7 = vshll.u32 %v345_v2, 16  ;;  %v346_v14 = vld [vmem:[%s15048_s23 + $0xc] sm:$0xf]  ;;  %1660 = vrot.lane.b32.xlu1 %v8665_v10, %s9585_s19  ;;  %v347_v17 = vld [vmem:[%s15048_s23 + $0x10] sm:$0xf] }
   0xb   :  { %v445_v8 = vrot.slane %v443_v3, 4  ;;  %v448_v9 = vrot.slane %v446_v4, 5  ;;  %v454_v11 = vrot.slane %v452_v5, 5  ;;  %v458_v12 = vrot.slane %v456_v6, 4  ;;  %v348_v18 = vld [vmem:[%s15048_s23 + $0x14] sm:$0x1] }
   0xc   :  { %v464_v13 = vrot.slane %v462_v7, 5  ;;  %v467_v19 = vshrl.u32 %v346_v14, 16  ;;  %v470_v20 = vshll.u32 %v346_v14, 16  ;;  %v476_v23 = vshll.u32 %v347_v17, 16  ;;  %v7968_v33 = vld [vmem:[%s15048_s23 + $0xc] sm:$0xf] }
   0xd   :  { %v449_v16 = vor.u32 %v448_v9, %v445_v8  ;;  %v459_v22 = vor.u32 %v458_v12, %v454_v11  ;;  %v480_v24 = vshrl.u32 %v347_v17, 16  ;;  %v486_v25 = vshll.u32 %v348_v18, 16  ;;  %v7969_v36 = vld [vmem:[%s15048_s23 + $0x10] sm:$0xf]  ;;  %v7970_v37 = vld [vmem:[%s15048_s23 + $0x14] sm:$0x1] }
   0xe   :  { %v469_v27 = vrot.slane %v467_v19, 4  ;;  %v472_v28 = vrot.slane %v470_v20, 5  ;;  %v478_v30 = vrot.slane %v476_v23, 5  ;;  %1662 = vrot.lane.b32.xlu1 %v8666_v15, %s9585_s19  ;;  %v1886_v38 = vshrl.u32 %v7968_v33, 16  ;;  %v7971_v44 = vld [vmem:[%s15048_s23 + $0x18] sm:$0xf] }
   0xf   :  { %v450_v26 = vrot.slane %v449_v16, 4  ;;  %v460_v29 = vrot.slane %v459_v22, 4  ;;  %v482_v31 = vrot.slane %v480_v24, 4  ;;  %v488_v32 = vrot.slane %v486_v25, 5  ;;  %v7972_v49 = vld [vmem:[%s15048_s23 + $0x1c] sm:$0xf] }
  0x10   :  { %v473_v35 = vor.u32 %v472_v28, %v469_v27  ;;  %v1889_v39 = vshll.u32 %v7968_v33, 16  ;;  %v1895_v42 = vshll.u32 %v7969_v36, 16  ;;  %v1899_v43 = vshrl.u32 %v7969_v36, 16  ;;  %v7973_v56 = vld [vmem:[%s15048_s23 + $0x20] sm:$0x1] }
  0x11   :  { %v455_v34 = vsel %vm9706_vm2, %v450_v26, %v454_v11  ;;  %v465_v40 = vsel %vm9706_vm2, %v460_v29, %v464_v13  ;;  %v483_v41 = vor.u32 %v482_v31, %v478_v30  ;;  %v1888_v47 = vrot.slane %v1886_v38, 4  ;;  %v349_v63 = vld [vmem:[%s15048_s23 + $0x18] sm:$0xf]  ;;  %v350_v0 = vld [vmem:[%s15048_s23 + $0x1c] sm:$0xf] }
  0x12   :  { %v7840_v45 = vcombine.low %v455_v34, %v465_v40  ;;  %v474_v46 = vrot.slane %v473_v35, 4  ;;  %v1891_v48 = vrot.slane %v1889_v39, 5  ;;  %v1897_v51 = vrot.slane %v1895_v42, 5  ;;  %v351_v5 = vld [vmem:[%s15048_s23 + $0x20] sm:$0x1] }
  0x13   :  { %v484_v50 = vrot.slane %v483_v41, 4  ;;  %v1901_v52 = vrot.slane %v1899_v43, 4  ;;  %v1905_v53 = vshll.u32 %v7970_v37, 16  ;;  %v1910_v57 = vshrl.u32 %v7971_v44, 16  ;;  %v352_v10 = vld [vmem:[%s15048_s23 + $0x24] sm:$0xf] }
  0x14   :  { %1306 = vrot.lane.b32.xlu0 %v7840_v45, %s9586_s21  ;;  %v479_v54 = vsel %vm9706_vm2, %v474_v46, %v478_v30  ;;  %v1892_v55 = vor.u32 %v1891_v48, %v1888_v47  ;;  %v1913_v58 = vshll.u32 %v7971_v44, 16  ;;  %v1919_v62 = vshll.u32 %v7972_v49, 16  ;;  %v353_v24 = vld [vmem:[%s15048_s23 + $0x28] sm:$0xf]  ;;  %v354_v31 = vld [vmem:[%s15048_s23 + $0x2c] sm:$0x1] }
  0x15   :  { %v489_v59 = vsel %vm9706_vm2, %v484_v50, %v488_v32  ;;  %v1902_v60 = vor.u32 %v1901_v52, %v1897_v51  ;;  %v1907_v61 = vrot.slane %v1905_v53, 5  ;;  %v1912_v3 = vrot.slane %v1910_v57, 4  ;;  %v7974_v42 = vld [vmem:[%s15048_s23 + $0x24] sm:$0xf]  ;;  %v7975_v47 = vld [vmem:[%s15048_s23 + $0x28] sm:$0xf] }
  0x16   :  { %v7841_v1 = vcombine.low %v479_v54, %v489_v59  ;;  %v1893_v2 = vrot.slane %v1892_v55, 4  ;;  %v1915_v4 = vrot.slane %v1913_v58, 5  ;;  %v1921_v7 = vrot.slane %v1919_v62, 5  ;;  %v7976_v52 = vld [vmem:[%s15048_s23 + $0x2c] sm:$0x1] }
  0x17   :  { %v1903_v6 = vrot.slane %v1902_v60, 4  ;;  %v1923_v8 = vshrl.u32 %v7972_v49, 16  ;;  %v1929_v9 = vshll.u32 %v7973_v56, 16  ;;  %v491_v13 = vshrl.u32 %v349_v63, 16  ;;  %v7977_v57 = vld [vmem:[%s15048_s23 + $0x30] sm:$0xf] }
  0x18   :  { %1308 = vrot.lane.b32.xlu0 %v7841_v1, %s9586_s21  ;;  %v1898_v11 = vsel %vm9706_vm2, %v1893_v2, %v1897_v51  ;;  %v1916_v12 = vor.u32 %v1915_v4, %v1912_v3  ;;  %v494_v14 = vshll.u32 %v349_v63, 16  ;;  %v500_v18 = vshll.u32 %v350_v0, 16  ;;  %v7978_v62 = vld [vmem:[%s15048_s23 + $0x34] sm:$0xf]  ;;  %v7979_v3 = vld [vmem:[%s15048_s23 + $0x38] sm:$0x1] }
  0x19   :  { %v1908_v15 = vsel %vm9706_vm2, %v1903_v6, %v1907_v61  ;;  %v1925_v16 = vrot.slane %v1923_v8, 4  ;;  %v1931_v17 = vrot.slane %v1929_v9, 5  ;;  %v493_v22 = vrot.slane %v491_v13, 4  ;;  %v8667_v13 = vld [vmem:[%s15048_s23 + $0x24] sm:$0xff]  }
  0x1a   :  { %v8064_v19 = vcombine.low %v1898_v11, %v1908_v15  ;;  %v1917_v20 = vrot.slane %v1916_v12, 4  ;;  %v496_v23 = vrot.slane %v494_v14, 5  ;;  %v502_v26 = vrot.slane %v500_v18, 5 }
  0x1b   :  { %v1926_v25 = vor.u32 %v1925_v16, %v1921_v7  ;;  %v504_v27 = vshrl.u32 %v350_v0, 16  ;;  %v510_v28 = vshll.u32 %v351_v5, 16  ;;  %v515_v32 = vshrl.u32 %v352_v10, 16 }
  0x1c   :  { %2749 = vrot.lane.b32.xlu0 %v8064_v19, %s9587_s22  ;;  %v1922_v29 = vsel %vm9706_vm2, %v1917_v20, %v1921_v7  ;;  %v497_v30 = vor.u32 %v496_v23, %v493_v22  ;;  %v518_v33 = vshll.u32 %v352_v10, 16  ;;  %v524_v37 = vshll.u32 %v353_v24, 16  ;;  %v356_v23 = vld [vmem:[%s15048_s23 + $0x34] sm:$0xf] }
  0x1d   :  { %v1927_v34 = vrot.slane %v1926_v25, 4  ;;  %v506_v35 = vrot.slane %v504_v27, 4  ;;  %v512_v36 = vrot.slane %v510_v28, 5  ;;  %v517_v39 = vrot.slane %v515_v32, 4  ;;  %v8668_v28 = vld [vmem:[%s15048_s23 + $0x30] sm:$0xff]  }
  0x1e   :  { %v498_v38 = vrot.slane %v497_v30, 4  ;;  %v520_v40 = vrot.slane %v518_v33, 5  ;;  %v528_v41 = vshrl.u32 %v353_v24, 16  ;;  %v526_v45 = vrot.slane %v524_v37, 5 }
  0x1f   :  { %v1932_v43 = vsel %vm9706_vm2, %v1927_v34, %v1931_v17  ;;  %v507_v44 = vor.u32 %v506_v35, %v502_v26  ;;  %v534_v46 = vshll.u32 %v354_v31, 16  ;;  %v1934_v55 = vshrl.u32 %v7974_v42, 16  ;;  %v355_v17 = vld [vmem:[%s15048_s23 + $0x30] sm:$0xf] }
  0x20   :  { %v8065_v48 = vcombine.low %v1922_v29, %v1932_v43  ;;  %v503_v49 = vsel %vm9706_vm2, %v498_v38, %v502_v26  ;;  %v521_v50 = vor.u32 %v520_v40, %v517_v39  ;;  %v530_v51 = vrot.slane %v528_v41, 4  ;;  %v358_v38 = vld [vmem:[%s15048_s23 + $0x3c] sm:$0xf]  ;;  %v359_v43 = vld [vmem:[%s15048_s23 + $0x40] sm:$0xf] }
  0x21   :  { %v508_v53 = vrot.slane %v507_v44, 4  ;;  %v536_v54 = vrot.slane %v534_v46, 5  ;;  %v1937_v56 = vshll.u32 %v7974_v42, 16  ;;  %v1943_v60 = vshll.u32 %v7975_v47, 16 }
  0x22   :  { %2751 = vrot.lane.b32.xlu1 %v8065_v48, %s9587_s22  ;;  %v522_v58 = vrot.slane %v521_v50, 4  ;;  %v531_v59 = vor.u32 %v530_v51, %v526_v45  ;;  %v1947_v61 = vshrl.u32 %v7975_v47, 16  ;;  %v1936_v0 = vrot.slane %v1934_v55, 4  ;;  %v360_v51 = vld [vmem:[%s15048_s23 + $0x44] sm:$0x1] }
  0x23   :  { %v513_v63 = vsel %vm9706_vm2, %v508_v53, %v512_v36  ;;  %v1939_v1 = vrot.slane %v1937_v56, 5  ;;  %v1953_v2 = vshll.u32 %v7976_v52, 16  ;;  %v1945_v7 = vrot.slane %v1943_v60, 5  ;;  %v357_v36 = vld [vmem:[%s15048_s23 + $0x38] sm:$0x1] }
  0x24   :  { %v7842_v4 = vcombine.low %v503_v49, %v513_v63  ;;  %v527_v5 = vsel %vm9706_vm2, %v522_v58, %v526_v45  ;;  %v532_v6 = vrot.slane %v531_v59, 4  ;;  %v1949_v9 = vrot.slane %v1947_v61, 4  ;;  %v7981_v58 = vld [vmem:[%s15048_s23 + $0x40] sm:$0xf] }
  0x25   :  { %v1940_v8 = vor.u32 %v1939_v1, %v1936_v0  ;;  %v1955_v10 = vrot.slane %v1953_v2, 5  ;;  %v1958_v11 = vshrl.u32 %v7977_v57, 16  ;;  %v1961_v14 = vshll.u32 %v7977_v57, 16  ;;  %v7980_v57 = vld [vmem:[%s15048_s23 + $0x3c] sm:$0xf] }
  0x26   :  { %1310 = vrot.lane.b32.xlu0 %v7842_v4, %s9586_s21  ;;  %v537_v12 = vsel %vm9706_vm2, %v532_v6, %v536_v54  ;;  %v1967_v15 = vshll.u32 %v7978_v62, 16  ;;  %v1971_v16 = vshrl.u32 %v7978_v62, 16  ;;  %v1950_v20 = vor.u32 %v1949_v9, %v1945_v7 }
  0x27   :  { %v7843_v18 = vcombine.low %v527_v5, %v537_v12  ;;  %v1941_v19 = vrot.slane %v1940_v8, 4  ;;  %v1960_v22 = vrot.slane %v1958_v11, 4  ;;  %v1963_v24 = vrot.slane %v1961_v14, 5  ;;  %v7983_v12 = vld [vmem:[%s15048_s23 + $0x48] sm:$0xf] }
  0x28   :  { %v1969_v25 = vrot.slane %v1967_v15, 5  ;;  %v1973_v26 = vrot.slane %v1971_v16, 4  ;;  %v1977_v27 = vshll.u32 %v7979_v3, 16  ;;  %v1951_v30 = vrot.slane %v1950_v20, 4  ;;  %v7982_v3 = vld [vmem:[%s15048_s23 + $0x44] sm:$0x1] }
  0x29   :  { %1312 = vrot.lane.b32.xlu1 %v7843_v18, %s9586_s21  ;;  %v1946_v29 = vsel %vm9706_vm2, %v1941_v19, %v1945_v7  ;;  %v539_v31 = vshrl.u32 %v355_v17, 16  ;;  %v542_v32 = vshll.u32 %v355_v17, 16  ;;  %v1964_v33 = vor.u32 %v1963_v24, %v1960_v22  ;;  %v7984_v22 = vld [vmem:[%s15048_s23 + $0x4c] sm:$0xf] }
  0x2a   :  { %1664 = vrot.lane.b32.xlu0 %v8667_v13, %s9585_s19  ;;  %v1974_v34 = vor.u32 %v1973_v26, %v1969_v25  ;;  %v1979_v35 = vrot.slane %v1977_v27, 5  ;;  %v548_v37 = vshll.u32 %v356_v23, 16  ;;  %v1956_v39 = vsel %vm9706_vm2, %v1951_v30, %v1955_v10 }
  0x2b   :  { %v541_v40 = vrot.slane %v539_v31, 4  ;;  %v544_v41 = vrot.slane %v542_v32, 5  ;;  %v552_v42 = vshrl.u32 %v356_v23, 16  ;;  %v8066_v44 = vcombine.low %v1946_v29, %v1956_v39  ;;  %v8669_v29 = vld [vmem:[%s15048_s23 + $0x3c] sm:$0xff]   ;;  %v7985_v31 = vld [vmem:[%s15048_s23 + $0x50] sm:$0x1] }
  0x2c   :  { %v1965_v45 = vrot.slane %v1964_v33, 4  ;;  %v1975_v46 = vrot.slane %v1974_v34, 4  ;;  %v550_v47 = vrot.slane %v548_v37, 5  ;;  %v558_v50 = vshll.u32 %v357_v36, 16  ;;  %v361_v37 = vld [vmem:[%s15048_s23 + $0x48] sm:$0xf] }
  0x2d   :  { %1666 = vrot.lane.b32.xlu1 %v8668_v28, %s9585_s19  ;;  %v545_v48 = vor.u32 %v544_v41, %v541_v40  ;;  %v554_v49 = vrot.slane %v552_v42, 4  ;;  %v563_v52 = vshrl.u32 %v358_v38, 16  ;;  %v566_v55 = vshll.u32 %v358_v38, 16  ;;  %v362_v42 = vld [vmem:[%s15048_s23 + $0x4c] sm:$0xf] }
  0x2e   :  { %2753 = vrot.lane.b32.xlu0 %v8066_v44, %s9587_s22  ;;  %v1970_v53 = vsel %vm9706_vm2, %v1965_v45, %v1969_v25  ;;  %v1980_v54 = vsel %vm9706_vm2, %v1975_v46, %v1979_v35  ;;  %v572_v56 = vshll.u32 %v359_v43, 16  ;;  %v560_v62 = vrot.slane %v558_v50, 5 }
  0x2f   :  { %v8067_v59 = vcombine.low %v1970_v53, %v1980_v54  ;;  %v546_v60 = vrot.slane %v545_v48, 4  ;;  %v555_v61 = vor.u32 %v554_v49, %v550_v47  ;;  %v565_v63 = vrot.slane %v563_v52, 4  ;;  %v364_v52 = vld [vmem:[%s15048_s23 + $0x54] sm:$0xf]  ;;  %v365_v53 = vld [vmem:[%s15048_s23 + $0x58] sm:$0xf] }
  0x30   :  { %v568_v0 = vrot.slane %v566_v55, 5  ;;  %v574_v1 = vrot.slane %v572_v56, 5  ;;  %v576_v2 = vshrl.u32 %v359_v43, 16  ;;  %v582_v6 = vshll.u32 %v360_v51, 16  ;;  %v8670_v54 = vld [vmem:[%s15048_s23 + $0x48] sm:$0xff]  }
  0x31   :  { %2755 = vrot.lane.b32.xlu1 %v8067_v59, %s9587_s22  ;;  %v551_v4 = vsel %vm9706_vm2, %v546_v60, %v550_v47  ;;  %v556_v5 = vrot.slane %v555_v61, 4  ;;  %v1982_v7 = vshrl.u32 %v7980_v57, 16  ;;  %v1985_v10 = vshll.u32 %v7980_v57, 16  ;;  %v363_v47 = vld [vmem:[%s15048_s23 + $0x50] sm:$0x1] }
  0x32   :  { %v569_v8 = vor.u32 %v568_v0, %v565_v63  ;;  %v578_v9 = vrot.slane %v576_v2, 4  ;;  %v1991_v11 = vshll.u32 %v7981_v58, 16  ;;  %v584_v14 = vrot.slane %v582_v6, 5 }
  0x33   :  { %v561_v13 = vsel %vm9706_vm2, %v556_v5, %v560_v62  ;;  %v1984_v15 = vrot.slane %v1982_v7, 4  ;;  %v1995_v16 = vshrl.u32 %v7981_v58, 16  ;;  %v1987_v20 = vrot.slane %v1985_v10, 5  ;;  %v366_v5 = vld [vmem:[%s15048_s23 + $0x5c] sm:$0x1] }
  0x34   :  { %v7844_v17 = vcombine.low %v551_v4, %v561_v13  ;;  %v570_v18 = vrot.slane %v569_v8, 4  ;;  %v579_v19 = vor.u32 %v578_v9, %v574_v1  ;;  %v1993_v23 = vrot.slane %v1991_v11, 5  ;;  %v8687_v8 = vld [vmem:[%s14926_s2] sm:$0xff]   ;;  %v7986_v13 = vld [vmem:[%s15048_s23 + $0x54] sm:$0xf] }
  0x35   :  { %v1997_v24 = vrot.slane %v1995_v16, 4  ;;  %v2001_v25 = vshll.u32 %v7982_v3, 16  ;;  %v2006_v26 = vshrl.u32 %v7983_v12, 16  ;;  %v1988_v30 = vor.u32 %v1987_v20, %v1984_v15  ;;  %8463 = vmatprep.subr.bf16.mxu0 %v8687_v8 }
  0x36   :  { %1314 = vrot.lane.b32.xlu0 %v7844_v17, %s9586_s21  ;;  %v575_v27 = vsel %vm9706_vm2, %v570_v18, %v574_v1  ;;  %v580_v28 = vrot.slane %v579_v19, 4  ;;  %v2009_v32 = vshll.u32 %v7983_v12, 16  ;;  %v2015_v36 = vshll.u32 %v7984_v22, 16  ;;  %v7987_v18 = vld [vmem:[%s15048_s23 + $0x58] sm:$0xf]  ;;  %8464 = vmatpush3.bf16.msra.mxu0 %v8687_v8 }
  0x37   :  { %v1998_v33 = vor.u32 %v1997_v24, %v1993_v23  ;;  %v2003_v34 = vrot.slane %v2001_v25, 5  ;;  %v2008_v35 = vrot.slane %v2006_v26, 4  ;;  %v1989_v39 = vrot.slane %v1988_v30, 4  ;;  %v7988_v30 = vld [vmem:[%s15048_s23 + $0x5c] sm:$0x1] }
  0x38   :  { %v585_v38 = vsel %vm9706_vm2, %v580_v28, %v584_v14  ;;  %v2011_v40 = vrot.slane %v2009_v32, 5  ;;  %v2019_v41 = vshrl.u32 %v7984_v22, 16  ;;  %v2017_v45 = vrot.slane %v2015_v36, 5 }
  0x39   :  { %v7845_v43 = vcombine.low %v575_v27, %v585_v38  ;;  %v1999_v44 = vrot.slane %v1998_v33, 4  ;;  %v2025_v46 = vshll.u32 %v7985_v31, 16  ;;  %v1994_v48 = vsel %vm9706_vm2, %v1989_v39, %v1993_v23  ;;  %v8688_v33 = vld [vmem:[%s14926_s2 + $0x8] sm:$0xff]   ;;  %v7989_v38 = vld [vmem:[%s15048_s23 + $0x60] sm:$0xf] }
  0x3a   :  { %1668 = vrot.lane.b32.xlu0 %v8669_v29, %s9585_s19  ;;  %v2012_v49 = vor.u32 %v2011_v40, %v2008_v35  ;;  %v2021_v50 = vrot.slane %v2019_v41, 4  ;;  %v587_v51 = vshrl.u32 %v361_v37, 16  ;;  %v590_v57 = vshll.u32 %v361_v37, 16  ;;  %8465 = vmatprep.subr.bf16.mxu0 %v8688_v33 }
  0x3b   :  { %1316 = vrot.lane.b32.xlu1 %v7845_v43, %s9586_s21  ;;  %v2004_v55 = vsel %vm9706_vm2, %v1999_v44, %v2003_v34  ;;  %v2027_v56 = vrot.slane %v2025_v46, 5  ;;  %v596_v58 = vshll.u32 %v362_v42, 16  ;;  %v600_v1 = vshrl.u32 %v362_v42, 16  ;;  %v7990_v43 = vld [vmem:[%s15048_s23 + $0x64] sm:$0xf]  ;;  %8466 = vmatpush3.bf16.msra.mxu0 %v8688_v33 }
  0x3c   :  { %v8068_v59 = vcombine.low %v1994_v48, %v2004_v55  ;;  %v2013_v60 = vrot.slane %v2012_v49, 4  ;;  %v2022_v61 = vor.u32 %v2021_v50, %v2017_v45  ;;  %v589_v62 = vrot.slane %v587_v51, 4  ;;  %v7991_v48 = vld [vmem:[%s15048_s23 + $0x68] sm:$0x1]  ;;  %v367_v49 = vld [vmem:[%s15048_s23 + $0x60] sm:$0xf] }
  0x3d   :  { %v592_v63 = vrot.slane %v590_v57, 5  ;;  %v598_v0 = vrot.slane %v596_v58, 5  ;;  %v606_v2 = vshll.u32 %v363_v47, 16  ;;  %v611_v6 = vshrl.u32 %v364_v52, 16 }
  0x3e   :  { %2757 = vrot.lane.b32.xlu0 %v8068_v59, %s9587_s22  ;;  %v2018_v3 = vsel %vm9706_vm2, %v2013_v60, %v2017_v45  ;;  %v2023_v4 = vrot.slane %v2022_v61, 4  ;;  %v614_v7 = vshll.u32 %v364_v52, 16  ;;  %v602_v10 = vrot.slane %v600_v1, 4 }
  0x3f   :  { %1670 = vrot.lane.b32.xlu1 %v8670_v54, %s9585_s19  ;;  %v593_v9 = vor.u32 %v592_v63, %v589_v62  ;;  %v608_v11 = vrot.slane %v606_v2, 5  ;;  %v620_v12 = vshll.u32 %v365_v53, 16  ;;  %v613_v15 = vrot.slane %v611_v6, 4  ;;  %v368_v54 = vld [vmem:[%s15048_s23 + $0x64] sm:$0xf] }
  0x40   :  { %v2028_v14 = vsel %vm9706_vm2, %v2023_v4, %v2027_v56  ;;  %v616_v16 = vrot.slane %v614_v7, 5  ;;  %v624_v17 = vshrl.u32 %v365_v53, 16  ;;  %v603_v22 = vor.u32 %v602_v10, %v598_v0  ;;  %v8671_v56 = vld [vmem:[%s15048_s23 + $0x54] sm:$0xff]   ;;  %v8672_v4 = vld [vmem:[%s15048_s23 + $0x60] sm:$0xff]  }
  0x41   :  { %v8069_v19 = vcombine.low %v2018_v3, %v2028_v14  ;;  %v594_v20 = vrot.slane %v593_v9, 4  ;;  %v622_v23 = vrot.slane %v620_v12, 5  ;;  %v630_v26 = vshll.u32 %v366_v5, 16  ;;  %v8693_v9 = vld [vmem:[%s14926_s2 + $0x10] sm:$0xff]  }
  0x42   :  { %v617_v24 = vor.u32 %v616_v16, %v613_v15  ;;  %v626_v25 = vrot.slane %v624_v17, 4  ;;  %v2030_v27 = vshrl.u32 %v7986_v13, 16  ;;  %v604_v29 = vrot.slane %v603_v22, 4  ;;  %v370_v15 = vld [vmem:[%s15048_s23 + $0x6c] sm:$0xf]  ;;  %8467 = vmatprep.subr.bf16.mxu0 %v8693_v9 }
  0x43   :  { %2759 = vrot.lane.b32.xlu1 %v8069_v19, %s9587_s22  ;;  %v599_v28 = vsel %vm9706_vm2, %v594_v20, %v598_v0  ;;  %v2033_v31 = vshll.u32 %v7986_v13, 16  ;;  %v2039_v32 = vshll.u32 %v7987_v18, 16  ;;  %v632_v36 = vrot.slane %v630_v26, 5  ;;  %v369_v13 = vld [vmem:[%s15048_s23 + $0x68] sm:$0x1]  ;;  %8468 = vmatpush3.bf16.msra.mxu0 %v8693_v9 }
  0x44   :  { %v618_v34 = vrot.slane %v617_v24, 4  ;;  %v627_v35 = vor.u32 %v626_v25, %v622_v23  ;;  %v2032_v37 = vrot.slane %v2030_v27, 4  ;;  %v609_v39 = vsel %vm9706_vm2, %v604_v29, %v608_v11  ;;  %v371_v20 = vld [vmem:[%s15048_s23 + $0x70] sm:$0xf] }
  0x45   :  { %v2035_v40 = vrot.slane %v2033_v31, 5  ;;  %v2041_v41 = vrot.slane %v2039_v32, 5  ;;  %v2043_v42 = vshrl.u32 %v7987_v18, 16  ;;  %v7846_v44 = vcombine.low %v599_v28, %v609_v39  ;;  %v372_v32 = vld [vmem:[%s15048_s23 + $0x74] sm:$0x1] }
  0x46   :  { %v623_v45 = vsel %vm9706_vm2, %v618_v34, %v622_v23  ;;  %v628_v46 = vrot.slane %v627_v35, 4  ;;  %v2049_v47 = vshll.u32 %v7988_v30, 16  ;;  %v2054_v52 = vshrl.u32 %v7989_v38, 16  ;;  %v7992_v35 = vld [vmem:[%s15048_s23 + $0x6c] sm:$0xf] }
  0x47   :  { %v2036_v50 = vor.u32 %v2035_v40, %v2032_v37  ;;  %v2045_v51 = vrot.slane %v2043_v42, 4  ;;  %v2057_v53 = vshll.u32 %v7989_v38, 16  ;;  %1318 = vrot.lane.b32.xlu0 %v7846_v44, %s9586_s21  ;;  %v2063_v58 = vshll.u32 %v7990_v43, 16  ;;  %v7993_v40 = vld [vmem:[%s15048_s23 + $0x70] sm:$0xf] }
  0x48   :  { %v633_v55 = vsel %vm9706_vm2, %v628_v46, %v632_v36  ;;  %v2051_v57 = vrot.slane %v2049_v47, 5  ;;  %v2067_v59 = vshrl.u32 %v7990_v43, 16  ;;  %v2056_v63 = vrot.slane %v2054_v52, 4 }
  0x49   :  { %v7847_v60 = vcombine.low %v623_v45, %v633_v55  ;;  %v2037_v61 = vrot.slane %v2036_v50, 4  ;;  %v2046_v62 = vor.u32 %v2045_v51, %v2041_v41  ;;  %v2059_v0 = vrot.slane %v2057_v53, 5  ;;  %v7994_v45 = vld [vmem:[%s15048_s23 + $0x74] sm:$0x1]  ;;  %v7995_v50 = vld [vmem:[%s15048_s23 + $0x78] sm:$0xf] }
  0x4a   :  { %v2065_v1 = vrot.slane %v2063_v58, 5  ;;  %v2069_v2 = vrot.slane %v2067_v59, 4  ;;  %v2073_v3 = vshll.u32 %v7991_v48, 16  ;;  %v635_v7 = vshrl.u32 %v367_v49, 16  ;;  %v7996_v55 = vld [vmem:[%s15048_s23 + $0x7c] sm:$0xf] }
  0x4b   :  { %1320 = vrot.lane.b32.xlu1 %v7847_v60, %s9586_s21  ;;  %v2042_v5 = vsel %vm9706_vm2, %v2037_v61, %v2041_v41  ;;  %v2047_v6 = vrot.slane %v2046_v62, 4  ;;  %v638_v8 = vshll.u32 %v367_v49, 16  ;;  %1672 = vrot.lane.b32.xlu0 %v8671_v56, %s9585_s19  ;;  %v2060_v10 = vor.u32 %v2059_v0, %v2056_v63 }
  0x4c   :  { %v2070_v11 = vor.u32 %v2069_v2, %v2065_v1  ;;  %v2075_v12 = vrot.slane %v2073_v3, 5  ;;  %v644_v14 = vshll.u32 %v368_v54, 16  ;;  %v637_v17 = vrot.slane %v635_v7, 4 }
  0x4d   :  { %v2052_v16 = vsel %vm9706_vm2, %v2047_v6, %v2051_v57  ;;  %v640_v18 = vrot.slane %v638_v8, 5  ;;  %v648_v19 = vshrl.u32 %v368_v54, 16  ;;  %v2061_v23 = vrot.slane %v2060_v10, 4  ;;  %v8673_v6 = vld [vmem:[%s15048_s23 + $0x6c] sm:$0xff]   ;;  %v7997_v8 = vld [vmem:[%s15048_s23 + $0x80] sm:$0x1] }
  0x4e   :  { %v8070_v22 = vcombine.low %v2042_v5, %v2052_v16  ;;  %v2071_v24 = vrot.slane %v2070_v11, 4  ;;  %v646_v25 = vrot.slane %v644_v14, 5  ;;  %v654_v28 = vshll.u32 %v369_v13, 16  ;;  %v373_v14 = vld [vmem:[%s15048_s23 + $0x78] sm:$0xf] }
  0x4f   :  { %1674 = vrot.lane.b32.xlu1 %v8672_v4, %s9585_s19  ;;  %v641_v26 = vor.u32 %v640_v18, %v637_v17  ;;  %v650_v27 = vrot.slane %v648_v19, 4  ;;  %v659_v29 = vshrl.u32 %v370_v15, 16  ;;  %v2066_v30 = vsel %vm9706_vm2, %v2061_v23, %v2065_v1  ;;  %v374_v19 = vld [vmem:[%s15048_s23 + $0x7c] sm:$0xf] }
  0x50   :  { %2761 = vrot.lane.b32.xlu0 %v8070_v22, %s9587_s22  ;;  %v2076_v31 = vsel %vm9706_vm2, %v2071_v24, %v2075_v12  ;;  %v662_v33 = vshll.u32 %v370_v15, 16  ;;  %v668_v34 = vshll.u32 %v371_v20, 16  ;;  %v656_v39 = vrot.slane %v654_v28, 5  ;;  %v375_v28 = vld [vmem:[%s15048_s23 + $0x80] sm:$0x1] }
  0x51   :  { %v8071_v36 = vcombine.low %v2066_v30, %v2076_v31  ;;  %v642_v37 = vrot.slane %v641_v26, 4  ;;  %v651_v38 = vor.u32 %v650_v27, %v646_v25  ;;  %v661_v41 = vrot.slane %v659_v29, 4  ;;  %v8674_v30 = vld [vmem:[%s15048_s23 + $0x78] sm:$0xff]  }
  0x52   :  { %v664_v42 = vrot.slane %v662_v33, 5  ;;  %v670_v43 = vrot.slane %v668_v34, 5  ;;  %v672_v44 = vshrl.u32 %v371_v20, 16  ;;  %v678_v48 = vshll.u32 %v372_v32, 16 }
  0x53   :  { %2763 = vrot.lane.b32.xlu1 %v8071_v36, %s9587_s22  ;;  %v647_v46 = vsel %vm9706_vm2, %v642_v37, %v646_v25  ;;  %v652_v47 = vrot.slane %v651_v38, 4  ;;  %v2078_v49 = vshrl.u32 %v7992_v35, 16  ;;  %v2081_v53 = vshll.u32 %v7992_v35, 16  ;;  %v376_v35 = vld [vmem:[%s15048_s23 + $0x84] sm:$0xf] }
  0x54   :  { %v665_v51 = vor.u32 %v664_v42, %v661_v41  ;;  %v674_v52 = vrot.slane %v672_v44, 4  ;;  %v2087_v54 = vshll.u32 %v7993_v40, 16  ;;  %v680_v57 = vrot.slane %v678_v48, 5 }
  0x55   :  { %v657_v56 = vsel %vm9706_vm2, %v652_v47, %v656_v39  ;;  %v2080_v58 = vrot.slane %v2078_v49, 4  ;;  %v2091_v59 = vshrl.u32 %v7993_v40, 16  ;;  %v2083_v63 = vrot.slane %v2081_v53, 5  ;;  %v377_v40 = vld [vmem:[%s15048_s23 + $0x88] sm:$0xf] }
  0x56   :  { %v7848_v60 = vcombine.low %v647_v46, %v657_v56  ;;  %v666_v61 = vrot.slane %v665_v51, 4  ;;  %v675_v62 = vor.u32 %v674_v52, %v670_v43  ;;  %v2089_v0 = vrot.slane %v2087_v54, 5  ;;  %v7998_v46 = vld [vmem:[%s15048_s23 + $0x84] sm:$0xf]  ;;  %v7999_v51 = vld [vmem:[%s15048_s23 + $0x88] sm:$0xf] }
  0x57   :  { %v2093_v1 = vrot.slane %v2091_v59, 4  ;;  %v2097_v2 = vshll.u32 %v7994_v45, 16  ;;  %v2102_v3 = vshrl.u32 %v7995_v50, 16  ;;  %v2084_v7 = vor.u32 %v2083_v63, %v2080_v58  ;;  %v378_v45 = vld [vmem:[%s15048_s23 + $0x8c] sm:$0x1] }
  0x58   :  { %1322 = vrot.lane.b32.xlu0 %v7848_v60, %s9586_s21  ;;  %v671_v4 = vsel %vm9706_vm2, %v666_v61, %v670_v43  ;;  %v676_v5 = vrot.slane %v675_v62, 4  ;;  %v2105_v9 = vshll.u32 %v7995_v50, 16  ;;  %v2111_v13 = vshll.u32 %v7996_v55, 16 }
  0x59   :  { %v2094_v10 = vor.u32 %v2093_v1, %v2089_v0  ;;  %v2099_v11 = vrot.slane %v2097_v2, 5  ;;  %v2104_v12 = vrot.slane %v2102_v3, 4  ;;  %v2085_v16 = vrot.slane %v2084_v7, 4 }
  0x5a   :  { %v681_v15 = vsel %vm9706_vm2, %v676_v5, %v680_v57  ;;  %v2107_v17 = vrot.slane %v2105_v9, 5  ;;  %v2115_v18 = vshrl.u32 %v7996_v55, 16  ;;  %v2113_v23 = vrot.slane %v2111_v13, 5  ;;  %v8001_v13 = vld [vmem:[%s15048_s23 + $0x90] sm:$0xf] }
  0x5b   :  { %v7849_v20 = vcombine.low %v671_v4, %v681_v15  ;;  %v2095_v22 = vrot.slane %v2094_v10, 4  ;;  %v2121_v24 = vshll.u32 %v7997_v8, 16  ;;  %v2090_v25 = vsel %vm9706_vm2, %v2085_v16, %v2089_v0 }
  0x5c   :  { %1676 = vrot.lane.b32.xlu0 %v8673_v6, %s9585_s19  ;;  %v2108_v26 = vor.u32 %v2107_v17, %v2104_v12  ;;  %v2117_v27 = vrot.slane %v2115_v18, 4  ;;  %v683_v29 = vshrl.u32 %v373_v14, 16  ;;  %v686_v33 = vshll.u32 %v373_v14, 16  ;;  %v8000_v6 = vld [vmem:[%s15048_s23 + $0x8c] sm:$0x1] }
  0x5d   :  { %1324 = vrot.lane.b32.xlu1 %v7849_v20, %s9586_s21  ;;  %v2100_v31 = vsel %vm9706_vm2, %v2095_v22, %v2099_v11  ;;  %v2123_v32 = vrot.slane %v2121_v24, 5  ;;  %v692_v34 = vshll.u32 %v374_v19, 16  ;;  %v696_v43 = vshrl.u32 %v374_v19, 16  ;;  %v8002_v18 = vld [vmem:[%s15048_s23 + $0x94] sm:$0xf] }
  0x5e   :  { %v8072_v36 = vcombine.low %v2090_v25, %v2100_v31  ;;  %v2109_v37 = vrot.slane %v2108_v26, 4  ;;  %v2118_v38 = vor.u32 %v2117_v27, %v2113_v23  ;;  %v685_v39 = vrot.slane %v683_v29, 4  ;;  %v8003_v26 = vld [vmem:[%s15048_s23 + $0x98] sm:$0x1] }
  0x5f   :  { %v688_v41 = vrot.slane %v686_v33, 5  ;;  %v694_v42 = vrot.slane %v692_v34, 5  ;;  %v702_v44 = vshll.u32 %v375_v28, 16  ;;  %v707_v49 = vshrl.u32 %v376_v35, 16  ;;  %v379_v34 = vld [vmem:[%s15048_s23 + $0x90] sm:$0xf] }
  0x60   :  { %2765 = vrot.lane.b32.xlu0 %v8072_v36, %s9587_s22  ;;  %v2114_v47 = vsel %vm9706_vm2, %v2109_v37, %v2113_v23  ;;  %v2119_v48 = vrot.slane %v2118_v38, 4  ;;  %v710_v50 = vshll.u32 %v376_v35, 16  ;;  %v698_v53 = vrot.slane %v696_v43, 4 }
  0x61   :  { %1678 = vrot.lane.b32.xlu1 %v8674_v30, %s9585_s19  ;;  %v689_v52 = vor.u32 %v688_v41, %v685_v39  ;;  %v704_v54 = vrot.slane %v702_v44, 5  ;;  %v716_v55 = vshll.u32 %v377_v40, 16  ;;  %v709_v57 = vrot.slane %v707_v49, 4  ;;  %v8675_v30 = vld [vmem:[%s15048_s23 + $0x84] sm:$0xff]   ;;  %v380_v39 = vld [vmem:[%s15048_s23 + $0x94] sm:$0xf] }
  0x62   :  { %v2124_v56 = vsel %vm9706_vm2, %v2119_v48, %v2123_v32  ;;  %v712_v58 = vrot.slane %v710_v50, 5  ;;  %v720_v59 = vshrl.u32 %v377_v40, 16  ;;  %v699_v62 = vor.u32 %v698_v53, %v694_v42  ;;  %v381_v44 = vld [vmem:[%s15048_s23 + $0x98] sm:$0x1] }
  0x63   :  { %v8073_v60 = vcombine.low %v2114_v47, %v2124_v56  ;;  %v690_v61 = vrot.slane %v689_v52, 4  ;;  %v718_v63 = vrot.slane %v716_v55, 5  ;;  %v726_v2 = vshll.u32 %v378_v45, 16  ;;  %v382_v45 = vld [vmem:[%s15048_s23 + $0x9c] sm:$0xf] }
  0x64   :  { %v713_v0 = vor.u32 %v712_v58, %v709_v57  ;;  %v722_v1 = vrot.slane %v720_v59, 4  ;;  %v2126_v3 = vshrl.u32 %v7998_v46, 16  ;;  %v700_v5 = vrot.slane %v699_v62, 4 }
  0x65   :  { %2767 = vrot.lane.b32.xlu1 %v8073_v60, %s9587_s22  ;;  %v695_v4 = vsel %vm9706_vm2, %v690_v61, %v694_v42  ;;  %v2129_v7 = vshll.u32 %v7998_v46, 16  ;;  %v2135_v8 = vshll.u32 %v7999_v51, 16  ;;  %v728_v11 = vrot.slane %v726_v2, 5  ;;  %v8676_v46 = vld [vmem:[%s15048_s23 + $0x90] sm:$0xff]  }
  0x66   :  { %v714_v9 = vrot.slane %v713_v0, 4  ;;  %v723_v10 = vor.u32 %v722_v1, %v718_v63  ;;  %v2128_v12 = vrot.slane %v2126_v3, 4  ;;  %v705_v14 = vsel %vm9706_vm2, %v700_v5, %v704_v54 }
  0x67   :  { %v2131_v15 = vrot.slane %v2129_v7, 5  ;;  %v2137_v16 = vrot.slane %v2135_v8, 5  ;;  %v2139_v17 = vshrl.u32 %v7999_v51, 16  ;;  %v7850_v19 = vcombine.low %v695_v4, %v705_v14  ;;  %v383_v51 = vld [vmem:[%s15048_s23 + $0xa0] sm:$0xf] }
  0x68   :  { %v719_v20 = vsel %vm9706_vm2, %v714_v9, %v718_v63  ;;  %v724_v22 = vrot.slane %v723_v10, 4  ;;  %v2145_v23 = vshll.u32 %v8000_v6, 16  ;;  %v2150_v27 = vshrl.u32 %v8001_v13, 16  ;;  %v384_v6 = vld [vmem:[%s15048_s23 + $0xa4] sm:$0x1] }
  0x69   :  { %v2132_v24 = vor.u32 %v2131_v15, %v2128_v12  ;;  %v2141_v25 = vrot.slane %v2139_v17, 4  ;;  %v2153_v28 = vshll.u32 %v8001_v13, 16  ;;  %1326 = vrot.lane.b32.xlu0 %v7850_v19, %s9586_s21  ;;  %v2159_v32 = vshll.u32 %v8002_v18, 16  ;;  %v8004_v9 = vld [vmem:[%s15048_s23 + $0x9c] sm:$0xf] }
  0x6a   :  { %v729_v29 = vsel %vm9706_vm2, %v724_v22, %v728_v11  ;;  %v2147_v31 = vrot.slane %v2145_v23, 5  ;;  %v2163_v33 = vshrl.u32 %v8002_v18, 16  ;;  %v2152_v38 = vrot.slane %v2150_v27, 4  ;;  %v8005_v14 = vld [vmem:[%s15048_s23 + $0xa0] sm:$0xf] }
  0x6b   :  { %v7851_v35 = vcombine.low %v719_v20, %v729_v29  ;;  %v2133_v36 = vrot.slane %v2132_v24, 4  ;;  %v2142_v37 = vor.u32 %v2141_v25, %v2137_v16  ;;  %v2155_v40 = vrot.slane %v2153_v28, 5  ;;  %v8006_v23 = vld [vmem:[%s15048_s23 + $0xa4] sm:$0x1]  ;;  %v8007_v29 = vld [vmem:[%s15048_s23 + $0xa8] sm:$0xf] }
  0x6c   :  { %v2161_v41 = vrot.slane %v2159_v32, 5  ;;  %v2165_v42 = vrot.slane %v2163_v33, 4  ;;  %v2169_v43 = vshll.u32 %v8003_v26, 16  ;;  %v731_v49 = vshrl.u32 %v379_v34, 16 }
  0x6d   :  { %1328 = vrot.lane.b32.xlu1 %v7851_v35, %s9586_s21  ;;  %v2138_v47 = vsel %vm9706_vm2, %v2133_v36, %v2137_v16  ;;  %v2143_v48 = vrot.slane %v2142_v37, 4  ;;  %v734_v50 = vshll.u32 %v379_v34, 16  ;;  %1680 = vrot.lane.b32.xlu0 %v8675_v30, %s9585_s19  ;;  %v2156_v52 = vor.u32 %v2155_v40, %v2152_v38  ;;  %v8677_v37 = vld [vmem:[%s15048_s23 + $0x9c] sm:$0xff]   ;;  %v8009_v40 = vld [vmem:[%s15048_s23 + $0xb0] sm:$0x1] }
  0x6e   :  { %v2166_v53 = vor.u32 %v2165_v42, %v2161_v41  ;;  %v2171_v54 = vrot.slane %v2169_v43, 5  ;;  %v740_v55 = vshll.u32 %v380_v39, 16  ;;  %v733_v57 = vrot.slane %v731_v49, 4 }
  0x6f   :  { %v2148_v56 = vsel %vm9706_vm2, %v2143_v48, %v2147_v31  ;;  %v736_v58 = vrot.slane %v734_v50, 5  ;;  %v744_v59 = vshrl.u32 %v380_v39, 16  ;;  %v2157_v61 = vrot.slane %v2156_v52, 4  ;;  %v8008_v39 = vld [vmem:[%s15048_s23 + $0xac] sm:$0xf] }
  0x70   :  { %v8074_v60 = vcombine.low %v2138_v47, %v2148_v56  ;;  %v2167_v62 = vrot.slane %v2166_v53, 4  ;;  %v742_v63 = vrot.slane %v740_v55, 5  ;;  %v750_v2 = vshll.u32 %v381_v44, 16  ;;  %v386_v50 = vld [vmem:[%s15048_s23 + $0xac] sm:$0xf] }
  0x71   :  { %1682 = vrot.lane.b32.xlu1 %v8676_v46, %s9585_s19  ;;  %v737_v0 = vor.u32 %v736_v58, %v733_v57  ;;  %v746_v1 = vrot.slane %v744_v59, 4  ;;  %v755_v3 = vshrl.u32 %v382_v45, 16  ;;  %v2162_v4 = vsel %vm9706_vm2, %v2157_v61, %v2161_v41 }
  0x72   :  { %2769 = vrot.lane.b32.xlu0 %v8074_v60, %s9587_s22  ;;  %v2172_v5 = vsel %vm9706_vm2, %v2167_v62, %v2171_v54  ;;  %v758_v7 = vshll.u32 %v382_v45, 16  ;;  %v764_v8 = vshll.u32 %v383_v51, 16  ;;  %v752_v13 = vrot.slane %v750_v2, 5  ;;  %v385_v45 = vld [vmem:[%s15048_s23 + $0xa8] sm:$0xf] }
  0x73   :  { %v8075_v10 = vcombine.low %v2162_v4, %v2172_v5  ;;  %v738_v11 = vrot.slane %v737_v0, 4  ;;  %v747_v12 = vor.u32 %v746_v1, %v742_v63  ;;  %v757_v15 = vrot.slane %v755_v3, 4  ;;  %v387_v2 = vld [vmem:[%s15048_s23 + $0xb0] sm:$0x1]  ;;  %v8678_v4 = vld [vmem:[%s15048_s23 + $0xa8] sm:$0xff]  }
  0x74   :  { %v760_v16 = vrot.slane %v758_v7, 5  ;;  %v766_v17 = vrot.slane %v764_v8, 5  ;;  %v768_v18 = vshrl.u32 %v383_v51, 16  ;;  %v774_v22 = vshll.u32 %v384_v6, 16 }
  0x75   :  { %2771 = vrot.lane.b32.xlu1 %v8075_v10, %s9587_s22  ;;  %v743_v19 = vsel %vm9706_vm2, %v738_v11, %v742_v63  ;;  %v748_v20 = vrot.slane %v747_v12, 4  ;;  %v2174_v24 = vshrl.u32 %v8004_v9, 16  ;;  %v2177_v27 = vshll.u32 %v8004_v9, 16  ;;  %v388_v9 = vld [vmem:[%s15048_s23 + $0xb4] sm:$0xf] }
  0x76   :  { %v761_v25 = vor.u32 %v760_v16, %v757_v15  ;;  %v770_v26 = vrot.slane %v768_v18, 4  ;;  %v2183_v28 = vshll.u32 %v8005_v14, 16  ;;  %v776_v31 = vrot.slane %v774_v22, 5 }
  0x77   :  { %v753_v30 = vsel %vm9706_vm2, %v748_v20, %v752_v13  ;;  %v2176_v32 = vrot.slane %v2174_v24, 4  ;;  %v2187_v33 = vshrl.u32 %v8005_v14, 16  ;;  %v2179_v38 = vrot.slane %v2177_v27, 5  ;;  %v389_v14 = vld [vmem:[%s15048_s23 + $0xb8] sm:$0xf] }
  0x78   :  { %v7852_v34 = vcombine.low %v743_v19, %v753_v30  ;;  %v762_v35 = vrot.slane %v761_v25, 4  ;;  %v771_v36 = vor.u32 %v770_v26, %v766_v17  ;;  %v2185_v41 = vrot.slane %v2183_v28, 5  ;;  %v390_v19 = vld [vmem:[%s15048_s23 + $0xbc] sm:$0x1]  ;;  %v8010_v20 = vld [vmem:[%s15048_s23 + $0xb4] sm:$0xf] }
  0x79   :  { %v2189_v42 = vrot.slane %v2187_v33, 4  ;;  %v2193_v43 = vshll.u32 %v8006_v23, 16  ;;  %v2198_v44 = vshrl.u32 %v8007_v29, 16  ;;  %v2180_v48 = vor.u32 %v2179_v38, %v2176_v32  ;;  %v8011_v26 = vld [vmem:[%s15048_s23 + $0xb8] sm:$0xf] }
  0x7a   :  { %1330 = vrot.lane.b32.xlu0 %v7852_v34, %s9586_s21  ;;  %v767_v46 = vsel %vm9706_vm2, %v762_v35, %v766_v17  ;;  %v772_v47 = vrot.slane %v771_v36, 4  ;;  %v2201_v49 = vshll.u32 %v8007_v29, 16  ;;  %v2207_v54 = vshll.u32 %v8008_v39, 16 }
  0x7b   :  { %v2190_v51 = vor.u32 %v2189_v42, %v2185_v41  ;;  %v2195_v52 = vrot.slane %v2193_v43, 5  ;;  %v2200_v53 = vrot.slane %v2198_v44, 4  ;;  %v2181_v56 = vrot.slane %v2180_v48, 4  ;;  %v8012_v42 = vld [vmem:[%s15048_s23 + $0xbc] sm:$0x1] }
  0x7c   :  { %v777_v55 = vsel %vm9706_vm2, %v772_v47, %v776_v31  ;;  %v2203_v57 = vrot.slane %v2201_v49, 5  ;;  %v2211_v58 = vshrl.u32 %v8008_v39, 16  ;;  %v2209_v61 = vrot.slane %v2207_v54, 5  ;;  %v8013_v49 = vld [vmem:[%s15048_s23 + $0xc0] sm:$0xf] }
  0x7d   :  { %v7853_v59 = vcombine.low %v767_v46, %v777_v55  ;;  %v2191_v60 = vrot.slane %v2190_v51, 4  ;;  %v2217_v62 = vshll.u32 %v8009_v40, 16  ;;  %v2186_v63 = vsel %vm9706_vm2, %v2181_v56, %v2185_v41  ;;  %v8014_v54 = vld [vmem:[%s15048_s23 + $0xc4] sm:$0xf] }
  0x7e   :  { %1684 = vrot.lane.b32.xlu0 %v8677_v37, %s9585_s19  ;;  %v2204_v0 = vor.u32 %v2203_v57, %v2200_v53  ;;  %v2213_v1 = vrot.slane %v2211_v58, 4  ;;  %v779_v3 = vshrl.u32 %v385_v45, 16  ;;  %v782_v7 = vshll.u32 %v385_v45, 16 }
  0x7f   :  { %1332 = vrot.lane.b32.xlu1 %v7853_v59, %s9586_s21  ;;  %v2196_v5 = vsel %vm9706_vm2, %v2191_v60, %v2195_v52  ;;  %v2219_v6 = vrot.slane %v2217_v62, 5  ;;  %v788_v8 = vshll.u32 %v386_v50, 16  ;;  %v792_v17 = vshrl.u32 %v386_v50, 16  ;;  %v8015_v59 = vld [vmem:[%s15048_s23 + $0xc8] sm:$0x1]  ;;  %v10184_v60 = vpop.permute.xlu1 %1660 }
  0x80   :  { %v8076_v10 = vcombine.low %v2186_v63, %v2196_v5  ;;  %v2205_v11 = vrot.slane %v2204_v0, 4  ;;  %v2214_v12 = vor.u32 %v2213_v1, %v2209_v61  ;;  %v781_v13 = vrot.slane %v779_v3, 4  ;;  %v391_v1 = vld [vmem:[%s15048_s23 + $0xcc] sm:$0xf] }
  0x81   :  { %v784_v15 = vrot.slane %v782_v7, 5  ;;  %v790_v16 = vrot.slane %v788_v8, 5  ;;  %v798_v18 = vshll.u32 %v387_v2, 16  ;;  %v803_v24 = vshrl.u32 %v388_v9, 16  ;;  %v8679_v8 = vld [vmem:[%s15048_s23 + $0xb4] sm:$0xff]  }
  0x82   :  { %2773 = vrot.lane.b32.xlu0 %v8076_v10, %s9587_s22  ;;  %v2210_v22 = vsel %vm9706_vm2, %v2205_v11, %v2209_v61  ;;  %v2215_v23 = vrot.slane %v2214_v12, 4  ;;  %v806_v25 = vshll.u32 %v388_v9, 16  ;;  %v794_v28 = vrot.slane %v792_v17, 4 }
  0x83   :  { %1686 = vrot.lane.b32.xlu1 %v8678_v4, %s9585_s19  ;;  %v785_v27 = vor.u32 %v784_v15, %v781_v13  ;;  %v800_v29 = vrot.slane %v798_v18, 5  ;;  %v812_v30 = vshll.u32 %v389_v14, 16  ;;  %v805_v32 = vrot.slane %v803_v24, 4  ;;  %v8680_v24 = vld [vmem:[%s15048_s23 + $0xc0] sm:$0xff]  }
  0x84   :  { %v2220_v31 = vsel %vm9706_vm2, %v2215_v23, %v2219_v6  ;;  %v808_v33 = vrot.slane %v806_v25, 5  ;;  %v816_v34 = vshrl.u32 %v389_v14, 16  ;;  %v795_v37 = vor.u32 %v794_v28, %v790_v16  ;;  %v392_v6 = vld [vmem:[%s15048_s23 + $0xd0] sm:$0xf]  ;;  %v394_v23 = vld [vmem:[%s15048_s23 + $0xd8] sm:$0xf] }
  0x85   :  { %v8077_v35 = vcombine.low %v2210_v22, %v2220_v31  ;;  %v786_v36 = vrot.slane %v785_v27, 4  ;;  %v814_v38 = vrot.slane %v812_v30, 5  ;;  %v822_v41 = vshll.u32 %v390_v19, 16  ;;  %v393_v22 = vld [vmem:[%s15048_s23 + $0xd4] sm:$0x1]  ;;  %v10217_v30 = vpop.permute.xlu1 %1662 }
  0x86   :  { %v809_v39 = vor.u32 %v808_v33, %v805_v32  ;;  %v818_v40 = vrot.slane %v816_v34, 4  ;;  %v2222_v43 = vshrl.u32 %v8010_v20, 16  ;;  %v10168_v44 = vpop.permute.xlu0 %1306  ;;  %v796_v46 = vrot.slane %v795_v37, 4 }
  0x87   :  { %2775 = vrot.lane.b32.xlu1 %v8077_v35, %s9587_s22  ;;  %v791_v45 = vsel %vm9706_vm2, %v786_v36, %v790_v16  ;;  %v2225_v47 = vshll.u32 %v8010_v20, 16  ;;  %v2231_v48 = vshll.u32 %v8011_v26, 16  ;;  %v824_v52 = vrot.slane %v822_v41, 5 }
  0x88   :  { %v810_v50 = vrot.slane %v809_v39, 4  ;;  %v819_v51 = vor.u32 %v818_v40, %v814_v38  ;;  %v2224_v53 = vrot.slane %v2222_v43, 4  ;;  %v801_v55 = vsel %vm9706_vm2, %v796_v46, %v800_v29  ;;  %v395_v29 = vld [vmem:[%s15048_s23 + $0xdc] sm:$0xf] }
  0x89   :  { %v2227_v56 = vrot.slane %v2225_v47, 5  ;;  %v2233_v57 = vrot.slane %v2231_v48, 5  ;;  %v2235_v58 = vshrl.u32 %v8011_v26, 16  ;;  %v7854_v61 = vcombine.low %v791_v45, %v801_v55 }
  0x8a   :  { %v815_v62 = vsel %vm9706_vm2, %v810_v50, %v814_v38  ;;  %v820_v63 = vrot.slane %v819_v51, 4  ;;  %v2241_v0 = vshll.u32 %v8012_v42, 16  ;;  %v2246_v4 = vshrl.u32 %v8013_v49, 16  ;;  %v10200_v12 = vpop.permute.xlu0 %1308  ;;  %v396_v51 = vld [vmem:[%s15048_s23 + $0xe0] sm:$0x1] }
  0x8b   :  { %v2228_v2 = vor.u32 %v2227_v56, %v2224_v53  ;;  %v2237_v3 = vrot.slane %v2235_v58, 4  ;;  %v2249_v5 = vshll.u32 %v8013_v49, 16  ;;  %1334 = vrot.lane.b32.xlu0 %v7854_v61, %s9586_s21  ;;  %v2255_v10 = vshll.u32 %v8014_v54, 16 }
  0x8c   :  { %v825_v7 = vsel %vm9706_vm2, %v820_v63, %v824_v52  ;;  %v2243_v9 = vrot.slane %v2241_v0, 5  ;;  %v2259_v11 = vshrl.u32 %v8014_v54, 16  ;;  %v2248_v16 = vrot.slane %v2246_v4, 4  ;;  %v8016_v54 = vld [vmem:[%s15048_s23 + $0xd8] sm:$0xf] }
  0x8d   :  { %v7855_v13 = vcombine.low %v815_v62, %v825_v7  ;;  %v2229_v14 = vrot.slane %v2228_v2, 4  ;;  %v2238_v15 = vor.u32 %v2237_v3, %v2233_v57  ;;  %v2251_v17 = vrot.slane %v2249_v5, 5  ;;  %v8018_v5 = vld [vmem:[%s15048_s23 + $0xe0] sm:$0x1] }
  0x8e   :  { %v2257_v18 = vrot.slane %v2255_v10, 5  ;;  %v2261_v19 = vrot.slane %v2259_v11, 4  ;;  %v2265_v20 = vshll.u32 %v8015_v59, 16  ;;  %v827_v27 = vshrl.u32 %v391_v1, 16  ;;  %v10222_v43 = vpop.permute.xlu0 %2749  ;;  %v8017_v59 = vld [vmem:[%s15048_s23 + $0xdc] sm:$0xf] }
  0x8f   :  { %1336 = vrot.lane.b32.xlu1 %v7855_v13, %s9586_s21  ;;  %v2234_v25 = vsel %vm9706_vm2, %v2229_v14, %v2233_v57  ;;  %v2239_v26 = vrot.slane %v2238_v15, 4  ;;  %v830_v28 = vshll.u32 %v391_v1, 16  ;;  %1688 = vrot.lane.b32.xlu0 %v8679_v8, %s9585_s19  ;;  %v2252_v31 = vor.u32 %v2251_v17, %v2248_v16  ;;  %v8019_v11 = vld [vmem:[%s15048_s23 + $0xe4] sm:$0xf] }
  0x90   :  { %v2262_v32 = vor.u32 %v2261_v19, %v2257_v18  ;;  %v2267_v33 = vrot.slane %v2265_v20, 5  ;;  %v836_v34 = vshll.u32 %v392_v6, 16  ;;  %v829_v36 = vrot.slane %v827_v27, 4 }
  0x91   :  { %v2244_v35 = vsel %vm9706_vm2, %v2239_v26, %v2243_v9  ;;  %v832_v37 = vrot.slane %v830_v28, 5  ;;  %v840_v38 = vshrl.u32 %v392_v6, 16  ;;  %v2253_v40 = vrot.slane %v2252_v31, 4  ;;  %v397_v31 = vld [vmem:[%s15048_s23 + $0xe4] sm:$0xf] }
  0x92   :  { %v8078_v39 = vcombine.low %v2234_v25, %v2244_v35  ;;  %v2263_v41 = vrot.slane %v2262_v32, 4  ;;  %v838_v42 = vrot.slane %v836_v34, 5  ;;  %v846_v47 = vshll.u32 %v393_v22, 16  ;;  %v8681_v22 = vld [vmem:[%s15048_s23 + $0xd8] sm:$0xff]   ;;  %v8021_v25 = vld [vmem:[%s15048_s23 + $0xec] sm:$0x1] }
  0x93   :  { %1690 = vrot.lane.b32.xlu1 %v8680_v24, %s9585_s19  ;;  %v833_v45 = vor.u32 %v832_v37, %v829_v36  ;;  %v842_v46 = vrot.slane %v840_v38, 4  ;;  %v851_v48 = vshrl.u32 %v394_v23, 16  ;;  %v2258_v49 = vsel %vm9706_vm2, %v2253_v40, %v2257_v18  ;;  %v8020_v24 = vld [vmem:[%s15048_s23 + $0xe8] sm:$0xf] }
  0x94   :  { %2777 = vrot.lane.b32.xlu0 %v8078_v39, %s9587_s22  ;;  %v2268_v50 = vsel %vm9706_vm2, %v2263_v41, %v2267_v33  ;;  %v854_v52 = vshll.u32 %v394_v23, 16  ;;  %v860_v53 = vshll.u32 %v395_v29, 16  ;;  %v848_v58 = vrot.slane %v846_v47, 5  ;;  %v10239_v61 = vpop.permute.xlu1 %2751  ;;  %v398_v37 = vld [vmem:[%s15048_s23 + $0xe8] sm:$0xf] }
  0x95   :  { %v8079_v55 = vcombine.low %v2258_v49, %v2268_v50  ;;  %v834_v56 = vrot.slane %v833_v45, 4  ;;  %v843_v57 = vor.u32 %v842_v46, %v838_v42  ;;  %v853_v62 = vrot.slane %v851_v48, 4  ;;  %v399_v49 = vld [vmem:[%s15048_s23 + $0xec] sm:$0x1] }
  0x96   :  { %v856_v63 = vrot.slane %v854_v52, 5  ;;  %v862_v0 = vrot.slane %v860_v53, 5  ;;  %v864_v1 = vshrl.u32 %v395_v29, 16  ;;  %v870_v4 = vshll.u32 %v396_v51, 16 }
  0x97   :  { %2779 = vrot.lane.b32.xlu1 %v8079_v55, %s9587_s22  ;;  %v839_v2 = vsel %vm9706_vm2, %v834_v56, %v838_v42  ;;  %v844_v3 = vrot.slane %v843_v57, 4  ;;  %v2270_v6 = vshrl.u32 %v8016_v54, 16  ;;  %v2273_v9 = vshll.u32 %v8016_v54, 16  ;;  %v400_v54 = vld [vmem:[%s15048_s23 + $0xf0] sm:$0xf] }
  0x98   :  { %v857_v7 = vor.u32 %v856_v63, %v853_v62  ;;  %v866_v8 = vrot.slane %v864_v1, 4  ;;  %v2279_v10 = vshll.u32 %v8017_v59, 16  ;;  %v10250_v13 = vpop.permute.xlu0 %1310  ;;  %v872_v15 = vrot.slane %v870_v4, 5 }
  0x99   :  { %v849_v14 = vsel %vm9706_vm2, %v844_v3, %v848_v58  ;;  %v2272_v16 = vrot.slane %v2270_v6, 4  ;;  %v2283_v17 = vshrl.u32 %v8017_v59, 16  ;;  %v2275_v23 = vrot.slane %v2273_v9, 5  ;;  %v8682_v59 = vld [vmem:[%s15048_s23 + $0xe4] sm:$0xff]  }
  0x9a   :  { %v7856_v18 = vcombine.low %v839_v2, %v849_v14  ;;  %v858_v19 = vrot.slane %v857_v7, 4  ;;  %v867_v20 = vor.u32 %v866_v8, %v862_v0  ;;  %v2281_v26 = vrot.slane %v2279_v10, 5  ;;  %v401_v7 = vld [vmem:[%s15048_s23 + $0xf4] sm:$0xf] }
  0x9b   :  { %v2285_v27 = vrot.slane %v2283_v17, 4  ;;  %v2289_v28 = vshll.u32 %v8018_v5, 16  ;;  %v2294_v29 = vshrl.u32 %v8019_v11, 16  ;;  %v10266_v32 = vpop.permute.xlu1 %1312  ;;  %v2276_v35 = vor.u32 %v2275_v23, %v2272_v16  ;;  %v8691_v23 = vld [vmem:[%s15048_s23 + $0x18] sm:$0xff]  }
  0x9c   :  { %1338 = vrot.lane.b32.xlu0 %v7856_v18, %s9586_s21  ;;  %v863_v33 = vsel %vm9706_vm2, %v858_v19, %v862_v0  ;;  %v868_v34 = vrot.slane %v867_v20, 4  ;;  %v2297_v36 = vshll.u32 %v8019_v11, 16  ;;  %v10274_v38 = vpop.permute.xlu0 %1664  ;;  %v2303_v42 = vshll.u32 %v8020_v24, 16  ;;  %v8685_v20 = vld [vmem:[%s15048_s23] sm:$0xff]   ;;  %313 = vst.msk [vmem:[#allocation2 + $0x10] sm:$0xff] %vm310_vm4, %v8691_v23 }
  0x9d   :  { %v2286_v39 = vor.u32 %v2285_v27, %v2281_v26  ;;  %v2291_v40 = vrot.slane %v2289_v28, 5  ;;  %v2296_v41 = vrot.slane %v2294_v29, 4  ;;  %v2277_v46 = vrot.slane %v2276_v35, 4  ;;  %v8700_v27 = vld [vmem:[%s15048_s23 + $0x48] sm:$0xff]   ;;  %v8701_v28 = vld [vmem:[%s15048_s23 + $0x54] sm:$0xff]   ;;  %v8704_v29 = vld [vmem:[%s15048_s23 + $0x60] sm:$0xff]  }
  0x9e   :  { %v873_v45 = vsel %vm9706_vm2, %v868_v34, %v872_v15  ;;  %v2299_v47 = vrot.slane %v2297_v36, 5  ;;  %v2307_v48 = vshrl.u32 %v8020_v24, 16  ;;  %v2305_v52 = vrot.slane %v2303_v42, 5  ;;  %v402_v15 = vld [vmem:[%s15048_s23 + $0xf8] sm:$0x1]  ;;  %v8692_v24 = vld [vmem:[%s15048_s23 + $0x24] sm:$0xff]  }
  0x9f   :  { %v7857_v50 = vcombine.low %v863_v33, %v873_v45  ;;  %v2287_v51 = vrot.slane %v2286_v39, 4  ;;  %v2313_v53 = vshll.u32 %v8021_v25, 16  ;;  %v2282_v55 = vsel %vm9706_vm2, %v2277_v46, %v2281_v26  ;;  %v10293_v2 = vpop.permute.xlu1 %1666  ;;  %v8696_v25 = vld [vmem:[%s15048_s23 + $0x30] sm:$0xff]   ;;  %v8697_v26 = vld [vmem:[%s15048_s23 + $0x3c] sm:$0xff]   ;;  %v8709_v34 = vld [vmem:[%s15048_s23 + $0x84] sm:$0xff]   ;;  %311 = vst.msk [vmem:[#allocation2] sm:$0xff] %vm310_vm4, %v8685_v20 }
  0xa0   :  { %1692 = vrot.lane.b32.xlu0 %v8681_v22, %s9585_s19  ;;  %v2300_v56 = vor.u32 %v2299_v47, %v2296_v41  ;;  %v2309_v57 = vrot.slane %v2307_v48, 4  ;;  %v875_v58 = vshrl.u32 %v397_v31, 16  ;;  %v878_v0 = vshll.u32 %v397_v31, 16  ;;  %v10298_v8 = vpop.permute.xlu0 %2753  ;;  %v8686_v22 = vld [vmem:[%s15048_s23 + $0xc] sm:$0xff]   ;;  %v8708_v33 = vld [vmem:[%s15048_s23 + $0x78] sm:$0xff]   ;;  %314 = vst.msk [vmem:[#allocation2 + $0x18] sm:$0xff] %vm310_vm4, %v8692_v24 }
  0xa1   :  { %1340 = vrot.lane.b32.xlu1 %v7857_v50, %s9586_s21  ;;  %v2292_v62 = vsel %vm9706_vm2, %v2287_v51, %v2291_v40  ;;  %v2315_v63 = vrot.slane %v2313_v53, 5  ;;  %v884_v1 = vshll.u32 %v398_v37, 16  ;;  %v888_v11 = vshrl.u32 %v398_v37, 16  ;;  %v8705_v31 = vld [vmem:[%s15048_s23 + $0x6c] sm:$0xff]   ;;  %v8713_v41 = vld [vmem:[%s15048_s23 + $0x9c] sm:$0xff]   ;;  %312 = vst.msk [vmem:[#allocation2 + $0x8] sm:$0xff] %vm310_vm4, %v8686_v22 }
  0xa2   :  { %v8080_v3 = vcombine.low %v2282_v55, %v2292_v62  ;;  %v2301_v4 = vrot.slane %v2300_v56, 4  ;;  %v2310_v5 = vor.u32 %v2309_v57, %v2305_v52  ;;  %v877_v6 = vrot.slane %v875_v58, 4  ;;  %v8712_v40 = vld [vmem:[%s15048_s23 + $0x90] sm:$0xff]   ;;  %v8714_v42 = vld [vmem:[%s15048_s23 + $0xa8] sm:$0xff]   ;;  %v8717_v51 = vld [vmem:[%s15048_s23 + $0xd8] sm:$0xff]   ;;  %315 = vst.msk [vmem:[#allocation2 + $0x20] sm:$0xff] %vm310_vm4, %v8696_v25 }
  0xa3   :  { %v880_v9 = vrot.slane %v878_v0, 5  ;;  %v10300_v10 = vrot.slane %v884_v1, 5  ;;  %v894_v14 = vshll.u32 %v399_v49, 16  ;;  %v899_v18 = vshrl.u32 %v400_v54, 16  ;;  %v8715_v49 = vld [vmem:[%s15048_s23 + $0xb4] sm:$0xff]   ;;  %v8716_v50 = vld [vmem:[%s15048_s23 + $0xcc] sm:$0xff]   ;;  %v10373_v57 = vpop.permute.xlu1 %2755 }
  0xa4   :  { %2781 = vrot.lane.b32.xlu0 %v8080_v3, %s9587_s22  ;;  %v2306_v16 = vsel %vm9706_vm2, %v2301_v4, %v2305_v52  ;;  %v2311_v17 = vrot.slane %v2310_v5, 4  ;;  %v902_v19 = vshll.u32 %v400_v54, 16  ;;  %v890_v36 = vrot.slane %v888_v11, 4  ;;  %v8022_v56 = vld [vmem:[%s15048_s23 + $0xf0] sm:$0xf]  ;;  %v8718_v1 = vld [vmem:[%s15048_s23 + $0xe4] sm:$0xff]  }
  0xa5   :  { %1694 = vrot.lane.b32.xlu1 %v8682_v59, %s9585_s19  ;;  %v881_v35 = vor.u32 %v880_v9, %v877_v6  ;;  %v10345_v37 = vrot.slane %v894_v14, 5  ;;  %v908_v39 = vshll.u32 %v401_v7, 16  ;;  %v901_v46 = vrot.slane %v899_v18, 4  ;;  %v10388_v5 = vld [vmem:[%s15048_s23 + $0xf8] sm:$0x1]  ;;  %v8719_v6 = vld [vmem:[%s15048_s23 + $0xf0] sm:$0xff]  }
  0xa6   :  { %v2316_v45 = vsel %vm9706_vm2, %v2311_v17, %v2315_v63  ;;  %v904_v47 = vrot.slane %v902_v19, 5  ;;  %v912_v48 = vshrl.u32 %v401_v7, 16  ;;  %v891_v54 = vor.u32 %v890_v36, %v10300_v10  ;;  %v8023_v63 = vld [vmem:[%s15048_s23 + $0xf4] sm:$0xf]  ;;  %316 = vst.msk [vmem:[#allocation2 + $0x28] sm:$0xff] %vm310_vm4, %v8697_v26  ;;  %317 = vst.msk [vmem:[#allocation2 + $0x30] sm:$0xff] %vm310_vm4, %v8700_v27 }
  0xa7   :  { %v8081_v52 = vcombine.low %v2306_v16, %v2316_v45  ;;  %v882_v53 = vrot.slane %v881_v35, 4  ;;  %v10368_v55 = vrot.slane %v908_v39, 5  ;;  %v918_v62 = vshll.u32 %v402_v15, 16  ;;  %318 = vst.msk [vmem:[#allocation2 + $0x38] sm:$0xff] %vm310_vm4, %v8701_v28  ;;  %319 = vst.msk [vmem:[#allocation2 + $0x40] sm:$0xff] %vm310_vm4, %v8704_v29 }
  0xa8   :  { %v905_v58 = vor.u32 %v904_v47, %v901_v46  ;;  %v914_v59 = vrot.slane %v912_v48, 4  ;;  %v1315_v0 = vpop.permute.xlu0 %1314  ;;  %v892_v4 = vrot.slane %v891_v54, 4  ;;  %v2318_v14 = vshrl.u32 %v8022_v56, 16  ;;  %320 = vst.msk [vmem:[#allocation2 + $0x48] sm:$0xff] %vm310_vm4, %v8705_v31  ;;  %321 = vst.msk [vmem:[#allocation2 + $0x50] sm:$0xff] %vm310_vm4, %v8708_v33 }
  0xa9   :  { %2783 = vrot.lane.b32.xlu1 %v8081_v52, %s9587_s22  ;;  %v887_v3 = vsel %vm9706_vm2, %v882_v53, %v10300_v10  ;;  %v920_v11 = vrot.slane %v918_v62, 5  ;;  %v8025_v10 = vld [vmem:[%s15048_s23 + $0xfc] sm:$0xf]  ;;  %322 = vst.msk [vmem:[#allocation2 + $0x58] sm:$0xff] %vm310_vm4, %v8709_v34  ;;  %323 = vst.msk [vmem:[#allocation2 + $0x60] sm:$0xff] %vm310_vm4, %v8712_v40  ;;  %v2321_v16 = vshll.u32 %v8022_v56, 16 }
  0xaa   :  { %v906_v7 = vrot.slane %v905_v58, 4  ;;  %v915_v9 = vor.u32 %v914_v59, %v10368_v55  ;;  %324 = vst.msk [vmem:[#allocation2 + $0x68] sm:$0xff] %vm310_vm4, %v8713_v41  ;;  %325 = vst.msk [vmem:[#allocation2 + $0x70] sm:$0xff] %vm310_vm4, %v8714_v42  ;;  %v897_v15 = vsel %vm9706_vm2, %v892_v4, %v10345_v37  ;;  %v2327_v17 = vshll.u32 %v8023_v63, 16  ;;  %v8026_v19 = vld [vmem:[%s15048_s23 + $0x100] sm:$0xf] }
  0xab   :  { %326 = vst.msk [vmem:[#allocation2 + $0x78] sm:$0xff] %vm310_vm4, %v8715_v49  ;;  %327 = vst.msk [vmem:[#allocation2 + $0x80] sm:$0xff] %vm310_vm4, %v8716_v50  ;;  %v2331_v18 = vshrl.u32 %v8023_v63, 16  ;;  %v2337_v26 = vshll.u32 %v10388_v5, 16  ;;  %v2342_v28 = vshrl.u32 %v8025_v10, 16  ;;  %v2345_v29 = vshll.u32 %v8025_v10, 16 }
  0xac   :  { %328 = vst.msk [vmem:[#allocation2 + $0x88] sm:$0xff] %vm310_vm4, %v8717_v51  ;;  %329 = vst.msk [vmem:[#allocation2 + $0x90] sm:$0xff] %vm310_vm4, %v8718_v1  ;;  %v911_v20 = vsel %vm9706_vm2, %v906_v7, %v10368_v55  ;;  %v916_v22 = vrot.slane %v915_v9, 4  ;;  %v1669_v23 = vpop.permute.xlu0 %1668  ;;  %v2329_v24 = vrot.slane %v2327_v17, 5  ;;  %v2351_v31 = vshll.u32 %v8026_v19, 16  ;;  %v8684_v34 = vld [vmem:[%s15048_s23 + $0xfc] sm:$0xff]  }
  0xad   :  { %1403 = vst.msk [vmem:[#allocation2] sm:$0xff] %vm1402_vm3, %v10168_v44  ;;  %1404 = vst.msk [vmem:[#allocation2 + $0x8] sm:$0xff] %vm1402_vm3, %v10200_v12  ;;  %v7858_v44 = vcombine.low %v887_v3, %v897_v15  ;;  %v2320_v12 = vrot.slane %v2318_v14, 4  ;;  %v2333_v25 = vrot.slane %v2331_v18, 4  ;;  %v1317_v27 = vpop.permute.xlu1 %1316  ;;  %v2339_v37 = vrot.slane %v2337_v26, 5  ;;  %v8720_v56 = vld [vmem:[%s15048_s23 + $0xfc] sm:$0xff]  }
  0xae   :  { %1405 = vst.msk [vmem:[#allocation2 + $0x10] sm:$0xff] %vm1402_vm3, %v10250_v13  ;;  %1406 = vst.msk [vmem:[#allocation2 + $0x18] sm:$0xff] %vm1402_vm3, %v10266_v32  ;;  %v8027_v13 = vld [vmem:[%s15048_s23 + $0x104] sm:$0x1]  ;;  %v403_v32 = vld [vmem:[%s15048_s23 + $0xfc] sm:$0xf] }
  0xaf   :  { %1407 = vst.msk [vmem:[#allocation2 + $0x20] sm:$0xff] %vm1402_vm3, %v1315_v0  ;;  %1342 = vrot.lane.b32.xlu0 %v7858_v44, %s9586_s21  ;;  %1408 = vst.msk [vmem:[#allocation2 + $0x28] sm:$0xff] %vm1402_vm3, %v1317_v27  ;;  %v2334_v36 = vor.u32 %v2333_v25, %v2329_v24  ;;  %v2344_v39 = vrot.slane %v2342_v28, 4  ;;  %v2347_v40 = vrot.slane %v2345_v29, 5  ;;  %v2353_v41 = vrot.slane %v2351_v31, 5  ;;  %v8721_v25 = vld [vmem:[%s15048_s23 + $0x108] sm:$0xff]  }
  0xb0   :  { %330 = vst.msk [vmem:[#allocation2 + $0x98] sm:$0xff] %vm310_vm4, %v8719_v6  ;;  %v2355_v42 = vshrl.u32 %v8026_v19, 16  ;;  %v405_v45 = vld [vmem:[%s15048_s23 + $0x104] sm:$0x1]  ;;  %v406_v46 = vld [vmem:[%s15048_s23 + $0x108] sm:$0xf]  ;;  %v2758_v6 = vpop.permute.xlu0 %2757 }
  0xb1   :  { %1757 = vst.msk [vmem:[#allocation2] sm:$0xff] %vm1756_vm5, %v10184_v60  ;;  %1758 = vst.msk [vmem:[#allocation2 + $0x8] sm:$0xff] %vm1756_vm5, %v10217_v30  ;;  %v2323_v60 = vrot.slane %v2321_v16, 5  ;;  %v404_v30 = vld [vmem:[%s15048_s23 + $0x100] sm:$0xf]  ;;  %v2335_v48 = vrot.slane %v2334_v36, 4  ;;  %v1671_v51 = vpop.permute.xlu1 %1670  ;;  %v2348_v52 = vor.u32 %v2347_v40, %v2344_v39 }
  0xb2   :  { %1759 = vst.msk [vmem:[#allocation2 + $0x10] sm:$0xff] %vm1756_vm5, %v10274_v38  ;;  %1760 = vst.msk [vmem:[#allocation2 + $0x18] sm:$0xff] %vm1756_vm5, %v10293_v2  ;;  %v921_v38 = vsel %vm9706_vm2, %v916_v22, %v920_v11  ;;  %v8683_v2 = vld [vmem:[%s15048_s23 + $0xf0] sm:$0xff]   ;;  %v2361_v49 = vshll.u32 %v8027_v13, 16  ;;  %v923_v50 = vshrl.u32 %v403_v32, 16  ;;  %v2357_v53 = vrot.slane %v2355_v42, 4 }
  0xb3   :  { %1761 = vst.msk [vmem:[#allocation2 + $0x20] sm:$0xff] %vm1756_vm5, %v1669_v23  ;;  %v7859_v33 = vcombine.low %v911_v20, %v921_v38  ;;  %v2324_v35 = vor.u32 %v2323_v60, %v2320_v12  ;;  %1696 = vrot.lane.b32.xlu0 %v8683_v2, %s9585_s19  ;;  %v926_v54 = vshll.u32 %v403_v32, 16  ;;  %v932_v55 = vshll.u32 %v404_v30, 16  ;;  %1762 = vst.msk [vmem:[#allocation2 + $0x28] sm:$0xff] %vm1756_vm5, %v1671_v51  ;;  %v407_v5 = vld [vmem:[%s15048_s23 + $0x10c] sm:$0xf] }
  0xb4   :  { %v2340_v59 = vsel %vm9706_vm2, %v2335_v48, %v2339_v37  ;;  %v2363_v62 = vrot.slane %v2361_v49, 5  ;;  %v925_v63 = vrot.slane %v923_v50, 4  ;;  %v2349_v1 = vrot.slane %v2348_v52, 4  ;;  %331 = vst.msk [vmem:[#allocation2 + $0xa0] sm:$0xff] %vm310_vm4, %v8720_v56  ;;  %v408_v17 = vld [vmem:[%s15048_s23 + $0x110] sm:$0x1] }
  0xb5   :  { %1344 = vrot.lane.b32.xlu1 %v7859_v33, %s9586_s21  ;;  %v2325_v47 = vrot.slane %v2324_v35, 4  ;;  %v2358_v3 = vor.u32 %v2357_v53, %v2353_v41  ;;  %v928_v4 = vrot.slane %v926_v54, 5  ;;  %v934_v7 = vrot.slane %v932_v55, 5  ;;  %v2760_v12 = vpop.permute.xlu1 %2759  ;;  %v8029_v2 = vld [vmem:[%s15048_s23 + $0x10c] sm:$0xf]  ;;  %332 = vst.msk [vmem:[#allocation2 + $0xa8] sm:$0xff] %vm310_vm4, %v8721_v25 }
  0xb6   :  { %v936_v9 = vshrl.u32 %v404_v30, 16  ;;  %v942_v11 = vshll.u32 %v405_v45, 16  ;;  %v947_v14 = vshrl.u32 %v406_v46, 16  ;;  %v2354_v10 = vsel %vm9706_vm2, %v2349_v1, %v2353_v41  ;;  %v8030_v28 = vld [vmem:[%s15048_s23 + $0x110] sm:$0x1]  ;;  %2846 = vst.msk [vmem:[#allocation2] sm:$0xff] %vm2845_vm6, %v10222_v43 }
  0xb7   :  { %v2330_v58 = vsel %vm9706_vm2, %v2325_v47, %v2329_v24  ;;  %v2359_v15 = vrot.slane %v2358_v3, 4  ;;  %v929_v16 = vor.u32 %v928_v4, %v925_v63  ;;  %v950_v18 = vshll.u32 %v406_v46, 16  ;;  %v8028_v24 = vld [vmem:[%s15048_s23 + $0x108] sm:$0xf]  ;;  %2847 = vst.msk [vmem:[#allocation2 + $0x8] sm:$0xff] %vm2845_vm6, %v10239_v61  ;;  %2848 = vst.msk [vmem:[#allocation2 + $0x10] sm:$0xff] %vm2845_vm6, %v10298_v8 }
  0xb8   :  { %v8082_v0 = vcombine.low %v2330_v58, %v2340_v59  ;;  %v938_v19 = vrot.slane %v936_v9, 4  ;;  %v944_v44 = vrot.slane %v942_v11, 5  ;;  %v949_v20 = vrot.slane %v947_v14, 4  ;;  %v8032_v41 = vld [vmem:[%s15048_s23 + $0x118] sm:$0xf]  ;;  %2849 = vst.msk [vmem:[#allocation2 + $0x18] sm:$0xff] %vm2845_vm6, %v10373_v57 }
  0xb9   :  { %1698 = vrot.lane.b32.xlu1 %v8684_v34, %s9585_s19  ;;  %v956_v22 = vshll.u32 %v407_v5, 16  ;;  %v2364_v13 = vsel %vm9706_vm2, %v2359_v15, %v2363_v62  ;;  %v930_v32 = vrot.slane %v929_v16, 4  ;;  %v952_v23 = vrot.slane %v950_v18, 5  ;;  %v8031_v34 = vld [vmem:[%s15048_s23 + $0x114] sm:$0xf]  ;;  %v1319_v35 = vpop.permute.xlu0 %1318  ;;  %2850 = vst.msk [vmem:[#allocation2 + $0x20] sm:$0xff] %vm2845_vm6, %v2758_v6 }
  0xba   :  { %2785 = vrot.lane.b32.xlu0 %v8082_v0, %s9587_s22  ;;  %v960_v60 = vshrl.u32 %v407_v5, 16  ;;  %v8083_v26 = vcombine.low %v2354_v10, %v2364_v13  ;;  %v939_v30 = vor.u32 %v938_v19, %v934_v7  ;;  %v966_v38 = vshll.u32 %v408_v17, 16  ;;  %2851 = vst.msk [vmem:[#allocation2 + $0x28] sm:$0xff] %vm2845_vm6, %v2760_v12  ;;  %v8033_v8 = vld [vmem:[%s15048_s23 + $0x11c] sm:$0x1]  ;;  %v8689_v0 = vld [vmem:[%s15048_s23 + $0x108] sm:$0xff]  }
  0xbb   :  { %v958_v27 = vrot.slane %v956_v22, 5  ;;  %v935_v29 = vsel %vm9706_vm2, %v930_v32, %v934_v7  ;;  %v953_v31 = vor.u32 %v952_v23, %v949_v20  ;;  %v2366_v39 = vshrl.u32 %v8028_v24, 16  ;;  %1409 = vst.msk [vmem:[#allocation2 + $0x30] sm:$0xff] %vm1402_vm3, %v1319_v35  ;;  %v409_v54 = vld [vmem:[%s15048_s23 + $0x114] sm:$0xf] }
  0xbc   :  { %v962_v33 = vrot.slane %v960_v60, 4  ;;  %v940_v36 = vrot.slane %v939_v30, 4  ;;  %v968_v37 = vrot.slane %v966_v38, 5  ;;  %v2369_v40 = vshll.u32 %v8028_v24, 16  ;;  %v8690_v6 = vld [vmem:[%s15048_s23 + $0x114] sm:$0xff]  }
  0xbd   :  { %2787 = vrot.lane.b32.xlu1 %v8083_v26, %s9587_s22  ;;  %v954_v43 = vrot.slane %v953_v31, 4  ;;  %v2375_v42 = vshll.u32 %v8029_v2, 16  ;;  %v2379_v45 = vshrl.u32 %v8029_v2, 16  ;;  %v2368_v47 = vrot.slane %v2366_v39, 4  ;;  %v1321_v57 = vpop.permute.xlu1 %1320  ;;  %v1673_v55 = vpop.permute.xlu0 %1672  ;;  %v410_v14 = vld [vmem:[%s15048_s23 + $0x118] sm:$0xf] }
  0xbe   :  { %v963_v61 = vor.u32 %v962_v33, %v958_v27  ;;  %v945_v46 = vsel %vm9706_vm2, %v940_v36, %v944_v44  ;;  %v2371_v48 = vrot.slane %v2369_v40, 5  ;;  %v2385_v49 = vshll.u32 %v8030_v28, 16  ;;  %1410 = vst.msk [vmem:[#allocation2 + $0x38] sm:$0xff] %vm1402_vm3, %v1321_v57  ;;  %v2878_v19 = vld [vmem:[#allocation2] sm:$0xff]  ;;  %v2879_v44 = vld [vmem:[#allocation2 + $0x8] sm:$0xff]  ;;  %v2880_v23 = vld [vmem:[#allocation2 + $0x10] sm:$0xff] }
  0xbf   :  { %v7860_v50 = vcombine.low %v935_v29, %v945_v46  ;;  %v959_v51 = vsel %vm9706_vm2, %v954_v43, %v958_v27  ;;  %v2377_v53 = vrot.slane %v2375_v42, 5  ;;  %v2381_v58 = vrot.slane %v2379_v45, 4  ;;  %1763 = vst.msk [vmem:[#allocation2 + $0x30] sm:$0xff] %vm1756_vm5, %v1673_v55  ;;  %v411_v13 = vld [vmem:[%s15048_s23 + $0x11c] sm:$0x1]  ;;  %8469 = vmatprep.mubr.msk.bf16.mxu0 %vm2941_vm7, %v2878_v19  ;;  %v8722_v27 = vld [vmem:[%s15048_s23 + $0x114] sm:$0xff]  }
  0xc0   :  { %v964_v52 = vrot.slane %v963_v61, 4  ;;  %v2372_v56 = vor.u32 %v2371_v48, %v2368_v47  ;;  %v2387_v59 = vrot.slane %v2385_v49, 5  ;;  %v2390_v62 = vshrl.u32 %v8031_v34, 16  ;;  %v412_v30 = vld [vmem:[%s15048_s23 + $0x120] sm:$0xf]  ;;  %8470 = vmatmul.mubr.msk.bf16.vlgmr.msra.gmra.mrb[0].mxu0 %vm2941_vm7, %v2879_v44  ;;  %333 = vst.msk [vmem:[#allocation2 + $0xb0] sm:$0xff] %vm310_vm4, %v8722_v27 }
  0xc1   :  { %1346 = vrot.lane.b32.xlu0 %v7860_v50, %s9586_s21  ;;  %v2393_v1 = vshll.u32 %v8031_v34, 16  ;;  %v2399_v3 = vshll.u32 %v8032_v41, 16  ;;  %v2403_v4 = vshrl.u32 %v8032_v41, 16  ;;  %v2382_v9 = vor.u32 %v2381_v58, %v2377_v53  ;;  %v1675_v10 = vpop.permute.xlu1 %1674  ;;  %8473 = vmatprep.mubr.msk.bf16.mxu0 %vm2941_vm7, %v2880_v23  ;;  %v413_v41 = vld [vmem:[%s15048_s23 + $0x124] sm:$0xf] }
  0xc2   :  { %v969_v63 = vsel %vm9706_vm2, %v964_v52, %v968_v37  ;;  %v2373_v7 = vrot.slane %v2372_v56, 4  ;;  %v2392_v11 = vrot.slane %v2390_v62, 4  ;;  %v2409_v18 = vshll.u32 %v8033_v8, 16  ;;  %1764 = vst.msk [vmem:[#allocation2 + $0x38] sm:$0xff] %vm1756_vm5, %v1675_v10  ;;  %v2762_v20 = vpop.permute.xlu0 %2761  ;;  %v414_v46 = vld [vmem:[%s15048_s23 + $0x128] sm:$0x1] }
  0xc3   :  { %v7861_v5 = vcombine.low %v959_v51, %v969_v63  ;;  %v2395_v15 = vrot.slane %v2393_v1, 5  ;;  %v2401_v16 = vrot.slane %v2399_v3, 5  ;;  %v2405_v17 = vrot.slane %v2403_v4, 4  ;;  %2852 = vst.msk [vmem:[#allocation2 + $0x30] sm:$0xff] %vm2845_vm6, %v2762_v20  ;;  %v8034_v48 = vld [vmem:[%s15048_s23 + $0x120] sm:$0xf] }
  0xc4   :  { %v2378_v22 = vsel %vm9706_vm2, %v2373_v7, %v2377_v53  ;;  %v2383_v12 = vrot.slane %v2382_v9, 4  ;;  %v971_v32 = vshrl.u32 %v409_v54, 16  ;;  %v2411_v25 = vrot.slane %v2409_v18, 5  ;;  %v8723_v49 = vld [vmem:[%s15048_s23 + $0x120] sm:$0xff]   ;;  %v8036_v58 = vld [vmem:[%s15048_s23 + $0x128] sm:$0x1] }
  0xc5   :  { %1348 = vrot.lane.b32.xlu1 %v7861_v5, %s9586_s21  ;;  %1700 = vrot.lane.b32.xlu0 %v8689_v0, %s9585_s19  ;;  %v2396_v60 = vor.u32 %v2395_v15, %v2392_v11  ;;  %v2406_v24 = vor.u32 %v2405_v17, %v2401_v16  ;;  %v974_v26 = vshll.u32 %v409_v54, 16  ;;  %v980_v28 = vshll.u32 %v410_v14, 16  ;;  %v2764_v31 = vpop.permute.xlu1 %2763  ;;  %v8035_v52 = vld [vmem:[%s15048_s23 + $0x124] sm:$0xf]  ;;  %334 = vst.msk [vmem:[#allocation2 + $0xb8] sm:$0xff] %vm310_vm4, %v8723_v49 }
  0xc6   :  { %v2388_v38 = vsel %vm9706_vm2, %v2383_v12, %v2387_v59  ;;  %v973_v2 = vrot.slane %v971_v32, 4  ;;  %v984_v29 = vshrl.u32 %v410_v14, 16  ;;  %2853 = vst.msk [vmem:[#allocation2 + $0x38] sm:$0xff] %vm2845_vm6, %v2764_v31  ;;  %v990_v40 = vshll.u32 %v411_v13, 16  ;;  %v2881_v59 = vld [vmem:[#allocation2 + $0x18] sm:$0xff]  ;;  %v2882_v4 = vld [vmem:[#allocation2 + $0x20] sm:$0xff] }
  0xc7   :  { %v8084_v33 = vcombine.low %v2378_v22, %v2388_v38  ;;  %v2397_v34 = vrot.slane %v2396_v60, 4  ;;  %v2407_v35 = vrot.slane %v2406_v24, 4  ;;  %v976_v36 = vrot.slane %v974_v26, 5  ;;  %v8037_v11 = vld [vmem:[%s15048_s23 + $0x12c] sm:$0xf]  ;;  %v8694_v27 = vld [vmem:[%s15048_s23 + $0x120] sm:$0xff]  }
  0xc8   :  { %v982_v37 = vrot.slane %v980_v28, 5  ;;  %v986_v39 = vrot.slane %v984_v29, 4  ;;  %v995_v43 = vshrl.u32 %v412_v30, 16  ;;  %v998_v47 = vshll.u32 %v412_v30, 16  ;;  %v8038_v17 = vld [vmem:[%s15048_s23 + $0x130] sm:$0xf]  ;;  %8474 = vmatmul.mubr.msk.bf16.gmra.mrb[4].mxu0 %vm2941_vm7, %v2881_v59 }
  0xc9   :  { %1702 = vrot.lane.b32.xlu1 %v8690_v6, %s9585_s19  ;;  %2789 = vrot.lane.b32.xlu0 %v8084_v33, %s9587_s22  ;;  %v2402_v61 = vsel %vm9706_vm2, %v2397_v34, %v2401_v16  ;;  %v2412_v42 = vsel %vm9706_vm2, %v2407_v35, %v2411_v25  ;;  %v977_v45 = vor.u32 %v976_v36, %v973_v2  ;;  %v992_v50 = vrot.slane %v990_v40, 5  ;;  %v8039_v22 = vld [vmem:[%s15048_s23 + $0x134] sm:$0x1]  ;;  %v415_v24 = vld [vmem:[%s15048_s23 + $0x12c] sm:$0xf] }
  0xca   :  { %v8085_v8 = vcombine.low %v2402_v61, %v2412_v42  ;;  %v987_v57 = vor.u32 %v986_v39, %v982_v37  ;;  %v997_v51 = vrot.slane %v995_v43, 4  ;;  %v1000_v54 = vrot.slane %v998_v47, 5  ;;  %v1323_v62 = vpop.permute.xlu0 %1322  ;;  %8477 = vmatprep.mubr.msk.bf16.mxu0 %vm2941_vm7, %v2882_v4  ;;  %v416_v28 = vld [vmem:[%s15048_s23 + $0x130] sm:$0xf]  ;;  %v2883_v40 = vld [vmem:[#allocation2 + $0x28] sm:$0xff] }
  0xcb   :  { %v978_v53 = vrot.slane %v977_v45, 4  ;;  %v1004_v55 = vshll.u32 %v413_v41, 16  ;;  %v1008_v56 = vshrl.u32 %v413_v41, 16  ;;  %v1014_v0 = vshll.u32 %v414_v46, 16  ;;  %1411 = vst.msk [vmem:[#allocation2 + $0x40] sm:$0xff] %vm1402_vm3, %v1323_v62  ;;  %v2884_v47 = vld [vmem:[#allocation2 + $0x30] sm:$0xff] }
  0xcc   :  { %v988_v63 = vrot.slane %v987_v57, 4  ;;  %v2414_v1 = vshrl.u32 %v8034_v48, 16  ;;  %v2417_v3 = vshll.u32 %v8034_v48, 16  ;;  %v1001_v6 = vor.u32 %v1000_v54, %v997_v51  ;;  %v8724_v48 = vld [vmem:[%s15048_s23 + $0x12c] sm:$0xff]  }
  0xcd   :  { %2791 = vrot.lane.b32.xlu1 %v8085_v8, %s9587_s22  ;;  %v983_v5 = vsel %vm9706_vm2, %v978_v53, %v982_v37  ;;  %v1006_v7 = vrot.slane %v1004_v55, 5  ;;  %v1010_v9 = vrot.slane %v1008_v56, 4  ;;  %v1016_v10 = vrot.slane %v1014_v0, 5  ;;  %335 = vst.msk [vmem:[#allocation2 + $0xc0] sm:$0xff] %vm310_vm4, %v8724_v48  ;;  %v418_v0 = vld [vmem:[%s15048_s23 + $0x138] sm:$0xf] }
  0xce   :  { %v993_v14 = vsel %vm9706_vm2, %v988_v63, %v992_v50  ;;  %v2416_v15 = vrot.slane %v2414_v1, 4  ;;  %v2419_v16 = vrot.slane %v2417_v3, 5  ;;  %v1002_v19 = vrot.slane %v1001_v6, 4  ;;  %v1677_v12 = vpop.permute.xlu0 %1676  ;;  %v417_v50 = vld [vmem:[%s15048_s23 + $0x134] sm:$0x1] }
  0xcf   :  { %v7862_v18 = vcombine.low %v983_v5, %v993_v14  ;;  %v1011_v44 = vor.u32 %v1010_v9, %v1006_v7  ;;  %v2423_v20 = vshll.u32 %v8035_v52, 16  ;;  %v2427_v32 = vshrl.u32 %v8035_v52, 16  ;;  %v1325_v25 = vpop.permute.xlu1 %1324  ;;  %1765 = vst.msk [vmem:[#allocation2 + $0x40] sm:$0xff] %vm1756_vm5, %v1677_v12  ;;  %v8695_v52 = vld [vmem:[%s15048_s23 + $0x12c] sm:$0xff]   ;;  %v419_v6 = vld [vmem:[%s15048_s23 + $0x13c] sm:$0xf] }
  0xd0   :  { %v2420_v13 = vor.u32 %v2419_v16, %v2416_v15  ;;  %v2433_v23 = vshll.u32 %v8036_v58, 16  ;;  %v2438_v60 = vshrl.u32 %v8037_v11, 16  ;;  %v1007_v26 = vsel %vm9706_vm2, %v1002_v19, %v1006_v7  ;;  %1412 = vst.msk [vmem:[#allocation2 + $0x48] sm:$0xff] %vm1402_vm3, %v1325_v25  ;;  %8478 = vmatmul.mubr.msk.bf16.gmra.mrb[8].mxu0 %vm2941_vm7, %v2883_v40  ;;  %v8725_v9 = vld [vmem:[%s15048_s23 + $0x138] sm:$0xff]   ;;  %v420_v16 = vld [vmem:[%s15048_s23 + $0x140] sm:$0x1] }
  0xd1   :  { %1350 = vrot.lane.b32.xlu0 %v7862_v18, %s9586_s21  ;;  %v1012_v30 = vrot.slane %v1011_v44, 4  ;;  %v2425_v38 = vrot.slane %v2423_v20, 5  ;;  %v2441_v2 = vshll.u32 %v8037_v11, 16  ;;  %v2429_v31 = vrot.slane %v2427_v32, 4  ;;  %8481 = vmatprep.mubr.msk.bf16.mxu0 %vm2941_vm7, %v2884_v47  ;;  %v8040_v20 = vld [vmem:[%s15048_s23 + $0x138] sm:$0xf] }
  0xd2   :  { %v2421_v29 = vrot.slane %v2420_v13, 4  ;;  %v2435_v33 = vrot.slane %v2433_v23, 5  ;;  %v2440_v34 = vrot.slane %v2438_v60, 4  ;;  %v2447_v37 = vshll.u32 %v8038_v17, 16  ;;  %v2766_v41 = vpop.permute.xlu0 %2765  ;;  %336 = vst.msk [vmem:[#allocation2 + $0xc8] sm:$0xff] %vm310_vm4, %v8725_v9  ;;  %v2885_v60 = vld [vmem:[#allocation2 + $0x38] sm:$0xff] }
  0xd3   :  { %v1017_v35 = vsel %vm9706_vm2, %v1012_v30, %v1016_v10  ;;  %v2443_v36 = vrot.slane %v2441_v2, 5  ;;  %v2451_v39 = vshrl.u32 %v8038_v17, 16  ;;  %v2430_v42 = vor.u32 %v2429_v31, %v2425_v38  ;;  %v1679_v46 = vpop.permute.xlu1 %1678  ;;  %2854 = vst.msk [vmem:[#allocation2 + $0x40] sm:$0xff] %vm2845_vm6, %v2766_v41  ;;  %v8041_v23 = vld [vmem:[%s15048_s23 + $0x13c] sm:$0xf] }
  0xd4   :  { %v7863_v43 = vcombine.low %v1007_v26, %v1017_v35  ;;  %v2426_v61 = vsel %vm9706_vm2, %v2421_v29, %v2425_v38  ;;  %v2457_v45 = vshll.u32 %v8039_v22, 16  ;;  %v2449_v8 = vrot.slane %v2447_v37, 5  ;;  %1766 = vst.msk [vmem:[#allocation2 + $0x48] sm:$0xff] %vm1756_vm5, %v1679_v46  ;;  %v8044_v40 = vld [vmem:[%s15048_s23 + $0x148] sm:$0xf]  ;;  %v8698_v47 = vld [vmem:[%s15048_s23 + $0x138] sm:$0xff]  }
  0xd5   :  { %1704 = vrot.lane.b32.xlu0 %v8694_v27, %s9585_s19  ;;  %v2444_v49 = vor.u32 %v2443_v36, %v2440_v34  ;;  %v2453_v57 = vrot.slane %v2451_v39, 4  ;;  %v1019_v51 = vshrl.u32 %v415_v24, 16  ;;  %v2431_v53 = vrot.slane %v2430_v42, 4  ;;  %v8042_v27 = vld [vmem:[%s15048_s23 + $0x140] sm:$0x1] }
  0xd6   :  { %1352 = vrot.lane.b32.xlu1 %v7863_v43, %s9586_s21  ;;  %v2459_v54 = vrot.slane %v2457_v45, 5  ;;  %v1022_v55 = vshll.u32 %v415_v24, 16  ;;  %v1028_v56 = vshll.u32 %v416_v28, 16  ;;  %v1032_v63 = vshrl.u32 %v416_v28, 16  ;;  %v422_v9 = vld [vmem:[%s15048_s23 + $0x148] sm:$0xf] }
  0xd7   :  { %v2445_v58 = vrot.slane %v2444_v49, 4  ;;  %v2454_v59 = vor.u32 %v2453_v57, %v2449_v8  ;;  %v1021_v62 = vrot.slane %v1019_v51, 4  ;;  %v2436_v1 = vsel %vm9706_vm2, %v2431_v53, %v2435_v33  ;;  %v2768_v7 = vpop.permute.xlu1 %2767  ;;  %v8043_v33 = vld [vmem:[%s15048_s23 + $0x144] sm:$0xf] }
  0xd8   :  { %v1024_v3 = vrot.slane %v1022_v55, 5  ;;  %v1030_v4 = vrot.slane %v1028_v56, 5  ;;  %v1038_v5 = vshll.u32 %v417_v50, 16  ;;  %v8086_v11 = vcombine.low %v2426_v61, %v2436_v1  ;;  %2855 = vst.msk [vmem:[#allocation2 + $0x48] sm:$0xff] %vm2845_vm6, %v2768_v7  ;;  %8482 = vmatmul.mubr.msk.bf16.gmra.mrb[12].mxu0 %vm2941_vm7, %v2885_v60 }
  0xd9   :  { %v2450_v14 = vsel %vm9706_vm2, %v2445_v58, %v2449_v8  ;;  %v2455_v10 = vrot.slane %v2454_v59, 4  ;;  %v1034_v15 = vrot.slane %v1032_v63, 4  ;;  %v1043_v19 = vshrl.u32 %v418_v0, 16  ;;  %v8045_v8 = vld [vmem:[%s15048_s23 + $0x14c] sm:$0x1] }
  0xda   :  { %1706 = vrot.lane.b32.xlu1 %v8695_v52, %s9585_s19  ;;  %v1025_v17 = vor.u32 %v1024_v3, %v1021_v62  ;;  %v1040_v18 = vrot.slane %v1038_v5, 5  ;;  %v1046_v44 = vshll.u32 %v418_v0, 16  ;;  %2793 = vrot.lane.b32.xlu0 %v8086_v11, %s9587_s22  ;;  %v1052_v13 = vshll.u32 %v419_v6, 16  ;;  %v2886_v38 = vld [vmem:[#allocation2 + $0x40] sm:$0xff] }
  0xdb   :  { %v2460_v22 = vsel %vm9706_vm2, %v2455_v10, %v2459_v54  ;;  %v1035_v12 = vor.u32 %v1034_v15, %v1030_v4  ;;  %v1056_v32 = vshrl.u32 %v419_v6, 16  ;;  %v1045_v26 = vrot.slane %v1043_v19, 4  ;;  %v1327_v34 = vpop.permute.xlu0 %1326  ;;  %8485 = vmatprep.mubr.msk.bf16.mxu0 %vm2941_vm7, %v2886_v38  ;;  %v421_v3 = vld [vmem:[%s15048_s23 + $0x144] sm:$0xf] }
  0xdc   :  { %v8087_v24 = vcombine.low %v2450_v14, %v2460_v22  ;;  %v1026_v25 = vrot.slane %v1025_v17, 4  ;;  %v1048_v30 = vrot.slane %v1046_v44, 5  ;;  %v1054_v28 = vrot.slane %v1052_v13, 5  ;;  %1413 = vst.msk [vmem:[#allocation2 + $0x50] sm:$0xff] %vm1402_vm3, %v1327_v34  ;;  %v8699_v10 = vld [vmem:[%s15048_s23 + $0x144] sm:$0xff]  }
  0xdd   :  { %v1036_v2 = vrot.slane %v1035_v12, 4  ;;  %v1058_v29 = vrot.slane %v1056_v32, 4  ;;  %v1062_v31 = vshll.u32 %v420_v16, 16  ;;  %v2462_v37 = vshrl.u32 %v8040_v20, 16  ;;  %v8726_v44 = vld [vmem:[%s15048_s23 + $0x144] sm:$0xff]  }
  0xde   :  { %2795 = vrot.lane.b32.xlu1 %v8087_v24, %s9587_s22  ;;  %v1031_v35 = vsel %vm9706_vm2, %v1026_v25, %v1030_v4  ;;  %v1049_v36 = vor.u32 %v1048_v30, %v1045_v26  ;;  %v2465_v39 = vshll.u32 %v8040_v20, 16  ;;  %v2471_v42 = vshll.u32 %v8041_v23, 16  ;;  %v423_v12 = vld [vmem:[%s15048_s23 + $0x14c] sm:$0x1]  ;;  %v425_v30 = vld [vmem:[%s15048_s23 + $0x154] sm:$0xf] }
  0xdf   :  { %v1041_v41 = vsel %vm9706_vm2, %v1036_v2, %v1040_v18  ;;  %v1059_v43 = vor.u32 %v1058_v29, %v1054_v28  ;;  %v1064_v61 = vrot.slane %v1062_v31, 5  ;;  %v2464_v48 = vrot.slane %v2462_v37, 4  ;;  %v1329_v57 = vpop.permute.xlu1 %1328  ;;  %v1681_v54 = vpop.permute.xlu0 %1680  ;;  %v2887_v14 = vld [vmem:[#allocation2 + $0x48] sm:$0xff]  ;;  %337 = vst.msk [vmem:[#allocation2 + $0xd0] sm:$0xff] %vm310_vm4, %v8726_v44  ;;  %v426_v29 = vld [vmem:[%s15048_s23 + $0x158] sm:$0x1] }
  0xe0   :  { %v7864_v45 = vcombine.low %v1031_v35, %v1041_v41  ;;  %v1050_v46 = vrot.slane %v1049_v36, 4  ;;  %v2467_v49 = vrot.slane %v2465_v39, 5  ;;  %v2473_v51 = vrot.slane %v2471_v42, 5  ;;  %1414 = vst.msk [vmem:[#allocation2 + $0x58] sm:$0xff] %vm1402_vm3, %v1329_v57  ;;  %8486 = vmatmul.mubr.msk.bf16.gmra.mrb[16].mxu0 %vm2941_vm7, %v2887_v14 }
  0xe1   :  { %v1060_v50 = vrot.slane %v1059_v43, 4  ;;  %v2475_v52 = vshrl.u32 %v8041_v23, 16  ;;  %v2481_v53 = vshll.u32 %v8042_v27, 16  ;;  %v2486_v58 = vshrl.u32 %v8043_v33, 16  ;;  %1767 = vst.msk [vmem:[#allocation2 + $0x50] sm:$0xff] %vm1756_vm5, %v1681_v54 }
  0xe2   :  { %1354 = vrot.lane.b32.xlu0 %v7864_v45, %s9586_s21  ;;  %v1055_v55 = vsel %vm9706_vm2, %v1050_v46, %v1054_v28  ;;  %v2468_v56 = vor.u32 %v2467_v49, %v2464_v48  ;;  %v2489_v59 = vshll.u32 %v8043_v33, 16  ;;  %v2495_v1 = vshll.u32 %v8044_v40, 16  ;;  %v424_v23 = vld [vmem:[%s15048_s23 + $0x150] sm:$0xf]  ;;  %v8047_v48 = vld [vmem:[%s15048_s23 + $0x154] sm:$0xf] }
  0xe3   :  { %v1065_v62 = vsel %vm9706_vm2, %v1060_v50, %v1064_v61  ;;  %v2477_v63 = vrot.slane %v2475_v52, 4  ;;  %v2483_v0 = vrot.slane %v2481_v53, 5  ;;  %v2488_v6 = vrot.slane %v2486_v58, 4  ;;  %v1683_v11 = vpop.permute.xlu1 %1682  ;;  %v8046_v43 = vld [vmem:[%s15048_s23 + $0x150] sm:$0xf] }
  0xe4   :  { %v7865_v4 = vcombine.low %v1055_v55, %v1065_v62  ;;  %v2469_v5 = vrot.slane %v2468_v56, 4  ;;  %v2491_v7 = vrot.slane %v2489_v59, 5  ;;  %v2497_v16 = vrot.slane %v2495_v1, 5  ;;  %1768 = vst.msk [vmem:[#allocation2 + $0x58] sm:$0xff] %vm1756_vm5, %v1683_v11  ;;  %v2770_v19 = vpop.permute.xlu0 %2769  ;;  %v8727_v61 = vld [vmem:[%s15048_s23 + $0x150] sm:$0xff]  }
  0xe5   :  { %v2478_v15 = vor.u32 %v2477_v63, %v2473_v51  ;;  %v2499_v17 = vshrl.u32 %v8044_v40, 16  ;;  %v2505_v18 = vshll.u32 %v8045_v8, 16  ;;  %v1067_v13 = vshrl.u32 %v421_v3, 16  ;;  %2856 = vst.msk [vmem:[#allocation2 + $0x50] sm:$0xff] %vm2845_vm6, %v2770_v19  ;;  %v8048_v55 = vld [vmem:[%s15048_s23 + $0x158] sm:$0x1] }
  0xe6   :  { %1356 = vrot.lane.b32.xlu1 %v7865_v4, %s9586_s21  ;;  %1708 = vrot.lane.b32.xlu0 %v8698_v47, %s9585_s19  ;;  %v2474_v20 = vsel %vm9706_vm2, %v2469_v5, %v2473_v51  ;;  %v2492_v22 = vor.u32 %v2491_v7, %v2488_v6  ;;  %v1070_v32 = vshll.u32 %v421_v3, 16  ;;  %v1076_v26 = vshll.u32 %v422_v9, 16  ;;  %338 = vst.msk [vmem:[#allocation2 + $0xd8] sm:$0xff] %vm310_vm4, %v8727_v61  ;;  %v8049_v1 = vld [vmem:[%s15048_s23 + $0x15c] sm:$0xf] }
  0xe7   :  { %v2479_v60 = vrot.slane %v2478_v15, 4  ;;  %v2501_v24 = vrot.slane %v2499_v17, 4  ;;  %v2507_v25 = vrot.slane %v2505_v18, 5  ;;  %v1069_v38 = vrot.slane %v1067_v13, 4  ;;  %v2772_v31 = vpop.permute.xlu1 %2771  ;;  %v8050_v7 = vld [vmem:[%s15048_s23 + $0x160] sm:$0xf] }
  0xe8   :  { %v2493_v27 = vrot.slane %v2492_v22, 4  ;;  %v1072_v2 = vrot.slane %v1070_v32, 5  ;;  %v1080_v28 = vshrl.u32 %v422_v9, 16  ;;  %v1078_v35 = vrot.slane %v1076_v26, 5  ;;  %2857 = vst.msk [vmem:[#allocation2 + $0x58] sm:$0xff] %vm2845_vm6, %v2772_v31  ;;  %v8702_v26 = vld [vmem:[%s15048_s23 + $0x150] sm:$0xff]  }
  0xe9   :  { %v2484_v33 = vsel %vm9706_vm2, %v2479_v60, %v2483_v0  ;;  %v2502_v34 = vor.u32 %v2501_v24, %v2497_v16  ;;  %v1086_v36 = vshll.u32 %v423_v12, 16  ;;  %v1091_v46 = vshrl.u32 %v424_v23, 16  ;;  %v8051_v32 = vld [vmem:[%s15048_s23 + $0x164] sm:$0x1] }
  0xea   :  { %1710 = vrot.lane.b32.xlu1 %v8699_v10, %s9585_s19  ;;  %v8088_v37 = vcombine.low %v2474_v20, %v2484_v33  ;;  %v2498_v39 = vsel %vm9706_vm2, %v2493_v27, %v2497_v16  ;;  %v1073_v40 = vor.u32 %v1072_v2, %v1069_v38  ;;  %v1082_v41 = vrot.slane %v1080_v28, 4  ;;  %v428_v38 = vld [vmem:[%s15048_s23 + $0x160] sm:$0xf] }
  0xeb   :  { %v2503_v42 = vrot.slane %v2502_v34, 4  ;;  %v1088_v45 = vrot.slane %v1086_v36, 5  ;;  %v1094_v47 = vshll.u32 %v424_v23, 16  ;;  %v1100_v57 = vshll.u32 %v425_v30, 16  ;;  %v427_v23 = vld [vmem:[%s15048_s23 + $0x15c] sm:$0xf] }
  0xec   :  { %2797 = vrot.lane.b32.xlu0 %v8088_v37, %s9587_s22  ;;  %v1074_v49 = vrot.slane %v1073_v40, 4  ;;  %v1083_v8 = vor.u32 %v1082_v41, %v1078_v35  ;;  %v1104_v50 = vshrl.u32 %v425_v30, 16  ;;  %v1093_v52 = vrot.slane %v1091_v46, 4  ;;  %v1331_v56 = vpop.permute.xlu0 %1330  ;;  %v2888_v58 = vld [vmem:[#allocation2 + $0x50] sm:$0xff]  ;;  %v8703_v40 = vld [vmem:[%s15048_s23 + $0x15c] sm:$0xff]  }
  0xed   :  { %v2508_v51 = vsel %vm9706_vm2, %v2503_v42, %v2507_v25  ;;  %v1096_v53 = vrot.slane %v1094_v47, 5  ;;  %v1110_v54 = vshll.u32 %v426_v29, 16  ;;  %v1102_v0 = vrot.slane %v1100_v57, 5  ;;  %1415 = vst.msk [vmem:[#allocation2 + $0x60] sm:$0xff] %vm1402_vm3, %v1331_v56  ;;  %8489 = vmatprep.mubr.msk.bf16.mxu0 %vm2941_vm7, %v2888_v58  ;;  %v429_v42 = vld [vmem:[%s15048_s23 + $0x164] sm:$0x1] }
  0xee   :  { %v8089_v59 = vcombine.low %v2498_v39, %v2508_v51  ;;  %v1079_v62 = vsel %vm9706_vm2, %v1074_v49, %v1078_v35  ;;  %v1084_v63 = vrot.slane %v1083_v8, 4  ;;  %v1106_v4 = vrot.slane %v1104_v50, 4  ;;  %v431_v57 = vld [vmem:[%s15048_s23 + $0x16c] sm:$0xf]  ;;  %v8728_v50 = vld [vmem:[%s15048_s23 + $0x15c] sm:$0xff]  }
  0xef   :  { %v1097_v3 = vor.u32 %v1096_v53, %v1093_v52  ;;  %v1112_v5 = vrot.slane %v1110_v54, 5  ;;  %v2510_v6 = vshrl.u32 %v8046_v43, 16  ;;  %v2513_v11 = vshll.u32 %v8046_v43, 16  ;;  %v2889_v15 = vld [vmem:[#allocation2 + $0x58] sm:$0xff]  ;;  %339 = vst.msk [vmem:[#allocation2 + $0xe0] sm:$0xff] %vm310_vm4, %v8728_v50 }
  0xf0   :  { %2799 = vrot.lane.b32.xlu1 %v8089_v59, %s9587_s22  ;;  %v1089_v9 = vsel %vm9706_vm2, %v1084_v63, %v1088_v45  ;;  %v2519_v14 = vshll.u32 %v8047_v48, 16  ;;  %v2523_v10 = vshrl.u32 %v8047_v48, 16  ;;  %v1107_v18 = vor.u32 %v1106_v4, %v1102_v0  ;;  %v1685_v44 = vpop.permute.xlu0 %1684  ;;  %8490 = vmatmul.mubr.msk.bf16.gmra.mrb[20].mxu0 %vm2941_vm7, %v2889_v15  ;;  %v430_v45 = vld [vmem:[%s15048_s23 + $0x168] sm:$0xf] }
  0xf1   :  { %v7866_v16 = vcombine.low %v1079_v62, %v1089_v9  ;;  %v1098_v17 = vrot.slane %v1097_v3, 4  ;;  %v2512_v19 = vrot.slane %v2510_v6, 4  ;;  %v2515_v20 = vrot.slane %v2513_v11, 5  ;;  %v1333_v60 = vpop.permute.xlu1 %1332  ;;  %1769 = vst.msk [vmem:[#allocation2 + $0x60] sm:$0xff] %vm1756_vm5, %v1685_v44  ;;  %v432_v3 = vld [vmem:[%s15048_s23 + $0x170] sm:$0x1] }
  0xf2   :  { %v2521_v22 = vrot.slane %v2519_v14, 5  ;;  %v2525_v12 = vrot.slane %v2523_v10, 4  ;;  %v2529_v13 = vshll.u32 %v8048_v55, 16  ;;  %v1108_v25 = vrot.slane %v1107_v18, 4  ;;  %1416 = vst.msk [vmem:[#allocation2 + $0x68] sm:$0xff] %vm1402_vm3, %v1333_v60  ;;  %v8729_v14 = vld [vmem:[%s15048_s23 + $0x168] sm:$0xff]  }
  0xf3   :  { %1358 = vrot.lane.b32.xlu0 %v7866_v16, %s9586_s21  ;;  %v1103_v24 = vsel %vm9706_vm2, %v1098_v17, %v1102_v0  ;;  %v2534_v30 = vshrl.u32 %v8049_v1, 16  ;;  %v2537_v27 = vshll.u32 %v8049_v1, 16  ;;  %v2516_v2 = vor.u32 %v2515_v20, %v2512_v19  ;;  %v8052_v4 = vld [vmem:[%s15048_s23 + $0x168] sm:$0xf]  ;;  %v8053_v18 = vld [vmem:[%s15048_s23 + $0x16c] sm:$0xf] }
  0xf4   :  { %v2526_v28 = vor.u32 %v2525_v12, %v2521_v22  ;;  %v2531_v29 = vrot.slane %v2529_v13, 5  ;;  %v2543_v31 = vshll.u32 %v8050_v7, 16  ;;  %v1113_v33 = vsel %vm9706_vm2, %v1108_v25, %v1112_v5  ;;  %v2774_v37 = vpop.permute.xlu0 %2773  ;;  %340 = vst.msk [vmem:[#allocation2 + $0xe8] sm:$0xff] %vm310_vm4, %v8729_v14 }
  0xf5   :  { %v2536_v34 = vrot.slane %v2534_v30, 4  ;;  %v2539_v35 = vrot.slane %v2537_v27, 5  ;;  %v2547_v36 = vshrl.u32 %v8050_v7, 16  ;;  %v7867_v39 = vcombine.low %v1103_v24, %v1113_v33  ;;  %v1687_v46 = vpop.permute.xlu1 %1686  ;;  %2858 = vst.msk [vmem:[#allocation2 + $0x60] sm:$0xff] %vm2845_vm6, %v2774_v37  ;;  %v8054_v24 = vld [vmem:[%s15048_s23 + $0x170] sm:$0x1] }
  0xf6   :  { %v2517_v41 = vrot.slane %v2516_v2, 4  ;;  %v2527_v43 = vrot.slane %v2526_v28, 4  ;;  %v2545_v61 = vrot.slane %v2543_v31, 5  ;;  %v2553_v49 = vshll.u32 %v8051_v32, 16  ;;  %1770 = vst.msk [vmem:[#allocation2 + $0x68] sm:$0xff] %vm1756_vm5, %v1687_v46 }
  0xf7   :  { %1712 = vrot.lane.b32.xlu0 %v8702_v26, %s9585_s19  ;;  %v2540_v47 = vor.u32 %v2539_v35, %v2536_v34  ;;  %v2549_v48 = vrot.slane %v2547_v36, 4  ;;  %v1115_v8 = vshrl.u32 %v427_v23, 16  ;;  %1360 = vrot.lane.b32.xlu1 %v7867_v39, %s9586_s21  ;;  %v1118_v53 = vshll.u32 %v427_v23, 16  ;;  %v8056_v34 = vld [vmem:[%s15048_s23 + $0x178] sm:$0xf] }
  0xf8   :  { %v2522_v51 = vsel %vm9706_vm2, %v2517_v41, %v2521_v22  ;;  %v2532_v52 = vsel %vm9706_vm2, %v2527_v43, %v2531_v29  ;;  %v1124_v54 = vshll.u32 %v428_v38, 16  ;;  %v2555_v59 = vrot.slane %v2553_v49, 5 }
  0xf9   :  { %v8090_v55 = vcombine.low %v2522_v51, %v2532_v52  ;;  %v2541_v56 = vrot.slane %v2540_v47, 4  ;;  %v2550_v58 = vor.u32 %v2549_v48, %v2545_v61  ;;  %v1117_v62 = vrot.slane %v1115_v8, 4  ;;  %v2776_v5 = vpop.permute.xlu1 %2775 }
  0xfa   :  { %v1120_v63 = vrot.slane %v1118_v53, 5  ;;  %v1126_v0 = vrot.slane %v1124_v54, 5  ;;  %v1128_v1 = vshrl.u32 %v428_v38, 16  ;;  %v1134_v9 = vshll.u32 %v429_v42, 16  ;;  %2859 = vst.msk [vmem:[#allocation2 + $0x68] sm:$0xff] %vm2845_vm6, %v2776_v5 }
  0xfb   :  { %2801 = vrot.lane.b32.xlu0 %v8090_v55, %s9587_s22  ;;  %v2546_v6 = vsel %vm9706_vm2, %v2541_v56, %v2545_v61  ;;  %v2551_v7 = vrot.slane %v2550_v58, 4  ;;  %v1139_v11 = vshrl.u32 %v430_v45, 16  ;;  %1714 = vrot.lane.b32.xlu1 %v8703_v40, %s9585_s19  ;;  %v1142_v16 = vshll.u32 %v430_v45, 16  ;;  %v8055_v38 = vld [vmem:[%s15048_s23 + $0x174] sm:$0xf]  ;;  %v8706_v56 = vld [vmem:[%s15048_s23 + $0x168] sm:$0xff]  }
  0xfc   :  { %v1121_v10 = vor.u32 %v1120_v63, %v1117_v62  ;;  %v1130_v15 = vrot.slane %v1128_v1, 4  ;;  %v1148_v17 = vshll.u32 %v431_v57, 16  ;;  %v1136_v44 = vrot.slane %v1134_v9, 5  ;;  %v2890_v12 = vld [vmem:[#allocation2 + $0x60] sm:$0xff]  ;;  %v8057_v42 = vld [vmem:[%s15048_s23 + $0x17c] sm:$0x1] }
  0xfd   :  { %v2556_v19 = vsel %vm9706_vm2, %v2551_v7, %v2555_v59  ;;  %v1141_v20 = vrot.slane %v1139_v11, 4  ;;  %v1152_v22 = vshrl.u32 %v431_v57, 16  ;;  %v1144_v60 = vrot.slane %v1142_v16, 5  ;;  %8493 = vmatprep.mubr.msk.bf16.mxu0 %vm2941_vm7, %v2890_v12  ;;  %v1335_v2 = vpop.permute.xlu0 %1334  ;;  %v433_v57 = vld [vmem:[%s15048_s23 + $0x174] sm:$0xf] }
  0xfe   :  { %v8091_v13 = vcombine.low %v2546_v6, %v2556_v19  ;;  %v1122_v32 = vrot.slane %v1121_v10, 4  ;;  %v1131_v23 = vor.u32 %v1130_v15, %v1126_v0  ;;  %v1150_v25 = vrot.slane %v1148_v17, 5  ;;  %1417 = vst.msk [vmem:[#allocation2 + $0x70] sm:$0xff] %vm1402_vm3, %v1335_v2 }
  0xff   :  { %v1154_v26 = vrot.slane %v1152_v22, 4  ;;  %v1158_v30 = vshll.u32 %v432_v3, 16  ;;  %v2558_v27 = vshrl.u32 %v8052_v4, 16  ;;  %v1145_v31 = vor.u32 %v1144_v60, %v1141_v20 }
 0x100   :  { %2803 = vrot.lane.b32.xlu1 %v8091_v13, %s9587_s22  ;;  %v1127_v28 = vsel %vm9706_vm2, %v1122_v32, %v1126_v0  ;;  %v1132_v29 = vrot.slane %v1131_v23, 4  ;;  %v2561_v33 = vshll.u32 %v8052_v4, 16  ;;  %v2567_v39 = vshll.u32 %v8053_v18, 16  ;;  %v434_v4 = vld [vmem:[%s15048_s23 + $0x178] sm:$0xf] }
 0x101   :  { %v1155_v35 = vor.u32 %v1154_v26, %v1150_v25  ;;  %v1160_v36 = vrot.slane %v1158_v30, 5  ;;  %v2560_v37 = vrot.slane %v2558_v27, 4  ;;  %v1146_v41 = vrot.slane %v1145_v31, 4  ;;  %v1337_v45 = vpop.permute.xlu1 %1336  ;;  %v2891_v46 = vld [vmem:[#allocation2 + $0x68] sm:$0xff]  ;;  %v1689_v50 = vpop.permute.xlu0 %1688 }
 0x102   :  { %v1137_v40 = vsel %vm9706_vm2, %v1132_v29, %v1136_v44  ;;  %v2563_v43 = vrot.slane %v2561_v33, 5  ;;  %v2571_v61 = vshrl.u32 %v8053_v18, 16  ;;  %v2569_v49 = vrot.slane %v2567_v39, 5  ;;  %1418 = vst.msk [vmem:[#allocation2 + $0x78] sm:$0xff] %vm1402_vm3, %v1337_v45  ;;  %8494 = vmatmul.mubr.msk.bf16.gmra.mrb[24].mxu0 %vm2941_vm7, %v2891_v46 }
 0x103   :  { %v7868_v47 = vcombine.low %v1127_v28, %v1137_v40  ;;  %v1156_v48 = vrot.slane %v1155_v35, 4  ;;  %v2577_v8 = vshll.u32 %v8054_v24, 16  ;;  %v1151_v51 = vsel %vm9706_vm2, %v1146_v41, %v1150_v25  ;;  %1771 = vst.msk [vmem:[#allocation2 + $0x70] sm:$0xff] %vm1756_vm5, %v1689_v50 }
 0x104   :  { %v2564_v52 = vor.u32 %v2563_v43, %v2560_v37  ;;  %v2573_v53 = vrot.slane %v2571_v61, 4  ;;  %v2582_v54 = vshrl.u32 %v8055_v38, 16  ;;  %v2585_v59 = vshll.u32 %v8055_v38, 16 }
 0x105   :  { %1362 = vrot.lane.b32.xlu0 %v7868_v47, %s9586_s21  ;;  %v1161_v55 = vsel %vm9706_vm2, %v1156_v48, %v1160_v36  ;;  %v2579_v58 = vrot.slane %v2577_v8, 5  ;;  %v2591_v62 = vshll.u32 %v8056_v34, 16  ;;  %v1691_v5 = vpop.permute.xlu1 %1690 }
 0x106   :  { %v7869_v63 = vcombine.low %v1151_v51, %v1161_v55  ;;  %v2565_v0 = vrot.slane %v2564_v52, 4  ;;  %v2574_v1 = vor.u32 %v2573_v53, %v2569_v49  ;;  %v2584_v3 = vrot.slane %v2582_v54, 4 }
 0x107   :  { %22 = vsyncpa [#allocation5], 0  ;;  %v2587_v6 = vrot.slane %v2585_v59, 5  ;;  %v2593_v7 = vrot.slane %v2591_v62, 5  ;;  %v2595_v9 = vshrl.u32 %v8056_v34, 16  ;;  %v2601_v11 = vshll.u32 %v8057_v42, 16  ;;  %v2778_v14 = vpop.permute.xlu0 %2777 }
 0x108   :  { %1772 = vst.msk [vmem:[#allocation2 + $0x78] sm:$0xff] %vm1756_vm5, %v1691_v5  ;;  %v8730_v10 = vld [vmem:[%s15048_s23 + $0x174] sm:$0xff]   ;;  %1364 = vrot.lane.b32.xlu1 %v7869_v63, %s9586_s21  ;;  %v2570_v16 = vsel %vm9706_vm2, %v2565_v0, %v2569_v49  ;;  %v2575_v17 = vrot.slane %v2574_v1, 4  ;;  %v435_v18 = vld [vmem:[%s15048_s23 + $0x17c] sm:$0x1]  ;;  %v1163_v19 = vshrl.u32 %v433_v57, 16 }
 0x109   :  { %v8707_v15 = vld [vmem:[%s15048_s23 + $0x174] sm:$0xff]   ;;  %v1166_v44 = vshll.u32 %v433_v57, 16  ;;  %2860 = vst.msk [vmem:[#allocation2 + $0x70] sm:$0xff] %vm2845_vm6, %v2778_v14  ;;  %1716 = vrot.lane.b32.xlu0 %v8706_v56, %s9585_s19  ;;  %v2588_v20 = vor.u32 %v2587_v6, %v2584_v3  ;;  %v2597_v22 = vrot.slane %v2595_v9, 4  ;;  %v2603_v12 = vrot.slane %v2601_v11, 5  ;;  %v2780_v30 = vpop.permute.xlu1 %2779  ;;  %v8731_v27 = vld [vmem:[%s15048_s23 + $0x180] sm:$0xff]  }
 0x10a   :  { %v1172_v13 = vshll.u32 %v434_v4, 16  ;;  %v436_v32 = vld [vmem:[%s15048_s23 + $0x180] sm:$0xf]  ;;  %341 = vst.msk [vmem:[#allocation2 + $0xf0] sm:$0xff] %vm310_vm4, %v8730_v10  ;;  %v2580_v23 = vsel %vm9706_vm2, %v2575_v17, %v2579_v58  ;;  %v1165_v60 = vrot.slane %v1163_v19, 4  ;;  %v1176_v25 = vshrl.u32 %v434_v4, 16 }
 0x10b   :  { %v1168_v24 = vrot.slane %v1166_v44, 5  ;;  %v437_v26 = vld [vmem:[%s15048_s23 + $0x184] sm:$0xf]  ;;  %v8092_v38 = vcombine.low %v2570_v16, %v2580_v23  ;;  %v2589_v2 = vrot.slane %v2588_v20, 4  ;;  %v2598_v28 = vor.u32 %v2597_v22, %v2593_v7  ;;  %2861 = vst.msk [vmem:[#allocation2 + $0x78] sm:$0xff] %vm2845_vm6, %v2780_v30 }
 0x10c   :  { %v1174_v29 = vrot.slane %v1172_v13, 5  ;;  %1718 = vrot.lane.b32.xlu1 %v8707_v15, %s9585_s19  ;;  %v1178_v33 = vrot.slane %v1176_v25, 4  ;;  %v1182_v34 = vshll.u32 %v435_v18, 16  ;;  %v1187_v35 = vshrl.u32 %v436_v32, 16  ;;  %342 = vst.msk [vmem:[#allocation2 + $0xf8] sm:$0xff] %vm310_vm4, %v8731_v27 }
 0x10d   :  { %v1169_v31 = vor.u32 %v1168_v24, %v1165_v60  ;;  %2805 = vrot.lane.b32.xlu0 %v8092_v38, %s9587_s22  ;;  %v2594_v36 = vsel %vm9706_vm2, %v2589_v2, %v2593_v7  ;;  %v2599_v37 = vrot.slane %v2598_v28, 4  ;;  %v438_v39 = vld [vmem:[%s15048_s23 + $0x188] sm:$0x1]  ;;  %v1190_v40 = vshll.u32 %v436_v32, 16  ;;  %v8058_v46 = vld [vmem:[%s15048_s23 + $0x180] sm:$0xf] }
 0x10e   :  { %v1196_v41 = vshll.u32 %v437_v26, 16  ;;  %v1179_v61 = vor.u32 %v1178_v33, %v1174_v29  ;;  %v1184_v42 = vrot.slane %v1182_v34, 5  ;;  %v1189_v45 = vrot.slane %v1187_v35, 4  ;;  %v8059_v57 = vld [vmem:[%s15048_s23 + $0x184] sm:$0xf]  ;;  %v1339_v50 = vpop.permute.xlu0 %1338 }
 0x10f   :  { %v1170_v43 = vrot.slane %v1169_v31, 4  ;;  %v2604_v47 = vsel %vm9706_vm2, %v2599_v37, %v2603_v12  ;;  %v1192_v48 = vrot.slane %v1190_v40, 5  ;;  %v1200_v8 = vshrl.u32 %v437_v26, 16  ;;  %1419 = vst.msk [vmem:[#allocation2 + $0x80] sm:$0xff] %vm1402_vm3, %v1339_v50  ;;  %v8060_v59 = vld [vmem:[%s15048_s23 + $0x188] sm:$0x1] }
 0x110   :  { %v1198_v49 = vrot.slane %v1196_v41, 5  ;;  %v2892_v51 = vld [vmem:[#allocation2 + $0x70] sm:$0xff]  ;;  %v8093_v52 = vcombine.low %v2594_v36, %v2604_v47  ;;  %v1180_v54 = vrot.slane %v1179_v61, 4  ;;  %v1206_v55 = vshll.u32 %v438_v39, 16  ;;  %v8061_v5 = vld [vmem:[%s15048_s23 + $0x18c] sm:$0xf] }
 0x111   :  { %v1175_v53 = vsel %vm9706_vm2, %v1170_v43, %v1174_v29  ;;  %8497 = vmatprep.mubr.msk.bf16.mxu0 %vm2941_vm7, %v2892_v51  ;;  %v1193_v56 = vor.u32 %v1192_v48, %v1189_v45  ;;  %v1202_v58 = vrot.slane %v1200_v8, 4  ;;  %v2606_v62 = vshrl.u32 %v8058_v46, 16  ;;  %v8062_v10 = vld [vmem:[%s15048_s23 + $0x190] sm:$0xf]  ;;  %v8710_v12 = vld [vmem:[%s15048_s23 + $0x180] sm:$0xff]  }
 0x112   :  { %v2609_v63 = vshll.u32 %v8058_v46, 16  ;;  %2807 = vrot.lane.b32.xlu1 %v8093_v52, %s9587_s22  ;;  %v1185_v0 = vsel %vm9706_vm2, %v1180_v54, %v1184_v42  ;;  %v1208_v1 = vrot.slane %v1206_v55, 5  ;;  %v2615_v3 = vshll.u32 %v8059_v57, 16  ;;  %v2893_v6 = vld [vmem:[#allocation2 + $0x78] sm:$0xff]  ;;  %v1693_v15 = vpop.permute.xlu0 %1692  ;;  %v8063_v25 = vld [vmem:[%s15048_s23 + $0x194] sm:$0x1] }
 0x113   :  { %v2619_v4 = vshrl.u32 %v8059_v57, 16  ;;  %v7870_v7 = vcombine.low %v1175_v53, %v1185_v0  ;;  %v1194_v9 = vrot.slane %v1193_v56, 4  ;;  %v1203_v11 = vor.u32 %v1202_v58, %v1198_v49  ;;  %8498 = vmatmul.mubr.msk.bf16.gmra.mrb[28].mxu0 %vm2941_vm7, %v2893_v6  ;;  %v1341_v44 = vpop.permute.xlu1 %1340  ;;  %1773 = vst.msk [vmem:[#allocation2 + $0x80] sm:$0xff] %vm1756_vm5, %v1693_v15  ;;  %v8711_v40 = vld [vmem:[%s15048_s23 + $0x18c] sm:$0xff]  }
 0x114   :  { %v2608_v14 = vrot.slane %v2606_v62, 4  ;;  %v2611_v16 = vrot.slane %v2609_v63, 5  ;;  %v2617_v17 = vrot.slane %v2615_v3, 5  ;;  %v2625_v19 = vshll.u32 %v8060_v59, 16  ;;  %1420 = vst.msk [vmem:[#allocation2 + $0x88] sm:$0xff] %vm1402_vm3, %v1341_v44 }
 0x115   :  { %v2621_v18 = vrot.slane %v2619_v4, 4  ;;  %1366 = vrot.lane.b32.xlu0 %v7870_v7, %s9586_s21  ;;  %v1199_v20 = vsel %vm9706_vm2, %v1194_v9, %v1198_v49  ;;  %v1204_v22 = vrot.slane %v1203_v11, 4  ;;  %v2630_v13 = vshrl.u32 %v8061_v5, 16 }
 0x116   :  { %v2633_v32 = vshll.u32 %v8061_v5, 16  ;;  %v2612_v23 = vor.u32 %v2611_v16, %v2608_v14  ;;  %v2627_v24 = vrot.slane %v2625_v19, 5  ;;  %v2639_v26 = vshll.u32 %v8062_v10, 16  ;;  %v2782_v28 = vpop.permute.xlu0 %2781 }
 0x117   :  { %v2622_v60 = vor.u32 %v2621_v18, %v2617_v17  ;;  %v1209_v30 = vsel %vm9706_vm2, %v1204_v22, %v1208_v1  ;;  %v2632_v27 = vrot.slane %v2630_v13, 4  ;;  %v2643_v2 = vshrl.u32 %v8062_v10, 16  ;;  %v1695_v35 = vpop.permute.xlu1 %1694  ;;  %2862 = vst.msk [vmem:[#allocation2 + $0x80] sm:$0xff] %vm2845_vm6, %v2782_v28 }
 0x118   :  { %v2635_v38 = vrot.slane %v2633_v32, 5  ;;  %v7871_v29 = vcombine.low %v1199_v20, %v1209_v30  ;;  %v2613_v31 = vrot.slane %v2612_v23, 4  ;;  %v2641_v34 = vrot.slane %v2639_v26, 5  ;;  %1774 = vst.msk [vmem:[#allocation2 + $0x88] sm:$0xff] %vm1756_vm5, %v1695_v35 }
 0x119   :  { %v2623_v33 = vrot.slane %v2622_v60, 4  ;;  %1720 = vrot.lane.b32.xlu0 %v8710_v12, %s9585_s19  ;;  %v2645_v37 = vrot.slane %v2643_v2, 4  ;;  %v2649_v39 = vshll.u32 %v8063_v25, 16  ;;  %vm3775_vm8 = vcmask 261120  }
 0x11a   :  { %v2636_v36 = vor.u32 %v2635_v38, %v2632_v27  ;;  %1368 = vrot.lane.b32.xlu1 %v7871_v29, %s9586_s21  ;;  %v2618_v41 = vsel %vm9706_vm2, %v2613_v31, %v2617_v17  ;;  %vm3790_vm9 = vcmask 253952   ;;  %v14942_v1 = vmov 0.0  }
 0x11b   :  { %v2628_v43 = vsel %vm9706_vm2, %v2623_v33, %v2627_v24  ;;  %v2646_v45 = vor.u32 %v2645_v37, %v2641_v34  ;;  %v2651_v46 = vrot.slane %v2649_v39, 5  ;;  %v2784_v47 = vpop.permute.xlu1 %2783  ;;  %3793 = vst.msk [vmem:[#allocation3 + $0x30] sm:$0x1] %vm3790_vm9, %v14942_v1  ;;  %3792 = vst.msk [vmem:[#allocation3 + $0x18] sm:$0x1] %vm3790_vm9, %v14942_v1  ;;  %vm3778_vm10 = vcmask 254976  }
 0x11c   :  { %v8094_v61 = vcombine.low %v2618_v41, %v2628_v43  ;;  %v2637_v42 = vrot.slane %v2636_v36, 4  ;;  %2863 = vst.msk [vmem:[#allocation2 + $0x88] sm:$0xff] %vm2845_vm6, %v2784_v47  ;;  %vm9590_vm11 = vmmov 0   ;;  %vm6366_vm12 = vcmask 1040384  }
 0x11d   :  { %v2647_v49 = vrot.slane %v2646_v45, 4  ;;  %3776 = vst.msk [vmem:[#allocation3] sm:$0xff] %vm3775_vm8, %v14942_v1  ;;  %3777 = vst.msk [vmem:[#allocation3 + $0x8] sm:$0xff] %vm3775_vm8, %v14942_v1  ;;  %vm6468_vm13 = vcmask 64512   ;;  %vm7533_vm14 = vcmask 523264   ;;  %vm7762_vm15 = vcmask 50176  }
 0x11e   :  { %2809 = vrot.lane.b32.xlu0 %v8094_v61, %s9587_s22  ;;  %v2642_v48 = vsel %vm9706_vm2, %v2637_v42, %v2641_v34  ;;  %1722 = vrot.lane.b32.xlu1 %v8711_v40, %s9585_s19  ;;  %v2894_v57 = vld [vmem:[#allocation2 + $0x80] sm:$0xff]  ;;  %3780 = vst.msk [vmem:[#allocation3 + $0x1b0] sm:$0xff] %vm3775_vm8, %v14942_v1  ;;  %3781 = vst.msk [vmem:[#allocation3 + $0x1b8] sm:$0xff] %vm3775_vm8, %v14942_v1 }
 0x11f   :  { %v2652_v8 = vsel %vm9706_vm2, %v2647_v49, %v2651_v46  ;;  %8501 = vmatprep.mubr.msk.bf16.mxu0 %vm2941_vm7, %v2894_v57  ;;  %3784 = vst.msk [vmem:[#allocation3 + $0x198] sm:$0xff] %vm3775_vm8, %v14942_v1  ;;  %3785 = vst.msk [vmem:[#allocation3 + $0x1a0] sm:$0xff] %vm3775_vm8, %v14942_v1  ;;  %v11192_v46 = vld [vmem:[%s14927_s3] ss:$0 sm:$0xff] }
 0x120   :  { %v8095_v50 = vcombine.low %v2642_v48, %v2652_v8  ;;  %3787 = vst.msk [vmem:[#allocation3 + $0x348] sm:$0xff] %vm3775_vm8, %v14942_v1  ;;  %3788 = vst.msk [vmem:[#allocation3 + $0x350] sm:$0xff] %vm3775_vm8, %v14942_v1 }
 0x121   :  { %v1343_v51 = vpop.permute.xlu0 %1342  ;;  %3794 = vst.msk [vmem:[#allocation3 + $0x48] sm:$0x1] %vm3790_vm9, %v14942_v1  ;;  %3795 = vst.msk [vmem:[#allocation3 + $0x60] sm:$0x1] %vm3790_vm9, %v14942_v1 }
 0x122   :  { %2811 = vrot.lane.b32.xlu1 %v8095_v50, %s9587_s22  ;;  %1421 = vst.msk [vmem:[#allocation2 + $0x90] sm:$0xff] %vm1402_vm3, %v1343_v51 }
 0x123   :  { %v2895_v53 = vld [vmem:[#allocation2 + $0x88] sm:$0xff]  ;;  %3796 = vst.msk [vmem:[#allocation3 + $0x78] sm:$0x1] %vm3790_vm9, %v14942_v1  ;;  %3797 = vst.msk [vmem:[#allocation3 + $0x90] sm:$0x1] %vm3790_vm9, %v14942_v1 }
 0x124   :  { %8502 = vmatmul.mubr.msk.bf16.gmra.mrb[32].mxu0 %vm2941_vm7, %v2895_v53  ;;  %3798 = vst.msk [vmem:[#allocation3 + $0xa8] sm:$0x1] %vm3790_vm9, %v14942_v1  ;;  %3799 = vst.msk [vmem:[#allocation3 + $0xc0] sm:$0x1] %vm3790_vm9, %v14942_v1 }
 0x125   :  { %v1697_v54 = vpop.permute.xlu0 %1696  ;;  %3800 = vst.msk [vmem:[#allocation3 + $0xd8] sm:$0x1] %vm3790_vm9, %v14942_v1  ;;  %3801 = vst.msk [vmem:[#allocation3 + $0xf0] sm:$0x1] %vm3790_vm9, %v14942_v1 }
 0x126   :  { %1775 = vst.msk [vmem:[#allocation2 + $0x90] sm:$0xff] %vm1756_vm5, %v1697_v54 }
 0x127   :  { %v1345_v52 = vpop.permute.xlu1 %1344  ;;  %3802 = vst.msk [vmem:[#allocation3 + $0x108] sm:$0x1] %vm3790_vm9, %v14942_v1  ;;  %3803 = vst.msk [vmem:[#allocation3 + $0x120] sm:$0x1] %vm3790_vm9, %v14942_v1 }
 0x128   :  { %1422 = vst.msk [vmem:[#allocation2 + $0x98] sm:$0xff] %vm1402_vm3, %v1345_v52 }
 0x129   :  { %3804 = vst.msk [vmem:[#allocation3 + $0x138] sm:$0x1] %vm3790_vm9, %v14942_v1  ;;  %3805 = vst.msk [vmem:[#allocation3 + $0x150] sm:$0x1] %vm3790_vm9, %v14942_v1 }
 0x12a   :  { %3806 = vst.msk [vmem:[#allocation3 + $0x168] sm:$0x1] %vm3790_vm9, %v14942_v1  ;;  %3807 = vst.msk [vmem:[#allocation3 + $0x180] sm:$0x1] %vm3790_vm9, %v14942_v1 }
 0x12b   :  { %v1699_v21 = vpop.permute.xlu1 %1698  ;;  %3810 = vst.msk [vmem:[#allocation3 + $0x1c8] sm:$0x1] %vm3790_vm9, %v14942_v1  ;;  %3811 = vst.msk [vmem:[#allocation3 + $0x1e0] sm:$0x1] %vm3790_vm9, %v14942_v1 }
 0x12c   :  { %1776 = vst.msk [vmem:[#allocation2 + $0x98] sm:$0xff] %vm1756_vm5, %v1699_v21  ;;  %v2786_v55 = vpop.permute.xlu0 %2785 }
 0x12d   :  { %2864 = vst.msk [vmem:[#allocation2 + $0x90] sm:$0xff] %vm2845_vm6, %v2786_v55 }
 0x12e   :  { %3812 = vst.msk [vmem:[#allocation3 + $0x1f8] sm:$0x1] %vm3790_vm9, %v14942_v1  ;;  %3813 = vst.msk [vmem:[#allocation3 + $0x210] sm:$0x1] %vm3790_vm9, %v14942_v1 }
 0x12f   :  { %v2788_v56 = vpop.permute.xlu1 %2787  ;;  %3814 = vst.msk [vmem:[#allocation3 + $0x228] sm:$0x1] %vm3790_vm9, %v14942_v1  ;;  %3815 = vst.msk [vmem:[#allocation3 + $0x240] sm:$0x1] %vm3790_vm9, %v14942_v1 }
 0x130   :  { %2865 = vst.msk [vmem:[#allocation2 + $0x98] sm:$0xff] %vm2845_vm6, %v2788_v56 }
 0x131   :  { %3816 = vst.msk [vmem:[#allocation3 + $0x258] sm:$0x1] %vm3790_vm9, %v14942_v1  ;;  %3817 = vst.msk [vmem:[#allocation3 + $0x270] sm:$0x1] %vm3790_vm9, %v14942_v1 }
 0x132   :  { %3818 = vst.msk [vmem:[#allocation3 + $0x288] sm:$0x1] %vm3790_vm9, %v14942_v1  ;;  %3819 = vst.msk [vmem:[#allocation3 + $0x2a0] sm:$0x1] %vm3790_vm9, %v14942_v1 }
 0x133   :  { %v1347_v59 = vpop.permute.xlu0 %1346  ;;  %3820 = vst.msk [vmem:[#allocation3 + $0x2b8] sm:$0x1] %vm3790_vm9, %v14942_v1  ;;  %3821 = vst.msk [vmem:[#allocation3 + $0x2d0] sm:$0x1] %vm3790_vm9, %v14942_v1 }
 0x134   :  { %v2896_v58 = vld [vmem:[#allocation2 + $0x90] sm:$0xff]  ;;  %1423 = vst.msk [vmem:[#allocation2 + $0xa0] sm:$0xff] %vm1402_vm3, %v1347_v59 }
 0x135   :  { %8505 = vmatprep.mubr.msk.bf16.mxu0 %vm2941_vm7, %v2896_v58  ;;  %3822 = vst.msk [vmem:[#allocation3 + $0x2e8] sm:$0x1] %vm3790_vm9, %v14942_v1  ;;  %3823 = vst.msk [vmem:[#allocation3 + $0x300] sm:$0x1] %vm3790_vm9, %v14942_v1 }
 0x136   :  { %3824 = vst.msk [vmem:[#allocation3 + $0x318] sm:$0x1] %vm3790_vm9, %v14942_v1  ;;  %3825 = vst.msk [vmem:[#allocation3 + $0x330] sm:$0x1] %vm3790_vm9, %v14942_v1 }
 0x137   :  { %v1349_v62 = vpop.permute.xlu1 %1348  ;;  %v2897_v63 = vld [vmem:[#allocation2 + $0x98] sm:$0xff]  ;;  %v10977_v0 = vpop.permute.xlu0 %1700  ;;  %3828 = vst.msk [vmem:[#allocation3 + $0x29] sm:$0x1] %vm3790_vm9, %v14942_v1  ;;  %3829 = vst.msk [vmem:[#allocation3 + $0x41] sm:$0x1] %vm3790_vm9, %v14942_v1 }
 0x138   :  { %1424 = vst.msk [vmem:[#allocation2 + $0xa8] sm:$0xff] %vm1402_vm3, %v1349_v62  ;;  %8506 = vmatmul.mubr.msk.bf16.gmra.mrb[36].mxu0 %vm2941_vm7, %v2897_v63 }
 0x139   :  { %3830 = vst.msk [vmem:[#allocation3 + $0x59] sm:$0x1] %vm3790_vm9, %v14942_v1  ;;  %3831 = vst.msk [vmem:[#allocation3 + $0x71] sm:$0x1] %vm3790_vm9, %v14942_v1 }
 0x13a   :  { %3832 = vst.msk [vmem:[#allocation3 + $0x89] sm:$0x1] %vm3790_vm9, %v14942_v1  ;;  %3833 = vst.msk [vmem:[#allocation3 + $0xa1] sm:$0x1] %vm3790_vm9, %v14942_v1 }
 0x13b   :  { %3834 = vst.msk [vmem:[#allocation3 + $0xb9] sm:$0x1] %vm3790_vm9, %v14942_v1  ;;  %3835 = vst.msk [vmem:[#allocation3 + $0xd1] sm:$0x1] %vm3790_vm9, %v14942_v1  ;;  %v1703_v3 = vpop.permute.xlu1 %1702  ;;  %v2790_v4 = vpop.permute.xlu0 %2789 }
 0x13c   :  { %3836 = vst.msk [vmem:[#allocation3 + $0xe9] sm:$0x1] %vm3790_vm9, %v14942_v1  ;;  %3837 = vst.msk [vmem:[#allocation3 + $0x101] sm:$0x1] %vm3790_vm9, %v14942_v1 }
 0x13d   :  { %3838 = vst.msk [vmem:[#allocation3 + $0x119] sm:$0x1] %vm3790_vm9, %v14942_v1  ;;  %3839 = vst.msk [vmem:[#allocation3 + $0x131] sm:$0x1] %vm3790_vm9, %v14942_v1 }
 0x13e   :  { %3840 = vst.msk [vmem:[#allocation3 + $0x149] sm:$0x1] %vm3790_vm9, %v14942_v1  ;;  %3841 = vst.msk [vmem:[#allocation3 + $0x161] sm:$0x1] %vm3790_vm9, %v14942_v1 }
 0x13f   :  { %3842 = vst.msk [vmem:[#allocation3 + $0x179] sm:$0x1] %vm3790_vm9, %v14942_v1  ;;  %3843 = vst.msk [vmem:[#allocation3 + $0x191] sm:$0x1] %vm3790_vm9, %v14942_v1  ;;  %v2792_v5 = vpop.permute.xlu1 %2791 }
 0x140   :  { %3846 = vst.msk [vmem:[#allocation3 + $0x1d9] sm:$0x1] %vm3790_vm9, %v14942_v1  ;;  %3847 = vst.msk [vmem:[#allocation3 + $0x1f1] sm:$0x1] %vm3790_vm9, %v14942_v1 }
 0x141   :  { %3848 = vst.msk [vmem:[#allocation3 + $0x209] sm:$0x1] %vm3790_vm9, %v14942_v1  ;;  %3849 = vst.msk [vmem:[#allocation3 + $0x221] sm:$0x1] %vm3790_vm9, %v14942_v1 }
 0x142   :  { %3850 = vst.msk [vmem:[#allocation3 + $0x239] sm:$0x1] %vm3790_vm9, %v14942_v1  ;;  %3851 = vst.msk [vmem:[#allocation3 + $0x251] sm:$0x1] %vm3790_vm9, %v14942_v1 }
 0x143   :  { %3852 = vst.msk [vmem:[#allocation3 + $0x269] sm:$0x1] %vm3790_vm9, %v14942_v1  ;;  %3853 = vst.msk [vmem:[#allocation3 + $0x281] sm:$0x1] %vm3790_vm9, %v14942_v1  ;;  %v1351_v6 = vpop.permute.xlu0 %1350 }
 0x144   :  { %3854 = vst.msk [vmem:[#allocation3 + $0x299] sm:$0x1] %vm3790_vm9, %v14942_v1  ;;  %3855 = vst.msk [vmem:[#allocation3 + $0x2b1] sm:$0x1] %vm3790_vm9, %v14942_v1 }
 0x145   :  { %3856 = vst.msk [vmem:[#allocation3 + $0x2c9] sm:$0x1] %vm3790_vm9, %v14942_v1  ;;  %3857 = vst.msk [vmem:[#allocation3 + $0x2e1] sm:$0x1] %vm3790_vm9, %v14942_v1 }
 0x146   :  { %3858 = vst.msk [vmem:[#allocation3 + $0x2f9] sm:$0x1] %vm3790_vm9, %v14942_v1  ;;  %3859 = vst.msk [vmem:[#allocation3 + $0x311] sm:$0x1] %vm3790_vm9, %v14942_v1 }
 0x147   :  { %3860 = vst.msk [vmem:[#allocation3 + $0x329] sm:$0x1] %vm3790_vm9, %v14942_v1  ;;  %3861 = vst.msk [vmem:[#allocation3 + $0x341] sm:$0x1] %vm3790_vm9, %v14942_v1  ;;  %v1705_v11 = vpop.permute.xlu0 %1704 }
 0x148   :  { %1777 = vst.msk [vmem:[#allocation2 + $0xa0] sm:$0xff] %vm1756_vm5, %v10977_v0  ;;  %1778 = vst.msk [vmem:[#allocation2 + $0xa8] sm:$0xff] %vm1756_vm5, %v1703_v3  ;;  %v1353_v14 = vpop.permute.xlu1 %1352 }
 0x149   :  { %3791 = vst.msk [vmem:[#allocation3] sm:$0x1] %vm3790_vm9, %v14942_v1  ;;  %3808 = vst.msk [vmem:[#allocation3 + $0x198] sm:$0x1] %vm3790_vm9, %v14942_v1 }
 0x14a   :  { %3809 = vst.msk [vmem:[#allocation3 + $0x1b0] sm:$0x1] %vm3790_vm9, %v14942_v1  ;;  %3826 = vst.msk [vmem:[#allocation3 + $0x348] sm:$0x1] %vm3790_vm9, %v14942_v1 }
 0x14b   :  { %2866 = vst.msk [vmem:[#allocation2 + $0xa0] sm:$0xff] %vm2845_vm6, %v2790_v4  ;;  %2867 = vst.msk [vmem:[#allocation2 + $0xa8] sm:$0xff] %vm2845_vm6, %v2792_v5 }
 0x14c   :  { %1425 = vst.msk [vmem:[#allocation2 + $0xb0] sm:$0xff] %vm1402_vm3, %v1351_v6  ;;  %1426 = vst.msk [vmem:[#allocation2 + $0xb8] sm:$0xff] %vm1402_vm3, %v1353_v14  ;;  %v1707_v10 = vpop.permute.xlu1 %1706  ;;  %v2794_v15 = vpop.permute.xlu0 %2793 }
 0x14d   :  { %1779 = vst.msk [vmem:[#allocation2 + $0xb0] sm:$0xff] %vm1756_vm5, %v1705_v11  ;;  %1780 = vst.msk [vmem:[#allocation2 + $0xb8] sm:$0xff] %vm1756_vm5, %v1707_v10 }
 0x14e   :  { %3779 = vst.msk [vmem:[#allocation3 + $0x10] sm:$0x3] %vm3778_vm10, %v14942_v1  ;;  %3782 = vst.msk [vmem:[#allocation3 + $0x1c0] sm:$0x3] %vm3778_vm10, %v14942_v1 }
 0x14f   :  { %3786 = vst.msk [vmem:[#allocation3 + $0x1a8] sm:$0x3] %vm3778_vm10, %v14942_v1  ;;  %3789 = vst.msk [vmem:[#allocation3 + $0x358] sm:$0x3] %vm3778_vm10, %v14942_v1 }
 0x150   :  { %3827 = vst.msk [vmem:[#allocation3 + $0x11] sm:$0x1] %vm3790_vm9, %v14942_v1  ;;  %3844 = vst.msk [vmem:[#allocation3 + $0x1a9] sm:$0x1] %vm3790_vm9, %v14942_v1  ;;  %v2796_v16 = vpop.permute.xlu1 %2795 }
 0x151   :  { %3845 = vst.msk [vmem:[#allocation3 + $0x1c1] sm:$0x1] %vm3790_vm9, %v14942_v1  ;;  %3862 = vst.msk [vmem:[#allocation3 + $0x359] sm:$0x1] %vm3790_vm9, %v14942_v1 }
 0x152   :  { %v2898_v7 = vld [vmem:[#allocation2 + $0xa0] sm:$0xff]  ;;  %v2899_v9 = vld [vmem:[#allocation2 + $0xa8] sm:$0xff]  ;;  %2868 = vst.msk [vmem:[#allocation2 + $0xb0] sm:$0xff] %vm2845_vm6, %v2794_v15  ;;  %2869 = vst.msk [vmem:[#allocation2 + $0xb8] sm:$0xff] %vm2845_vm6, %v2796_v16 }
 0x153   :  { %8509 = vmatprep.mubr.msk.bf16.mxu0 %vm2941_vm7, %v2898_v7 }
 0x154   :  { %8510 = vmatmul.mubr.msk.bf16.gmra.mrb[40].mxu0 %vm2941_vm7, %v2899_v9  ;;  %v1355_v17 = vpop.permute.xlu0 %1354 }
 0x155   :  { %1427 = vst.msk [vmem:[#allocation2 + $0xc0] sm:$0xff] %vm1402_vm3, %v1355_v17 }
 0x158   :  { %v1357_v19 = vpop.permute.xlu1 %1356  ;;  %v1709_v44 = vpop.permute.xlu0 %1708 }
 0x159   :  { %v2900_v18 = vld [vmem:[#allocation2 + $0xb0] sm:$0xff]  ;;  %v2901_v20 = vld [vmem:[#allocation2 + $0xb8] sm:$0xff]  ;;  %1428 = vst.msk [vmem:[#allocation2 + $0xc8] sm:$0xff] %vm1402_vm3, %v1357_v19 }
 0x15a   :  { %8513 = vmatprep.mubr.msk.bf16.mxu0 %vm2941_vm7, %v2900_v18  ;;  %1781 = vst.msk [vmem:[#allocation2 + $0xc0] sm:$0xff] %vm1756_vm5, %v1709_v44 }
 0x15c   :  { %8514 = vmatmul.mubr.msk.bf16.gmra.mrb[44].mxu0 %vm2941_vm7, %v2901_v20  ;;  %v1711_v22 = vpop.permute.xlu1 %1710 }
 0x15d   :  { %1782 = vst.msk [vmem:[#allocation2 + $0xc8] sm:$0xff] %vm1756_vm5, %v1711_v22 }
 0x15e   :  { %v2798_v12 = vpop.permute.xlu0 %2797 }
 0x15f   :  { %2870 = vst.msk [vmem:[#allocation2 + $0xc0] sm:$0xff] %vm2845_vm6, %v2798_v12 }
 0x162   :  { %v2800_v13 = vpop.permute.xlu1 %2799 }
 0x163   :  { %2871 = vst.msk [vmem:[#allocation2 + $0xc8] sm:$0xff] %vm2845_vm6, %v2800_v13 }
 0x165   :  { %v1359_v32 = vpop.permute.xlu0 %1358 }
 0x166   :  { %1429 = vst.msk [vmem:[#allocation2 + $0xd0] sm:$0xff] %vm1402_vm3, %v1359_v32  ;;  %v2902_v23 = vld [vmem:[#allocation2 + $0xc0] sm:$0xff] }
 0x167   :  { %8517 = vmatprep.mubr.msk.bf16.mxu0 %vm2941_vm7, %v2902_v23 }
 0x169   :  { %v1713_v60 = vpop.permute.xlu0 %1712  ;;  %v1361_v24 = vpop.permute.xlu1 %1360 }
 0x16a   :  { %1783 = vst.msk [vmem:[#allocation2 + $0xd0] sm:$0xff] %vm1756_vm5, %v1713_v60  ;;  %v2903_v25 = vld [vmem:[#allocation2 + $0xc8] sm:$0xff] }
 0x16b   :  { %1430 = vst.msk [vmem:[#allocation2 + $0xd8] sm:$0xff] %vm1402_vm3, %v1361_v24  ;;  %8518 = vmatmul.mubr.msk.bf16.gmra.mrb[48].mxu0 %vm2941_vm7, %v2903_v25 }
 0x16d   :  { %v2802_v26 = vpop.permute.xlu0 %2801  ;;  %v1715_v30 = vpop.permute.xlu1 %1714 }
 0x16e   :  { %2872 = vst.msk [vmem:[#allocation2 + $0xd0] sm:$0xff] %vm2845_vm6, %v2802_v26 }
 0x16f   :  { %1784 = vst.msk [vmem:[#allocation2 + $0xd8] sm:$0xff] %vm1756_vm5, %v1715_v30 }
 0x172   :  { %v2804_v27 = vpop.permute.xlu1 %2803 }
 0x173   :  { %2873 = vst.msk [vmem:[#allocation2 + $0xd8] sm:$0xff] %vm2845_vm6, %v2804_v27 }
 0x175   :  { %v2904_v38 = vld [vmem:[#allocation2 + $0xd0] sm:$0xff] }
 0x176   :  { %8521 = vmatprep.mubr.msk.bf16.mxu0 %vm2941_vm7, %v2904_v38 }
 0x177   :  { %v1363_v2 = vpop.permute.xlu0 %1362 }
 0x178   :  { %1431 = vst.msk [vmem:[#allocation2 + $0xe0] sm:$0xff] %vm1402_vm3, %v1363_v2 }
 0x17a   :  { %v1365_v28 = vpop.permute.xlu1 %1364  ;;  %v2905_v29 = vld [vmem:[#allocation2 + $0xd8] sm:$0xff] }
 0x17b   :  { %1432 = vst.msk [vmem:[#allocation2 + $0xe8] sm:$0xff] %vm1402_vm3, %v1365_v28  ;;  %v1717_v31 = vpop.permute.xlu0 %1716  ;;  %8522 = vmatmul.mubr.msk.bf16.gmra.mrb[52].mxu0 %vm2941_vm7, %v2905_v29 }
 0x17c   :  { %1785 = vst.msk [vmem:[#allocation2 + $0xe0] sm:$0xff] %vm1756_vm5, %v1717_v31 }
 0x17e   :  { %v1719_v33 = vpop.permute.xlu1 %1718 }
 0x17f   :  { %1786 = vst.msk [vmem:[#allocation2 + $0xe8] sm:$0xff] %vm1756_vm5, %v1719_v33  ;;  %v2806_v34 = vpop.permute.xlu0 %2805 }
 0x180   :  { %2874 = vst.msk [vmem:[#allocation2 + $0xe0] sm:$0xff] %vm2845_vm6, %v2806_v34 }
 0x184   :  { %v2808_v35 = vpop.permute.xlu1 %2807 }
 0x185   :  { %2875 = vst.msk [vmem:[#allocation2 + $0xe8] sm:$0xff] %vm2845_vm6, %v2808_v35 }
 0x187   :  { %v1367_v36 = vpop.permute.xlu0 %1366  ;;  %v2906_v37 = vld [vmem:[#allocation2 + $0xe0] sm:$0xff] }
 0x188   :  { %1433 = vst.msk [vmem:[#allocation2 + $0xf0] sm:$0xff] %vm1402_vm3, %v1367_v36  ;;  %8525 = vmatprep.mubr.msk.bf16.mxu0 %vm2941_vm7, %v2906_v37 }
 0x18b   :  { %v1721_v39 = vpop.permute.xlu0 %1720 }
 0x18c   :  { %v1369_v40 = vpop.permute.xlu1 %1368  ;;  %1787 = vst.msk [vmem:[#allocation2 + $0xf0] sm:$0xff] %vm1756_vm5, %v1721_v39  ;;  %v2907_v41 = vld [vmem:[#allocation2 + $0xe8] sm:$0xff] }
 0x18d   :  { %1434 = vst.msk [vmem:[#allocation2 + $0xf8] sm:$0xff] %vm1402_vm3, %v1369_v40  ;;  %8526 = vmatmul.mubr.msk.bf16.gmra.mrb[56].mxu0 %vm2941_vm7, %v2907_v41 }
 0x190   :  { %v2810_v43 = vpop.permute.xlu0 %2809  ;;  %v1723_v61 = vpop.permute.xlu1 %1722 }
 0x191   :  { %2876 = vst.msk [vmem:[#allocation2 + $0xf0] sm:$0xff] %vm2845_vm6, %v2810_v43 }
 0x192   :  { %1788 = vst.msk [vmem:[#allocation2 + $0xf8] sm:$0xff] %vm1756_vm5, %v1723_v61 }
 0x193   :  { %v8471_v47 = vpop.f32.mrb[0].mxu0 }
 0x194   :  { %v2812_v42 = vpop.permute.xlu1 %2811  ;;  %v11196_v48 = vadd.f32 %v8471_v47, %v11192_v46  ;;  %v3072_v49 = vpop.f32.mrb[1].mxu0 }
 0x195   :  { %2877 = vst.msk [vmem:[#allocation2 + $0xf8] sm:$0xff] %vm2845_vm6, %v2812_v42  ;;  %v11199_v8 = vadd.f32 %v11192_v46, %v3072_v49  ;;  %v8472_v57 = vpop.f32.mrb[2].mxu0 }
 0x196   :  { %v8134_v51 = vmul.f32 -1.442695, %v11196_v48  ;;  %v11203_v52 = vadd.f32 %v8472_v57, %v11192_v46  ;;  %v3075_v53 = vpop.f32.mrb[3].mxu0 }
 0x197   :  { %v8132_v54 = vmul.f32 -1.442695, %v11199_v8  ;;  %v11208_v21 = vadd.f32 %v11192_v46, %v3075_v53  ;;  %v3928_v53 = vld [vmem:[#allocation3] sm:$0xff] }
 0x198   :  { %v2908_v45 = vld [vmem:[#allocation2 + $0xf0] sm:$0xff]  ;;  %8734 = vpow2.f32 %v8134_v51  ;;  %v8135_v55 = vmul.f32 -1.442695, %v11203_v52 }
 0x199   :  { %8529 = vmatprep.mubr.msk.bf16.mxu0 %vm2941_vm7, %v2908_v45  ;;  %8736 = vpow2.f32 %v8132_v54  ;;  %v8133_v56 = vmul.f32 -1.442695, %v11208_v21  ;;  %v4061_v54 = vld [vmem:[#allocation3 + $0x1] sm:$0xff] }
 0x19a   :  { %8738 = vpow2.f32 %v8135_v55 }
 0x19b   :  { %8740 = vpow2.f32 %v8133_v56  ;;  %v8475_v58 = vpop.f32.mrb[4].mxu0 }
 0x19c   :  { %v2909_v50 = vld [vmem:[#allocation2 + $0xf8] sm:$0xff]  ;;  %v11213_v59 = vadd.f32 %v8475_v58, %v11192_v46  ;;  %v3088_v62 = vpop.f32.mrb[5].mxu0 }
 0x19d   :  { %8530 = vmatmul.mubr.msk.bf16.gmra.mrb[60].mxu0 %vm2941_vm7, %v2909_v50  ;;  %v11216_v63 = vadd.f32 %v11192_v46, %v3088_v62  ;;  %v8476_v0 = vpop.f32.mrb[6].mxu0 }
 0x19e   :  { %v8138_v3 = vmul.f32 -1.442695, %v11213_v59  ;;  %v11220_v4 = vadd.f32 %v8476_v0, %v11192_v46  ;;  %v3091_v5 = vpop.f32.mrb[7].mxu0 }
 0x19f   :  { %v8136_v6 = vmul.f32 -1.442695, %v11216_v63  ;;  %v11225_v9 = vadd.f32 %v11192_v46, %v3091_v5 }
 0x1a0   :  { %8742 = vpow2.f32 %v8138_v3  ;;  %v8139_v7 = vmul.f32 -1.442695, %v11220_v4 }
 0x1a1   :  { %8744 = vpow2.f32 %v8136_v6  ;;  %v8137_v22 = vmul.f32 -1.442695, %v11225_v9 }
 0x1a2   :  { %v8735_v11 = vpop.eup %8734  ;;  %8746 = vpow2.f32 %v8139_v7 }
 0x1a3   :  { %v8737_v14 = vpop.eup %8736  ;;  %v3521_v10 = vadd.f32 1.0, %v8735_v11  ;;  %v8479_v15 = vpop.f32.mrb[8].mxu0 }
 0x1a4   :  { %v8739_v16 = vpop.eup %8738  ;;  %v3519_v17 = vadd.f32 1.0, %v8737_v14  ;;  %v11228_v18 = vadd.f32 %v8479_v15, %v11192_v46  ;;  %v3104_v19 = vpop.f32.mrb[9].mxu0  ;;  %v11285_v15 = vld [vmem:[%s14928_s4 + $0x2] ss:$0 sm:$0xff] }
 0x1a5   :  { %v8741_v44 = vpop.eup %8740  ;;  %8748 = vrcp.f32 %v3521_v10  ;;  %v3522_v20 = vadd.f32 1.0, %v8739_v16  ;;  %v11232_v12 = vadd.f32 %v11192_v46, %v3104_v19  ;;  %v8480_v13 = vpop.f32.mrb[10].mxu0  ;;  %v4258_v10 = vld [vmem:[#allocation3 + $0x2] sm:$0xff] }
 0x1a6   :  { %8750 = vrcp.f32 %v3519_v17  ;;  %v3520_v32 = vadd.f32 1.0, %v8741_v44  ;;  %v8142_v23 = vmul.f32 -1.442695, %v11228_v18  ;;  %v11236_v60 = vadd.f32 %v8480_v13, %v11192_v46  ;;  %v3107_v24 = vpop.f32.mrb[11].mxu0  ;;  %v3929_v17 = vld [vmem:[#allocation3 + $0x8] sm:$0xff] }
 0x1a7   :  { %8752 = vrcp.f32 %v3522_v20  ;;  %v8140_v25 = vmul.f32 -1.442695, %v11232_v12  ;;  %v11240_v26 = vadd.f32 %v11192_v46, %v3107_v24 }
 0x1a8   :  { %8754 = vrcp.f32 %v3520_v32  ;;  %v8143_v30 = vmul.f32 -1.442695, %v11236_v60 }
 0x1a9   :  { %8756 = vpow2.f32 %v8137_v22  ;;  %v8141_v28 = vmul.f32 -1.442695, %v11240_v26  ;;  %v11293_v22 = vld [vmem:[%s14928_s4 + $0x3] ss:$0 sm:$0xff] }
 0x1aa   :  { %v8743_v27 = vpop.eup %8742  ;;  %8758 = vpow2.f32 %v8142_v23 }
 0x1ab   :  { %v8745_v38 = vpop.eup %8744  ;;  %v3525_v2 = vadd.f32 1.0, %v8743_v27  ;;  %8760 = vpow2.f32 %v8140_v25  ;;  %v11244_v29 = vpop.f32.mrb[12].mxu0  ;;  %v4259_v25 = vld [vmem:[#allocation3 + $0xa] sm:$0xff] }
 0x1ac   :  { %v3523_v31 = vadd.f32 1.0, %v8745_v38  ;;  %8762 = vpow2.f32 %v8143_v30  ;;  %v11246_v33 = vpop.f32.mrb[13].mxu0  ;;  %v8747_v35 = vpop.eup %8746 }
 0x1ad   :  { %8764 = vrcp.f32 %v3525_v2  ;;  %v11248_v34 = vpop.f32.mrb[14].mxu0  ;;  %v3526_v56 = vadd.f32 1.0, %v8747_v35  ;;  %v4328_v35 = vmul.f32 %v11285_v15, %v4259_v25 }
 0x1ae   :  { %8766 = vrcp.f32 %v3523_v31  ;;  %v11250_v36 = vpop.f32.mrb[15].mxu0 }
 0x1af   :  { %v8749_v37 = vpop.eup %8748  ;;  %8768 = vpow2.f32 %v8141_v28 }
 0x1b0   :  { %v8751_v39 = vpop.eup %8750  ;;  %v3713_v40 = vmul.f32 %v8749_v37, %v11196_v48  ;;  %v11264_v48 = vld [vmem:[%s14928_s4] ss:$0 sm:$0xff]  ;;  %8770 = vrcp.f32 %v3526_v56  ;;  %v11327_v56 = vld [vmem:[%s14928_s4 + $0x5] ss:$0 sm:$0xff] }
 0x1b1   :  { %v8753_v41 = vpop.eup %8752  ;;  %v3711_v43 = vmul.f32 %v8751_v39, %v11199_v8  ;;  %v3997_v6 = vmul.f32 %v11264_v48, %v3928_v53  ;;  %v3998_v32 = vmul.f32 %v11264_v48, %v3929_v17  ;;  %v11310_v39 = vld [vmem:[%s14928_s4 + $0x4] ss:$0 sm:$0xff] }
 0x1b2   :  { %v8755_v61 = vpop.eup %8754  ;;  %3866 = vst.msk [vmem:[#allocation3 + $0x31] sm:$0xff] %vm3775_vm8, %v3713_v40  ;;  %v3714_v42 = vmul.f32 %v8753_v41, %v11203_v52  ;;  %v11272_v52 = vld [vmem:[%s14928_s4 + $0x1] ss:$0 sm:$0xff]  ;;  %15051 = vst [vmem:[#allocation7_spill] sm:$0xff] %v11310_v39 }
 0x1b3   :  { %v8757_v45 = vpop.eup %8756  ;;  %3864 = vst.msk [vmem:[#allocation3 + $0x19] sm:$0xff] %vm3775_vm8, %v3711_v43  ;;  %v3712_v47 = vmul.f32 %v8755_v61, %v11208_v21  ;;  %v11259_v57 = vpop.f32.mrb[16].mxu0  ;;  %v4130_v7 = vmul.f32 %v11272_v52, %v4061_v54 }
 0x1b4   :  { %v8759_v49 = vpop.eup %8758  ;;  %3867 = vst.msk [vmem:[#allocation3 + $0x39] sm:$0xff] %vm3775_vm8, %v3714_v42  ;;  %v11267_v8 = vpop.f32.mrb[17].mxu0  ;;  %v3524_v3 = vadd.f32 1.0, %v8757_v45 }
 0x1b5   :  { %v8761_v50 = vpop.eup %8760  ;;  %3865 = vst.msk [vmem:[#allocation3 + $0x21] sm:$0xff] %vm3775_vm8, %v3712_v47  ;;  %v11274_v21 = vpop.f32.mrb[18].mxu0  ;;  %v3529_v14 = vadd.f32 1.0, %v8759_v49  ;;  %v4194_v20 = vadd.f32 %v4130_v7, %v3997_v6  ;;  %v11315_v47 = vadd.f32 %v11244_v29, %v11192_v46 }
 0x1b6   :  { %v8763_v51 = vpop.eup %8762  ;;  %v11276_v58 = vpop.f32.mrb[19].mxu0  ;;  %v3527_v16 = vadd.f32 1.0, %v8761_v50  ;;  %8772 = vrcp.f32 %v3524_v3 }
 0x1b7   :  { %v8765_v55 = vpop.eup %8764  ;;  %v3530_v19 = vadd.f32 1.0, %v8763_v51  ;;  %8774 = vrcp.f32 %v3529_v14  ;;  %v11320_v51 = vadd.f32 %v11192_v46, %v11246_v33  ;;  %v8146_v33 = vmul.f32 -1.442695, %v11315_v47 }
 0x1b8   :  { %v8767_v62 = vpop.eup %8766  ;;  %v3717_v0 = vmul.f32 %v8765_v55, %v11213_v59  ;;  %v4062_v59 = vld [vmem:[#allocation3 + $0x9] sm:$0xff]  ;;  %8776 = vrcp.f32 %v3527_v16 }
 0x1b9   :  { %v8769_v5 = vpop.eup %8768  ;;  %v3715_v11 = vmul.f32 %v8767_v62, %v11216_v63  ;;  %v4327_v63 = vmul.f32 %v11285_v15, %v4258_v10  ;;  %v4131_v23 = vmul.f32 %v11272_v52, %v4062_v59  ;;  %8778 = vrcp.f32 %v3530_v19  ;;  %v3932_v59 = vld [vmem:[#allocation3 + $0x30] sm:$0xff]  ;;  %v11342_v19 = vld [vmem:[%s14928_s4 + $0x6] ss:$0 sm:$0xff] }
 0x1ba   :  { %3870 = vst.msk [vmem:[#allocation3 + $0x61] sm:$0xff] %vm3775_vm8, %v3717_v0  ;;  %v3528_v44 = vadd.f32 1.0, %v8769_v5  ;;  %v3930_v13 = vld [vmem:[#allocation3 + $0x18] sm:$0xff]  ;;  %v8771_v41 = vpop.eup %8770  ;;  %v8144_v17 = vmul.f32 -1.442695, %v11320_v51 }
 0x1bb   :  { %3868 = vst.msk [vmem:[#allocation3 + $0x49] sm:$0xff] %vm3775_vm8, %v3715_v11  ;;  %v4391_v38 = vadd.f32 %v4327_v63, %v4194_v20  ;;  %v4524_v2 = vmul.f32 %v11293_v22, %v3930_v13  ;;  %v4195_v31 = vadd.f32 %v4131_v23, %v3998_v32  ;;  %v4063_v40 = vld [vmem:[#allocation3 + $0x19] sm:$0xff]  ;;  %v3999_v54 = vmul.f32 %v11264_v48, %v3930_v13 }
 0x1bc   :  { %8780 = vrcp.f32 %v3528_v44  ;;  %v3931_v37 = vld [vmem:[#allocation3 + $0x20] sm:$0xff]  ;;  %v4721_v50 = vmul.f32 %v11310_v39, %v4063_v40  ;;  %v4132_v55 = vmul.f32 %v11272_v52, %v4063_v40  ;;  %v3718_v7 = vmul.f32 %v8771_v41, %v11220_v4 }
 0x1bd   :  { %v4588_v43 = vadd.f32 %v4524_v2, %v4391_v38  ;;  %v4392_v42 = vadd.f32 %v4328_v35, %v4195_v31  ;;  %v4525_v45 = vmul.f32 %v11293_v22, %v3931_v37  ;;  %v4260_v62 = vld [vmem:[#allocation3 + $0x1a] sm:$0xff]  ;;  %v11333_v11 = vadd.f32 %v11248_v34, %v11192_v46  ;;  %v4065_v2 = vld [vmem:[#allocation3 + $0x31] sm:$0xff] }
 0x1be   :  { %v4064_v3 = vld [vmem:[#allocation3 + $0x21] sm:$0xff]  ;;  %v4918_v14 = vmul.f32 %v11327_v56, %v4260_v62  ;;  %v4196_v4 = vadd.f32 %v4132_v55, %v3999_v54  ;;  %3871 = vst.msk [vmem:[#allocation3 + $0x69] sm:$0xff] %vm3775_vm8, %v3718_v7  ;;  %v4329_v20 = vmul.f32 %v11285_v15, %v4260_v62  ;;  %v4000_v23 = vmul.f32 %v11264_v48, %v3931_v37  ;;  %v3933_v35 = vld [vmem:[#allocation3 + $0x38] sm:$0xff] }
 0x1bf   :  { %v4785_v0 = vadd.f32 %v4721_v50, %v4588_v43  ;;  %v4589_v6 = vadd.f32 %v4525_v45, %v4392_v42  ;;  %v4722_v44 = vmul.f32 %v11310_v39, %v4064_v3  ;;  %v5116_v38 = vmul.f32 %v11342_v19, %v3932_v59  ;;  %v4066_v37 = vld [vmem:[#allocation3 + $0x39] sm:$0xff] }
 0x1c0   :  { %v8773_v61 = vpop.eup %8772  ;;  %8782 = vpow2.f32 %v8146_v33  ;;  %v4393_v40 = vadd.f32 %v4329_v20, %v4196_v4  ;;  %v4001_v50 = vmul.f32 %v11264_v48, %v3932_v59  ;;  %v4526_v54 = vmul.f32 %v11293_v22, %v3932_v59 }
 0x1c1   :  { %v8775_v49 = vpop.eup %8774  ;;  %v3716_v10 = vmul.f32 %v8773_v61, %v11225_v9  ;;  %v11349_v9 = vadd.f32 %v11192_v46, %v11250_v36  ;;  %v4982_v63 = vadd.f32 %v4918_v14, %v4785_v0  ;;  %v4786_v25 = vadd.f32 %v4722_v44, %v4589_v6  ;;  %v11388_v6 = vld [vmem:[%s14928_s4 + $0x8] ss:$0 sm:$0xff] }
 0x1c2   :  { %v8777_v53 = vpop.eup %8776  ;;  %v3721_v16 = vmul.f32 %v8775_v49, %v11228_v18  ;;  %v4261_v18 = vld [vmem:[#allocation3 + $0x22] sm:$0xff]  ;;  %v8147_v36 = vmul.f32 -1.442695, %v11333_v11  ;;  %8784 = vpow2.f32 %v8144_v17  ;;  %v4135_v0 = vmul.f32 %v11272_v52, %v4066_v37 }
 0x1c3   :  { %v11297_v24 = vpop.f32.mrb[20].mxu0  ;;  %v8779_v29 = vpop.eup %8778  ;;  %v3719_v34 = vmul.f32 %v8777_v53, %v11232_v12  ;;  %3869 = vst.msk [vmem:[#allocation3 + $0x51] sm:$0xff] %vm3775_vm8, %v3716_v10  ;;  %v4133_v12 = vmul.f32 %v11272_v52, %v4064_v3  ;;  %v5180_v41 = vadd.f32 %v5116_v38, %v4982_v63  ;;  %v8145_v45 = vmul.f32 -1.442695, %v11349_v9  ;;  %v4262_v3 = vld [vmem:[#allocation3 + $0x32] sm:$0xff]  ;;  %v4263_v10 = vld [vmem:[#allocation3 + $0x3a] sm:$0xff] }
 0x1c4   :  { %v11299_v30 = vpop.f32.mrb[21].mxu0  ;;  %3874 = vst.msk [vmem:[#allocation3 + $0x91] sm:$0xff] %vm3775_vm8, %v3721_v16  ;;  %v3722_v13 = vmul.f32 %v8779_v29, %v11236_v60  ;;  %v11366_v60 = vld [vmem:[%s14928_s4 + $0x7] ss:$0 sm:$0xff]  ;;  %8786 = vpow2.f32 %v8147_v36  ;;  %v4134_v53 = vmul.f32 %v11272_v52, %v4065_v2  ;;  %v4002_v29 = vmul.f32 %v11264_v48, %v3933_v35  ;;  %v3934_v20 = vld [vmem:[#allocation3 + $0x48] sm:$0xff] }
 0x1c5   :  { %v11301_v27 = vpop.f32.mrb[22].mxu0  ;;  %3872 = vst.msk [vmem:[#allocation3 + $0x79] sm:$0xff] %vm3775_vm8, %v3719_v34  ;;  %v4197_v61 = vadd.f32 %v4133_v12, %v4000_v23  ;;  %v5313_v55 = vmul.f32 %v11366_v60, %v4065_v2  ;;  %v4330_v7 = vmul.f32 %v11285_v15, %v4261_v18  ;;  %v4590_v33 = vadd.f32 %v4526_v54, %v4393_v40  ;;  %v3936_v12 = vld [vmem:[#allocation3 + $0x60] sm:$0xff]  ;;  %v3937_v1 = vld [vmem:[#allocation3 + $0x68] sm:$0xff] }
 0x1c6   :  { %v11304_v28 = vpop.f32.mrb[23].mxu0  ;;  %v8781_v5 = vpop.eup %8780  ;;  %3875 = vst.msk [vmem:[#allocation3 + $0x99] sm:$0xff] %vm3775_vm8, %v3722_v13  ;;  %8788 = vpow2.f32 %v8145_v45  ;;  %v4198_v59 = vadd.f32 %v4134_v53, %v4001_v50  ;;  %v4723_v4 = vmul.f32 %v11310_v39, %v4065_v2  ;;  %v4331_v44 = vmul.f32 %v11285_v15, %v4262_v3 }
 0x1c7   :  { %v3720_v32 = vmul.f32 %v8781_v5, %v11240_v26  ;;  %v4919_v26 = vmul.f32 %v11327_v56, %v4261_v18  ;;  %v5117_v5 = vmul.f32 %v11342_v19, %v3933_v35  ;;  %v5377_v14 = vadd.f32 %v5313_v55, %v5180_v41  ;;  %v11403_v41 = vld [vmem:[%s14929_s5] ss:$0 sm:$0xff] }
 0x1c8   :  { %v4394_v16 = vadd.f32 %v4330_v7, %v4197_v61  ;;  %v5510_v34 = vmul.f32 %v11388_v6, %v4262_v3  ;;  %v4199_v63 = vadd.f32 %v4135_v0, %v4002_v29  ;;  %v4527_v13 = vmul.f32 %v11293_v22, %v3933_v35  ;;  %v4067_v35 = vld [vmem:[#allocation3 + $0x49] sm:$0xff] }
 0x1c9   :  { %3873 = vst.msk [vmem:[#allocation3 + $0x81] sm:$0xff] %vm3775_vm8, %v3720_v32  ;;  %v4983_v42 = vadd.f32 %v4919_v26, %v4786_v25  ;;  %v5314_v32 = vmul.f32 %v11366_v60, %v4066_v37  ;;  %v4332_v18 = vmul.f32 %v11285_v15, %v4263_v10  ;;  %v11397_v25 = vld [vmem:[#allocation3 + $0x61] sm:$0xff]  ;;  %v4787_v36 = vadd.f32 %v4723_v4, %v4590_v33 }
 0x1ca   :  { %v5574_v23 = vadd.f32 %v5510_v34, %v5377_v14  ;;  %v8783_v38 = vpop.eup %8782  ;;  %v4724_v2 = vmul.f32 %v11310_v39, %v4066_v37  ;;  %v4591_v26 = vadd.f32 %v4527_v13, %v4394_v16  ;;  %v4528_v61 = vmul.f32 %v11293_v22, %v3934_v20  ;;  %v3935_v7 = vld [vmem:[#allocation3 + $0x50] sm:$0xff] }
 0x1cb   :  { %v5181_v17 = vadd.f32 %v5117_v5, %v4983_v42  ;;  %v4395_v45 = vadd.f32 %v4331_v44, %v4198_v59  ;;  %v4920_v50 = vmul.f32 %v11327_v56, %v4262_v3  ;;  %v4921_v53 = vmul.f32 %v11327_v56, %v4263_v10  ;;  %v11419_v59 = vld [vmem:[%s14930_s6] ss:$0 sm:$0xff] }
 0x1cc   :  { %v8785_v42 = vpop.eup %8784  ;;  %v5118_v54 = vmul.f32 %v11342_v19, %v3934_v20  ;;  %v4396_v37 = vadd.f32 %v4332_v18, %v4199_v63  ;;  %v5511_v29 = vmul.f32 %v11388_v6, %v4263_v10  ;;  %v4005_v0 = vmul.f32 %v11264_v48, %v3936_v12 }
 0x1cd   :  { %v5378_v40 = vadd.f32 %v5314_v32, %v5181_v17  ;;  %v4138_v5 = vmul.f32 %v11272_v52, %v11397_v25  ;;  %v5645_v33 = vmul.f32 %v11403_v41, %v5574_v23  ;;  %v4003_v14 = vmul.f32 %v11264_v48, %v3934_v20 }
 0x1ce   :  { %v8787_v55 = vpop.eup %8786  ;;  %v4136_v3 = vmul.f32 %v11272_v52, %v4067_v35  ;;  %v4984_v16 = vadd.f32 %v4920_v50, %v4787_v36  ;;  %v11422_v10 = vmul.f32 %v11293_v22, %v3936_v12  ;;  %v4592_v4 = vadd.f32 %v4528_v61, %v4395_v45  ;;  %v4068_v45 = vld [vmem:[#allocation3 + $0x51] sm:$0xff] }
 0x1cf   :  { %v5575_v17 = vadd.f32 %v5511_v29, %v5378_v40  ;;  %v4788_v44 = vadd.f32 %v4724_v2, %v4591_v26  ;;  %v11426_v34 = vmul.f32 %v11310_v39, %v11397_v25  ;;  %v4529_v20 = vmul.f32 %v11293_v22, %v3935_v7 }
 0x1d0   :  { %v5182_v63 = vadd.f32 %v5118_v54, %v4984_v16  ;;  %v3533_v13 = vadd.f32 1.0, %v8783_v38  ;;  %v8789_v32 = vpop.eup %8788  ;;  %v4202_v18 = vadd.f32 %v4138_v5, %v4005_v0  ;;  %v5120_v23 = vmul.f32 %v11342_v19, %v3936_v12  ;;  %v4264_v54 = vld [vmem:[#allocation3 + $0x4a] sm:$0xff] }
 0x1d1   :  { %v4725_v36 = vmul.f32 %v11310_v39, %v4067_v35  ;;  %v3531_v40 = vadd.f32 1.0, %v8785_v42  ;;  %v11434_v61 = vadd.f32 %v11419_v59, %v5645_v33  ;;  %v4200_v2 = vadd.f32 %v4136_v3, %v4003_v14  ;;  %v11439_v42 = vld [vmem:[#allocation3 + $0x62] sm:$0xff] }
 0x1d2   :  { %v5315_v26 = vmul.f32 %v11366_v60, %v4067_v35  ;;  %v3534_v29 = vadd.f32 1.0, %v8787_v55  ;;  %v5646_v38 = vmul.f32 %v11403_v41, %v5575_v17  ;;  %v4985_v0 = vadd.f32 %v4921_v53, %v4788_v44 }
 0x1d3   :  { %15056 = vst [vmem:[#allocation12_spill] sm:$0xff] %v11434_v61  ;;  %v4789_v16 = vadd.f32 %v4725_v36, %v4592_v4  ;;  %v5119_v12 = vmul.f32 %v11342_v19, %v3935_v7  ;;  %8790 = vrcp.f32 %v3533_v13  ;;  %v3532_v33 = vadd.f32 1.0, %v8789_v32  ;;  %v11447_v4 = vld [vmem:[#allocation3 + $0x78] sm:$0xff] }
 0x1d4   :  { %v5379_v5 = vadd.f32 %v5315_v26, %v5182_v63  ;;  %v4004_v14 = vmul.f32 %v11264_v48, %v3935_v7  ;;  %v4137_v35 = vmul.f32 %v11272_v52, %v4068_v45  ;;  %v4333_v55 = vmul.f32 %v11285_v15, %v4264_v54 }
 0x1d5   :  { %v11369_v31 = vpop.f32.mrb[24].mxu0  ;;  %8792 = vrcp.f32 %v3531_v40  ;;  %v8207_v3 = vmul.f32 -1.442695, %v11434_v61  ;;  %v4726_v53 = vmul.f32 %v11310_v39, %v4068_v45  ;;  %v4922_v17 = vmul.f32 %v11327_v56, %v4264_v54 }
 0x1d6   :  { %v11371_v43 = vpop.f32.mrb[25].mxu0  ;;  %8794 = vrcp.f32 %v3534_v29  ;;  %v11452_v44 = vadd.f32 %v11419_v59, %v5646_v38  ;;  %v4006_v7 = vmul.f32 %v11264_v48, %v3937_v1  ;;  %v4335_v63 = vmul.f32 %v11285_v15, %v11439_v42 }
 0x1d7   :  { %15052 = vst [vmem:[#allocation8_spill] sm:$0xff] %v11371_v43  ;;  %v11374_v49 = vpop.f32.mrb[26].mxu0  ;;  %v5183_v13 = vadd.f32 %v5119_v12, %v4985_v0  ;;  %v4986_v40 = vadd.f32 %v4922_v17, %v4789_v16  ;;  %v5512_v26 = vmul.f32 %v11388_v6, %v4264_v54  ;;  %v4201_v29 = vadd.f32 %v4137_v35, %v4004_v14  ;;  %v4267_v16 = vld [vmem:[#allocation3 + $0x6a] sm:$0xff] }
 0x1d8   :  { %15053 = vst [vmem:[#allocation9_spill] sm:$0xff] %v11374_v49  ;;  %v11380_v62 = vpop.f32.mrb[27].mxu0  ;;  %v5316_v38 = vmul.f32 %v11366_v60, %v4068_v45  ;;  %v4532_v61 = vmul.f32 %v11293_v22, %v11447_v4  ;;  %8796 = vpow2.f32 %v8207_v3  ;;  %v5317_v43 = vmul.f32 %v11366_v60, %v11397_v25 }
 0x1d9   :  { %15054 = vst [vmem:[#allocation10_spill] sm:$0xff] %v11380_v62  ;;  %v4070_v62 = vld [vmem:[#allocation3 + $0x69] sm:$0xff]  ;;  %v5576_v12 = vadd.f32 %v5512_v26, %v5379_v5  ;;  %v4399_v54 = vadd.f32 %v4335_v63, %v4202_v18  ;;  %v5184_v45 = vadd.f32 %v5120_v23, %v4986_v40  ;;  %8798 = vrcp.f32 %v3532_v33  ;;  %v11473_v5 = vld [vmem:[#allocation3 + $0x80] sm:$0xff] }
 0x1da   :  { %v4139_v32 = vmul.f32 %v11272_v52, %v4070_v62  ;;  %v5380_v14 = vadd.f32 %v5316_v38, %v5183_v13  ;;  %v4336_v18 = vmul.f32 %v11285_v15, %v4267_v16  ;;  %v4531_v63 = vmul.f32 %v11293_v22, %v3937_v1 }
 0x1db   :  { %v5647_v23 = vmul.f32 %v11403_v41, %v5576_v12  ;;  %v4728_v33 = vmul.f32 %v11310_v39, %v4070_v62  ;;  %v5381_v40 = vadd.f32 %v5317_v43, %v5184_v45  ;;  %v5318_v38 = vmul.f32 %v11366_v60, %v4070_v62  ;;  %v11500_v62 = vld [vmem:[#allocation3 + $0x90] sm:$0xff] }
 0x1dd   :  { %v8791_v26 = vpop.eup %8790 }
 0x1df   :  { %v8793_v13 = vpop.eup %8792 }
 0x1e6   :  { %v11431_v50 = vpop.f32.mrb[28].mxu0 }
 0x1e7   :  { %15055 = vst [vmem:[#allocation11_spill] sm:$0xff] %v11431_v50  ;;  %v4593_v50 = vadd.f32 %v4529_v20, %v4396_v37  ;;  %v11449_v37 = vpop.f32.mrb[29].mxu0  ;;  %v4265_v20 = vld [vmem:[#allocation3 + $0x52] sm:$0xff] }
 0x1e8   :  { %15057 = vst [vmem:[#allocation13_spill] sm:$0xff] %v11449_v37  ;;  %v11459_v49 = vpop.f32.mrb[30].mxu0  ;;  %v4397_v37 = vadd.f32 %v4333_v55, %v4200_v2  ;;  %v4923_v0 = vmul.f32 %v11327_v56, %v4265_v20  ;;  %v4203_v2 = vadd.f32 %v4139_v32, %v4006_v7  ;;  %v11469_v55 = vld [vmem:[#allocation3 + $0x79] sm:$0xff]  ;;  %v5513_v25 = vmul.f32 %v11388_v6, %v4265_v20 }
 0x1e9   :  { %v4790_v36 = vadd.f32 %v4726_v53, %v4593_v50  ;;  %15058 = vst [vmem:[#allocation14_spill] sm:$0xff] %v11459_v49  ;;  %v8208_v50 = vmul.f32 -1.442695, %v11452_v44  ;;  %v4334_v53 = vmul.f32 %v11285_v15, %v4265_v20  ;;  %v4596_v49 = vadd.f32 %v4532_v61, %v4399_v54  ;;  %v11482_v61 = vld [vmem:[#allocation3 + $0x81] sm:$0xff] }
 0x1ea   :  { %v4594_v17 = vadd.f32 %v11422_v10, %v4397_v37  ;;  %v5121_v7 = vmul.f32 %v11342_v19, %v3937_v1  ;;  %v5577_v32 = vadd.f32 %v5513_v25, %v5380_v14  ;;  %v4729_v10 = vmul.f32 %v11310_v39, %v11469_v55  ;;  %v8795_v37 = vpop.eup %8794 }
 0x1eb   :  { %v4987_v35 = vadd.f32 %v4923_v0, %v4790_v36  ;;  %v4398_v3 = vadd.f32 %v4334_v53, %v4201_v29  ;;  %8800 = vpow2.f32 %v8208_v50  ;;  %v4400_v20 = vadd.f32 %v4336_v18, %v4203_v2  ;;  %v11484_v29 = vld [vmem:[#allocation3 + $0x7a] sm:$0xff] }
 0x1ec   :  { %v4533_v1 = vmul.f32 %v11293_v22, %v11473_v5  ;;  %v4791_v12 = vadd.f32 %v11426_v34, %v4594_v17  ;;  %v4793_v50 = vadd.f32 %v4729_v10, %v4596_v49  ;;  %v5514_v54 = vmul.f32 %v11388_v6, %v11439_v42  ;;  %v11504_v34 = vld [vmem:[#allocation3 + $0x82] sm:$0xff]  ;;  %v11513_v10 = vpop.f32.mrb[31].mxu0 }
 0x1ed   :  { %v5185_v36 = vadd.f32 %v5121_v7, %v4987_v35  ;;  %v4595_v0 = vadd.f32 %v4531_v63, %v4398_v3  ;;  %v11493_v53 = vadd.f32 %v11419_v59, %v5647_v23  ;;  %v4730_v43 = vmul.f32 %v11310_v39, %v11482_v61  ;;  %v8797_v3 = vpop.eup %8796 }
 0x1ee   :  { %v4597_v14 = vadd.f32 %v4533_v1, %v4400_v20  ;;  %v4924_v2 = vmul.f32 %v11327_v56, %v11439_v42  ;;  %v5648_v35 = vmul.f32 %v11403_v41, %v5577_v32  ;;  %v5122_v49 = vmul.f32 %v11342_v19, %v11447_v4  ;;  %v8799_v20 = vpop.eup %8798 }
 0x1ef   :  { %v4926_v45 = vmul.f32 %v11327_v56, %v11484_v29  ;;  %v5382_v17 = vadd.f32 %v5318_v38, %v5185_v36  ;;  %v5578_v25 = vadd.f32 %v5514_v54, %v5381_v40  ;;  %v11510_v63 = vadd.f32 %v11259_v57, %v11192_v46  ;;  %v11530_v54 = vld [vmem:[#allocation3 + $0x91] sm:$0xff] }
 0x1f0   :  { %v4794_v18 = vadd.f32 %v4730_v43, %v4597_v14  ;;  %v4925_v42 = vmul.f32 %v11327_v56, %v4267_v16  ;;  %v4988_v7 = vadd.f32 %v4924_v2, %v4791_v12  ;;  %v4792_v23 = vadd.f32 %v4728_v33, %v4595_v0  ;;  %v11524_v12 = vld [vmem:[#allocation3 + $0x98] sm:$0xff] }
 0x1f1   :  { %v4990_v32 = vadd.f32 %v4926_v45, %v4793_v50  ;;  %v5515_v1 = vmul.f32 %v11388_v6, %v4267_v16  ;;  %v8209_v39 = vmul.f32 -1.442695, %v11493_v53  ;;  %v5124_v36 = vmul.f32 %v11342_v19, %v11500_v62 }
 0x1f2   :  { %v4927_v40 = vmul.f32 %v11327_v56, %v11504_v34  ;;  %v11522_v57 = vadd.f32 %v11419_v59, %v5648_v35  ;;  %v5186_v38 = vadd.f32 %v5122_v49, %v4988_v7  ;;  %v5123_v33 = vmul.f32 %v11342_v19, %v11473_v5 }
 0x1f3   :  { %v3725_v0 = vmul.f32 %v8791_v26, %v11315_v47  ;;  %v5579_v16 = vadd.f32 %v5515_v1, %v5382_v17  ;;  %v5649_v50 = vmul.f32 %v11403_v41, %v5578_v25  ;;  %v3723_v43 = vmul.f32 %v8793_v13, %v11320_v51 }
 0x1f4   :  { %v4991_v14 = vadd.f32 %v4927_v40, %v4794_v18  ;;  %v5319_v35 = vmul.f32 %v11366_v60, %v11469_v55  ;;  %v4989_v49 = vadd.f32 %v4925_v42, %v4792_v23  ;;  %v5188_v45 = vadd.f32 %v5124_v36, %v4990_v32  ;;  %v11548_v18 = vld [vmem:[#allocation3 + $0x99] sm:$0xff] }
 0x1f5   :  { %v8801_v2 = vpop.eup %8800  ;;  %3878 = vst.msk [vmem:[#allocation3 + $0xc1] sm:$0xff] %vm3775_vm8, %v3725_v0  ;;  %v3726_v7 = vmul.f32 %v8795_v37, %v11333_v11  ;;  %8802 = vpow2.f32 %v8209_v39  ;;  %v5125_v47 = vmul.f32 %v11342_v19, %v11524_v12  ;;  %3876 = vst.msk [vmem:[#allocation3 + $0xa9] sm:$0xff] %vm3775_vm8, %v3723_v43  ;;  %v3724_v26 = vmul.f32 %v8799_v20, %v11349_v9  ;;  %v11555_v9 = vld [vmem:[#allocation3 + $0x92] sm:$0xff] }
 0x1f6   :  { %v11543_v51 = vadd.f32 %v11192_v46, %v11267_v8  ;;  %v8210_v13 = vmul.f32 -1.442695, %v11522_v57  ;;  %v5321_v17 = vmul.f32 %v11366_v60, %v11530_v54  ;;  %v5383_v25 = vadd.f32 %v5319_v35, %v5186_v38 }
 0x1f7   :  { %v5187_v39 = vadd.f32 %v5123_v33, %v4989_v49  ;;  %3879 = vst.msk [vmem:[#allocation3 + $0xc9] sm:$0xff] %vm3775_vm8, %v3726_v7  ;;  %v5650_v11 = vmul.f32 %v11403_v41, %v5579_v16  ;;  %v11553_v37 = vadd.f32 %v11419_v59, %v5649_v50  ;;  %v5189_v8 = vadd.f32 %v5125_v47, %v4991_v14 }
 0x1f8   :  { %3877 = vst.msk [vmem:[#allocation3 + $0xb1] sm:$0xff] %vm3775_vm8, %v3724_v26  ;;  %v8150_v42 = vmul.f32 -1.442695, %v11510_v63  ;;  %v5972_v23 = vadd.f32 1.0, %v8797_v3  ;;  %v5320_v32 = vmul.f32 %v11366_v60, %v11482_v61  ;;  %v5385_v20 = vadd.f32 %v5321_v17, %v5188_v45  ;;  %v11573_v3 = vld [vmem:[#allocation3 + $0x9a] sm:$0xff]  ;;  %v11588_v45 = vpop.f32.mrb[32].mxu0 }
 0x1f9   :  { %v5516_v1 = vmul.f32 %v11388_v6, %v11484_v29  ;;  %v5973_v36 = vadd.f32 1.0, %v8801_v2  ;;  %v5322_v40 = vmul.f32 %v11366_v60, %v11548_v18  ;;  %v11567_v38 = vadd.f32 %v11274_v21, %v11192_v46  ;;  %15059 = vst [vmem:[#allocation15_spill] sm:$0xff] %v11588_v45  ;;  %v11600_v17 = vpop.f32.mrb[33].mxu0 }
 0x1fa   :  { %v11571_v33 = vadd.f32 %v11192_v46, %v11276_v58  ;;  %8804 = vpow2.f32 %v8210_v13  ;;  %v5518_v0 = vmul.f32 %v11388_v6, %v11555_v9  ;;  %v5384_v16 = vadd.f32 %v5320_v32, %v5187_v39  ;;  %15061 = vst [vmem:[#allocation17_spill] sm:$0xff] %v11600_v17 }
 0x1fb   :  { %v5580_v50 = vadd.f32 %v5516_v1, %v5383_v25  ;;  %v11578_v14 = vadd.f32 %v11419_v59, %v5650_v11  ;;  %v8211_v43 = vmul.f32 -1.442695, %v11553_v37  ;;  %v5386_v2 = vadd.f32 %v5322_v40, %v5189_v8  ;;  %v11607_v11 = vpop.f32.mrb[34].mxu0 }
 0x1fc   :  { %v8148_v21 = vmul.f32 -1.442695, %v11543_v51  ;;  %8806 = vrcp.f32 %v5972_v23  ;;  %v5517_v58 = vmul.f32 %v11388_v6, %v11504_v34  ;;  %v5582_v35 = vadd.f32 %v5518_v0, %v5385_v20  ;;  %15062 = vst [vmem:[#allocation18_spill] sm:$0xff] %v11607_v11  ;;  %v11614_v20 = vpop.f32.mrb[35].mxu0  ;;  %v11705_v17 = vld [vmem:[#allocation3 + $0xa9] sm:$0xff] }
 0x1fd   :  { %v11586_v49 = vadd.f32 %v11297_v24, %v11192_v46  ;;  %v5519_v7 = vmul.f32 %v11388_v6, %v11573_v3  ;;  %v8151_v47 = vmul.f32 -1.442695, %v11567_v38  ;;  %v11594_v26 = vmul.f32 -1.442695, %v11571_v33  ;;  %15063 = vst [vmem:[#allocation19_spill] sm:$0xff] %v11614_v20 }
 0x1fe   :  { %v11598_v13 = vadd.f32 %v11192_v46, %v11299_v30  ;;  %8808 = vrcp.f32 %v5973_v36  ;;  %v5581_v25 = vadd.f32 %v5517_v58, %v5384_v16  ;;  %v5651_v24 = vmul.f32 %v11403_v41, %v5580_v50 }
 0x1ff   :  { %v11605_v39 = vadd.f32 %v11301_v27, %v11192_v46  ;;  %v8803_v8 = vpop.eup %8802  ;;  %8810 = vpow2.f32 %v8211_v43  ;;  %v8212_v23 = vmul.f32 -1.442695, %v11578_v14  ;;  %v5583_v32 = vadd.f32 %v5519_v7, %v5386_v2 }
 0x200   :  { %15060 = vst [vmem:[#allocation16_spill] sm:$0xff] %v11598_v13  ;;  %v11612_v30 = vadd.f32 %v11192_v46, %v11304_v28  ;;  %v4007_v1 = vmul.f32 %v11264_v48, %v11447_v4  ;;  %v4140_v27 = vmul.f32 %v11272_v52, %v11469_v55  ;;  %v5653_v36 = vmul.f32 %v11403_v41, %v5582_v35 }
 0x201   :  { %v11622_v40 = vmul.f32 -1.442695, %v11586_v49  ;;  %v4008_v0 = vmul.f32 %v11264_v48, %v11473_v5  ;;  %v4141_v28 = vmul.f32 %v11272_v52, %v11482_v61  ;;  %8812 = vpow2.f32 %v8150_v42 }
 0x202   :  { %v11630_v16 = vadd.f32 %v11369_v31, %v11192_v46  ;;  %v5974_v4 = vadd.f32 1.0, %v8803_v8  ;;  %v5652_v50 = vmul.f32 %v11403_v41, %v5581_v25  ;;  %v11634_v55 = vadd.f32 %v11419_v59, %v5651_v24  ;;  %v15064_v25 = vld [vmem:[#allocation8_spill] sm:$0xff] }
 0x203   :  { %8814 = vpow2.f32 %v8148_v21  ;;  %v4009_v43 = vmul.f32 %v11264_v48, %v11500_v62  ;;  %v4142_v5 = vmul.f32 %v11272_v52, %v11530_v54  ;;  %v5654_v61 = vmul.f32 %v11403_v41, %v5583_v32 }
 0x204   :  { %8816 = vpow2.f32 %v8212_v23  ;;  %v8805_v42 = vpop.eup %8804  ;;  %v4204_v2 = vadd.f32 %v4140_v27, %v4007_v1  ;;  %v4337_v31 = vmul.f32 %v11285_v15, %v11484_v29  ;;  %v11644_v58 = vadd.f32 %v11419_v59, %v5653_v36  ;;  %v11666_v36 = vld [vmem:[#allocation3 + $0xa8] sm:$0xff] }
 0x205   :  { %8818 = vpow2.f32 %v8151_v47  ;;  %v4010_v21 = vmul.f32 %v11264_v48, %v11524_v12  ;;  %v4143_v35 = vmul.f32 %v11272_v52, %v11548_v18  ;;  %v11651_v7 = vmul.f32 -1.442695, %v11598_v13 }
 0x206   :  { %v11655_v24 = vadd.f32 %v11192_v46, %v15064_v25  ;;  %v8807_v8 = vpop.eup %8806  ;;  %8820 = vrcp.f32 %v5974_v4  ;;  %v4205_v29 = vadd.f32 %v4141_v28, %v4008_v0  ;;  %v11658_v23 = vadd.f32 %v11419_v59, %v5652_v50  ;;  %v15066_v25 = vld [vmem:[#allocation12_spill] sm:$0xff] }
 0x207   :  { %v8213_v47 = vmul.f32 -1.442695, %v11634_v55  ;;  %v5975_v32 = vadd.f32 1.0, %v8805_v42  ;;  %v4206_v1 = vadd.f32 %v4142_v5, %v4009_v43  ;;  %v4339_v52 = vmul.f32 %v11285_v15, %v11555_v9  ;;  %v11673_v42 = vld [vmem:[#allocation3 + $0xb0] sm:$0xff] }
 0x208   :  { %v11664_v27 = vadd.f32 %v11419_v59, %v5654_v61  ;;  %v8809_v46 = vpop.eup %8808  ;;  %v4534_v4 = vmul.f32 %v11293_v22, %v11500_v62  ;;  %v4338_v0 = vmul.f32 %v11285_v15, %v11504_v34  ;;  %v4401_v28 = vadd.f32 %v4337_v31, %v4204_v2 }
 0x209   :  { %v8215_v50 = vmul.f32 -1.442695, %v11644_v58  ;;  %v8811_v5 = vpop.eup %8810  ;;  %v11678_v61 = vmul.f32 %v8807_v8, %v15066_v25  ;;  %v4207_v20 = vadd.f32 %v4143_v35, %v4010_v21  ;;  %v4340_v11 = vmul.f32 %v11285_v15, %v11573_v3 }
 0x20a   :  { %v4535_v62 = vmul.f32 %v11293_v22, %v11524_v12  ;;  %v4402_v34 = vadd.f32 %v4338_v0, %v4205_v29  ;;  %8822 = vpow2.f32 %v8213_v47  ;;  %v8214_v2 = vmul.f32 -1.442695, %v11658_v23 }
 0x20b   :  { %v11675_v43 = vpop.f32.mrb[36].mxu0  ;;  %15067 = vst [vmem:[#allocation12_spill] sm:$0xff] %v11678_v61  ;;  %v4536_v31 = vmul.f32 %v11293_v22, %v11666_v36  ;;  %v8813_v8 = vpop.eup %8812  ;;  %8824 = vrcp.f32 %v5975_v32  ;;  %v4403_v21 = vadd.f32 %v4339_v52, %v4206_v1  ;;  %v8216_v35 = vmul.f32 -1.442695, %v11664_v27  ;;  %v15072_v32 = vld [vmem:[#allocation7_spill] sm:$0xff] }
 0x20c   :  { %15065 = vst [vmem:[#allocation8_spill] sm:$0xff] %v11675_v43  ;;  %v11684_v13 = vpop.f32.mrb[37].mxu0  ;;  %v4537_v15 = vmul.f32 %v11293_v22, %v11673_v42  ;;  %v11697_v29 = vmul.f32 %v8809_v46, %v11452_v44  ;;  %v5976_v47 = vadd.f32 1.0, %v8811_v5  ;;  %v4598_v0 = vadd.f32 %v4534_v4, %v4401_v28  ;;  %v11709_v28 = vld [vmem:[#allocation3 + $0xb1] sm:$0xff] }
 0x20d   :  { %15068 = vst [vmem:[#allocation20_spill] sm:$0xff] %v11684_v13  ;;  %v11689_v43 = vpop.f32.mrb[38].mxu0  ;;  %v8815_v25 = vpop.eup %8814  ;;  %8826 = vpow2.f32 %v8215_v50  ;;  %v4731_v1 = vmul.f32 %v15072_v32, %v11530_v54  ;;  %v4404_v52 = vadd.f32 %v4340_v11, %v4207_v20  ;;  %v4732_v22 = vmul.f32 %v15072_v32, %v11548_v18 }
 0x20e   :  { %15069 = vst [vmem:[#allocation21_spill] sm:$0xff] %v11689_v43  ;;  %v11694_v12 = vpop.f32.mrb[39].mxu0  ;;  %15071 = vst [vmem:[#allocation23_spill] sm:$0xff] %v11697_v29  ;;  %v8817_v13 = vpop.eup %8816  ;;  %v6228_v43 = vsel %vm3775_vm8, %v11678_v61, 0.0  ;;  %v4928_v44 = vmul.f32 %v11327_v56, %v11555_v9  ;;  %v4599_v46 = vadd.f32 %v4535_v62, %v4402_v34  ;;  %8828 = vpow2.f32 %v8214_v2  ;;  %v11715_v9 = vld [vmem:[#allocation3 + $0xaa] sm:$0xff] }
 0x20f   :  { %15070 = vst [vmem:[#allocation22_spill] sm:$0xff] %v11694_v12  ;;  %v8819_v12 = vpop.eup %8818  ;;  %v4600_v4 = vadd.f32 %v4536_v31, %v4403_v21  ;;  %8830 = vpow2.f32 %v8216_v35  ;;  %v4601_v50 = vadd.f32 %v4537_v15, %v4404_v52  ;;  %v3537_v5 = vadd.f32 1.0, %v8813_v8  ;;  %v11721_v8 = vld [vmem:[#allocation3 + $0xb2] sm:$0xff] }
 0x210   :  { %v3535_v61 = vadd.f32 1.0, %v8815_v25  ;;  %v8821_v54 = vpop.eup %8820  ;;  %8832 = vrcp.f32 %v5976_v47  ;;  %v6229_v18 = vsel %vm3775_vm8, %v11697_v29, 0.0  ;;  %v4733_v11 = vmul.f32 %v15072_v32, %v11705_v17  ;;  %v15074_v52 = vld [vmem:[#allocation9_spill] sm:$0xff] }
 0x211   :  { %v4795_v20 = vadd.f32 %v4731_v1, %v4598_v0  ;;  %v5977_v45 = vadd.f32 1.0, %v8817_v13  ;;  %v4734_v62 = vmul.f32 %v15072_v32, %v11709_v28  ;;  %8834 = vrcp.f32 %v3537_v5  ;;  %v11740_v1 = vld [vmem:[%s14927_s3] ss:$0 sm:$0xff] }
 0x212   :  { %v3538_v34 = vadd.f32 1.0, %v8819_v12  ;;  %v4797_v2 = vadd.f32 %v4733_v11, %v4600_v4  ;;  %v5126_v31 = vmul.f32 %v11342_v19, %v11666_v36  ;;  %v4796_v21 = vadd.f32 %v4732_v22, %v4599_v46  ;;  %v11756_v11 = vld [vmem:[#allocation3 + $0xc1] sm:$0xff] }
 0x213   :  { %8836 = vrcp.f32 %v3535_v61  ;;  %v11724_v35 = vmul.f32 %v8821_v54, %v11493_v53  ;;  %v4929_v13 = vmul.f32 %v11327_v56, %v11573_v3  ;;  %v4798_v15 = vadd.f32 %v4734_v62, %v4601_v50  ;;  %v11733_v53 = vld [vmem:[#allocation3 + $0xc0] sm:$0xff] }
 0x214   :  { %8838 = vrcp.f32 %v3538_v34  ;;  %v8823_v25 = vpop.eup %8822  ;;  %v4992_v47 = vadd.f32 %v4928_v44, %v4795_v20  ;;  %v4930_v12 = vmul.f32 %v11327_v56, %v11715_v9  ;;  %v5127_v0 = vmul.f32 %v11342_v19, %v11673_v42 }
 0x215   :  { %15073 = vst [vmem:[#allocation7_spill] sm:$0xff] %v11724_v35  ;;  %8840 = vpow2.f32 %v11594_v26  ;;  %v8825_v32 = vpop.eup %8824  ;;  %v6230_v61 = vadd.f32 %v6229_v18, %v6228_v43  ;;  %v4931_v3 = vmul.f32 %v11327_v56, %v11721_v8  ;;  %v11744_v22 = vadd.f32 %v11740_v1, %v15074_v52  ;;  %v11746_v26 = vld [vmem:[#allocation3 + $0xc8] sm:$0xff] }
 0x216   :  { %8842 = vrcp.f32 %v5977_v45  ;;  %v5190_v46 = vadd.f32 %v5126_v31, %v4992_v47  ;;  %v4993_v45 = vadd.f32 %v4929_v13, %v4796_v21  ;;  %v4994_v43 = vadd.f32 %v4930_v12, %v4797_v2 }
 0x217   :  { %v8827_v44 = vpop.eup %8826  ;;  %v11749_v4 = vmul.f32 -1.442695, %v11605_v39  ;;  %v6231_v56 = vsel %vm3775_vm8, %v11724_v35, 0.0  ;;  %v5978_v50 = vadd.f32 1.0, %v8823_v25  ;;  %v4995_v5 = vadd.f32 %v4931_v3, %v4798_v15  ;;  %v11771_v3 = vld [vmem:[#allocation3 + $0xc9] sm:$0xff] }
 0x218   :  { %v11754_v54 = vmul.f32 -1.442695, %v11612_v30  ;;  %v8829_v18 = vpop.eup %8828  ;;  %v5128_v20 = vmul.f32 %v11342_v19, %v11733_v53  ;;  %v5323_v62 = vmul.f32 %v11366_v60, %v11705_v17  ;;  %v5191_v34 = vadd.f32 %v5127_v0, %v4993_v45 }
 0x219   :  { %8844 = vpow2.f32 %v11622_v40  ;;  %v8831_v2 = vpop.eup %8830  ;;  %v11764_v31 = vmul.f32 %v8825_v32, %v11522_v57  ;;  %v5980_v21 = vadd.f32 1.0, %v8827_v44  ;;  %v5129_v13 = vmul.f32 %v11342_v19, %v11746_v26 }
 0x21a   :  { %v11769_v15 = vmul.f32 -1.442695, %v11630_v16  ;;  %v8833_v25 = vpop.eup %8832  ;;  %v6232_v47 = vadd.f32 %v6231_v56, %v6230_v61  ;;  %v5387_v12 = vadd.f32 %v5323_v62, %v5190_v46  ;;  %v5192_v52 = vadd.f32 %v5128_v20, %v4994_v43  ;;  %v11789_v62 = vld [vmem:[#allocation3 + $0xca] sm:$0xff] }
 0x21b   :  { %15075 = vst [vmem:[#allocation9_spill] sm:$0xff] %v11764_v31  ;;  %v5324_v40 = vmul.f32 %v11366_v60, %v11709_v28  ;;  %v8835_v0 = vpop.eup %8834  ;;  %v5979_v45 = vadd.f32 1.0, %v8829_v18  ;;  %8846 = vrcp.f32 %v5978_v50  ;;  %v5325_v57 = vmul.f32 %v11366_v60, %v11756_v11  ;;  %v11784_v18 = vld [vmem:[#allocation3 + $0xc2] sm:$0xff] }
 0x21c   :  { %v5193_v32 = vadd.f32 %v5129_v13, %v4995_v5  ;;  %v5981_v44 = vadd.f32 1.0, %v8831_v2  ;;  %v5520_v61 = vmul.f32 %v11388_v6, %v11715_v9  ;;  %v3729_v46 = vmul.f32 %v8835_v0, %v11510_v63 }
 0x21d   :  { %v8837_v19 = vpop.eup %8836  ;;  %v5388_v35 = vadd.f32 %v5324_v40, %v5191_v34  ;;  %8848 = vrcp.f32 %v5980_v21  ;;  %v11782_v43 = vmul.f32 %v11264_v48, %v11733_v53  ;;  %v5326_v50 = vmul.f32 %v11366_v60, %v11771_v3 }
 0x21e   :  { %v8839_v56 = vpop.eup %8838  ;;  %v3727_v5 = vmul.f32 %v8837_v19, %v11543_v51  ;;  %v5389_v34 = vadd.f32 %v5325_v57, %v5192_v52  ;;  %v5521_v63 = vmul.f32 %v11388_v6, %v11721_v8  ;;  %v5584_v2 = vadd.f32 %v5520_v61, %v5387_v12  ;;  %3882 = vst.msk [vmem:[#allocation3 + $0xf1] sm:$0xff] %vm3775_vm8, %v3729_v46 }
 0x21f   :  { %v8841_v20 = vpop.eup %8840  ;;  %v3730_v48 = vmul.f32 %v8839_v56, %v11567_v38  ;;  %v6233_v13 = vsel %vm3775_vm8, %v11764_v31, 0.0  ;;  %8850 = vrcp.f32 %v5979_v45  ;;  %v5390_v60 = vadd.f32 %v5326_v50, %v5193_v32  ;;  %v11807_v38 = vld [vmem:[%s14928_s4 + $0x1] ss:$0 sm:$0xff] }
 0x220   :  { %v8843_v21 = vpop.eup %8842  ;;  %3880 = vst.msk [vmem:[#allocation3 + $0xd9] sm:$0xff] %vm3775_vm8, %v3727_v5  ;;  %v3536_v51 = vadd.f32 1.0, %v8841_v20  ;;  %v11799_v40 = vmul.f32 %v8833_v25, %v11553_v37  ;;  %8852 = vrcp.f32 %v5981_v44  ;;  %v5522_v12 = vmul.f32 %v11388_v6, %v11784_v18  ;;  %v15077_v37 = vld [vmem:[#allocation10_spill] sm:$0xff] }
 0x221   :  { %v5585_v52 = vadd.f32 %v5521_v63, %v5388_v35  ;;  %3883 = vst.msk [vmem:[#allocation3 + $0xf9] sm:$0xff] %vm3775_vm8, %v3730_v48  ;;  %v4146_v0 = vmul.f32 %v11807_v38, %v11756_v11  ;;  %v5523_v45 = vmul.f32 %v11388_v6, %v11789_v62  ;;  %8854 = vpow2.f32 %v11651_v7  ;;  %v11833_v20 = vld [vmem:[%s14928_s4] ss:$0 sm:$0xff] }
 0x222   :  { %15076 = vst [vmem:[#allocation24_spill] sm:$0xff] %v11799_v40  ;;  %v11816_v25 = vadd.f32 %v11740_v1, %v15077_v37  ;;  %v6234_v57 = vadd.f32 %v6233_v13, %v6232_v47  ;;  %v5586_v32 = vadd.f32 %v5522_v12, %v5389_v34  ;;  %v5655_v19 = vmul.f32 %v11403_v41, %v5584_v2 }
 0x223   :  { %v8845_v35 = vpop.eup %8844  ;;  %8856 = vrcp.f32 %v3536_v51  ;;  %v5587_v61 = vadd.f32 %v5523_v45, %v5390_v60  ;;  %v8156_v6 = vmul.f32 -1.442695, %v11655_v24  ;;  %v6235_v7 = vsel %vm3775_vm8, %v11799_v40, 0.0 }
 0x224   :  { %v3541_v46 = vadd.f32 1.0, %v8845_v35  ;;  %8858 = vpow2.f32 %v11749_v4  ;;  %v5656_v50 = vmul.f32 %v11403_v41, %v5585_v52  ;;  %v8159_v47 = vmul.f32 -1.442695, %v11744_v22  ;;  %v11882_v35 = vld [vmem:[%s14928_s4 + $0x2] ss:$0 sm:$0xff] }
 0x225   :  { %8860 = vpow2.f32 %v11754_v54  ;;  %v8847_v5 = vpop.eup %8846  ;;  %v4011_v4 = vmul.f32 %v11833_v20, %v11666_v36  ;;  %v4144_v34 = vmul.f32 %v11807_v38, %v11705_v17  ;;  %v8157_v63 = vmul.f32 -1.442695, %v11816_v25 }
 0x226   :  { %8862 = vrcp.f32 %v3541_v46  ;;  %v11841_v2 = vmul.f32 %v8843_v21, %v11578_v14  ;;  %v4012_v54 = vmul.f32 %v11833_v20, %v11673_v42  ;;  %v5657_v48 = vmul.f32 %v11403_v41, %v5586_v32  ;;  %v11858_v14 = vld [vmem:[%s14928_s4 + $0x3] ss:$0 sm:$0xff] }
 0x227   :  { %v11819_v44 = vpop.f32.mrb[40].mxu0  ;;  %8864 = vpow2.f32 %v11769_v15  ;;  %v8849_v60 = vpop.eup %8848  ;;  %v4145_v36 = vmul.f32 %v11807_v38, %v11709_v28  ;;  %v5658_v17 = vmul.f32 %v11403_v41, %v5587_v61  ;;  %v11853_v51 = vadd.f32 %v11419_v59, %v5655_v19  ;;  %v11868_v41 = vld [vmem:[%s14928_s4 + $0x4] ss:$0 sm:$0xff] }
 0x228   :  { %v11823_v56 = vpop.f32.mrb[41].mxu0  ;;  %15078 = vst [vmem:[#allocation10_spill] sm:$0xff] %v11841_v2  ;;  %8866 = vpow2.f32 %v8156_v6  ;;  %v4538_v42 = vmul.f32 %v11858_v14, %v11733_v53  ;;  %v11863_v15 = vadd.f32 %v11419_v59, %v5656_v50  ;;  %v6236_v28 = vadd.f32 %v6235_v7, %v6234_v57 }
 0x229   :  { %v11847_v13 = vpop.f32.mrb[42].mxu0  ;;  %8868 = vpow2.f32 %v8159_v47  ;;  %v8851_v21 = vpop.eup %8850  ;;  %v11872_v12 = vmul.f32 %v11868_v41, %v11756_v11  ;;  %v4208_v52 = vadd.f32 %v4144_v34, %v4011_v4  ;;  %v11875_v53 = vmul.f32 %v8847_v5, %v11634_v55 }
 0x22a   :  { %8870 = vpow2.f32 %v8157_v63  ;;  %v8853_v45 = vpop.eup %8852  ;;  %v6237_v37 = vsel %vm3775_vm8, %v11841_v2, 0.0  ;;  %v4341_v57 = vmul.f32 %v11882_v35, %v11715_v9  ;;  %v11887_v11 = vadd.f32 %v11419_v59, %v5657_v48  ;;  %v11894_v6 = vpop.f32.mrb[43].mxu0 }
 0x22b   :  { %15079 = vst [vmem:[#allocation25_spill] sm:$0xff] %v11875_v53  ;;  %v8855_v32 = vpop.eup %8854  ;;  %v4210_v19 = vadd.f32 %v4146_v0, %v11782_v43  ;;  %v4209_v61 = vadd.f32 %v4145_v36, %v4012_v54  ;;  %v11891_v55 = vadd.f32 %v11419_v59, %v5658_v17  ;;  %v8217_v46 = vmul.f32 -1.442695, %v11853_v51 }
 0x22c   :  { %v4014_v50 = vmul.f32 %v11833_v20, %v11746_v26  ;;  %v4147_v9 = vmul.f32 %v11807_v38, %v11771_v3  ;;  %v4343_v47 = vmul.f32 %v11882_v35, %v11784_v18  ;;  %v8218_v43 = vmul.f32 -1.442695, %v11863_v15 }
 0x22d   :  { %v8857_v7 = vpop.eup %8856  ;;  %v6238_v5 = vadd.f32 %v6237_v37, %v6236_v28  ;;  %v4344_v59 = vmul.f32 %v11882_v35, %v11789_v62  ;;  %v4539_v4 = vmul.f32 %v11858_v14, %v11746_v26  ;;  %v4342_v34 = vmul.f32 %v11882_v35, %v11721_v8 }
 0x22e   :  { %v8859_v0 = vpop.eup %8858  ;;  %v11910_v54 = vmul.f32 %v8851_v21, %v11658_v23  ;;  %v6239_v48 = vsel %vm3775_vm8, %v11875_v53, 0.0  ;;  %v4405_v36 = vadd.f32 %v4341_v57, %v4208_v52  ;;  %v8219_v17 = vmul.f32 -1.442695, %v11887_v11 }
 0x22f   :  { %v8861_v63 = vpop.eup %8860  ;;  %v4406_v37 = vadd.f32 %v4342_v34, %v4209_v61  ;;  %8872 = vpow2.f32 %v8217_v46  ;;  %v8220_v2 = vmul.f32 -1.442695, %v11891_v55  ;;  %v3728_v26 = vmul.f32 %v8857_v7, %v11571_v33  ;;  %v11927_v7 = vld [vmem:[#allocation3 + $0xd8] sm:$0xff]  ;;  %v12020_v29 = vpop.f32.mrb[44].mxu0 }
 0x230   :  { %15080 = vst [vmem:[#allocation26_spill] sm:$0xff] %v11910_v54  ;;  %v8863_v28 = vpop.eup %8862  ;;  %v11918_v8 = vmul.f32 %v8849_v60, %v11644_v58  ;;  %8874 = vpow2.f32 %v8218_v43  ;;  %v3539_v21 = vadd.f32 1.0, %v8855_v32  ;;  %v6240_v53 = vadd.f32 %v6239_v48, %v6238_v5  ;;  %v11937_v43 = vld [vmem:[%s14928_s4 + $0x5] ss:$0 sm:$0xff]  ;;  %v15085_v48 = vld [vmem:[#allocation13_spill] sm:$0xff]  ;;  %15095 = vst [vmem:[#allocation31_spill] sm:$0xff] %v12020_v29 }
 0x231   :  { %v8865_v40 = vpop.eup %8864  ;;  %v3733_v23 = vmul.f32 %v8863_v28, %v11586_v49  ;;  %v4211_v52 = vadd.f32 %v4147_v9, %v4014_v50  ;;  %v4407_v57 = vadd.f32 %v4343_v47, %v4210_v19  ;;  %3881 = vst.msk [vmem:[#allocation3 + $0xe1] sm:$0xff] %vm3775_vm8, %v3728_v26  ;;  %v3542_v61 = vadd.f32 1.0, %v8859_v0  ;;  %v4079_v28 = vld [vmem:[#allocation3 + $0xd9] sm:$0xff] }
 0x232   :  { %15081 = vst [vmem:[#allocation27_spill] sm:$0xff] %v11918_v8  ;;  %v8867_v31 = vpop.eup %8866  ;;  %v6241_v34 = vsel %vm3775_vm8, %v11910_v54, 0.0  ;;  %v4602_v33 = vadd.f32 %v4538_v42, %v4405_v36  ;;  %8876 = vpow2.f32 %v8219_v17  ;;  %v3540_v58 = vadd.f32 1.0, %v8861_v63 }
 0x233   :  { %v8869_v46 = vpop.eup %8868  ;;  %3886 = vst.msk [vmem:[#allocation3 + $0x121] sm:$0xff] %vm3775_vm8, %v3733_v23  ;;  %v4736_v49 = vmul.f32 %v11868_v41, %v11771_v3  ;;  %v4603_v32 = vadd.f32 %v4539_v4, %v4406_v37  ;;  %8878 = vpow2.f32 %v8220_v2  ;;  %v3545_v19 = vadd.f32 1.0, %v8865_v40 }
 0x234   :  { %v8871_v60 = vpop.eup %8870  ;;  %v11930_v50 = vmul.f32 %v8853_v45, %v11664_v27  ;;  %v6243_v9 = vsel %vm3775_vm8, %v11918_v8, 0.0  ;;  %8880 = vrcp.f32 %v3539_v21  ;;  %v3543_v42 = vadd.f32 1.0, %v8867_v31  ;;  %v12016_v8 = vld [vmem:[#allocation3 + $0xf0] sm:$0xff] }
 0x235   :  { %v6242_v47 = vadd.f32 %v6241_v34, %v6240_v53  ;;  %v4932_v3 = vmul.f32 %v11937_v43, %v11784_v18  ;;  %8882 = vrcp.f32 %v3542_v61  ;;  %v3546_v2 = vadd.f32 1.0, %v8869_v46  ;;  %v15083_v18 = vld [vmem:[#allocation11_spill] sm:$0xff] }
 0x236   :  { %15082 = vst [vmem:[#allocation28_spill] sm:$0xff] %v11930_v50  ;;  %v4540_v27 = vmul.f32 %v11858_v14, %v11927_v7  ;;  %v4799_v40 = vadd.f32 %v11872_v12, %v4602_v33  ;;  %8884 = vrcp.f32 %v3540_v58  ;;  %v3544_v45 = vadd.f32 1.0, %v8871_v60  ;;  %v15087_v33 = vld [vmem:[#allocation14_spill] sm:$0xff] }
 0x237   :  { %v6244_v0 = vadd.f32 %v6243_v9, %v6242_v47  ;;  %v4933_v31 = vmul.f32 %v11937_v43, %v11789_v62  ;;  %v4800_v53 = vadd.f32 %v4736_v49, %v4603_v32  ;;  %8886 = vrcp.f32 %v3545_v19  ;;  %v11961_v62 = vld [vmem:[%s14928_s4 + $0x6] ss:$0 sm:$0xff]  ;;  %v3960_v9 = vld [vmem:[#allocation3 + $0x1b0] sm:$0xff] }
 0x238   :  { %v6245_v5 = vsel %vm3775_vm8, %v11930_v50, 0.0  ;;  %v11948_v4 = vld [vmem:[#allocation3 + $0xe0] sm:$0xff]  ;;  %8888 = vrcp.f32 %v3543_v42  ;;  %v11952_v63 = vadd.f32 %v11740_v1, %v15083_v18  ;;  %v11956_v12 = vadd.f32 %v11740_v1, %v15085_v48 }
 0x239   :  { %v8873_v36 = vpop.eup %8872  ;;  %v4408_v17 = vadd.f32 %v4344_v59, %v4211_v52  ;;  %v5130_v37 = vmul.f32 %v11961_v62, %v11927_v7  ;;  %v4541_v26 = vmul.f32 %v11858_v14, %v11948_v4  ;;  %8890 = vrcp.f32 %v3546_v2  ;;  %v11967_v46 = vld [vmem:[#allocation3 + $0xe1] sm:$0xff] }
 0x23a   :  { %15084 = vst [vmem:[#allocation11_spill] sm:$0xff] %v11952_v63  ;;  %15086 = vst [vmem:[#allocation13_spill] sm:$0xff] %v11956_v12  ;;  %v8875_v23 = vpop.eup %8874  ;;  %v4604_v21 = vadd.f32 %v4540_v27, %v4407_v57  ;;  %v4996_v61 = vadd.f32 %v4932_v3, %v4799_v40  ;;  %8892 = vrcp.f32 %v3544_v45  ;;  %v11969_v59 = vadd.f32 %v6245_v5, %v6244_v0  ;;  %v4276_v2 = vld [vmem:[#allocation3 + $0xda] sm:$0xff]  ;;  %v4093_v45 = vld [vmem:[#allocation3 + $0x1b1] sm:$0xff] }
 0x23b   :  { %v4605_v52 = vadd.f32 %v4541_v26, %v4408_v17  ;;  %v4997_v34 = vadd.f32 %v4933_v31, %v4800_v53  ;;  %v11973_v58 = vadd.f32 %v11740_v1, %v15087_v33  ;;  %v5982_v49 = vadd.f32 1.0, %v8873_v36  ;;  %v11986_v53 = vld [vmem:[#allocation3 + $0xe2] sm:$0xff]  ;;  %v15092_v36 = vld [vmem:[#allocation17_spill] sm:$0xff] }
 0x23c   :  { %v8877_v60 = vpop.eup %8876  ;;  %v4737_v32 = vmul.f32 %v11868_v41, %v4079_v28  ;;  %v11977_v19 = vmul.f32 -1.442695, %v11952_v63  ;;  %v11980_v57 = vmul.f32 -1.442695, %v11956_v12  ;;  %v5983_v47 = vadd.f32 1.0, %v8875_v23  ;;  %v15090_v18 = vld [vmem:[#allocation15_spill] sm:$0xff] }
 0x23d   :  { %15088 = vst [vmem:[#allocation14_spill] sm:$0xff] %v11973_v58  ;;  %v8879_v42 = vpop.eup %8878  ;;  %v5194_v3 = vadd.f32 %v5130_v37, %v4996_v61  ;;  %v4738_v27 = vmul.f32 %v11868_v41, %v11967_v46  ;;  %v5131_v40 = vmul.f32 %v11961_v62, %v11948_v4  ;;  %v11990_v5 = vadd.f32 %v11740_v1, %v11513_v10  ;;  %v12003_v26 = vld [vmem:[%s14928_s4 + $0x7] ss:$0 sm:$0xff]  ;;  %v15096_v12 = vld [vmem:[#allocation16_spill] sm:$0xff]  ;;  %v12028_v63 = vpop.f32.mrb[45].mxu0 }
 0x23e   :  { %v8881_v0 = vpop.eup %8880  ;;  %v4801_v31 = vadd.f32 %v4737_v32, %v4604_v21  ;;  %v11994_v48 = vadd.f32 %v11740_v1, %v15090_v18  ;;  %v11998_v17 = vadd.f32 %v11740_v1, %v15092_v36  ;;  %v5327_v23 = vmul.f32 %v12003_v26, %v4079_v28  ;;  %15097 = vst [vmem:[#allocation16_spill] sm:$0xff] %v12028_v63 }
 0x23f   :  { %15089 = vst [vmem:[#allocation29_spill] sm:$0xff] %v11990_v5  ;;  %v8883_v37 = vpop.eup %8882  ;;  %v4802_v21 = vadd.f32 %v4738_v27, %v4605_v52  ;;  %v12007_v10 = vmul.f32 -1.442695, %v11973_v58  ;;  %v12010_v61 = vmul.f32 %v11833_v20, %v3960_v9  ;;  %v5984_v32 = vadd.f32 1.0, %v8877_v60  ;;  %v12025_v58 = vld [vmem:[#allocation3 + $0xf8] sm:$0xff] }
 0x240   :  { %15091 = vst [vmem:[#allocation15_spill] sm:$0xff] %v11994_v48  ;;  %15093 = vst [vmem:[#allocation17_spill] sm:$0xff] %v11998_v17  ;;  %v8885_v33 = vpop.eup %8884  ;;  %8894 = vrcp.f32 %v5982_v49  ;;  %v4934_v18 = vmul.f32 %v11937_v43, %v4276_v2  ;;  %v12014_v36 = vmul.f32 %v11807_v38, %v4093_v45  ;;  %v5391_v54 = vadd.f32 %v5327_v23, %v5194_v3 }
 0x241   :  { %15094 = vst [vmem:[#allocation30_spill] sm:$0xff] %v12007_v10  ;;  %v8887_v50 = vpop.eup %8886  ;;  %8896 = vrcp.f32 %v5983_v47  ;;  %v4935_v52 = vmul.f32 %v11937_v43, %v11986_v53  ;;  %v5195_v27 = vadd.f32 %v5131_v40, %v4997_v34  ;;  %v4015_v60 = vmul.f32 %v11833_v20, %v11927_v7  ;;  %v12035_v40 = vld [vmem:[%s14928_s4 + $0x8] ss:$0 sm:$0xff] }
 0x242   :  { %v8889_v9 = vpop.eup %8888  ;;  %v4148_v49 = vmul.f32 %v11807_v38, %v4079_v28  ;;  %v4998_v45 = vadd.f32 %v4934_v18, %v4801_v31  ;;  %v3731_v47 = vmul.f32 %v8881_v0, %v15096_v12  ;;  %v5328_v34 = vmul.f32 %v12003_v26, %v11967_v46 }
 0x243   :  { %v8891_v3 = vpop.eup %8890  ;;  %v4999_v23 = vadd.f32 %v4935_v52, %v4802_v21  ;;  %v5524_v7 = vmul.f32 %v12035_v40, %v4276_v2  ;;  %v3734_v28 = vmul.f32 %v8883_v37, %v11605_v39  ;;  %v5985_v31 = vadd.f32 1.0, %v8879_v42  ;;  %v12043_v21 = vld [vmem:[#allocation3 + $0xf1] sm:$0xff]  ;;  %v12049_v37 = vld [vmem:[#allocation3 + $0xf9] sm:$0xff] }
 0x244   :  { %v8893_v10 = vpop.eup %8892  ;;  %8898 = vrcp.f32 %v5984_v32  ;;  %v5132_v12 = vmul.f32 %v11961_v62, %v12016_v8  ;;  %3884 = vst.msk [vmem:[#allocation3 + $0x109] sm:$0xff] %vm3775_vm8, %v3731_v47  ;;  %v3732_v0 = vmul.f32 %v8885_v33, %v11612_v30  ;;  %v5133_v18 = vmul.f32 %v11961_v62, %v12025_v58  ;;  %v4290_v33 = vld [vmem:[#allocation3 + $0x1b2] sm:$0xff] }
 0x245   :  { %v5392_v52 = vadd.f32 %v5328_v34, %v5195_v27  ;;  %v5588_v63 = vadd.f32 %v5524_v7, %v5391_v54  ;;  %3887 = vst.msk [vmem:[#allocation3 + $0x129] sm:$0xff] %vm3775_vm8, %v3734_v28  ;;  %v3737_v39 = vmul.f32 %v8887_v50, %v11630_v16  ;;  %v4212_v42 = vadd.f32 %v4148_v49, %v4015_v60  ;;  %v4278_v60 = vld [vmem:[#allocation3 + $0xf2] sm:$0xff]  ;;  %v12084_v34 = vld [vmem:[#allocation3 + $0xfa] sm:$0xff] }
 0x246   :  { %v4345_v32 = vmul.f32 %v11882_v35, %v4276_v2  ;;  %v5196_v29 = vadd.f32 %v5132_v12, %v4998_v45  ;;  %3885 = vst.msk [vmem:[#allocation3 + $0x111] sm:$0xff] %vm3775_vm8, %v3732_v0  ;;  %v3735_v30 = vmul.f32 %v8889_v9, %v11655_v24  ;;  %v5197_v47 = vadd.f32 %v5133_v18, %v4999_v23  ;;  %v15099_v12 = vld [vmem:[#allocation18_spill] sm:$0xff] }
 0x247   :  { %v5525_v27 = vmul.f32 %v12035_v40, %v11986_v53  ;;  %3890 = vst.msk [vmem:[#allocation3 + $0x151] sm:$0xff] %vm3775_vm8, %v3737_v39  ;;  %v3738_v54 = vmul.f32 %v8891_v3, %v11744_v22  ;;  %v3736_v16 = vmul.f32 %v8893_v10, %v11816_v25  ;;  %v5329_v50 = vmul.f32 %v12003_v26, %v12043_v21  ;;  %v12076_v25 = vld [vmem:[%s14929_s5] ss:$0 sm:$0xff]  ;;  %v12082_v3 = vpop.f32.mrb[46].mxu0 }
 0x248   :  { %3888 = vst.msk [vmem:[#allocation3 + $0x139] sm:$0xff] %vm3775_vm8, %v3735_v30  ;;  %v12063_v2 = vmul.f32 -1.442695, %v11990_v5  ;;  %v12066_v24 = vmul.f32 -1.442695, %v11994_v48  ;;  %v5330_v22 = vmul.f32 %v12003_v26, %v12049_v37  ;;  %v5659_v10 = vmul.f32 %v12076_v25, %v5588_v63  ;;  %15098 = vst [vmem:[#allocation32_spill] sm:$0xff] %v12082_v3 }
 0x249   :  { %v12069_v9 = vmul.f32 -1.442695, %v11998_v17  ;;  %v5589_v49 = vadd.f32 %v5525_v27, %v5392_v52  ;;  %3891 = vst.msk [vmem:[#allocation3 + $0x159] sm:$0xff] %vm3775_vm8, %v3738_v54  ;;  %3889 = vst.msk [vmem:[#allocation3 + $0x141] sm:$0xff] %vm3775_vm8, %v3736_v16  ;;  %v4359_v45 = vmul.f32 %v11882_v35, %v4290_v33  ;;  %8900 = vrcp.f32 %v5985_v31  ;;  %v3961_v33 = vld [vmem:[#allocation3 + $0x1b8] sm:$0xff]  ;;  %v12103_v27 = vpop.f32.mrb[47].mxu0 }
 0x24a   :  { %v8895_v23 = vpop.eup %8894  ;;  %v5393_v7 = vadd.f32 %v5329_v50, %v5196_v29  ;;  %v4226_v28 = vadd.f32 %v12014_v36, %v12010_v61  ;;  %v12090_v0 = vadd.f32 %v11740_v1, %v15099_v12  ;;  %v4017_v18 = vmul.f32 %v11833_v20, %v12016_v8  ;;  %15101 = vst [vmem:[#allocation33_spill] sm:$0xff] %v12103_v27  ;;  %v15103_v50 = vld [vmem:[#allocation19_spill] sm:$0xff] }
 0x24b   :  { %v8897_v63 = vpop.eup %8896  ;;  %v4150_v52 = vmul.f32 %v11807_v38, %v12043_v21  ;;  %v4409_v39 = vadd.f32 %v4345_v32, %v4212_v42  ;;  %v5394_v30 = vadd.f32 %v5330_v22, %v5197_v47  ;;  %v4542_v31 = vmul.f32 %v11858_v14, %v12016_v8  ;;  %v12114_v8 = vld [vmem:[%s14930_s6] ss:$0 sm:$0xff] }
 0x24c   :  { %15100 = vst [vmem:[#allocation18_spill] sm:$0xff] %v12090_v0  ;;  %v5526_v29 = vmul.f32 %v12035_v40, %v4278_v60  ;;  %v4016_v61 = vmul.f32 %v11833_v20, %v11948_v4  ;;  %v4149_v36 = vmul.f32 %v11807_v38, %v11967_v46  ;;  %v12106_v54 = vmul.f32 %v8895_v23, %v11853_v51 }
 0x24d   :  { %v5527_v42 = vmul.f32 %v12035_v40, %v12084_v34  ;;  %v5660_v32 = vmul.f32 %v12076_v25, %v5589_v49  ;;  %v12117_v4 = vadd.f32 %v12114_v8, %v5659_v10  ;;  %v4018_v47 = vmul.f32 %v11833_v20, %v12025_v58 }
 0x24e   :  { %15102 = vst [vmem:[#allocation34_spill] sm:$0xff] %v12106_v54  ;;  %v8899_v46 = vpop.eup %8898  ;;  %v4151_v51 = vmul.f32 %v11807_v38, %v12049_v37  ;;  %v5590_v16 = vadd.f32 %v5526_v29, %v5393_v7  ;;  %v12125_v22 = vadd.f32 %v11740_v1, %v15103_v50  ;;  %v4606_v49 = vadd.f32 %v4542_v31, %v4409_v39  ;;  %v12148_v31 = vld [vmem:[#allocation3 + $0x108] sm:$0xff] }
 0x24f   :  { %v5591_v23 = vadd.f32 %v5527_v42, %v5394_v30  ;;  %v12127_v12 = vadd.f32 %v4359_v45, %v4226_v28  ;;  %v4030_v27 = vmul.f32 %v11833_v20, %v3961_v33  ;;  %v4214_v10 = vadd.f32 %v4150_v52, %v4017_v18  ;;  %v4094_v28 = vld [vmem:[#allocation3 + $0x1b9] sm:$0xff] }
 0x250   :  { %15104 = vst [vmem:[#allocation19_spill] sm:$0xff] %v12125_v22  ;;  %v4739_v3 = vmul.f32 %v11868_v41, %v12043_v21  ;;  %v4213_v17 = vadd.f32 %v4149_v36, %v4016_v61  ;;  %v12133_v48 = vmul.f32 -1.442695, %v12090_v0  ;;  %v12136_v7 = vmul.f32 %v8897_v63, %v11863_v15 }
 0x251   :  { %15105 = vst [vmem:[#allocation35_spill] sm:$0xff] %v12127_v12  ;;  %v6247_v29 = vsel %vm3775_vm8, %v12106_v54, 0.0  ;;  %v12141_v39 = vadd.f32 %v12114_v8, %v5660_v32  ;;  %v8221_v45 = vmul.f32 -1.442695, %v12117_v4  ;;  %v4215_v18 = vadd.f32 %v4151_v51, %v4018_v47 }
 0x252   :  { %15106 = vst [vmem:[#allocation36_spill] sm:$0xff] %v12136_v7  ;;  %v4347_v52 = vmul.f32 %v11882_v35, %v4278_v60  ;;  %v4346_v21 = vmul.f32 %v11882_v35, %v11986_v53  ;;  %v5661_v30 = vmul.f32 %v12076_v25, %v5590_v16  ;;  %v12151_v15 = vmul.f32 %v8899_v46, %v11887_v11  ;;  %v4291_v16 = vld [vmem:[#allocation3 + $0x1ba] sm:$0xff] }
 0x253   :  { %v4348_v63 = vmul.f32 %v11882_v35, %v12084_v34  ;;  %v5662_v61 = vmul.f32 %v12076_v25, %v5591_v23  ;;  %v4803_v36 = vadd.f32 %v4739_v3, %v4606_v49  ;;  %v8901_v33 = vpop.eup %8900  ;;  %v6248_v42 = vadd.f32 %v6247_v29, %v11969_v59 }
 0x254   :  { %15107 = vst [vmem:[#allocation37_spill] sm:$0xff] %v12151_v15  ;;  %v4936_v32 = vmul.f32 %v11937_v43, %v4278_v60  ;;  %v4410_v47 = vadd.f32 %v4346_v21, %v4213_v17  ;;  %v4163_v53 = vmul.f32 %v11807_v38, %v4094_v28  ;;  %v6249_v51 = vsel %vm3775_vm8, %v12136_v7, 0.0  ;;  %v4083_v28 = vld [vmem:[#allocation3 + $0x109] sm:$0xff]  ;;  %v4085_v21 = vld [vmem:[#allocation3 + $0x121] sm:$0xff] }
 0x255   :  { %8902 = vpow2.f32 %v8221_v45  ;;  %v8222_v11 = vmul.f32 -1.442695, %v12141_v39  ;;  %v5134_v46 = vmul.f32 %v11961_v62, %v12148_v31  ;;  %v4411_v50 = vadd.f32 %v4347_v52, %v4214_v10  ;;  %v15111_v7 = vld [vmem:[#allocation8_spill] sm:$0xff] }
 0x256   :  { %v4543_v3 = vmul.f32 %v11858_v14, %v12025_v58  ;;  %v4740_v59 = vmul.f32 %v11868_v41, %v12049_v37  ;;  %v12169_v17 = vadd.f32 %v12114_v8, %v5661_v30  ;;  %v12172_v60 = vmul.f32 %v8901_v33, %v11891_v55  ;;  %v3952_v37 = vld [vmem:[#allocation3 + $0x120] sm:$0xff]  ;;  %v15113_v33 = vld [vmem:[#allocation20_spill] sm:$0xff] }
 0x257   :  { %v6251_v49 = vsel %vm3775_vm8, %v12151_v15, 0.0  ;;  %v12177_v23 = vadd.f32 %v12114_v8, %v5662_v61  ;;  %v5000_v29 = vadd.f32 %v4936_v32, %v4803_v36  ;;  %v6250_v10 = vadd.f32 %v6249_v51, %v6248_v42 }
 0x258   :  { %15108 = vst [vmem:[#allocation38_spill] sm:$0xff] %v12169_v17  ;;  %15109 = vst [vmem:[#allocation39_spill] sm:$0xff] %v12172_v60  ;;  %v4607_v45 = vadd.f32 %v4543_v3, %v4410_v47  ;;  %v4227_v58 = vadd.f32 %v4163_v53, %v4030_v27  ;;  %v4360_v52 = vmul.f32 %v11882_v35, %v4291_v16  ;;  %8904 = vpow2.f32 %v8222_v11 }
 0x259   :  { %15110 = vst [vmem:[#allocation40_spill] sm:$0xff] %v12177_v23  ;;  %v5198_v30 = vadd.f32 %v5134_v46, %v5000_v29  ;;  %v12182_v55 = vadd.f32 %v11740_v1, %v15111_v7  ;;  %v12186_v15 = vadd.f32 %v11740_v1, %v15113_v33  ;;  %v6252_v61 = vadd.f32 %v6251_v49, %v6250_v10  ;;  %v15116_v49 = vld [vmem:[#allocation21_spill] sm:$0xff]  ;;  %v12214_v10 = vpop.f32.mrb[48].mxu0 }
 0x25a   :  { %v4412_v36 = vadd.f32 %v4348_v63, %v4215_v18  ;;  %v4937_v42 = vmul.f32 %v11937_v43, %v12084_v34  ;;  %v8223_v27 = vmul.f32 -1.442695, %v12169_v17  ;;  %v8224_v32 = vmul.f32 -1.442695, %v12177_v23  ;;  %v12200_v18 = vld [vmem:[#allocation3 + $0x10a] sm:$0xff]  ;;  %15118 = vst [vmem:[#allocation42_spill] sm:$0xff] %v12214_v10 }
 0x25b   :  { %15112 = vst [vmem:[#allocation8_spill] sm:$0xff] %v12182_v55  ;;  %15114 = vst [vmem:[#allocation20_spill] sm:$0xff] %v12186_v15  ;;  %v6253_v47 = vsel %vm3775_vm8, %v12172_v60, 0.0  ;;  %v5331_v53 = vmul.f32 %v12003_v26, %v4083_v28  ;;  %v12196_v7 = vmul.f32 -1.442695, %v12125_v22  ;;  %v4021_v51 = vmul.f32 %v11833_v20, %v3952_v37  ;;  %v4283_v10 = vld [vmem:[#allocation3 + $0x12a] sm:$0xff] }
 0x25c   :  { %v4154_v11 = vmul.f32 %v11807_v38, %v4085_v21  ;;  %v4804_v63 = vadd.f32 %v4740_v59, %v4607_v45  ;;  %v12202_v34 = vadd.f32 %v4360_v52, %v4227_v58  ;;  %v12205_v16 = vmul.f32 -1.442695, %v12182_v55  ;;  %v3951_v58 = vld [vmem:[#allocation3 + $0x110] sm:$0xff]  ;;  %v12223_v52 = vpop.f32.mrb[49].mxu0 }
 0x25d   :  { %v5395_v46 = vadd.f32 %v5331_v53, %v5198_v30  ;;  %v12208_v3 = vmul.f32 -1.442695, %v12186_v15  ;;  %v12212_v29 = vadd.f32 %v11740_v1, %v15116_v49  ;;  %8906 = vpow2.f32 %v8223_v27  ;;  %15119 = vst [vmem:[#allocation43_spill] sm:$0xff] %v12223_v52  ;;  %v15120_v27 = vld [vmem:[#allocation22_spill] sm:$0xff]  ;;  %v4282_v15 = vld [vmem:[#allocation3 + $0x122] sm:$0xff] }
 0x25e   :  { %15115 = vst [vmem:[#allocation41_spill] sm:$0xff] %v12202_v34  ;;  %v12216_v33 = vadd.f32 %v6253_v47, %v6252_v61  ;;  %v12219_v59 = vmul.f32 %v11858_v14, %v3952_v37  ;;  %v4544_v45 = vmul.f32 %v11858_v14, %v12148_v31  ;;  %8908 = vpow2.f32 %v8224_v32 }
 0x25f   :  { %15117 = vst [vmem:[#allocation21_spill] sm:$0xff] %v12212_v29  ;;  %v8903_v30 = vpop.eup %8902  ;;  %v12226_v53 = vmul.f32 %v11868_v41, %v4085_v21  ;;  %v5528_v49 = vmul.f32 %v12035_v40, %v12200_v18  ;;  %v12232_v61 = vadd.f32 %v11740_v1, %v15120_v27  ;;  %v12234_v47 = vadd.f32 %v4154_v11, %v4021_v51 }
 0x260   :  { %v12237_v60 = vmul.f32 %v11961_v62, %v3952_v37  ;;  %v12240_v54 = vmul.f32 %v12003_v26, %v4085_v21  ;;  %v5001_v23 = vadd.f32 %v4937_v42, %v4804_v63  ;;  %v5135_v32 = vmul.f32 %v11961_v62, %v3951_v58 }
 0x261   :  { %15121 = vst [vmem:[#allocation22_spill] sm:$0xff] %v12232_v61  ;;  %v5592_v17 = vadd.f32 %v5528_v49, %v5395_v46  ;;  %8910 = vpow2.f32 %v11977_v19  ;;  %v12246_v34 = vadd.f32 %v11740_v1, %v11819_v44  ;;  %v5986_v27 = vadd.f32 1.0, %v8903_v30  ;;  %v3953_v46 = vld [vmem:[#allocation3 + $0x128] sm:$0xff]  ;;  %v12272_v30 = vpop.f32.mrb[50].mxu0 }
 0x262   :  { %v4608_v12 = vadd.f32 %v4544_v45, %v4411_v50  ;;  %v4545_v51 = vmul.f32 %v11858_v14, %v3951_v58  ;;  %v12250_v37 = vmul.f32 -1.442695, %v12212_v29  ;;  %v8905_v11 = vpop.eup %8904  ;;  %8912 = vpow2.f32 %v11980_v57  ;;  %v4084_v57 = vld [vmem:[#allocation3 + $0x111] sm:$0xff]  ;;  %15125 = vst [vmem:[#allocation47_spill] sm:$0xff] %v12272_v30 }
 0x263   :  { %15122 = vst [vmem:[#allocation44_spill] sm:$0xff] %v12246_v34  ;;  %v12254_v21 = vmul.f32 -1.442695, %v12232_v61  ;;  %v12258_v19 = vadd.f32 %v11740_v1, %v11823_v56  ;;  %v12262_v44 = vadd.f32 %v11740_v1, %v11847_v13  ;;  %v4019_v50 = vmul.f32 %v11833_v20, %v12148_v31  ;;  %v4086_v56 = vld [vmem:[#allocation3 + $0x129] sm:$0xff] }
 0x264   :  { %v4152_v42 = vmul.f32 %v11807_v38, %v4083_v28  ;;  %v4741_v63 = vmul.f32 %v11868_v41, %v4083_v28  ;;  %v12270_v45 = vadd.f32 %v11740_v1, %v11894_v6  ;;  %v5199_v49 = vadd.f32 %v5135_v32, %v5001_v23  ;;  %v15127_v31 = vld [vmem:[#allocation31_spill] sm:$0xff] }
 0x265   :  { %15123 = vst [vmem:[#allocation45_spill] sm:$0xff] %v12262_v44  ;;  %v5663_v13 = vmul.f32 %v12076_v25, %v5592_v17  ;;  %v12276_v61 = vmul.f32 -1.442695, %v12246_v34  ;;  %v12280_v29 = vadd.f32 %v11740_v1, %v15127_v31  ;;  %v5987_v28 = vadd.f32 1.0, %v8905_v11  ;;  %v4281_v1 = vld [vmem:[#allocation3 + $0x112] sm:$0xff] }
 0x266   :  { %15124 = vst [vmem:[#allocation46_spill] sm:$0xff] %v12270_v45  ;;  %8914 = vrcp.f32 %v5986_v27  ;;  %v4805_v52 = vadd.f32 %v4741_v63, %v4608_v12  ;;  %v4609_v6 = vadd.f32 %v4545_v51, %v4412_v36  ;;  %v4022_v45 = vmul.f32 %v11833_v20, %v3953_v46 }
 0x267   :  { %15126 = vst [vmem:[#allocation48_spill] sm:$0xff] %v12276_v61  ;;  %15128 = vst [vmem:[#allocation31_spill] sm:$0xff] %v12280_v29  ;;  %v4020_v30 = vmul.f32 %v11833_v20, %v3951_v58  ;;  %v4153_v23 = vmul.f32 %v11807_v38, %v4084_v57  ;;  %v5332_v17 = vmul.f32 %v12003_v26, %v4084_v57  ;;  %v8907_v32 = vpop.eup %8906  ;;  %8916 = vrcp.f32 %v5987_v28 }
 0x268   :  { %v4216_v34 = vadd.f32 %v4152_v42, %v4019_v50  ;;  %v4155_v55 = vmul.f32 %v11807_v38, %v4086_v56  ;;  %v4742_v11 = vmul.f32 %v11868_v41, %v4084_v57  ;;  %v4938_v12 = vmul.f32 %v11937_v43, %v12200_v18  ;;  %v8909_v27 = vpop.eup %8908 }
 0x269   :  { %v4351_v36 = vmul.f32 %v11882_v35, %v4282_v15  ;;  %v4352_v51 = vmul.f32 %v11882_v35, %v4283_v10  ;;  %v5396_v58 = vadd.f32 %v5332_v17, %v5199_v49  ;;  %v12293_v63 = vadd.f32 %v12114_v8, %v5663_v13 }
 0x26a   :  { %v4547_v50 = vmul.f32 %v11858_v14, %v3953_v46  ;;  %v4806_v42 = vadd.f32 %v4742_v11, %v4609_v6  ;;  %v5002_v31 = vadd.f32 %v4938_v12, %v4805_v52  ;;  %v5988_v22 = vadd.f32 1.0, %v8907_v32 }
 0x26b   :  { %15129 = vst [vmem:[#allocation49_spill] sm:$0xff] %v12293_v63  ;;  %v8911_v29 = vpop.eup %8910  ;;  %v4217_v57 = vadd.f32 %v4153_v23, %v4020_v30  ;;  %v4349_v0 = vmul.f32 %v11882_v35, %v12200_v18  ;;  %v5529_v5 = vmul.f32 %v12035_v40, %v4281_v1  ;;  %v5989_v44 = vadd.f32 1.0, %v8909_v27 }
 0x26c   :  { %v4219_v61 = vadd.f32 %v4155_v55, %v4022_v45  ;;  %v12300_v49 = vmul.f32 %v11868_v41, %v4086_v56  ;;  %v4939_v13 = vmul.f32 %v11937_v43, %v4281_v1  ;;  %v8913_v28 = vpop.eup %8912  ;;  %v4415_v17 = vadd.f32 %v4351_v36, %v12234_v47 }
 0x26d   :  { %v4350_v52 = vmul.f32 %v11882_v35, %v4281_v1  ;;  %v5593_v6 = vadd.f32 %v5529_v5, %v5396_v58  ;;  %v8225_v30 = vmul.f32 -1.442695, %v12293_v63  ;;  %v12307_v23 = vmul.f32 %v11937_v43, %v4282_v15 }
 0x26e   :  { %v12310_v18 = vmul.f32 %v11937_v43, %v4283_v10  ;;  %v5003_v55 = vadd.f32 %v4939_v13, %v4806_v42  ;;  %v5200_v45 = vadd.f32 %v12237_v60, %v5002_v31  ;;  %8918 = vrcp.f32 %v5988_v22  ;;  %v3956_v42 = vld [vmem:[#allocation3 + $0x150] sm:$0xff]  ;;  %v15131_v31 = vld [vmem:[#allocation30_spill] sm:$0xff] }
 0x26f   :  { %v4413_v32 = vadd.f32 %v4349_v0, %v4216_v34  ;;  %v4414_v11 = vadd.f32 %v4350_v52, %v4217_v57  ;;  %v3549_v12 = vadd.f32 1.0, %v8911_v29  ;;  %8920 = vrcp.f32 %v5989_v44  ;;  %v4089_v60 = vld [vmem:[#allocation3 + $0x151] sm:$0xff]  ;;  %v4087_v57 = vld [vmem:[#allocation3 + $0x139] sm:$0xff] }
 0x270   :  { %v8915_v27 = vpop.eup %8914  ;;  %v12313_v47 = vadd.f32 %v4352_v51, %v4219_v61  ;;  %v5137_v5 = vmul.f32 %v11961_v62, %v3953_v46  ;;  %v3547_v1 = vadd.f32 1.0, %v8913_v28  ;;  %v5334_v36 = vmul.f32 %v12003_v26, %v4086_v56  ;;  %v3954_v46 = vld [vmem:[#allocation3 + $0x138] sm:$0xff] }
 0x271   :  { %v5530_v58 = vmul.f32 %v12035_v40, %v4282_v15  ;;  %v5664_v63 = vmul.f32 %v12076_v25, %v5593_v6  ;;  %8922 = vpow2.f32 %v8225_v30  ;;  %v5531_v0 = vmul.f32 %v12035_v40, %v4283_v10  ;;  %v8917_v15 = vpop.eup %8916 }
 0x272   :  { %v5201_v22 = vadd.f32 %v5137_v5, %v5003_v55  ;;  %v5397_v34 = vadd.f32 %v12240_v54, %v5200_v45  ;;  %8924 = vrcp.f32 %v3549_v12  ;;  %v12322_v29 = vmul.f32 %v8915_v27, %v12117_v4  ;;  %v12333_v54 = vpop.f32.mrb[51].mxu0  ;;  %v12373_v27 = vld [vmem:[#allocation3 + $0x158] sm:$0xff] }
 0x273   :  { %v4610_v61 = vadd.f32 %v12219_v59, %v4413_v32  ;;  %v12325_v44 = vadd.f32 %v4547_v50, %v4414_v11  ;;  %8926 = vrcp.f32 %v3547_v1  ;;  %v4025_v56 = vmul.f32 %v11833_v20, %v3956_v42 }
 0x274   :  { %15130 = vst [vmem:[#allocation50_spill] sm:$0xff] %v12322_v29  ;;  %v4158_v51 = vmul.f32 %v11807_v38, %v4089_v60  ;;  %v12330_v10 = vmul.f32 %v11858_v14, %v3956_v42  ;;  %8928 = vpow2.f32 %v15131_v31  ;;  %v12336_v4 = vadd.f32 %v12114_v8, %v5664_v63 }
 0x275   :  { %v12339_v59 = vmul.f32 %v11868_v41, %v4089_v60  ;;  %v12342_v50 = vmul.f32 %v11961_v62, %v3956_v42  ;;  %8930 = vpow2.f32 %v12063_v2  ;;  %v5398_v13 = vadd.f32 %v5334_v36, %v5201_v22  ;;  %v12389_v42 = vld [vmem:[#allocation3 + $0x152] sm:$0xff]  ;;  %v15139_v22 = vld [vmem:[#allocation11_spill] sm:$0xff] }
 0x276   :  { %15132 = vst [vmem:[#allocation30_spill] sm:$0xff] %v12336_v4  ;;  %v12345_v28 = vadd.f32 %v5530_v58, %v5397_v34  ;;  %v4548_v52 = vmul.f32 %v11858_v14, %v3954_v46  ;;  %8932 = vpow2.f32 %v12066_v24  ;;  %v12350_v6 = vmul.f32 %v8917_v15, %v12141_v39  ;;  %v12387_v58 = vld [vmem:[#allocation3 + $0x159] sm:$0xff] }
 0x277   :  { %v6255_v8 = vsel %vm3775_vm8, %v12322_v29, 0.0  ;;  %v4807_v63 = vadd.f32 %v12226_v53, %v4610_v61  ;;  %8934 = vpow2.f32 %v12069_v9  ;;  %v12356_v30 = vadd.f32 %v4158_v51, %v4025_v56  ;;  %v3955_v56 = vld [vmem:[#allocation3 + $0x140] sm:$0xff] }
 0x278   :  { %15133 = vst [vmem:[#allocation51_spill] sm:$0xff] %v12345_v28  ;;  %15134 = vst [vmem:[#allocation52_spill] sm:$0xff] %v12350_v6  ;;  %v4023_v2 = vmul.f32 %v11833_v20, %v3954_v46  ;;  %v4156_v55 = vmul.f32 %v11807_v38, %v4087_v57  ;;  %8936 = vpow2.f32 %v12133_v48  ;;  %v12361_v45 = vpop.eup %8918  ;;  %v8226_v24 = vmul.f32 -1.442695, %v12336_v4  ;;  %v12688_v28 = vld [vmem:[%s14928_s4 + $0x2] ss:$0 sm:$0xff] }
 0x279   :  { %15135 = vst [vmem:[#allocation53_spill] sm:$0xff] %v12361_v45  ;;  %v12365_v39 = vmul.f32 %v12003_v26, %v4089_v60  ;;  %v5138_v32 = vmul.f32 %v11961_v62, %v3954_v46  ;;  %8938 = vpow2.f32 %v12196_v7  ;;  %v12369_v9 = vpop.eup %8920  ;;  %v6256_v53 = vadd.f32 %v6255_v8, %v12216_v33  ;;  %v15142_v8 = vld [vmem:[#allocation48_spill] sm:$0xff] }
 0x27a   :  { %15137 = vst [vmem:[#allocation55_spill] sm:$0xff] %v12369_v9  ;;  %v4612_v11 = vadd.f32 %v4548_v52, %v4415_v17  ;;  %v4745_v12 = vmul.f32 %v11868_v41, %v4087_v57  ;;  %8940 = vpow2.f32 %v12205_v16  ;;  %v6257_v5 = vsel %vm3775_vm8, %v12350_v6, 0.0 }
 0x27b   :  { %15136 = vst [vmem:[#allocation54_spill] sm:$0xff] %v12365_v39  ;;  %v12376_v48 = vpop.eup %8922  ;;  %v12380_v1 = vadd.f32 %v5531_v0, %v5398_v13  ;;  %v5004_v7 = vadd.f32 %v12307_v23, %v4807_v63  ;;  %8942 = vpow2.f32 %v12208_v3  ;;  %v12384_v33 = vadd.f32 %v4156_v55, %v4023_v2  ;;  %v12397_v3 = vld [vmem:[#allocation3 + $0x15a] sm:$0xff] }
 0x27c   :  { %v8925_v36 = vpop.eup %8924  ;;  %v5335_v17 = vmul.f32 %v12003_v26, %v4087_v57  ;;  %8944 = vpow2.f32 %v12250_v37  ;;  %v8172_v16 = vmul.f32 -1.442695, %v12258_v19  ;;  %v12395_v23 = vmul.f32 %v11833_v20, %v12373_v27  ;;  %v15141_v37 = vld [vmem:[#allocation13_spill] sm:$0xff]  ;;  %v12424_v55 = vld [vmem:[#allocation3 + $0x141] sm:$0xff] }
 0x27d   :  { %15138 = vst [vmem:[#allocation56_spill] sm:$0xff] %v12380_v1  ;;  %v8927_v60 = vpop.eup %8926  ;;  %8946 = vpow2.f32 %v8226_v24  ;;  %v5202_v0 = vadd.f32 %v5138_v32, %v5004_v7  ;;  %v3741_v34 = vmul.f32 %v8925_v36, %v15139_v22  ;;  %v12400_v46 = vadd.f32 %v6257_v5, %v6256_v53 }
 0x27e   :  { %v8929_v61 = vpop.eup %8928  ;;  %v12402_v15 = vadd.f32 %v4745_v12, %v4612_v11  ;;  %v3739_v51 = vmul.f32 %v8927_v60, %v15141_v37  ;;  %8948 = vpow2.f32 %v12254_v21  ;;  %v12408_v57 = vmul.f32 %v11807_v38, %v12387_v58  ;;  %v4284_v11 = vld [vmem:[#allocation3 + $0x13a] sm:$0xff] }
 0x27f   :  { %15140 = vst [vmem:[#allocation11_spill] sm:$0xff] %v12400_v46  ;;  %v8931_v31 = vpop.eup %8930  ;;  %v12412_v13 = vmul.f32 %v11882_v35, %v12389_v42  ;;  %3894 = vst.msk [vmem:[#allocation3 + $0x181] sm:$0xff] %vm3775_vm8, %v3741_v34  ;;  %v3550_v52 = vadd.f32 1.0, %v8929_v61  ;;  %8950 = vpow2.f32 %v15142_v8  ;;  %v12418_v2 = vmul.f32 %v11882_v35, %v12397_v3  ;;  %v12445_v8 = vpop.f32.mrb[52].mxu0 }
 0x280   :  { %v8933_v63 = vpop.eup %8932  ;;  %v12422_v21 = vmul.f32 %v11858_v14, %v12373_v27  ;;  %3892 = vst.msk [vmem:[#allocation3 + $0x169] sm:$0xff] %vm3775_vm8, %v3739_v51  ;;  %v3548_v24 = vadd.f32 1.0, %v8931_v31  ;;  %8952 = vpow2.f32 %v8172_v16  ;;  %v12427_v53 = vadd.f32 %v5335_v17, %v5202_v0  ;;  %v15144_v31 = vld [vmem:[#allocation45_spill] sm:$0xff] }
 0x281   :  { %v8935_v32 = vpop.eup %8934  ;;  %v4549_v12 = vmul.f32 %v11858_v14, %v3955_v56  ;;  %8954 = vrcp.f32 %v3550_v52  ;;  %v3553_v5 = vadd.f32 1.0, %v8933_v63  ;;  %v12432_v36 = vmul.f32 %v11868_v41, %v12387_v58  ;;  %v12441_v14 = vld [vmem:[#allocation3 + $0x142] sm:$0xff] }
 0x282   :  { %v8937_v7 = vpop.eup %8936  ;;  %v12436_v60 = vmul.f32 %v11937_v43, %v12389_v42  ;;  %8956 = vrcp.f32 %v3548_v24  ;;  %v3551_v22 = vadd.f32 1.0, %v8935_v32  ;;  %v4024_v17 = vmul.f32 %v11833_v20, %v3955_v56  ;;  %v12450_v32 = vpop.f32.mrb[53].mxu0 }
 0x283   :  { %15143 = vst [vmem:[#allocation13_spill] sm:$0xff] %v12432_v36  ;;  %v8939_v16 = vpop.eup %8938  ;;  %v4157_v0 = vmul.f32 %v11807_v38, %v12424_v55  ;;  %8958 = vrcp.f32 %v3553_v5  ;;  %v3554_v34 = vadd.f32 1.0, %v8937_v7  ;;  %v4353_v37 = vmul.f32 %v11882_v35, %v4284_v11 }
 0x284   :  { %v8941_v61 = vpop.eup %8940  ;;  %8960 = vrcp.f32 %v3551_v22  ;;  %v3552_v51 = vadd.f32 1.0, %v8939_v16  ;;  %v8175_v52 = vmul.f32 -1.442695, %v15144_v31  ;;  %v4613_v24 = vadd.f32 %v4549_v12, %v12313_v47 }
 0x285   :  { %v8943_v63 = vpop.eup %8942  ;;  %v4808_v20 = vadd.f32 %v12300_v49, %v12325_v44  ;;  %8962 = vrcp.f32 %v3554_v34  ;;  %v3557_v38 = vadd.f32 1.0, %v8941_v61  ;;  %v12454_v7 = vmul.f32 %v11937_v43, %v12397_v3  ;;  %v12461_v44 = vpop.f32.mrb[54].mxu0 }
 0x286   :  { %v8945_v5 = vpop.eup %8944  ;;  %v4354_v22 = vmul.f32 %v11882_v35, %v12441_v14  ;;  %8964 = vrcp.f32 %v3552_v51  ;;  %v3555_v16 = vadd.f32 1.0, %v8943_v63  ;;  %v4221_v29 = vadd.f32 %v4157_v0, %v4024_v17 }
 0x287   :  { %15145 = vst [vmem:[#allocation48_spill] sm:$0xff] %v12454_v7  ;;  %v8947_v6 = vpop.eup %8946  ;;  %v4746_v47 = vmul.f32 %v11868_v41, %v12424_v55  ;;  %v5139_v49 = vmul.f32 %v11961_v62, %v3955_v56  ;;  %8966 = vrcp.f32 %v3557_v38  ;;  %v5990_v34 = vadd.f32 1.0, %v12376_v48 }
 0x288   :  { %v12463_v12 = vpop.eup %8948  ;;  %v4417_v61 = vadd.f32 %v4353_v37, %v12384_v33  ;;  %v4942_v35 = vmul.f32 %v11937_v43, %v4284_v11  ;;  %8968 = vpow2.f32 %v8175_v52  ;;  %v5005_v0 = vadd.f32 %v12310_v18, %v4808_v20 }
 0x289   :  { %v12468_v51 = vpop.eup %8950  ;;  %v4810_v17 = vadd.f32 %v4746_v47, %v4613_v24  ;;  %8970 = vrcp.f32 %v3555_v16  ;;  %v3558_v41 = vadd.f32 1.0, %v8945_v5  ;;  %v4223_v63 = vadd.f32 %v12408_v57, %v12395_v23  ;;  %v15146_v57 = vld [vmem:[#allocation14_spill] sm:$0xff]  ;;  %v15147_v16 = vld [vmem:[#allocation29_spill] sm:$0xff] }
 0x28a   :  { %v12471_v56 = vpop.eup %8952  ;;  %v12477_v48 = vadd.f32 %v12412_v13, %v12356_v30  ;;  %v5141_v33 = vmul.f32 %v11961_v62, %v12373_v27  ;;  %v4943_v37 = vmul.f32 %v11937_v43, %v12441_v14  ;;  %v4418_v24 = vadd.f32 %v4354_v22, %v4221_v29 }
 0x28b   :  { %v8955_v52 = vpop.eup %8954  ;;  %v5006_v18 = vadd.f32 %v4942_v35, %v12402_v15  ;;  %v5203_v20 = vadd.f32 %v5139_v49, %v5005_v0  ;;  %8972 = vrcp.f32 %v3558_v41  ;;  %v5336_v23 = vmul.f32 %v12003_v26, %v12424_v55  ;;  %v15154_v0 = vld [vmem:[#allocation18_spill] sm:$0xff] }
 0x28c   :  { %v8957_v38 = vpop.eup %8956  ;;  %8974 = vrcp.f32 %v5990_v34  ;;  %v5532_v30 = vmul.f32 %v12035_v40, %v4284_v11  ;;  %v3742_v13 = vmul.f32 %v8955_v52, %v15146_v57  ;;  %v5991_v62 = vadd.f32 1.0, %v8947_v6  ;;  %v15150_v11 = vld [vmem:[#allocation15_spill] sm:$0xff]  ;;  %v15164_v57 = vld [vmem:[#allocation33_spill] sm:$0xff] }
 0x28d   :  { %v8959_v5 = vpop.eup %8958  ;;  %v4614_v27 = vadd.f32 %v12330_v10, %v4417_v61  ;;  %v5007_v43 = vadd.f32 %v4943_v37, %v4810_v17  ;;  %v3740_v29 = vmul.f32 %v8957_v38, %v15147_v16  ;;  %v12492_v15 = vmul.f32 %v12003_v26, %v12387_v58  ;;  %v15152_v61 = vld [vmem:[#allocation17_spill] sm:$0xff] }
 0x28e   :  { %v8961_v22 = vpop.eup %8960  ;;  %v12496_v47 = vmul.f32 %v12035_v40, %v12389_v42  ;;  %v5596_v55 = vadd.f32 %v5532_v30, %v12427_v53  ;;  %3895 = vst.msk [vmem:[#allocation3 + $0x189] sm:$0xff] %vm3775_vm8, %v3742_v13  ;;  %v3745_v6 = vmul.f32 %v8959_v5, %v15150_v11  ;;  %v12502_v10 = vadd.f32 %v12418_v2, %v4223_v63  ;;  %v15166_v5 = vld [vmem:[#allocation42_spill] sm:$0xff] }
 0x28f   :  { %15148 = vst [vmem:[#allocation45_spill] sm:$0xff] %v12492_v15  ;;  %v8963_v49 = vpop.eup %8962  ;;  %v12506_v34 = vmul.f32 %v12035_v40, %v12397_v3  ;;  %v5400_v58 = vadd.f32 %v5336_v23, %v5203_v20  ;;  %3893 = vst.msk [vmem:[#allocation3 + $0x171] sm:$0xff] %vm3775_vm8, %v3740_v29  ;;  %v3743_v42 = vmul.f32 %v8961_v22, %v15152_v61  ;;  %8976 = vrcp.f32 %v5991_v62  ;;  %v15161_v20 = vld [vmem:[#allocation32_spill] sm:$0xff]  ;;  %v15169_v22 = vld [vmem:[#allocation43_spill] sm:$0xff] }
 0x290   :  { %15149 = vst [vmem:[#allocation14_spill] sm:$0xff] %v12496_v47  ;;  %v8965_v35 = vpop.eup %8964  ;;  %v12511_v53 = vadd.f32 %v12422_v21, %v4418_v24  ;;  %v12514_v17 = vadd.f32 %v12342_v50, %v5006_v18  ;;  %v5533_v2 = vmul.f32 %v12035_v40, %v12441_v14  ;;  %3898 = vst.msk [vmem:[#allocation3 + $0x1e1] sm:$0xff] %vm3775_vm8, %v3745_v6  ;;  %v15156_v21 = vld [vmem:[#allocation19_spill] sm:$0xff]  ;;  %v15158_v40 = vld [vmem:[#allocation8_spill] sm:$0xff]  ;;  %v3556_v30 = vadd.f32 1.0, %v12463_v12 }
 0x291   :  { %15151 = vst [vmem:[#allocation29_spill] sm:$0xff] %v12506_v34  ;;  %v3746_v3 = vmul.f32 %v8963_v49, %v15154_v0  ;;  %v8967_v41 = vpop.eup %8966  ;;  %v12520_v63 = vadd.f32 %v5141_v33, %v5007_v43  ;;  %v4811_v37 = vadd.f32 %v12339_v59, %v4614_v27  ;;  %3896 = vst.msk [vmem:[#allocation3 + $0x1c9] sm:$0xff] %vm3775_vm8, %v3743_v42  ;;  %v12533_v18 = vld [vmem:[%s14927_s3] ss:$0 sm:$0xff]  ;;  %v15159_v33 = vld [vmem:[#allocation16_spill] sm:$0xff]  ;;  %v3561_v29 = vadd.f32 1.0, %v12468_v51 }
 0x292   :  { %15153 = vst [vmem:[#allocation15_spill] sm:$0xff] %v12514_v17  ;;  %v3744_v52 = vmul.f32 %v8965_v35, %v15156_v21  ;;  %v8969_v24 = vpop.eup %8968  ;;  %v12526_v50 = vmul.f32 %v12076_v25, %v5596_v55  ;;  %v3749_v14 = vmul.f32 %v8967_v41, %v15158_v40  ;;  %v12537_v59 = vadd.f32 %v12533_v18, %v15159_v33  ;;  %v3958_v27 = vld [vmem:[#allocation3 + $0x168] sm:$0xff]  ;;  %v15176_v0 = vld [vmem:[#allocation21_spill] sm:$0xff] }
 0x293   :  { %15155 = vst [vmem:[#allocation17_spill] sm:$0xff] %v12520_v63  ;;  %3899 = vst.msk [vmem:[#allocation3 + $0x1e9] sm:$0xff] %vm3775_vm8, %v3746_v3  ;;  %v12541_v38 = vadd.f32 %v12533_v18, %v15161_v20  ;;  %v8971_v23 = vpop.eup %8970  ;;  %v12543_v25 = vadd.f32 %v5533_v2, %v5400_v58  ;;  %v12549_v13 = vadd.f32 %v12533_v18, %v15164_v57  ;;  %v15168_v43 = vld [vmem:[#allocation20_spill] sm:$0xff]  ;;  %v15171_v12 = vld [vmem:[#allocation47_spill] sm:$0xff]  ;;  %v3559_v49 = vadd.f32 1.0, %v12471_v56 }
 0x294   :  { %15157 = vst [vmem:[#allocation18_spill] sm:$0xff] %v12526_v50  ;;  %15160 = vst [vmem:[#allocation19_spill] sm:$0xff] %v12537_v59  ;;  %v12553_v62 = vadd.f32 %v12533_v18, %v15166_v5  ;;  %v3747_v16 = vmul.f32 %v8971_v23, %v15168_v43  ;;  %v12560_v55 = vadd.f32 %v12533_v18, %v15169_v22  ;;  %v15173_v58 = vld [vmem:[#allocation46_spill] sm:$0xff]  ;;  %v15174_v42 = vld [vmem:[#allocation31_spill] sm:$0xff]  ;;  %v3562_v41 = vadd.f32 1.0, %v8969_v24 }
 0x295   :  { %15162 = vst [vmem:[#allocation8_spill] sm:$0xff] %v12541_v38  ;;  %15163 = vst [vmem:[#allocation16_spill] sm:$0xff] %v12543_v25  ;;  %v12564_v11 = vadd.f32 %v12533_v18, %v15171_v12  ;;  %v8973_v6 = vpop.eup %8972  ;;  %v8173_v61 = vmul.f32 -1.442695, %v15173_v58  ;;  %v8178_v35 = vmul.f32 -1.442695, %v15174_v42  ;;  %v12571_v2 = vadd.f32 %v12533_v18, %v12333_v54 }
 0x296   :  { %3897 = vst.msk [vmem:[#allocation3 + $0x1d1] sm:$0xff] %vm3775_vm8, %v3744_v52  ;;  %15165 = vst [vmem:[#allocation32_spill] sm:$0xff] %v12549_v13  ;;  %v8975_v51 = vpop.eup %8974  ;;  %v3750_v3 = vmul.f32 %v8973_v6, %v15176_v0  ;;  %v8176_v21 = vmul.f32 -1.442695, %v12537_v59  ;;  %v8179_v52 = vmul.f32 -1.442695, %v12541_v38  ;;  %8978 = vrcp.f32 %v3556_v30 }
 0x297   :  { %15167 = vst [vmem:[#allocation33_spill] sm:$0xff] %v12553_v62  ;;  %3902 = vst.msk [vmem:[#allocation3 + $0x211] sm:$0xff] %vm3775_vm8, %v3749_v14  ;;  %v4091_v40 = vld [vmem:[#allocation3 + $0x169] sm:$0xff]  ;;  %v12580_v56 = vld [vmem:[%s14928_s4 + $0x3] ss:$0 sm:$0xff]  ;;  %v5008_v24 = vadd.f32 %v12436_v60, %v4811_v37  ;;  %8980 = vrcp.f32 %v3561_v29  ;;  %v12599_v60 = vadd.f32 %v12533_v18, %v12445_v8 }
 0x298   :  { %15170 = vst [vmem:[#allocation42_spill] sm:$0xff] %v12560_v55  ;;  %15172 = vst [vmem:[#allocation20_spill] sm:$0xff] %v12564_v11  ;;  %v4552_v14 = vmul.f32 %v12580_v56, %v3958_v27  ;;  %v8177_v54 = vmul.f32 -1.442695, %v12549_v13  ;;  %v8182_v33 = vmul.f32 -1.442695, %v12553_v62  ;;  %8982 = vrcp.f32 %v3559_v49 }
 0x299   :  { %15175 = vst [vmem:[#allocation43_spill] sm:$0xff] %v12571_v2  ;;  %3900 = vst.msk [vmem:[#allocation3 + $0x1f9] sm:$0xff] %vm3775_vm8, %v3747_v16  ;;  %v4485_v20 = vld [vmem:[#allocation3 + $0x180] sm:$0xff]  ;;  %v8180_v23 = vmul.f32 -1.442695, %v12560_v55  ;;  %v15178_v5 = vld [vmem:[#allocation49_spill] sm:$0xff]  ;;  %8984 = vrcp.f32 %v3562_v41 }
 0x29a   :  { %3903 = vst.msk [vmem:[#allocation3 + $0x219] sm:$0xff] %vm3775_vm8, %v3750_v3  ;;  %v12589_v57 = vmul.f32 -1.442695, %v12564_v11  ;;  %v12592_v43 = vmul.f32 %v8975_v51, %v15178_v5  ;;  %v4682_v16 = vld [vmem:[#allocation3 + $0x181] sm:$0xff]  ;;  %v12595_v22 = vmul.f32 -1.442695, %v12571_v2  ;;  %v12619_v51 = vpop.eup %8976  ;;  %v12622_v0 = vmul.f32 %v12580_v56, %v4485_v20 }
 0x29b   :  { %v3962_v30 = vld [vmem:[#allocation3 + $0x1c8] sm:$0xff]  ;;  %15181 = vst [vmem:[#allocation57_spill] sm:$0xff] %v12599_v60  ;;  %v12604_v37 = vld [vmem:[%s14928_s4] ss:$0 sm:$0xff]  ;;  %v12610_v12 = vld [vmem:[%s14928_s4 + $0x1] ss:$0 sm:$0xff]  ;;  %v4616_v3 = vadd.f32 %v4552_v14, %v12477_v48  ;;  %8986 = vpow2.f32 %v8173_v61  ;;  %v12627_v5 = vadd.f32 %v12533_v18, %v12450_v32  ;;  %v12640_v48 = vadd.f32 %v12533_v18, %v12461_v44 }
 0x29c   :  { %15177 = vst [vmem:[#allocation47_spill] sm:$0xff] %v12589_v57  ;;  %15179 = vst [vmem:[#allocation21_spill] sm:$0xff] %v12592_v43  ;;  %v4027_v29 = vmul.f32 %v12604_v37, %v3958_v27  ;;  %v4160_v6 = vmul.f32 %v12610_v12, %v4091_v40  ;;  %v12616_v49 = vld [vmem:[%s14928_s4 + $0x6] ss:$0 sm:$0xff]  ;;  %v12632_v43 = vld [vmem:[%s14928_s4 + $0x4] ss:$0 sm:$0xff]  ;;  %8988 = vpow2.f32 %v8178_v35  ;;  %v12647_v14 = vmul.f32 %v12003_v26, %v4091_v40 }
 0x29d   :  { %15180 = vst [vmem:[#allocation49_spill] sm:$0xff] %v12595_v22  ;;  %15182 = vst [vmem:[#allocation58_spill] sm:$0xff] %v12616_v49  ;;  %v5142_v8 = vmul.f32 %v12616_v49, %v3958_v27  ;;  %v12635_v27 = vmul.f32 %v12632_v43, %v4682_v16  ;;  %v4095_v41 = vld [vmem:[#allocation3 + $0x1c9] sm:$0xff]  ;;  %v12643_v61 = vmul.f32 %v12616_v49, %v4485_v20  ;;  %8990 = vpow2.f32 %v8176_v21  ;;  %v12656_v50 = vld [vmem:[#allocation3 + $0x171] sm:$0xff] }
 0x29e   :  { %15183 = vst [vmem:[#allocation59_spill] sm:$0xff] %v12619_v51  ;;  %15184 = vst [vmem:[#allocation60_spill] sm:$0xff] %v12627_v5  ;;  %v4556_v51 = vmul.f32 %v12580_v56, %v3962_v30  ;;  %v4749_v32 = vmul.f32 %v12632_v43, %v4091_v40  ;;  %v4486_v4 = vld [vmem:[#allocation3 + $0x188] sm:$0xff]  ;;  %v4224_v16 = vadd.f32 %v4160_v6, %v4027_v29  ;;  %v12651_v9 = vld [vmem:[#allocation3 + $0x170] sm:$0xff]  ;;  %8992 = vpow2.f32 %v8179_v52  ;;  %v12664_v40 = vpop.f32.mrb[55].mxu0 }
 0x29f   :  { %15185 = vst [vmem:[#allocation61_spill] sm:$0xff] %v12635_v27  ;;  %15186 = vst [vmem:[#allocation62_spill] sm:$0xff] %v12640_v48  ;;  %v12649_v46 = vadd.f32 %v5142_v8, %v5008_v24  ;;  %v15190_v35 = vld [vmem:[#allocation35_spill] sm:$0xff]  ;;  %v12658_v20 = vld [vmem:[#allocation3 + $0x16a] sm:$0xff]  ;;  %v4753_v25 = vmul.f32 %v12632_v43, %v4095_v41  ;;  %8994 = vpow2.f32 %v8177_v54  ;;  %v12662_v21 = vmul.f32 -1.442695, %v12599_v60 }
 0x2a0   :  { %15187 = vst [vmem:[#allocation63_spill] sm:$0xff] %v12643_v61  ;;  %15188 = vst [vmem:[#allocation64_spill] sm:$0xff] %v12647_v14  ;;  %v4620_v45 = vadd.f32 %v4556_v51, %v15190_v35  ;;  %v12654_v44 = vadd.f32 %v4749_v32, %v4616_v3  ;;  %v3963_v26 = vld [vmem:[#allocation3 + $0x1d0] sm:$0xff]  ;;  %v12667_v24 = vmul.f32 %v12580_v56, %v4486_v4  ;;  %8996 = vpow2.f32 %v8182_v33  ;;  %v12675_v51 = vpop.eup %8978  ;;  %v12757_v62 = vld [vmem:[%s14928_s4 + $0x8] ss:$0 sm:$0xff] }
 0x2a1   :  { %15189 = vst [vmem:[#allocation65_spill] sm:$0xff] %v12649_v46  ;;  %15192 = vst [vmem:[#allocation66_spill] sm:$0xff] %v12662_v21  ;;  %v4289_v29 = vld [vmem:[#allocation3 + $0x172] sm:$0xff]  ;;  %v4292_v52 = vld [vmem:[#allocation3 + $0x1ca] sm:$0xff]  ;;  %v12670_v6 = vmul.f32 -1.442695, %v12627_v5  ;;  %v4031_v54 = vmul.f32 %v12604_v37, %v3962_v30  ;;  %v4164_v3 = vmul.f32 %v12610_v12, %v4095_v41  ;;  %8998 = vpow2.f32 %v8180_v23  ;;  %v12679_v4 = vpop.eup %8980 }
 0x2a2   :  { %15191 = vst [vmem:[#allocation35_spill] sm:$0xff] %v12654_v44  ;;  %v12673_v8 = vmul.f32 -1.442695, %v12640_v48  ;;  %v4817_v32 = vadd.f32 %v4753_v25, %v4620_v45  ;;  %v4096_v35 = vld [vmem:[#allocation3 + $0x1d1] sm:$0xff]  ;;  %v4028_v33 = vmul.f32 %v12604_v37, %v12651_v9  ;;  %v4161_v1 = vmul.f32 %v12610_v12, %v12656_v50  ;;  %v3964_v41 = vld [vmem:[#allocation3 + $0x1e0] sm:$0xff]  ;;  %v12693_v25 = vpop.eup %8982  ;;  %v3965_v44 = vld [vmem:[#allocation3 + $0x1e8] sm:$0xff] }
 0x2a3   :  { %15193 = vst [vmem:[#allocation67_spill] sm:$0xff] %v12670_v6  ;;  %v4357_v30 = vmul.f32 %v12688_v28, %v12658_v20  ;;  %v4557_v45 = vmul.f32 %v12580_v56, %v3963_v26  ;;  %v12696_v23 = vmul.f32 %v12688_v28, %v4289_v29  ;;  %v4553_v34 = vmul.f32 %v12580_v56, %v12651_v9  ;;  %v4097_v48 = vld [vmem:[#allocation3 + $0x1e1] sm:$0xff]  ;;  %v4293_v14 = vld [vmem:[#allocation3 + $0x1d2] sm:$0xff]  ;;  %v12710_v63 = vpop.eup %8984  ;;  %v4295_v57 = vld [vmem:[#allocation3 + $0x1ea] sm:$0xff] }
 0x2a4   :  { %15194 = vst [vmem:[#allocation68_spill] sm:$0xff] %v12673_v8  ;;  %v12702_v47 = vmul.f32 %v12632_v43, %v12656_v50  ;;  %v12707_v46 = vld [vmem:[%s14928_s4 + $0x5] ss:$0 sm:$0xff]  ;;  %v15198_v61 = vld [vmem:[#allocation41_spill] sm:$0xff]  ;;  %v4754_v5 = vmul.f32 %v12632_v43, %v4096_v35  ;;  %v5148_v2 = vmul.f32 %v12616_v49, %v3964_v41  ;;  %v4228_v11 = vadd.f32 %v4164_v3, %v4031_v54  ;;  %v4098_v3 = vld [vmem:[#allocation3 + $0x1e9] sm:$0xff] }
 0x2a5   :  { %v4950_v15 = vmul.f32 %v12707_v46, %v4292_v52  ;;  %v12714_v39 = vmul.f32 %v12707_v46, %v12658_v20  ;;  %v12717_v17 = vmul.f32 %v12707_v46, %v4289_v29  ;;  %v4621_v8 = vadd.f32 %v4557_v45, %v15198_v61  ;;  %v12721_v60 = vpop.eup %8986 }
 0x2a6   :  { %15195 = vst [vmem:[#allocation69_spill] sm:$0xff] %v12702_v47  ;;  %v4361_v55 = vmul.f32 %v12688_v28, %v4292_v52  ;;  %v12725_v6 = vpop.eup %8988  ;;  %v4166_v29 = vmul.f32 %v12610_v12, %v4097_v48  ;;  %v4951_v45 = vmul.f32 %v12707_v46, %v4293_v14  ;;  %v12734_v27 = vadd.f32 %v4161_v1, %v4028_v33 }
 0x2a7   :  { %15196 = vst [vmem:[#allocation70_spill] sm:$0xff] %v12714_v39  ;;  %15197 = vst [vmem:[#allocation71_spill] sm:$0xff] %v12717_v17  ;;  %v5014_v7 = vadd.f32 %v4950_v15, %v4817_v32  ;;  %v4033_v39 = vmul.f32 %v12604_v37, %v3964_v41  ;;  %v12729_v17 = vld [vmem:[#allocation3 + $0x1e2] sm:$0xff]  ;;  %v4818_v61 = vadd.f32 %v4754_v5, %v4621_v8  ;;  %v12732_v21 = vpop.eup %8990 }
 0x2a8   :  { %v12736_v54 = vadd.f32 %v4357_v30, %v4224_v16  ;;  %v12741_v15 = vld [vmem:[%s14928_s4 + $0x7] ss:$0 sm:$0xff]  ;;  %v12744_v22 = vpop.eup %8992  ;;  %v5149_v5 = vmul.f32 %v12616_v49, %v3965_v44  ;;  %v4032_v8 = vmul.f32 %v12604_v37, %v3963_v26  ;;  %v4165_v1 = vmul.f32 %v12610_v12, %v4096_v35 }
 0x2a9   :  { %v5345_v52 = vmul.f32 %v12741_v15, %v4097_v48  ;;  %v5212_v32 = vadd.f32 %v5148_v2, %v5014_v7  ;;  %v5015_v33 = vadd.f32 %v4951_v45, %v4818_v61  ;;  %v12749_v16 = vpop.eup %8994  ;;  %v12752_v30 = vadd.f32 %v4553_v34, %v12502_v10 }
 0x2aa   :  { %v5542_v7 = vmul.f32 %v12757_v62, %v12729_v17  ;;  %v4425_v2 = vadd.f32 %v4361_v55, %v4228_v11  ;;  %v12761_v26 = vpop.eup %8996  ;;  %v4230_v35 = vadd.f32 %v4166_v29, %v4033_v39  ;;  %v4558_v61 = vmul.f32 %v12580_v56, %v3964_v41 }
 0x2ab   :  { %15199 = vst [vmem:[#allocation41_spill] sm:$0xff] %v12752_v30  ;;  %v5409_v13 = vadd.f32 %v5345_v52, %v5212_v32  ;;  %v5346_v45 = vmul.f32 %v12741_v15, %v4098_v3  ;;  %v5213_v10 = vadd.f32 %v5149_v5, %v5015_v33  ;;  %v12765_v34 = vpop.eup %8998  ;;  %v4034_v38 = vmul.f32 %v12604_v37, %v3965_v44  ;;  %v3968_v5 = vld [vmem:[#allocation3 + $0x210] sm:$0xff] }
 0x2ac   :  { %v4167_v59 = vmul.f32 %v12610_v12, %v4098_v3  ;;  %v4363_v42 = vmul.f32 %v12688_v28, %v12729_v17  ;;  %v12773_v55 = vmul.f32 %v12616_v49, %v12651_v9  ;;  %v5543_v39 = vmul.f32 %v12757_v62, %v4295_v57  ;;  %v4101_v33 = vld [vmem:[#allocation3 + $0x211] sm:$0xff] }
 0x2ad   :  { %v5606_v58 = vadd.f32 %v5542_v7, %v5409_v13  ;;  %v4229_v11 = vadd.f32 %v4165_v1, %v4032_v8  ;;  %v5410_v41 = vadd.f32 %v5346_v45, %v5213_v10  ;;  %v12778_v29 = vmul.f32 %v12741_v15, %v12656_v50  ;;  %v12787_v13 = vld [vmem:[%s14929_s5] ss:$0 sm:$0xff]  ;;  %v3966_v45 = vld [vmem:[#allocation3 + $0x1f8] sm:$0xff] }
 0x2ae   :  { %15200 = vst [vmem:[#allocation72_spill] sm:$0xff] %v12773_v55  ;;  %v12782_v52 = vmul.f32 %v12757_v62, %v12658_v20  ;;  %v4622_v32 = vadd.f32 %v4558_v61, %v4425_v2  ;;  %v4755_v8 = vmul.f32 %v12632_v43, %v4097_v48  ;;  %v4364_v1 = vmul.f32 %v12688_v28, %v4295_v57  ;;  %v12793_v20 = vpop.f32.mrb[56].mxu0 }
 0x2af   :  { %15201 = vst [vmem:[#allocation73_spill] sm:$0xff] %v12778_v29  ;;  %v5677_v9 = vmul.f32 %v12787_v13, %v5606_v58  ;;  %v4362_v50 = vmul.f32 %v12688_v28, %v4293_v14  ;;  %v5607_v7 = vadd.f32 %v5543_v39, %v5410_v41  ;;  %v4231_v2 = vadd.f32 %v4167_v59, %v4034_v38  ;;  %v12799_v58 = vld [vmem:[%s14930_s6] ss:$0 sm:$0xff]  ;;  %v12804_v48 = vpop.f32.mrb[57].mxu0 }
 0x2b0   :  { %15202 = vst [vmem:[#allocation74_spill] sm:$0xff] %v12782_v52  ;;  %v4427_v61 = vadd.f32 %v4363_v42, %v4230_v35  ;;  %v4559_v10 = vmul.f32 %v12580_v56, %v3965_v44  ;;  %v4037_v39 = vmul.f32 %v12604_v37, %v3968_v5  ;;  %v4170_v59 = vmul.f32 %v12610_v12, %v4101_v33  ;;  %v12809_v38 = vpop.f32.mrb[58].mxu0  ;;  %v4099_v42 = vld [vmem:[#allocation3 + $0x1f9] sm:$0xff] }
 0x2b1   :  { %v12802_v52 = vadd.f32 %v12799_v58, %v5677_v9  ;;  %v4426_v29 = vadd.f32 %v4362_v50, %v4229_v11  ;;  %v5678_v14 = vmul.f32 %v12787_v13, %v5607_v7  ;;  %v4560_v44 = vmul.f32 %v12580_v56, %v3966_v45  ;;  %v15204_v41 = vld [vmem:[#allocation22_spill] sm:$0xff]  ;;  %v15205_v9 = vld [vmem:[#allocation44_spill] sm:$0xff] }
 0x2b2   :  { %v4819_v35 = vadd.f32 %v4755_v8, %v4622_v32  ;;  %v3748_v55 = vmul.f32 %v12675_v51, %v15204_v41  ;;  %v3753_v47 = vmul.f32 %v12679_v4, %v15205_v9  ;;  %v4756_v11 = vmul.f32 %v12632_v43, %v4098_v3  ;;  %v3969_v41 = vld [vmem:[#allocation3 + $0x218] sm:$0xff] }
 0x2b3   :  { %15203 = vst [vmem:[#allocation75_spill] sm:$0xff] %v12802_v52  ;;  %v12818_v50 = vadd.f32 %v12799_v58, %v5678_v14  ;;  %v3751_v7 = vmul.f32 %v12693_v25, %v12258_v19  ;;  %v3754_v30 = vmul.f32 %v12710_v63, %v15144_v31  ;;  %v4952_v32 = vmul.f32 %v12707_v46, %v12729_v17  ;;  %v4102_v3 = vld [vmem:[#allocation3 + $0x219] sm:$0xff]  ;;  %v12833_v19 = vpop.f32.mrb[59].mxu0 }
 0x2b4   :  { %v4953_v8 = vmul.f32 %v12707_v46, %v4295_v57  ;;  %v8239_v51 = vmul.f32 -1.442695, %v12802_v52  ;;  %v5150_v4 = vmul.f32 %v12616_v49, %v3966_v45  ;;  %v12829_v9 = vld [vmem:[#allocation3 + $0x212] sm:$0xff]  ;;  %3901 = vst.msk [vmem:[#allocation3 + $0x201] sm:$0xff] %vm3775_vm8, %v3748_v55  ;;  %3906 = vst.msk [vmem:[#allocation3 + $0x241] sm:$0xff] %vm3775_vm8, %v3753_v47  ;;  %v4428_v31 = vadd.f32 %v4364_v1, %v4231_v2  ;;  %v12845_v1 = vld [vmem:[#allocation3 + $0x21a] sm:$0xff] }
 0x2b5   :  { %15206 = vst [vmem:[#allocation22_spill] sm:$0xff] %v12818_v50  ;;  %v4623_v63 = vadd.f32 %v4559_v10, %v4426_v29  ;;  %v4035_v17 = vmul.f32 %v12604_v37, %v3966_v45  ;;  %v4168_v57 = vmul.f32 %v12610_v12, %v4099_v42  ;;  %3904 = vst.msk [vmem:[#allocation3 + $0x229] sm:$0xff] %vm3775_vm8, %v3751_v7  ;;  %v8240_v47 = vmul.f32 -1.442695, %v12818_v50 }
 0x2b6   :  { %3907 = vst.msk [vmem:[#allocation3 + $0x249] sm:$0xff] %vm3775_vm8, %v3754_v30  ;;  %v4234_v25 = vadd.f32 %v4170_v59, %v4037_v39  ;;  %v12840_v14 = vmul.f32 %v12580_v56, %v3968_v5  ;;  %v4624_v52 = vadd.f32 %v4560_v44, %v4427_v61  ;;  %v5016_v55 = vadd.f32 %v4952_v32, %v4819_v35 }
 0x2b7   :  { %v4038_v36 = vmul.f32 %v12604_v37, %v3969_v41  ;;  %v4171_v29 = vmul.f32 %v12610_v12, %v4102_v3  ;;  %v4367_v45 = vmul.f32 %v12688_v28, %v12829_v9  ;;  %9000 = vpow2.f32 %v8239_v51 }
 0x2b8   :  { %v12850_v30 = vmul.f32 %v12632_v43, %v4101_v33  ;;  %v4757_v2 = vmul.f32 %v12632_v43, %v4099_v42  ;;  %v5214_v10 = vadd.f32 %v5150_v4, %v5016_v55  ;;  %v5152_v61 = vmul.f32 %v12616_v49, %v3968_v5 }
 0x2b9   :  { %v5349_v39 = vmul.f32 %v12741_v15, %v4101_v33  ;;  %v12855_v59 = vadd.f32 %v4168_v57, %v4035_v17  ;;  %v4820_v44 = vadd.f32 %v4756_v11, %v4623_v63  ;;  %v5347_v7 = vmul.f32 %v12741_v15, %v4099_v42 }
 0x2ba   :  { %v4821_v35 = vadd.f32 %v4757_v2, %v4624_v52  ;;  %v12860_v32 = vmul.f32 %v12688_v28, %v12845_v1  ;;  %v12863_v51 = vmul.f32 %v12580_v56, %v3969_v41  ;;  %9002 = vpow2.f32 %v8240_v47 }
 0x2bb   :  { %v12865_v50 = vadd.f32 %v4171_v29, %v4038_v36  ;;  %v12867_v4 = vadd.f32 %v4367_v45, %v4234_v25  ;;  %v12870_v5 = vmul.f32 %v12632_v43, %v4102_v3  ;;  %v3967_v33 = vld [vmem:[#allocation3 + $0x200] sm:$0xff]  ;;  %v5411_v63 = vadd.f32 %v5347_v7, %v5214_v10 }
 0x2bc   :  { %15207 = vst [vmem:[#allocation44_spill] sm:$0xff] %v12863_v51  ;;  %v4100_v11 = vld [vmem:[#allocation3 + $0x201] sm:$0xff]  ;;  %v5153_v42 = vmul.f32 %v12616_v49, %v3969_v41  ;;  %v5350_v17 = vmul.f32 %v12741_v15, %v4102_v3  ;;  %v4561_v57 = vmul.f32 %v12580_v56, %v3967_v33  ;;  %v5546_v55 = vmul.f32 %v12757_v62, %v12829_v9 }
 0x2bd   :  { %15208 = vst [vmem:[#allocation76_spill] sm:$0xff] %v12867_v4  ;;  %15209 = vst [vmem:[#allocation77_spill] sm:$0xff] %v12870_v5  ;;  %v4296_v52 = vld [vmem:[#allocation3 + $0x1fa] sm:$0xff]  ;;  %v12877_v36 = vld [vmem:[#allocation3 + $0x202] sm:$0xff]  ;;  %v5017_v47 = vadd.f32 %v4953_v8, %v4820_v44  ;;  %v3560_v29 = vadd.f32 1.0, %v12721_v60  ;;  %v4758_v2 = vmul.f32 %v12632_v43, %v4100_v11  ;;  %v5151_v10 = vmul.f32 %v12616_v49, %v3967_v33 }
 0x2be   :  { %v4954_v25 = vmul.f32 %v12707_v46, %v4296_v52  ;;  %v4625_v45 = vadd.f32 %v4561_v57, %v4428_v31  ;;  %v3565_v41 = vadd.f32 1.0, %v12725_v6  ;;  %v5544_v7 = vmul.f32 %v12757_v62, %v4296_v52 }
 0x2bf   :  { %v3563_v5 = vadd.f32 1.0, %v12732_v21  ;;  %v3566_v4 = vadd.f32 1.0, %v12744_v22  ;;  %v4955_v8 = vmul.f32 %v12707_v46, %v12877_v36  ;;  %v5215_v44 = vadd.f32 %v5151_v10, %v5017_v47  ;;  %v12893_v22 = vpop.f32.mrb[60].mxu0 }
 0x2c0   :  { %v5018_v3 = vadd.f32 %v4954_v25, %v4821_v35  ;;  %v4822_v51 = vadd.f32 %v4758_v2, %v4625_v45  ;;  %v5348_v60 = vmul.f32 %v12741_v15, %v4100_v11  ;;  %v5608_v57 = vadd.f32 %v5544_v7, %v5411_v63 }
 0x2c1   :  { %9004 = vrcp.f32 %v3560_v29  ;;  %v3564_v49 = vadd.f32 1.0, %v12749_v16  ;;  %v9001_v6 = vpop.eup %9000  ;;  %v5545_v21 = vmul.f32 %v12757_v62, %v12877_v36  ;;  %v3569_v47 = vadd.f32 1.0, %v12761_v26 }
 0x2c2   :  { %v5216_v31 = vadd.f32 %v5152_v61, %v5018_v3  ;;  %v5019_v35 = vadd.f32 %v4955_v8, %v4822_v51  ;;  %v5412_v25 = vadd.f32 %v5348_v60, %v5215_v44  ;;  %9006 = vrcp.f32 %v3565_v41  ;;  %v12897_v61 = vpop.f32.mrb[61].mxu0 }
 0x2c3   :  { %v5679_v2 = vmul.f32 %v12787_v13, %v5608_v57  ;;  %9008 = vrcp.f32 %v3563_v5  ;;  %v5547_v16 = vmul.f32 %v12757_v62, %v12845_v1  ;;  %v6004_v10 = vadd.f32 1.0, %v9001_v6 }
 0x2c4   :  { %v5413_v45 = vadd.f32 %v5349_v39, %v5216_v31  ;;  %v5217_v63 = vadd.f32 %v5153_v42, %v5019_v35  ;;  %v5609_v51 = vadd.f32 %v5545_v21, %v5412_v25  ;;  %9010 = vrcp.f32 %v3566_v4  ;;  %v9003_v29 = vpop.eup %9002  ;;  %v4683_v35 = vld [vmem:[#allocation3 + $0x189] sm:$0xff] }
 0x2c5   :  { %v4365_v41 = vmul.f32 %v12688_v28, %v4296_v52  ;;  %v12903_v39 = vadd.f32 %v12799_v58, %v5679_v2  ;;  %9012 = vrcp.f32 %v3564_v49  ;;  %v12908_v26 = vadd.f32 %v12533_v18, %v12664_v40 }
 0x2c6   :  { %v5610_v3 = vadd.f32 %v5546_v55, %v5413_v45  ;;  %v5414_v7 = vadd.f32 %v5350_v17, %v5217_v63  ;;  %v5680_v5 = vmul.f32 %v12787_v13, %v5609_v51  ;;  %v4036_v42 = vmul.f32 %v12604_v37, %v3967_v33  ;;  %v4105_v51 = vld [vmem:[#allocation3 + $0x241] sm:$0xff] }
 0x2c7   :  { %15210 = vst [vmem:[#allocation78_spill] sm:$0xff] %v12908_v26  ;;  %v8241_v8 = vmul.f32 -1.442695, %v12903_v39  ;;  %9014 = vrcp.f32 %v3569_v47  ;;  %v6005_v52 = vadd.f32 1.0, %v9003_v29  ;;  %v4169_v55 = vmul.f32 %v12610_v12, %v4100_v11  ;;  %v3970_v29 = vld [vmem:[#allocation3 + $0x228] sm:$0xff] }
 0x2c8   :  { %v5681_v4 = vmul.f32 %v12787_v13, %v5610_v3  ;;  %v5611_v44 = vadd.f32 %v5547_v16, %v5414_v7  ;;  %v12915_v17 = vadd.f32 %v12799_v58, %v5680_v5  ;;  %9016 = vrcp.f32 %v6004_v10  ;;  %v15221_v5 = vld [vmem:[#allocation13_spill] sm:$0xff] }
 0x2c9   :  { %v4429_v49 = vadd.f32 %v4365_v41, %v12855_v59  ;;  %v12923_v33 = vadd.f32 %v12533_v18, %v12793_v20  ;;  %v12927_v60 = vmul.f32 %v12707_v46, %v12829_v9  ;;  %v12931_v11 = vmul.f32 %v12707_v46, %v12845_v1 }
 0x2ca   :  { %v12919_v40 = vadd.f32 %v12799_v58, %v5681_v4  ;;  %v12935_v31 = vadd.f32 %v12533_v18, %v12804_v48  ;;  %v12939_v59 = vadd.f32 %v12533_v18, %v12809_v38  ;;  %v5682_v20 = vmul.f32 %v12787_v13, %v5611_v44  ;;  %v4103_v44 = vld [vmem:[#allocation3 + $0x229] sm:$0xff] }
 0x2cb   :  { %15211 = vst [vmem:[#allocation79_spill] sm:$0xff] %v12923_v33  ;;  %v9005_v57 = vpop.eup %9004  ;;  %9018 = vpow2.f32 %v8241_v8  ;;  %v8242_v6 = vmul.f32 -1.442695, %v12915_v17  ;;  %v12945_v9 = vadd.f32 %v12533_v18, %v12833_v19  ;;  %v12949_v48 = vadd.f32 %v12860_v32, %v12865_v50  ;;  %v3972_v32 = vld [vmem:[#allocation3 + $0x240] sm:$0xff] }
 0x2cc   :  { %15212 = vst [vmem:[#allocation80_spill] sm:$0xff] %v12935_v31  ;;  %15213 = vst [vmem:[#allocation81_spill] sm:$0xff] %v12939_v59  ;;  %v9007_v1 = vpop.eup %9006  ;;  %9020 = vrcp.f32 %v6005_v52  ;;  %v4233_v25 = vadd.f32 %v4169_v55, %v4036_v42  ;;  %v4422_v38 = vadd.f32 %v12696_v23, %v12734_v27  ;;  %v4626_v45 = vadd.f32 %v12840_v14, %v4429_v49 }
 0x2cd   :  { %15214 = vst [vmem:[#allocation82_spill] sm:$0xff] %v12945_v9  ;;  %v9009_v21 = vpop.eup %9008  ;;  %v8243_v2 = vmul.f32 -1.442695, %v12919_v40  ;;  %v12956_v47 = vmul.f32 -1.442695, %v12908_v26  ;;  %v4366_v50 = vmul.f32 %v12688_v28, %v12877_v36  ;;  %v12964_v63 = vadd.f32 1.0, %v12765_v34 }
 0x2ce   :  { %v12959_v19 = vmul.f32 -1.442695, %v12923_v33  ;;  %v9011_v16 = vpop.eup %9010  ;;  %v12967_v27 = vmul.f32 -1.442695, %v12935_v31  ;;  %v12970_v23 = vmul.f32 -1.442695, %v12939_v59  ;;  %v12973_v14 = vadd.f32 %v12799_v58, %v5682_v20 }
 0x2cf   :  { %15215 = vst [vmem:[#allocation83_spill] sm:$0xff] %v12956_v47  ;;  %9022 = vpow2.f32 %v8242_v6  ;;  %v12976_v10 = vmul.f32 -1.442695, %v12945_v9  ;;  %v12980_v36 = vadd.f32 %v12622_v0, %v12736_v54  ;;  %v9013_v34 = vpop.eup %9012  ;;  %v4430_v41 = vadd.f32 %v4366_v50, %v4233_v25  ;;  %v15222_v0 = vld [vmem:[#allocation41_spill] sm:$0xff]  ;;  %v15225_v20 = vld [vmem:[#allocation58_spill] sm:$0xff]  ;;  %v15230_v59 = vld [vmem:[#allocation44_spill] sm:$0xff] }
 0x2d0   :  { %15216 = vst [vmem:[#allocation84_spill] sm:$0xff] %v12959_v19  ;;  %15217 = vst [vmem:[#allocation85_spill] sm:$0xff] %v12967_v27  ;;  %v12983_v3 = vadd.f32 %v12667_v24, %v4422_v38  ;;  %v12986_v7 = vmul.f32 %v12632_v43, %v4683_v35  ;;  %v12990_v42 = vadd.f32 %v15221_v5, %v12511_v53  ;;  %9024 = vpow2.f32 %v8243_v2  ;;  %v15223_v54 = vld [vmem:[#allocation69_spill] sm:$0xff]  ;;  %v13001_v35 = vld [vmem:[#allocation3 + $0x248] sm:$0xff]  ;;  %v13017_v27 = vpop.f32.mrb[62].mxu0 }
 0x2d1   :  { %15218 = vst [vmem:[#allocation86_spill] sm:$0xff] %v12970_v23  ;;  %15219 = vst [vmem:[#allocation87_spill] sm:$0xff] %v12973_v14  ;;  %v9015_v4 = vpop.eup %9014  ;;  %v4041_v8 = vmul.f32 %v12604_v37, %v3972_v32  ;;  %v4823_v52 = vadd.f32 %v12850_v30, %v4626_v45  ;;  %v12996_v55 = vadd.f32 %v15223_v54, %v15222_v0  ;;  %v13003_v53 = vld [vmem:[#allocation3 + $0x249] sm:$0xff]  ;;  %v15226_v25 = vld [vmem:[#allocation46_spill] sm:$0xff]  ;;  %v8244_v30 = vmul.f32 -1.442695, %v12973_v14 }
 0x2d2   :  { %15220 = vst [vmem:[#allocation88_spill] sm:$0xff] %v12976_v10  ;;  %v4174_v24 = vmul.f32 %v12610_v12, %v4105_v51  ;;  %v4564_v49 = vmul.f32 %v12580_v56, %v3970_v29  ;;  %v5154_v6 = vmul.f32 %v15225_v20, %v3970_v29  ;;  %v3752_v38 = vmul.f32 %v9005_v57, %v15226_v25  ;;  %v9017_v2 = vpop.eup %9016  ;;  %v15227_v45 = vld [vmem:[#allocation31_spill] sm:$0xff]  ;;  %v15229_v54 = vld [vmem:[#allocation8_spill] sm:$0xff]  ;;  %v15232_v57 = vld [vmem:[#allocation33_spill] sm:$0xff] }
 0x2d3   :  { %15224 = vst [vmem:[#allocation13_spill] sm:$0xff] %v12996_v55  ;;  %v3757_v50 = vmul.f32 %v9007_v1, %v15227_v45  ;;  %v15228_v5 = vld [vmem:[#allocation19_spill] sm:$0xff]  ;;  %v3758_v9 = vmul.f32 %v9011_v16, %v15229_v54  ;;  %v4627_v31 = vadd.f32 %v15230_v59, %v4430_v41  ;;  %v4039_v33 = vmul.f32 %v12604_v37, %v3970_v29  ;;  %v15231_v10 = vld [vmem:[#allocation32_spill] sm:$0xff]  ;;  %v13028_v29 = vpop.f32.mrb[63].mxu0 }
 0x2d4   :  { %v3755_v0 = vmul.f32 %v9009_v21, %v15228_v5  ;;  %v13012_v26 = vld [vmem:[#allocation3 + $0x242] sm:$0xff]  ;;  %3905 = vst.msk [vmem:[#allocation3 + $0x231] sm:$0xff] %vm3775_vm8, %v3752_v38  ;;  %v3756_v23 = vmul.f32 %v9013_v34, %v15231_v10  ;;  %v3761_v25 = vmul.f32 %v9015_v4, %v15232_v57  ;;  %v4172_v1 = vmul.f32 %v12610_v12, %v4103_v44 }
 0x2d5   :  { %v9019_v19 = vpop.eup %9018  ;;  %v5020_v21 = vadd.f32 %v12927_v60, %v4823_v52  ;;  %v4042_v59 = vmul.f32 %v12604_v37, %v13001_v35  ;;  %v4175_v16 = vmul.f32 %v12610_v12, %v13003_v53  ;;  %3910 = vst.msk [vmem:[#allocation3 + $0x271] sm:$0xff] %vm3775_vm8, %v3757_v50  ;;  %3911 = vst.msk [vmem:[#allocation3 + $0x279] sm:$0xff] %vm3775_vm8, %v3758_v9  ;;  %v15233_v34 = vld [vmem:[#allocation75_spill] sm:$0xff]  ;;  %v15235_v52 = vld [vmem:[#allocation76_spill] sm:$0xff]  ;;  %9026 = vpow2.f32 %v8244_v30 }
 0x2d6   :  { %3908 = vst.msk [vmem:[#allocation3 + $0x259] sm:$0xff] %vm3775_vm8, %v3755_v0  ;;  %v9021_v10 = vpop.eup %9020  ;;  %v13031_v41 = vmul.f32 %v9017_v2, %v15233_v34  ;;  %v4238_v4 = vadd.f32 %v4174_v24, %v4041_v8  ;;  %v13034_v60 = vmul.f32 %v12580_v56, %v3972_v32  ;;  %v4628_v38 = vadd.f32 %v4564_v49, %v15235_v52  ;;  %v13042_v50 = vld [vmem:[#allocation3 + $0x24a] sm:$0xff]  ;;  %v15236_v0 = vld [vmem:[#allocation22_spill] sm:$0xff] }
 0x2d7   :  { %3909 = vst.msk [vmem:[#allocation3 + $0x261] sm:$0xff] %vm3775_vm8, %v3756_v23  ;;  %3914 = vst.msk [vmem:[#allocation3 + $0x2a1] sm:$0xff] %vm3775_vm8, %v3761_v25  ;;  %v13040_v45 = vmul.f32 %v12632_v43, %v4105_v51  ;;  %v5218_v9 = vadd.f32 %v5154_v6, %v5020_v21  ;;  %v4371_v2 = vmul.f32 %v12688_v28, %v13012_v26  ;;  %v6006_v8 = vadd.f32 1.0, %v9019_v19 }
 0x2d8   :  { %15234 = vst [vmem:[#allocation41_spill] sm:$0xff] %v13031_v41  ;;  %v5156_v24 = vmul.f32 %v15225_v20, %v3972_v32  ;;  %v5353_v5 = vmul.f32 %v12741_v15, %v4105_v51  ;;  %v4761_v49 = vmul.f32 %v12632_v43, %v4103_v44  ;;  %v13050_v54 = vmul.f32 %v9021_v10, %v15236_v0 }
 0x2d9   :  { %v9023_v23 = vpop.eup %9022  ;;  %v4236_v30 = vadd.f32 %v4172_v1, %v4039_v33  ;;  %v5351_v57 = vmul.f32 %v12741_v15, %v4103_v44  ;;  %v4239_v6 = vadd.f32 %v4175_v16, %v4042_v59  ;;  %v6297_v25 = vsel %vm3775_vm8, %v13031_v41, 0.0  ;;  %v15239_v16 = vld [vmem:[#allocation77_spill] sm:$0xff] }
 0x2da   :  { %15237 = vst [vmem:[#allocation69_spill] sm:$0xff] %v13050_v54  ;;  %v4825_v21 = vadd.f32 %v4761_v49, %v4628_v38  ;;  %v4372_v19 = vmul.f32 %v12688_v28, %v13042_v50  ;;  %v13059_v32 = vmul.f32 %v12580_v56, %v13001_v35  ;;  %v9025_v51 = vpop.eup %9024  ;;  %v13061_v52 = vadd.f32 %v4371_v2, %v4238_v4 }
 0x2db   :  { %v5415_v34 = vadd.f32 %v5351_v57, %v5218_v9  ;;  %v13065_v33 = vmul.f32 %v12632_v43, %v13003_v53  ;;  %v3971_v44 = vld [vmem:[#allocation3 + $0x230] sm:$0xff]  ;;  %v4824_v10 = vadd.f32 %v15239_v16, %v4627_v31  ;;  %v6007_v38 = vadd.f32 1.0, %v9023_v23 }
 0x2dc   :  { %v4104_v1 = vld [vmem:[#allocation3 + $0x231] sm:$0xff]  ;;  %9028 = vrcp.f32 %v6006_v8  ;;  %v13070_v49 = vmul.f32 %v12707_v46, %v13012_v26  ;;  %v4565_v0 = vmul.f32 %v12580_v56, %v3971_v44  ;;  %v6298_v4 = vsel %vm3775_vm8, %v13050_v54, 0.0 }
 0x2dd   :  { %15238 = vst [vmem:[#allocation58_spill] sm:$0xff] %v13065_v33  ;;  %v4300_v59 = vld [vmem:[#allocation3 + $0x22a] sm:$0xff]  ;;  %v13075_v9 = vadd.f32 %v4372_v19, %v4239_v6  ;;  %v13079_v2 = vmul.f32 %v12707_v46, %v13042_v50  ;;  %v4301_v57 = vld [vmem:[#allocation3 + $0x232] sm:$0xff]  ;;  %v6008_v23 = vadd.f32 1.0, %v9025_v51  ;;  %v5157_v8 = vmul.f32 %v15225_v20, %v13001_v35 }
 0x2de   :  { %v4958_v31 = vmul.f32 %v12707_v46, %v4300_v59  ;;  %v4629_v16 = vadd.f32 %v4565_v0, %v12949_v48  ;;  %v4762_v41 = vmul.f32 %v12632_v43, %v4104_v1  ;;  %v5021_v47 = vadd.f32 %v12931_v11, %v4824_v10 }
 0x2df   :  { %15240 = vst [vmem:[#allocation46_spill] sm:$0xff] %v13075_v9  ;;  %15241 = vst [vmem:[#allocation31_spill] sm:$0xff] %v13079_v2  ;;  %v5155_v6 = vmul.f32 %v15225_v20, %v3971_v44  ;;  %v5548_v19 = vmul.f32 %v12757_v62, %v4300_v59  ;;  %9030 = vrcp.f32 %v6007_v38  ;;  %v5354_v55 = vmul.f32 %v12741_v15, %v13003_v53  ;;  %v9027_v9 = vpop.eup %9026 }
 0x2e0   :  { %v5022_v54 = vadd.f32 %v4958_v31, %v4825_v21  ;;  %v4826_v2 = vadd.f32 %v4762_v41, %v4629_v16  ;;  %v4959_v51 = vmul.f32 %v12707_v46, %v4301_v57  ;;  %v5352_v48 = vmul.f32 %v12741_v15, %v4104_v1 }
 0x2e1   :  { %v5219_v35 = vadd.f32 %v5155_v6, %v5021_v47  ;;  %v5612_v0 = vadd.f32 %v5548_v19, %v5415_v34  ;;  %9032 = vrcp.f32 %v6008_v23  ;;  %v5550_v11 = vmul.f32 %v12757_v62, %v13012_v26 }
 0x2e2   :  { %v5220_v33 = vadd.f32 %v5156_v24, %v5022_v54  ;;  %v4369_v21 = vmul.f32 %v12688_v28, %v4300_v59  ;;  %v5023_v10 = vadd.f32 %v4959_v51, %v4826_v2  ;;  %v5549_v53 = vmul.f32 %v12757_v62, %v4301_v57 }
 0x2e3   :  { %v5416_v38 = vadd.f32 %v5352_v48, %v5219_v35  ;;  %v5683_v41 = vmul.f32 %v12787_v13, %v5612_v0  ;;  %v6009_v16 = vadd.f32 1.0, %v9027_v9  ;;  %v6299_v14 = vadd.f32 %v6298_v4, %v6297_v25  ;;  %v15242_v4 = vld [vmem:[#allocation47_spill] sm:$0xff] }
 0x2e4   :  { %v5417_v31 = vadd.f32 %v5353_v5, %v5220_v33  ;;  %v4040_v47 = vmul.f32 %v12604_v37, %v3971_v44  ;;  %v5221_v24 = vadd.f32 %v5157_v8, %v5023_v10  ;;  %v4173_v54 = vmul.f32 %v12610_v12, %v4104_v1 }
 0x2e5   :  { %v5613_v34 = vadd.f32 %v5549_v53, %v5416_v38  ;;  %v13101_v26 = vadd.f32 %v12799_v58, %v5683_v41  ;;  %v5551_v5 = vmul.f32 %v12757_v62, %v13042_v50  ;;  %v4433_v33 = vadd.f32 %v4369_v21, %v4236_v30  ;;  %v15248_v38 = vld [vmem:[#allocation49_spill] sm:$0xff] }
 0x2e6   :  { %v5614_v23 = vadd.f32 %v5550_v11, %v5417_v31  ;;  %v9029_v59 = vpop.eup %9028  ;;  %v5418_v2 = vadd.f32 %v5354_v55, %v5221_v24  ;;  %9034 = vrcp.f32 %v12964_v63  ;;  %v13111_v1 = vadd.f32 %v12533_v18, %v12893_v22  ;;  %v13127_v22 = vld [vmem:[#allocation3 + $0x258] sm:$0xff] }
 0x2e7   :  { %v5684_v25 = vmul.f32 %v12787_v13, %v5613_v34  ;;  %9036 = vpow2.f32 %v15242_v4  ;;  %v8245_v8 = vmul.f32 -1.442695, %v13101_v26  ;;  %v13116_v50 = vadd.f32 %v12533_v18, %v12897_v61  ;;  %v13158_v41 = vld [vmem:[#allocation3 + $0x259] sm:$0xff] }
 0x2e8   :  { %v5685_v44 = vmul.f32 %v12787_v13, %v5614_v23  ;;  %15243 = vst [vmem:[#allocation19_spill] sm:$0xff] %v13111_v1  ;;  %9038 = vrcp.f32 %v6009_v16  ;;  %v5615_v9 = vadd.f32 %v5551_v5, %v5418_v2  ;;  %v13119_v63 = vmul.f32 %v9029_v59, %v12903_v39  ;;  %v13172_v23 = vld [vmem:[#allocation3 + $0x18a] sm:$0xff] }
 0x2e9   :  { %15244 = vst [vmem:[#allocation8_spill] sm:$0xff] %v13116_v50  ;;  %v4237_v55 = vadd.f32 %v4173_v54, %v4040_v47  ;;  %v13122_v30 = vadd.f32 %v12799_v58, %v5684_v25  ;;  %v9031_v19 = vpop.eup %9030  ;;  %v4630_v51 = vadd.f32 %v13034_v60, %v4433_v33  ;;  %9040 = vpow2.f32 %v8245_v8  ;;  %v13179_v33 = vld [vmem:[#allocation3 + $0x270] sm:$0xff] }
 0x2ea   :  { %15245 = vst [vmem:[#allocation44_spill] sm:$0xff] %v13119_v63  ;;  %v13125_v6 = vadd.f32 %v12799_v58, %v5685_v44  ;;  %v5686_v35 = vmul.f32 %v12787_v13, %v5615_v9  ;;  %v13133_v61 = vadd.f32 %v12533_v18, %v13017_v27  ;;  %v4370_v39 = vmul.f32 %v12688_v28, %v4301_v57  ;;  %v15249_v27 = vld [vmem:[#allocation61_spill] sm:$0xff] }
 0x2eb   :  { %v8246_v48 = vmul.f32 -1.442695, %v13122_v30  ;;  %v13140_v11 = vadd.f32 %v12533_v18, %v13028_v29  ;;  %v9033_v21 = vpop.eup %9032  ;;  %v4568_v10 = vmul.f32 %v12580_v56, %v13127_v22  ;;  %9042 = vpow2.f32 %v15248_v38  ;;  %v13222_v38 = vld [vmem:[#allocation3 + $0x271] sm:$0xff] }
 0x2ec   :  { %15246 = vst [vmem:[#allocation32_spill] sm:$0xff] %v13133_v61  ;;  %v8247_v0 = vmul.f32 -1.442695, %v13125_v6  ;;  %v13143_v60 = vadd.f32 %v12799_v58, %v5686_v35  ;;  %v13150_v57 = vadd.f32 %v15249_v27, %v12980_v36  ;;  %v13153_v31 = vmul.f32 %v9031_v19, %v12915_v17  ;;  %v4879_v36 = vld [vmem:[#allocation3 + $0x182] sm:$0xff]  ;;  %v15251_v17 = vld [vmem:[#allocation66_spill] sm:$0xff] }
 0x2ed   :  { %15247 = vst [vmem:[#allocation33_spill] sm:$0xff] %v13140_v11  ;;  %v6300_v18 = vsel %vm3775_vm8, %v13119_v63, 0.0  ;;  %v4434_v29 = vadd.f32 %v4370_v39, %v4237_v55  ;;  %9044 = vpow2.f32 %v8246_v48  ;;  %v4827_v16 = vadd.f32 %v13040_v45, %v4630_v51  ;;  %v13196_v55 = vld [vmem:[#allocation3 + $0x25a] sm:$0xff]  ;;  %v13250_v63 = vld [vmem:[#allocation3 + $0x272] sm:$0xff] }
 0x2ee   :  { %15250 = vst [vmem:[#allocation75_spill] sm:$0xff] %v13153_v31  ;;  %9046 = vpow2.f32 %v8247_v0  ;;  %v8248_v53 = vmul.f32 -1.442695, %v13143_v60  ;;  %v13162_v47 = vmul.f32 -1.442695, %v13111_v1  ;;  %v4632_v24 = vadd.f32 %v4568_v10, %v13061_v52  ;;  %v13213_v48 = vld [vmem:[#allocation3 + $0x261] sm:$0xff] }
 0x2ef   :  { %9048 = vpow2.f32 %v15251_v17  ;;  %v13167_v54 = vmul.f32 -1.442695, %v13116_v50  ;;  %v13170_v34 = vmul.f32 -1.442695, %v13133_v61  ;;  %v13177_v45 = vmul.f32 %v9033_v21, %v12919_v40  ;;  %v15257_v0 = vld [vmem:[#allocation48_spill] sm:$0xff]  ;;  %v13256_v61 = vld [vmem:[#allocation3 + $0x279] sm:$0xff] }
 0x2f0   :  { %v13174_v59 = vpop.eup %9034  ;;  %v6301_v5 = vadd.f32 %v6300_v18, %v6299_v14  ;;  %v5158_v52 = vmul.f32 %v15225_v20, %v13127_v22  ;;  %v13184_v2 = vmul.f32 -1.442695, %v13140_v11  ;;  %v6302_v44 = vsel %vm3775_vm8, %v13153_v31, 0.0  ;;  %v13193_v14 = vld [vmem:[#allocation3 + $0x260] sm:$0xff] }
 0x2f1   :  { %15252 = vst [vmem:[#allocation76_spill] sm:$0xff] %v13167_v54  ;;  %15253 = vst [vmem:[#allocation22_spill] sm:$0xff] %v13170_v34  ;;  %v13186_v25 = vpop.eup %9036  ;;  %v4631_v4 = vadd.f32 %v13059_v32, %v4434_v29  ;;  %9050 = vpow2.f32 %v8248_v53  ;;  %v4765_v40 = vmul.f32 %v12632_v43, %v13158_v41  ;;  %v5024_v8 = vadd.f32 %v13070_v49, %v4827_v16  ;;  %v15256_v49 = vld [vmem:[#allocation67_spill] sm:$0xff] }
 0x2f2   :  { %15254 = vst [vmem:[#allocation77_spill] sm:$0xff] %v13177_v45  ;;  %15255 = vst [vmem:[#allocation47_spill] sm:$0xff] %v13184_v2  ;;  %v9039_v9 = vpop.eup %9038  ;;  %v13200_v19 = vadd.f32 %v12986_v7, %v12983_v3  ;;  %v13203_v51 = vmul.f32 %v12707_v46, %v4879_v36  ;;  %v13207_v32 = vmul.f32 %v12707_v46, %v13172_v23  ;;  %9052 = vpow2.f32 %v15256_v49  ;;  %v15258_v29 = vld [vmem:[#allocation87_spill] sm:$0xff]  ;;  %v13245_v49 = vld [vmem:[#allocation3 + $0x278] sm:$0xff] }
 0x2f3   :  { %v13211_v35 = vmul.f32 %v12604_v37, %v13179_v33  ;;  %v4829_v39 = vadd.f32 %v4765_v40, %v4632_v24  ;;  %v13218_v3 = vadd.f32 %v15257_v0, %v12990_v42  ;;  %v9041_v7 = vpop.eup %9040  ;;  %v6303_v21 = vadd.f32 %v6302_v44, %v6301_v5  ;;  %v13229_v36 = vld [vmem:[#allocation3 + $0x262] sm:$0xff]  ;;  %v15260_v24 = vld [vmem:[#allocation58_spill] sm:$0xff] }
 0x2f4   :  { %v6304_v10 = vsel %vm3775_vm8, %v13177_v45, 0.0  ;;  %v5222_v27 = vadd.f32 %v5158_v52, %v5024_v8  ;;  %v4569_v18 = vmul.f32 %v12580_v56, %v13193_v14  ;;  %v13227_v53 = vmul.f32 %v9039_v9, %v15258_v29  ;;  %v15261_v56 = vld [vmem:[#allocation46_spill] sm:$0xff]  ;;  %v15262_v0 = vld [vmem:[#allocation31_spill] sm:$0xff] }
 0x2f5   :  { %v6010_v16 = vadd.f32 1.0, %v9041_v7  ;;  %v4828_v42 = vadd.f32 %v15260_v24, %v4631_v4  ;;  %v4962_v17 = vmul.f32 %v12707_v46, %v13196_v55  ;;  %v13234_v5 = vpop.eup %9042  ;;  %v5160_v44 = vmul.f32 %v15225_v20, %v13179_v33 }
 0x2f6   :  { %15259 = vst [vmem:[#allocation49_spill] sm:$0xff] %v13227_v53  ;;  %v5355_v52 = vmul.f32 %v12741_v15, %v13158_v41  ;;  %v4633_v40 = vadd.f32 %v4569_v18, %v15261_v56  ;;  %v4766_v9 = vmul.f32 %v12632_v43, %v13213_v48  ;;  %v5357_v4 = vmul.f32 %v12741_v15, %v13222_v38 }
 0x2f7   :  { %v9045_v8 = vpop.eup %9044  ;;  %v5025_v7 = vadd.f32 %v15262_v0, %v4828_v42  ;;  %v5026_v29 = vadd.f32 %v4962_v17, %v4829_v39  ;;  %v5159_v24 = vmul.f32 %v15225_v20, %v13193_v14  ;;  %9054 = vrcp.f32 %v6010_v16 }
 0x2f8   :  { %v9047_v45 = vpop.eup %9046  ;;  %v5419_v31 = vadd.f32 %v5355_v52, %v5222_v27  ;;  %v4830_v18 = vadd.f32 %v4766_v9, %v4633_v40  ;;  %v4963_v43 = vmul.f32 %v12707_v46, %v13229_v36  ;;  %v6011_v11 = vadd.f32 1.0, %v9045_v8  ;;  %v13262_v27 = vld [vmem:[#allocation3 + $0x27a] sm:$0xff] }
 0x2f9   :  { %v13254_v56 = vpop.eup %9048  ;;  %v5223_v50 = vadd.f32 %v5159_v24, %v5025_v7  ;;  %v5224_v42 = vadd.f32 %v5160_v44, %v5026_v29  ;;  %v5356_v39 = vmul.f32 %v12741_v15, %v13213_v48  ;;  %v4043_v16 = vmul.f32 %v12604_v37, %v13127_v22 }
 0x2fa   :  { %v5161_v17 = vmul.f32 %v15225_v20, %v13245_v49  ;;  %v5027_v52 = vadd.f32 %v4963_v43, %v4830_v18  ;;  %v5552_v46 = vmul.f32 %v12757_v62, %v13196_v55  ;;  %v6012_v9 = vadd.f32 1.0, %v9047_v45 }
 0x2fb   :  { %v9051_v40 = vpop.eup %9050  ;;  %v5554_v44 = vmul.f32 %v12757_v62, %v13250_v63  ;;  %v5420_v8 = vadd.f32 %v5356_v39, %v5223_v50  ;;  %v5421_v0 = vadd.f32 %v5357_v4, %v5224_v42  ;;  %v5358_v7 = vmul.f32 %v12741_v15, %v13256_v61 }
 0x2fc   :  { %v5225_v37 = vadd.f32 %v5161_v17, %v5027_v52  ;;  %v5553_v22 = vmul.f32 %v12757_v62, %v13229_v36  ;;  %v5616_v29 = vadd.f32 %v5552_v46, %v5419_v31  ;;  %v9053_v20 = vpop.eup %9052  ;;  %9056 = vrcp.f32 %v6011_v11  ;;  %v13282_v31 = vld [vmem:[%s14928_s4 + $0x1] ss:$0 sm:$0xff]  ;;  %v13298_v52 = vld [vmem:[%s14928_s4] ss:$0 sm:$0xff] }
 0x2fd   :  { %v4176_v24 = vmul.f32 %v12610_v12, %v13158_v41  ;;  %v5555_v45 = vmul.f32 %v12757_v62, %v13262_v27  ;;  %v5618_v18 = vadd.f32 %v5554_v44, %v5421_v0  ;;  %v6013_v43 = vadd.f32 1.0, %v9051_v40  ;;  %v15263_v17 = vld [vmem:[#allocation42_spill] sm:$0xff] }
 0x2fe   :  { %v5422_v50 = vadd.f32 %v5358_v7, %v5225_v37  ;;  %v5617_v4 = vadd.f32 %v5553_v22, %v5420_v8  ;;  %v5687_v42 = vmul.f32 %v12787_v13, %v5616_v29  ;;  %v6305_v15 = vadd.f32 %v6304_v10, %v6303_v21  ;;  %v15265_v22 = vld [vmem:[#allocation70_spill] sm:$0xff] }
 0x2ff   :  { %9058 = vrcp.f32 %v6012_v9  ;;  %v4178_v11 = vmul.f32 %v13282_v31, %v13222_v38  ;;  %v5689_v12 = vmul.f32 %v12787_v13, %v5618_v18  ;;  %v3759_v21 = vmul.f32 %v13174_v59, %v15263_v17 }
 0x300   :  { %v5619_v41 = vadd.f32 %v5555_v45, %v5422_v50  ;;  %v5688_v62 = vmul.f32 %v12787_v13, %v5617_v4  ;;  %v13289_v39 = vadd.f32 %v12799_v58, %v5687_v42  ;;  %v6306_v10 = vsel %vm3775_vm8, %v13227_v53, 0.0  ;;  %v6369_v4 = vld [vmem:[%s14931_s7] sm:$0xff]  ;;  %v6370_v42 = vld [vmem:[%s14931_s7 + $0x8] sm:$0xff] }
 0x301   :  { %v4044_v46 = vmul.f32 %v13298_v52, %v13193_v14  ;;  %v4177_v40 = vmul.f32 %v13282_v31, %v13213_v48  ;;  %v3570_v9 = vadd.f32 1.0, %v13186_v25  ;;  %v9055_v44 = vpop.eup %9054  ;;  %9060 = vrcp.f32 %v6013_v43  ;;  %3912 = vst.msk [vmem:[#allocation3 + $0x289] sm:$0xff] %vm3775_vm8, %v3759_v21 }
 0x302   :  { %v4240_v8 = vadd.f32 %v4176_v24, %v4043_v16  ;;  %v5690_v59 = vmul.f32 %v12787_v13, %v5619_v41  ;;  %v13307_v0 = vadd.f32 %v12799_v58, %v5689_v12  ;;  %v4373_v7 = vmul.f32 %v12688_v28, %v13196_v55  ;;  %v13322_v13 = vld [vmem:[%s14928_s4 + $0x3] ss:$0 sm:$0xff]  ;;  %v6371_v41 = vld [vmem:[%s14931_s7 + $0x10] sm:$0xff] }
 0x303   :  { %v13313_v14 = vadd.f32 %v12799_v58, %v5688_v62  ;;  %9062 = vrcp.f32 %v3570_v9  ;;  %v3568_v48 = vadd.f32 1.0, %v13234_v5  ;;  %v13317_v25 = vadd.f32 %v4178_v11, %v13211_v35  ;;  %v15264_v55 = vld [vmem:[#allocation35_spill] sm:$0xff]  ;;  %v6372_v62 = vld [vmem:[%s14931_s7 + $0x18] sm:$0xff] }
 0x304   :  { %v4570_v16 = vmul.f32 %v13322_v13, %v13179_v33  ;;  %v8249_v37 = vmul.f32 -1.442695, %v13289_v39  ;;  %v13329_v29 = vadd.f32 %v15265_v22, %v15264_v55  ;;  %v6307_v24 = vadd.f32 %v6306_v10, %v6305_v15  ;;  %v13389_v22 = vld [vmem:[%s14928_s4 + $0x4] ss:$0 sm:$0xff] }
 0x305   :  { %v4046_v5 = vmul.f32 %v13298_v52, %v13245_v49  ;;  %v4241_v35 = vadd.f32 %v4177_v40, %v4044_v46  ;;  %v4374_v45 = vmul.f32 %v12688_v28, %v13229_v36  ;;  %v13336_v18 = vmul.f32 %v9055_v44, %v13101_v26 }
 0x306   :  { %v13339_v43 = vadd.f32 %v12799_v58, %v5690_v59  ;;  %v8251_v33 = vmul.f32 -1.442695, %v13307_v0  ;;  %v3573_v50 = vadd.f32 1.0, %v13254_v56  ;;  %v9057_v15 = vpop.eup %9056  ;;  %v4437_v36 = vadd.f32 %v4373_v7, %v4240_v8  ;;  %v15270_v7 = vld [vmem:[#allocation13_spill] sm:$0xff] }
 0x307   :  { %15266 = vst [vmem:[#allocation61_spill] sm:$0xff] %v13336_v18  ;;  %v8250_v26 = vmul.f32 -1.442695, %v13313_v14  ;;  %9064 = vrcp.f32 %v3568_v48  ;;  %v4179_v58 = vmul.f32 %v13282_v31, %v13256_v61  ;;  %v4375_v11 = vmul.f32 %v12688_v28, %v13250_v63  ;;  %v15271_v48 = vld [vmem:[#allocation71_spill] sm:$0xff] }
 0x308   :  { %9066 = vpow2.f32 %v8249_v37  ;;  %v3571_v56 = vadd.f32 1.0, %v9053_v20  ;;  %v15013_v12 = vmov 0.0|0.0   ;;  %v4438_v21 = vadd.f32 %v4374_v45, %v4241_v35 }
 0x309   :  { %8636 = vmatprep.subr.bf16.mxu1 %v15013_v12  ;;  %8642 = vmatprep.subr.bf16.mxu0 %v15013_v12  ;;  %v9059_v17 = vpop.eup %9058  ;;  %9068 = vrcp.f32 %v3573_v50  ;;  %v8637_v10 = vpack.c.bf16 %v6370_v42, %v6369_v4  ;;  %v13363_v28 = vmul.f32 %v9057_v15, %v13122_v30  ;;  %v6308_v20 = vsel %vm3775_vm8, %v13336_v18, 0.0  ;;  %v15272_v50 = vld [vmem:[#allocation20_spill] sm:$0xff]  ;;  %v13403_v42 = vld [vmem:[%s14928_s4 + $0x2] ss:$0 sm:$0xff] }
 0x30a   :  { %9070 = vpow2.f32 %v8251_v33  ;;  %v8252_v46 = vmul.f32 -1.442695, %v13339_v43  ;;  %v15268_v40 = vmov 0.0   ;;  %v4571_v9 = vmul.f32 %v13322_v13, %v13245_v49  ;;  %v3978_v15 = vld [vmem:[#allocation3 + $0x288] sm:$0xff] }
 0x30b   :  { %15267 = vst [vmem:[#allocation66_spill] sm:$0xff] %v13363_v28  ;;  %8541 = vmatprep.mubr.msk.f32.mxu1 %vm9590_vm11, %v15268_v40  ;;  %8633 = vmatprep.mubr.msk.f32.mxu0 %vm9590_vm11, %v15268_v40  ;;  %v4634_v44 = vadd.f32 %v4570_v16, %v4437_v36  ;;  %9072 = vpow2.f32 %v8250_v26  ;;  %v8640_v30 = vpack.c.bf16 %v6372_v62, %v6371_v41  ;;  %v9061_v8 = vpop.eup %9060  ;;  %v6310_v33 = vsel %vm3775_vm8, %v13363_v28, 0.0  ;;  %v4111_v62 = vld [vmem:[#allocation3 + $0x289] sm:$0xff]  ;;  %v15293_v28 = vld [vmem:[#allocation65_spill] sm:$0xff] }
 0x30c   :  { %8638 = vmatpush3.bf16.msra.mxu1 %v8637_v10  ;;  %v13375_v59 = vmul.f32 %v9059_v17, %v13125_v6  ;;  %9074 = vrcp.f32 %v3571_v56  ;;  %v13380_v37 = vadd.f32 %v15271_v48, %v15270_v7  ;;  %v13384_v55 = vadd.f32 %v13203_v51, %v13150_v57  ;;  %v3980_v51 = vld [vmem:[#allocation3 + $0x2a0] sm:$0xff]  ;;  %v15294_v18 = vld [vmem:[#allocation64_spill] sm:$0xff] }
 0x30d   :  { %8639 = vmatprep.subr.bf16.mxu1 %v15013_v12  ;;  %v9063_v49 = vpop.eup %9062  ;;  %v6309_v16 = vadd.f32 %v6308_v20, %v6307_v24  ;;  %v4767_v6 = vmul.f32 %v13389_v22, %v13222_v38  ;;  %v4635_v35 = vadd.f32 %v4571_v9, %v4438_v21  ;;  %v13395_v45 = vadd.f32 %v13207_v32, %v13200_v19  ;;  %v4113_v24 = vld [vmem:[#allocation3 + $0x2a1] sm:$0xff] }
 0x30e   :  { %15269 = vst [vmem:[#allocation67_spill] sm:$0xff] %v13375_v59  ;;  %v4243_v57 = vadd.f32 %v4179_v58, %v4046_v5  ;;  %9076 = vpow2.f32 %v8252_v46  ;;  %v3762_v4 = vmul.f32 %v9063_v49, %v15272_v50  ;;  %v4376_v38 = vmul.f32 %v13403_v42, %v13262_v27  ;;  %v13418_v58 = vld [vmem:[%s14928_s4 + $0x5] ss:$0 sm:$0xff] }
 0x30f   :  { %v4439_v19 = vadd.f32 %v4375_v11, %v13317_v25  ;;  %v4768_v32 = vmul.f32 %v13389_v22, %v13256_v61  ;;  %v4831_v5 = vadd.f32 %v4767_v6, %v4634_v44  ;;  %v13411_v36 = vmul.f32 %v9061_v8, %v13143_v60  ;;  %v15274_v46 = vld [vmem:[#allocation43_spill] sm:$0xff] }
 0x310   :  { %8641 = vmatpush3.bf16.msra.mxu1 %v8640_v30  ;;  %v6312_v26 = vsel %vm3775_vm8, %v13375_v59, 0.0  ;;  %v4964_v25 = vmul.f32 %v13418_v58, %v13250_v63  ;;  %v4965_v61 = vmul.f32 %v13418_v58, %v13262_v27  ;;  %3915 = vst.msk [vmem:[#allocation3 + $0x2a9] sm:$0xff] %vm3775_vm8, %v3762_v4  ;;  %v6311_v11 = vadd.f32 %v6310_v33, %v6309_v16  ;;  %v13434_v27 = vld [vmem:[%s14928_s4 + $0x6] ss:$0 sm:$0xff]  ;;  %v15275_v33 = vld [vmem:[#allocation57_spill] sm:$0xff] }
 0x311   :  { %15273 = vst [vmem:[#allocation48_spill] sm:$0xff] %v13411_v36  ;;  %8544 = vmatprep.subr.mxu1 %v15268_v40  ;;  %v9065_v60 = vpop.eup %9064  ;;  %v4049_v56 = vmul.f32 %v13298_v52, %v3980_v51  ;;  %v4182_v41 = vmul.f32 %v13282_v31, %v4113_v24  ;;  %v4832_v17 = vadd.f32 %v4768_v32, %v4635_v35  ;;  %v6314_v16 = vsel %vm3775_vm8, %v13411_v36, 0.0  ;;  %v13458_v32 = vld [vmem:[%s14928_s4 + $0x7] ss:$0 sm:$0xff] }
 0x312   :  { %v9067_v21 = vpop.eup %9066  ;;  %v13428_v10 = vadd.f32 %v4376_v38, %v4243_v57  ;;  %v4572_v63 = vmul.f32 %v13322_v13, %v3978_v15  ;;  %v5162_v20 = vmul.f32 %v13434_v27, %v3978_v15  ;;  %v3760_v9 = vmul.f32 %v9065_v60, %v15274_v46 }
 0x313   :  { %v9069_v44 = vpop.eup %9068  ;;  %v6313_v30 = vadd.f32 %v6312_v26, %v6311_v11  ;;  %v13439_v8 = vmul.f32 %v13322_v13, %v3980_v51  ;;  %v13442_v7 = vmul.f32 %v13389_v22, %v4113_v24  ;;  %v5028_v48 = vadd.f32 %v4964_v25, %v4831_v5  ;;  %v5077_v26 = vld [vmem:[#allocation3 + $0x198] sm:$0xff] }
 0x314   :  { %v9071_v49 = vpop.eup %9070  ;;  %v4047_v6 = vmul.f32 %v13298_v52, %v3978_v15  ;;  %v4180_v35 = vmul.f32 %v13282_v31, %v4111_v62  ;;  %3913 = vst.msk [vmem:[#allocation3 + $0x291] sm:$0xff] %vm3775_vm8, %v3760_v9  ;;  %v3765_v57 = vmul.f32 %v9069_v44, %v15275_v33  ;;  %v13450_v4 = vadd.f32 %v4182_v41, %v4049_v56  ;;  %v15276_v44 = vld [vmem:[#allocation60_spill] sm:$0xff] }
 0x315   :  { %v9073_v50 = vpop.eup %9072  ;;  %v13453_v38 = vmul.f32 %v13434_v27, %v3980_v51  ;;  %v13461_v5 = vmul.f32 %v13458_v32, %v4113_v24  ;;  %v13463_v15 = vadd.f32 %v4965_v61, %v4832_v17  ;;  %v4636_v60 = vadd.f32 %v4572_v63, %v4439_v19  ;;  %v5078_v51 = vld [vmem:[#allocation3 + $0x1a0] sm:$0xff]  ;;  %v15277_v24 = vld [vmem:[#allocation68_spill] sm:$0xff] }
 0x316   :  { %v9075_v25 = vpop.eup %9074  ;;  %v4769_v11 = vmul.f32 %v13389_v22, %v4111_v62  ;;  %v5226_v56 = vadd.f32 %v5162_v20, %v5028_v48  ;;  %v5359_v41 = vmul.f32 %v13458_v32, %v4111_v62  ;;  %3918 = vst.msk [vmem:[#allocation3 + $0x2d1] sm:$0xff] %vm3775_vm8, %v3765_v57  ;;  %v6014_v46 = vadd.f32 1.0, %v9067_v21  ;;  %v5109_v61 = vld [vmem:[#allocation3 + $0x348] sm:$0xff]  ;;  %v5110_v63 = vld [vmem:[#allocation3 + $0x350] sm:$0xff] }
 0x317   :  { %v13468_v9 = vadd.f32 %v6314_v16, %v6313_v30  ;;  %v3763_v33 = vmul.f32 %v9075_v25, %v15276_v44  ;;  %9078 = vpow2.f32 %v15277_v24  ;;  %v6016_v12 = vadd.f32 1.0, %v9071_v49  ;;  %v15278_v19 = vld [vmem:[#allocation83_spill] sm:$0xff]  ;;  %v15279_v21 = vld [vmem:[#allocation84_spill] sm:$0xff]  ;;  %v15280_v49 = vld [vmem:[#allocation85_spill] sm:$0xff] }
 0x318   :  { %v9077_v17 = vpop.eup %9076  ;;  %v13472_v36 = vadd.f32 %v4180_v35, %v4047_v6  ;;  %9080 = vpow2.f32 %v15278_v19  ;;  %v5146_v62 = vmul.f32 %v13434_v27, %v5077_v26  ;;  %v6015_v20 = vadd.f32 1.0, %v9073_v50  ;;  %v9546_v30 = vld [vmem:[#allocation3 + $0x188] sm:$0xff] }
 0x319   :  { %3916 = vst.msk [vmem:[#allocation3 + $0x2b9] sm:$0xff] %vm3775_vm8, %v3763_v33  ;;  %9082 = vpow2.f32 %v15279_v21  ;;  %v5145_v48 = vmul.f32 %v9546_v30, %v13434_v27  ;;  %v5147_v16 = vmul.f32 %v13434_v27, %v5078_v51  ;;  %v4833_v57 = vadd.f32 %v4769_v11, %v4636_v60  ;;  %v5273_v35 = vld [vmem:[#allocation3 + $0x189] sm:$0xff]  ;;  %v5274_v51 = vld [vmem:[#allocation3 + $0x199] sm:$0xff]  ;;  %v5275_v60 = vld [vmem:[#allocation3 + $0x1a1] sm:$0xff] }
 0x31a   :  { %v13480_v25 = vadd.f32 %v5359_v41, %v5226_v56  ;;  %9084 = vpow2.f32 %v15280_v49  ;;  %v13484_v6 = vmul.f32 %v13434_v27, %v5109_v61  ;;  %v6017_v26 = vadd.f32 1.0, %v9077_v17  ;;  %v15283_v33 = vld [vmem:[#allocation72_spill] sm:$0xff]  ;;  %v15284_v56 = vld [vmem:[#allocation63_spill] sm:$0xff] }
 0x31b   :  { %9086 = vrcp.f32 %v6014_v46  ;;  %v13486_v50 = vld [vmem:[#allocation3 + $0x290] sm:$0xff]  ;;  %v13489_v44 = vmul.f32 %v13434_v27, %v5110_v63  ;;  %v5207_v24 = vadd.f32 %v15283_v33, %v13218_v3  ;;  %v5208_v41 = vadd.f32 %v15284_v56, %v13329_v29  ;;  %v9547_v21 = vld [vmem:[#allocation3 + $0x181] sm:$0xff] }
 0x31c   :  { %15281 = vst [vmem:[#allocation87_spill] sm:$0xff] %v13484_v6  ;;  %9088 = vrcp.f32 %v6016_v12  ;;  %v13493_v11 = vld [vmem:[#allocation3 + $0x291] sm:$0xff]  ;;  %v5209_v61 = vadd.f32 %v5145_v48, %v13380_v37  ;;  %v13499_v46 = vadd.f32 %v5146_v62, %v13384_v55  ;;  %v5306_v17 = vld [vmem:[#allocation3 + $0x349] sm:$0xff]  ;;  %v4573_v63 = vmul.f32 %v13322_v13, %v13486_v50  ;;  %v15285_v29 = vld [vmem:[#allocation86_spill] sm:$0xff] }
 0x31d   :  { %15282 = vst [vmem:[#allocation58_spill] sm:$0xff] %v13489_v44  ;;  %9090 = vrcp.f32 %v6015_v20  ;;  %v4308_v19 = vld [vmem:[#allocation3 + $0x28a] sm:$0xff]  ;;  %v13504_v3 = vadd.f32 %v5147_v16, %v13395_v45  ;;  %v5341_v30 = vmul.f32 %v9547_v21, %v13458_v32  ;;  %v13507_v49 = vld [vmem:[#allocation3 + $0x292] sm:$0xff]  ;;  %v5342_v37 = vmul.f32 %v13458_v32, %v5273_v35  ;;  %v15290_v56 = vld [vmem:[#allocation54_spill] sm:$0xff] }
 0x31e   :  { %v5307_v12 = vld [vmem:[#allocation3 + $0x351] sm:$0xff]  ;;  %9092 = vpow2.f32 %v15285_v29  ;;  %v13512_v55 = vmul.f32 %v13458_v32, %v5274_v51  ;;  %v13515_v62 = vmul.f32 %v13458_v32, %v5275_v60  ;;  %v4637_v45 = vadd.f32 %v4573_v63, %v13428_v10  ;;  %v13523_v16 = vld [vmem:[#allocation3 + $0x2a8] sm:$0xff] }
 0x31f   :  { %9094 = vrcp.f32 %v6017_v26  ;;  %v4770_v20 = vmul.f32 %v13389_v22, %v13493_v11  ;;  %v13521_v48 = vmul.f32 %v13458_v32, %v5306_v17  ;;  %v4966_v33 = vmul.f32 %v13418_v58, %v4308_v19  ;;  %v15287_v35 = vld [vmem:[#allocation88_spill] sm:$0xff]  ;;  %v15289_v60 = vld [vmem:[#allocation15_spill] sm:$0xff]  ;;  %v15291_v17 = vld [vmem:[#allocation17_spill] sm:$0xff] }
 0x320   :  { %9096 = vpow2.f32 %v15287_v35  ;;  %v13528_v51 = vmul.f32 %v13458_v32, %v5307_v12  ;;  %v13532_v26 = vadd.f32 %v15290_v56, %v15289_v60  ;;  %v4967_v21 = vmul.f32 %v13418_v58, %v13507_v49  ;;  %v15292_v29 = vld [vmem:[#allocation45_spill] sm:$0xff]  ;;  %v4114_v12 = vld [vmem:[#allocation3 + $0x2a9] sm:$0xff] }
 0x321   :  { %15286 = vst [vmem:[#allocation46_spill] sm:$0xff] %v13521_v48  ;;  %v9079_v10 = vpop.eup %9078  ;;  %v4834_v63 = vadd.f32 %v4770_v20, %v4637_v45  ;;  %v13538_v59 = vadd.f32 %v15292_v29, %v15291_v17  ;;  %v13542_v53 = vadd.f32 %v15294_v18, %v15293_v28  ;;  %v4310_v40 = vld [vmem:[#allocation3 + $0x2a2] sm:$0xff]  ;;  %v5163_v60 = vmul.f32 %v13434_v27, %v13486_v50  ;;  %v15295_v45 = vld [vmem:[#allocation73_spill] sm:$0xff] }
 0x322   :  { %15288 = vst [vmem:[#allocation31_spill] sm:$0xff] %v13528_v51  ;;  %v9081_v35 = vpop.eup %9080  ;;  %v5030_v51 = vadd.f32 %v4966_v33, %v4833_v57  ;;  %9098 = vpow2.f32 %v13162_v47  ;;  %v13548_v20 = vadd.f32 %v15295_v45, %v5207_v24  ;;  %v5165_v17 = vmul.f32 %v13434_v27, %v13523_v16  ;;  %v13557_v18 = vld [vmem:[%s14928_s4 + $0x8] ss:$0 sm:$0xff]  ;;  %v4311_v47 = vld [vmem:[#allocation3 + $0x2aa] sm:$0xff] }
 0x323   :  { %v13550_v56 = vpop.eup %9082  ;;  %v5031_v29 = vadd.f32 %v4967_v21, %v4834_v63  ;;  %v5556_v28 = vmul.f32 %v13557_v18, %v4308_v19  ;;  %v13560_v57 = vadd.f32 %v5341_v30, %v5208_v41  ;;  %v5227_v24 = vadd.f32 %v5163_v60, %v13463_v15 }
 0x324   :  { %v9085_v33 = vpop.eup %9084  ;;  %v5228_v45 = vadd.f32 %v13453_v38, %v5030_v51  ;;  %v5360_v48 = vmul.f32 %v13458_v32, %v13493_v11  ;;  %v13566_v44 = vadd.f32 %v5342_v37, %v5209_v61  ;;  %v5362_v21 = vmul.f32 %v13458_v32, %v4114_v12 }
 0x325   :  { %15296 = vst [vmem:[#allocation42_spill] sm:$0xff] %v13560_v57  ;;  %v9087_v63 = vpop.eup %9086  ;;  %v5558_v6 = vmul.f32 %v13557_v18, %v4310_v40  ;;  %v5229_v2 = vadd.f32 %v5165_v17, %v5031_v29  ;;  %v5620_v41 = vadd.f32 %v5556_v28, %v13480_v25  ;;  %v4377_v34 = vmul.f32 %v13403_v42, %v4308_v19  ;;  %v13581_v25 = vld [vmem:[%s14929_s5] ss:$0 sm:$0xff] }
 0x326   :  { %15297 = vst [vmem:[#allocation35_spill] sm:$0xff] %v13566_v44  ;;  %v9089_v30 = vpop.eup %9088  ;;  %v5424_v54 = vadd.f32 %v5360_v48, %v5227_v24  ;;  %v5425_v15 = vadd.f32 %v13461_v5, %v5228_v45  ;;  %v5557_v38 = vmul.f32 %v13557_v18, %v13507_v49  ;;  %v4050_v61 = vmul.f32 %v13298_v52, %v13523_v16  ;;  %v13593_v44 = vld [vmem:[%s14930_s6] ss:$0 sm:$0xff] }
 0x327   :  { %v9091_v51 = vpop.eup %9090  ;;  %v5559_v37 = vmul.f32 %v13557_v18, %v4311_v47  ;;  %v5426_v60 = vadd.f32 %v5362_v21, %v5229_v2  ;;  %v5691_v19 = vmul.f32 %v13581_v25, %v5620_v41  ;;  %v4183_v5 = vmul.f32 %v13282_v31, %v4114_v12 }
 0x328   :  { %v9093_v48 = vpop.eup %9092  ;;  %v4379_v17 = vmul.f32 %v13403_v42, %v4310_v40  ;;  %v5621_v29 = vadd.f32 %v5557_v38, %v5424_v54  ;;  %v5622_v28 = vadd.f32 %v5558_v6, %v5425_v15  ;;  %v4048_v45 = vmul.f32 %v13298_v52, %v13486_v50 }
 0x329   :  { %v9095_v24 = vpop.eup %9094  ;;  %v4181_v2 = vmul.f32 %v13282_v31, %v13493_v11  ;;  %v5623_v21 = vadd.f32 %v5559_v37, %v5426_v60  ;;  %v13596_v41 = vadd.f32 %v13593_v44, %v5691_v19  ;;  %v4441_v54 = vadd.f32 %v4377_v34, %v13472_v36 }
 0x32a   :  { %v9097_v1 = vpop.eup %9096  ;;  %v5692_v6 = vmul.f32 %v13581_v25, %v5621_v29  ;;  %v5693_v15 = vmul.f32 %v13581_v25, %v5622_v28  ;;  %v3574_v50 = vadd.f32 1.0, %v9079_v10  ;;  %v13602_v38 = vmul.f32 %v9087_v63, %v13289_v39 }
 0x32b   :  { %15298 = vst [vmem:[#allocation70_spill] sm:$0xff] %v13596_v41  ;;  %v13605_v11 = vmul.f32 %v13403_v42, %v4311_v47  ;;  %v4575_v37 = vmul.f32 %v13322_v13, %v13523_v16  ;;  %v3572_v60 = vadd.f32 1.0, %v9081_v35  ;;  %v5694_v57 = vmul.f32 %v13581_v25, %v5623_v21 }
 0x32c   :  { %15299 = vst [vmem:[#allocation13_spill] sm:$0xff] %v13602_v38  ;;  %v9099_v19 = vpop.eup %9098  ;;  %v13611_v34 = vadd.f32 %v13593_v44, %v5692_v6  ;;  %v13614_v36 = vadd.f32 %v13593_v44, %v5693_v15  ;;  %v8253_v10 = vmul.f32 -1.442695, %v13596_v41  ;;  %v4772_v39 = vmul.f32 %v13389_v22, %v4114_v12 }
 0x32d   :  { %v4968_v63 = vmul.f32 %v13418_v58, %v4310_v40  ;;  %v4245_v29 = vadd.f32 %v4181_v2, %v4048_v45  ;;  %v4378_v16 = vmul.f32 %v13403_v42, %v13507_v49  ;;  %v4638_v35 = vadd.f32 %v13439_v8, %v4441_v54 }
 0x32e   :  { %15300 = vst [vmem:[#allocation71_spill] sm:$0xff] %v13611_v34  ;;  %15301 = vst [vmem:[#allocation20_spill] sm:$0xff] %v13614_v36  ;;  %v8254_v28 = vmul.f32 -1.442695, %v13611_v34  ;;  %v8255_v21 = vmul.f32 -1.442695, %v13614_v36  ;;  %9100 = vrcp.f32 %v3574_v50  ;;  %v13625_v6 = vmul.f32 %v9091_v51, %v13313_v14 }
 0x32f   :  { %v6316_v15 = vsel %vm3775_vm8, %v13602_v38, 0.0  ;;  %9102 = vrcp.f32 %v3572_v60  ;;  %v3577_v40 = vadd.f32 1.0, %v13550_v56  ;;  %v13631_v12 = vmul.f32 %v13418_v58, %v4311_v47  ;;  %v3982_v14 = vld [vmem:[#allocation3 + $0x2b8] sm:$0xff] }
 0x330   :  { %15302 = vst [vmem:[#allocation43_spill] sm:$0xff] %v13625_v6  ;;  %v13634_v49 = vadd.f32 %v13593_v44, %v5694_v57  ;;  %9104 = vpow2.f32 %v8253_v10  ;;  %v3575_v8 = vadd.f32 1.0, %v9085_v33  ;;  %v13637_v45 = vmul.f32 %v9089_v30, %v13307_v0  ;;  %v3984_v0 = vld [vmem:[#allocation3 + $0x2d0] sm:$0xff] }
 0x331   :  { %v4442_v2 = vadd.f32 %v4378_v16, %v4245_v29  ;;  %9106 = vpow2.f32 %v8254_v28  ;;  %v3578_v51 = vadd.f32 1.0, %v9093_v48  ;;  %v6317_v54 = vadd.f32 %v6316_v15, %v13468_v9  ;;  %v4117_v30 = vld [vmem:[#allocation3 + $0x2d1] sm:$0xff]  ;;  %v4115_v29 = vld [vmem:[#allocation3 + $0x2b9] sm:$0xff] }
 0x332   :  { %15303 = vst [vmem:[#allocation57_spill] sm:$0xff] %v13634_v49  ;;  %15304 = vst [vmem:[#allocation60_spill] sm:$0xff] %v13637_v45  ;;  %9108 = vpow2.f32 %v8255_v21  ;;  %v4835_v56 = vadd.f32 %v13442_v7, %v4638_v35  ;;  %v3576_v50 = vadd.f32 1.0, %v9097_v1  ;;  %v6318_v47 = vsel %vm3775_vm8, %v13625_v6, 0.0 }
 0x333   :  { %v4247_v57 = vadd.f32 %v4183_v5, %v4050_v61  ;;  %9110 = vrcp.f32 %v3577_v40  ;;  %v3581_v60 = vadd.f32 1.0, %v9099_v19  ;;  %v8256_v33 = vmul.f32 -1.442695, %v13634_v49 }
 0x334   :  { %v4576_v10 = vmul.f32 %v13322_v13, %v3982_v14  ;;  %v5166_v48 = vmul.f32 %v13434_v27, %v3982_v14  ;;  %9112 = vrcp.f32 %v3575_v8  ;;  %v6320_v9 = vsel %vm3775_vm8, %v13637_v45, 0.0 }
 0x335   :  { %v4443_v1 = vadd.f32 %v4379_v17, %v13450_v4  ;;  %v4639_v7 = vadd.f32 %v4575_v37, %v4442_v2  ;;  %9114 = vrcp.f32 %v3578_v51  ;;  %v13650_v61 = vmul.f32 %v9095_v24, %v13339_v43  ;;  %v15307_v24 = vld [vmem:[#allocation62_spill] sm:$0xff] }
 0x336   :  { %v6319_v5 = vadd.f32 %v6318_v47, %v6317_v54  ;;  %v5032_v19 = vadd.f32 %v4968_v63, %v4835_v56  ;;  %9116 = vrcp.f32 %v3576_v50  ;;  %v4053_v16 = vmul.f32 %v13298_v52, %v3984_v0  ;;  %v15309_v56 = vld [vmem:[#allocation78_spill] sm:$0xff] }
 0x337   :  { %15305 = vst [vmem:[#allocation68_spill] sm:$0xff] %v13650_v61  ;;  %v4186_v35 = vmul.f32 %v13282_v31, %v4117_v30  ;;  %v4051_v28 = vmul.f32 %v13298_v52, %v3982_v14  ;;  %9118 = vrcp.f32 %v3581_v60  ;;  %v4184_v4 = vmul.f32 %v13282_v31, %v4115_v29 }
 0x338   :  { %v9101_v21 = vpop.eup %9100  ;;  %9120 = vpow2.f32 %v8256_v33  ;;  %v4640_v17 = vadd.f32 %v4576_v10, %v4443_v1  ;;  %v5230_v37 = vadd.f32 %v5166_v48, %v5032_v19  ;;  %v13656_v40 = vadd.f32 %v6320_v9, %v6319_v5  ;;  %v5469_v33 = vld [vmem:[#allocation3 + $0x182] sm:$0xff]  ;;  %v5471_v10 = vld [vmem:[#allocation3 + $0x19a] sm:$0xff]  ;;  %v5503_v19 = vld [vmem:[#allocation3 + $0x34a] sm:$0xff] }
 0x339   :  { %v9103_v15 = vpop.eup %9102  ;;  %v13659_v43 = vadd.f32 %v13605_v11, %v4247_v57  ;;  %v3766_v63 = vmul.f32 %v9101_v21, %v15307_v24  ;;  %v4836_v8 = vadd.f32 %v4772_v39, %v4639_v7  ;;  %v13664_v14 = vsel %vm3775_vm8, %v13650_v61, 0.0  ;;  %v5472_v48 = vld [vmem:[#allocation3 + $0x1a2] sm:$0xff] }
 0x33a   :  { %15306 = vst [vmem:[#allocation83_spill] sm:$0xff] %v13656_v40  ;;  %v9105_v2 = vpop.eup %9104  ;;  %15308 = vst [vmem:[#allocation84_spill] sm:$0xff] %v13664_v14  ;;  %v4773_v51 = vmul.f32 %v13389_v22, %v4115_v29  ;;  %v5363_v54 = vmul.f32 %v13458_v32, %v4115_v29  ;;  %v3764_v50 = vmul.f32 %v9103_v15, %v15309_v56  ;;  %v15314_v56 = vld [vmem:[#allocation81_spill] sm:$0xff] }
 0x33b   :  { %v9107_v47 = vpop.eup %9106  ;;  %v13669_v60 = vadd.f32 %v4186_v35, %v4053_v16  ;;  %v13672_v11 = vmul.f32 %v13322_v13, %v3984_v0  ;;  %v13675_v57 = vmul.f32 %v13389_v22, %v4117_v30  ;;  %v13678_v39 = vmul.f32 %v13434_v27, %v3984_v0  ;;  %3919 = vst.msk [vmem:[#allocation3 + $0x2d9] sm:$0xff] %vm3775_vm8, %v3766_v63  ;;  %v5504_v0 = vld [vmem:[#allocation3 + $0x352] sm:$0xff] }
 0x33c   :  { %v9109_v9 = vpop.eup %9108  ;;  %v13682_v1 = vmul.f32 %v13458_v32, %v4117_v30  ;;  %v13684_v7 = vadd.f32 %v4184_v4, %v4051_v28  ;;  %v13686_v29 = vadd.f32 %v4773_v51, %v4640_v17  ;;  %v13688_v5 = vadd.f32 %v5363_v54, %v5230_v37  ;;  %3917 = vst.msk [vmem:[#allocation3 + $0x2c1] sm:$0xff] %vm3775_vm8, %v3764_v50  ;;  %v9551_v28 = vld [vmem:[#allocation3 + $0x172] sm:$0xff]  ;;  %v15310_v37 = vld [vmem:[#allocation79_spill] sm:$0xff] }
 0x33d   :  { %v9111_v16 = vpop.eup %9110  ;;  %v13692_v35 = vadd.f32 %v13631_v12, %v4836_v8  ;;  %v5407_v21 = vadd.f32 %v13512_v55, %v13499_v46  ;;  %v5408_v30 = vadd.f32 %v13515_v62, %v13504_v3  ;;  %v5537_v4 = vmul.f32 %v9551_v28, %v13557_v18  ;;  %v15311_v8 = vld [vmem:[#allocation80_spill] sm:$0xff]  ;;  %v15317_v28 = vld [vmem:[#allocation74_spill] sm:$0xff] }
 0x33e   :  { %v9113_v17 = vpop.eup %9112  ;;  %v3769_v15 = vmul.f32 %v9111_v16, %v15310_v37  ;;  %v5538_v24 = vmul.f32 %v13557_v18, %v5469_v33  ;;  %v5540_v63 = vmul.f32 %v13557_v18, %v5471_v10  ;;  %v5541_v51 = vmul.f32 %v13557_v18, %v5472_v48  ;;  %v15315_v33 = vld [vmem:[#allocation14_spill] sm:$0xff]  ;;  %v15316_v48 = vld [vmem:[#allocation29_spill] sm:$0xff] }
 0x33f   :  { %v9115_v12 = vpop.eup %9114  ;;  %v3767_v54 = vmul.f32 %v9113_v17, %v15311_v8  ;;  %v5539_v46 = vmul.f32 %v13557_v18, %v13172_v23  ;;  %v13707_v3 = vmul.f32 %v13557_v18, %v5503_v19  ;;  %v13710_v55 = vmul.f32 %v13557_v18, %v5504_v0  ;;  %v15318_v0 = vld [vmem:[#allocation82_spill] sm:$0xff] }
 0x340   :  { %v9117_v62 = vpop.eup %9116  ;;  %3922 = vst.msk [vmem:[#allocation3 + $0x301] sm:$0xff] %vm3775_vm8, %v3769_v15  ;;  %v3770_v50 = vmul.f32 %v9115_v12, %v15314_v56  ;;  %v5598_v10 = vadd.f32 %v15315_v33, %v13532_v26  ;;  %v5599_v16 = vadd.f32 %v15316_v48, %v13538_v59  ;;  %v5600_v23 = vadd.f32 %v15317_v28, %v13542_v53  ;;  %v15319_v15 = vld [vmem:[#allocation42_spill] sm:$0xff]  ;;  %v15320_v26 = vld [vmem:[#allocation19_spill] sm:$0xff]  ;;  %v15326_v28 = vld [vmem:[#allocation16_spill] sm:$0xff] }
 0x341   :  { %15312 = vst [vmem:[#allocation85_spill] sm:$0xff] %v13707_v3  ;;  %15313 = vst [vmem:[#allocation72_spill] sm:$0xff] %v13710_v55  ;;  %v9119_v17 = vpop.eup %9118  ;;  %v6018_v19 = vadd.f32 1.0, %v9105_v2  ;;  %v3768_v37 = vmul.f32 %v9117_v62, %v15318_v0  ;;  %v5601_v8 = vadd.f32 %v5537_v4, %v13548_v20  ;;  %v5602_v61 = vadd.f32 %v5538_v24, %v15319_v15  ;;  %v15321_v33 = vld [vmem:[#allocation35_spill] sm:$0xff]  ;;  %v15322_v2 = vld [vmem:[#allocation76_spill] sm:$0xff] }
 0x342   :  { %3920 = vst.msk [vmem:[#allocation3 + $0x2e9] sm:$0xff] %vm3775_vm8, %v3767_v54  ;;  %v9121_v12 = vpop.eup %9120  ;;  %3923 = vst.msk [vmem:[#allocation3 + $0x309] sm:$0xff] %vm3775_vm8, %v3770_v50  ;;  %v3773_v56 = vmul.f32 %v9119_v17, %v15320_v26  ;;  %v5603_v59 = vadd.f32 %v5539_v46, %v15321_v33  ;;  %v5604_v48 = vadd.f32 %v5540_v63, %v5407_v21  ;;  %v6019_v53 = vadd.f32 1.0, %v9107_v47  ;;  %v15323_v54 = vld [vmem:[#allocation51_spill] sm:$0xff]  ;;  %v15324_v20 = vld [vmem:[#allocation56_spill] sm:$0xff] }
 0x343   :  { %v5605_v45 = vadd.f32 %v5541_v51, %v5408_v30  ;;  %3921 = vst.msk [vmem:[#allocation3 + $0x2f1] sm:$0xff] %vm3775_vm8, %v3768_v37  ;;  %9122 = vpow2.f32 %v15322_v2  ;;  %v5665_v62 = vmul.f32 %v13581_v25, %v15323_v54  ;;  %v5666_v4 = vmul.f32 %v13581_v25, %v15324_v20  ;;  %v15325_v50 = vld [vmem:[#allocation22_spill] sm:$0xff]  ;;  %v15327_v17 = vld [vmem:[#allocation47_spill] sm:$0xff] }
 0x344   :  { %v6020_v24 = vadd.f32 1.0, %v9109_v9  ;;  %3926 = vst.msk [vmem:[#allocation3 + $0x331] sm:$0xff] %vm3775_vm8, %v3773_v56  ;;  %9124 = vpow2.f32 %v15325_v50  ;;  %v5668_v21 = vmul.f32 %v13581_v25, %v15326_v28  ;;  %v5669_v47 = vmul.f32 %v13581_v25, %v5598_v10  ;;  %v3983_v63 = vld [vmem:[#allocation3 + $0x2c0] sm:$0xff] }
 0x345   :  { %v6021_v30 = vadd.f32 1.0, %v9121_v12  ;;  %9126 = vrcp.f32 %v6018_v19  ;;  %v5670_v51 = vmul.f32 %v13581_v25, %v5599_v16  ;;  %v5671_v46 = vmul.f32 %v13581_v25, %v5600_v23  ;;  %v15330_v12 = vld [vmem:[#allocation18_spill] sm:$0xff]  ;;  %v4313_v54 = vld [vmem:[#allocation3 + $0x2c2] sm:$0xff] }
 0x346   :  { %9128 = vpow2.f32 %v15327_v17  ;;  %v5672_v9 = vmul.f32 %v13581_v25, %v5601_v8  ;;  %v5673_v0 = vmul.f32 %v13581_v25, %v5602_v61  ;;  %v5674_v37 = vmul.f32 %v13581_v25, %v5603_v59  ;;  %v4116_v61 = vld [vmem:[#allocation3 + $0x2c1] sm:$0xff] }
 0x347   :  { %9130 = vrcp.f32 %v6019_v53  ;;  %v5675_v15 = vmul.f32 %v13581_v25, %v5604_v48  ;;  %v5676_v10 = vmul.f32 %v13581_v25, %v5605_v45  ;;  %v13747_v19 = vadd.f32 %v13593_v44, %v5665_v62  ;;  %v4312_v26 = vld [vmem:[#allocation3 + $0x2ba] sm:$0xff] }
 0x348   :  { %9132 = vrcp.f32 %v6020_v24  ;;  %v4577_v16 = vmul.f32 %v13322_v13, %v3983_v63  ;;  %v13751_v23 = vadd.f32 %v13593_v44, %v5666_v4  ;;  %v13755_v8 = vadd.f32 %v13593_v44, %v15330_v12  ;;  %v3985_v24 = vld [vmem:[#allocation3 + $0x2d8] sm:$0xff] }
 0x349   :  { %15328 = vst [vmem:[#allocation63_spill] sm:$0xff] %v13747_v19  ;;  %9134 = vrcp.f32 %v6021_v30  ;;  %v13758_v56 = vadd.f32 %v13593_v44, %v5668_v21  ;;  %v13761_v45 = vadd.f32 %v13593_v44, %v5669_v47  ;;  %v13764_v33 = vadd.f32 %v13593_v44, %v5670_v51  ;;  %v4118_v51 = vld [vmem:[#allocation3 + $0x2d9] sm:$0xff] }
 0x34a   :  { %15329 = vst [vmem:[#allocation86_spill] sm:$0xff] %v13751_v23  ;;  %v4641_v59 = vadd.f32 %v4577_v16, %v13659_v43  ;;  %v5167_v48 = vmul.f32 %v13434_v27, %v3983_v63  ;;  %v13769_v53 = vadd.f32 %v13593_v44, %v5671_v46  ;;  %v13772_v2 = vadd.f32 %v13593_v44, %v5672_v9 }
 0x34b   :  { %15331 = vst [vmem:[#allocation88_spill] sm:$0xff] %v13761_v45  ;;  %15332 = vst [vmem:[#allocation15_spill] sm:$0xff] %v13764_v33  ;;  %v13775_v62 = vadd.f32 %v13593_v44, %v5673_v0  ;;  %v13778_v20 = vadd.f32 %v13593_v44, %v5674_v37  ;;  %v13781_v4 = vadd.f32 %v13593_v44, %v5675_v15  ;;  %v4314_v15 = vld [vmem:[#allocation3 + $0x2d2] sm:$0xff]  ;;  %v13805_v38 = vmul.f32 -1.442695, %v13747_v19 }
 0x34c   :  { %15333 = vst [vmem:[#allocation54_spill] sm:$0xff] %v13769_v53  ;;  %15334 = vst [vmem:[#allocation17_spill] sm:$0xff] %v13772_v2  ;;  %v13784_v43 = vadd.f32 %v13593_v44, %v5676_v10  ;;  %v4774_v50 = vmul.f32 %v13389_v22, %v4116_v61  ;;  %v5231_v28 = vadd.f32 %v5167_v48, %v13692_v35  ;;  %v4315_v10 = vld [vmem:[#allocation3 + $0x2da] sm:$0xff] }
 0x34d   :  { %15335 = vst [vmem:[#allocation45_spill] sm:$0xff] %v13775_v62  ;;  %15336 = vst [vmem:[#allocation65_spill] sm:$0xff] %v13778_v20  ;;  %v5364_v21 = vmul.f32 %v13458_v32, %v4116_v61  ;;  %v5560_v47 = vmul.f32 %v13557_v18, %v4312_v26  ;;  %v13790_v30 = vpop.eup %9122  ;;  %v4052_v46 = vmul.f32 %v13298_v52, %v3983_v63 }
 0x34e   :  { %15337 = vst [vmem:[#allocation64_spill] sm:$0xff] %v13781_v4  ;;  %15338 = vst [vmem:[#allocation73_spill] sm:$0xff] %v13784_v43  ;;  %v4185_v17 = vmul.f32 %v13282_v31, %v4116_v61  ;;  %v4381_v9 = vmul.f32 %v13403_v42, %v4312_v26  ;;  %v4970_v0 = vmul.f32 %v13418_v58, %v4312_v26  ;;  %v13796_v37 = vpop.eup %9124  ;;  %v13808_v26 = vmul.f32 -1.442695, %v13751_v23 }
 0x34f   :  { %v4838_v35 = vadd.f32 %v4774_v50, %v4641_v59  ;;  %v5428_v16 = vadd.f32 %v5364_v21, %v5231_v28  ;;  %v5561_v12 = vmul.f32 %v13557_v18, %v4313_v54  ;;  %v5624_v48 = vadd.f32 %v5560_v47, %v13688_v5  ;;  %v13800_v6 = vpop.eup %9126 }
 0x350   :  { %15339 = vst [vmem:[#allocation62_spill] sm:$0xff] %v13800_v6  ;;  %v4054_v63 = vmul.f32 %v13298_v52, %v3985_v24  ;;  %v5034_v61 = vadd.f32 %v4970_v0, %v13686_v29  ;;  %v13810_v49 = vpop.eup %9128  ;;  %v4187_v59 = vmul.f32 %v13282_v31, %v4118_v51  ;;  %v4971_v50 = vmul.f32 %v13418_v58, %v4313_v54 }
 0x351   :  { %v5625_v28 = vadd.f32 %v5561_v12, %v5428_v16  ;;  %v5695_v5 = vmul.f32 %v13581_v25, %v5624_v48  ;;  %v13815_v21 = vpop.eup %9130  ;;  %v4383_v47 = vmul.f32 %v13403_v42, %v4314_v15  ;;  %v4384_v29 = vmul.f32 %v13403_v42, %v4315_v10 }
 0x352   :  { %15340 = vst [vmem:[#allocation78_spill] sm:$0xff] %v13815_v21  ;;  %v4579_v0 = vmul.f32 %v13322_v13, %v3985_v24  ;;  %v4249_v19 = vadd.f32 %v4185_v17, %v4052_v46  ;;  %v13820_v23 = vpop.eup %9132  ;;  %v4445_v36 = vadd.f32 %v4381_v9, %v13684_v7  ;;  %v5035_v34 = vadd.f32 %v4971_v50, %v4838_v35  ;;  %v3986_v17 = vld [vmem:[#allocation3 + $0x2e8] sm:$0xff]  ;;  %v3988_v50 = vld [vmem:[#allocation3 + $0x300] sm:$0xff] }
 0x353   :  { %15341 = vst [vmem:[#allocation79_spill] sm:$0xff] %v13820_v23  ;;  %v5696_v14 = vmul.f32 %v13581_v25, %v5625_v28  ;;  %v13825_v16 = vadd.f32 %v13593_v44, %v5695_v5  ;;  %v13827_v12 = vpop.eup %9134  ;;  %v4776_v48 = vmul.f32 %v13389_v22, %v4118_v51  ;;  %v4972_v21 = vmul.f32 %v13418_v58, %v4314_v15  ;;  %v4121_v28 = vld [vmem:[#allocation3 + $0x301] sm:$0xff] }
 0x354   :  { %15343 = vst [vmem:[#allocation81_spill] sm:$0xff] %v13827_v12  ;;  %v4382_v40 = vmul.f32 %v13403_v42, %v4313_v54  ;;  %v5232_v46 = vadd.f32 %v13678_v39, %v5034_v61  ;;  %v4251_v23 = vadd.f32 %v4187_v59, %v4054_v63  ;;  %v13834_v7 = vmul.f32 %v13418_v58, %v4315_v10  ;;  %v4119_v39 = vld [vmem:[#allocation3 + $0x2e9] sm:$0xff] }
 0x355   :  { %15342 = vst [vmem:[#allocation80_spill] sm:$0xff] %v13825_v16  ;;  %v5169_v9 = vmul.f32 %v13434_v27, %v3985_v24  ;;  %v13838_v35 = vadd.f32 %v13593_v44, %v5696_v14  ;;  %v4447_v5 = vadd.f32 %v4383_v47, %v13669_v60  ;;  %v5366_v12 = vmul.f32 %v13458_v32, %v4118_v51 }
 0x356   :  { %v5562_v54 = vmul.f32 %v13557_v18, %v4314_v15  ;;  %v4446_v6 = vadd.f32 %v4382_v40, %v4249_v19  ;;  %v4642_v63 = vadd.f32 %v13672_v11, %v4445_v36  ;;  %v8257_v59 = vmul.f32 -1.442695, %v13825_v16 }
 0x357   :  { %15344 = vst [vmem:[#allocation14_spill] sm:$0xff] %v13838_v35  ;;  %v5233_v61 = vadd.f32 %v5169_v9, %v5035_v34  ;;  %v4580_v24 = vmul.f32 %v13322_v13, %v3986_v17  ;;  %v5429_v14 = vadd.f32 %v13682_v1, %v5232_v46  ;;  %v8258_v41 = vmul.f32 -1.442695, %v13838_v35  ;;  %v3987_v34 = vld [vmem:[#allocation3 + $0x2f0] sm:$0xff] }
 0x358   :  { %v4057_v55 = vmul.f32 %v13298_v52, %v3988_v50  ;;  %v4190_v60 = vmul.f32 %v13282_v31, %v4121_v28  ;;  %v4448_v51 = vadd.f32 %v4384_v29, %v4251_v23  ;;  %v5563_v15 = vmul.f32 %v13557_v18, %v4315_v10  ;;  %v3989_v10 = vld [vmem:[#allocation3 + $0x308] sm:$0xff] }
 0x359   :  { %v4055_v40 = vmul.f32 %v13298_v52, %v3986_v17  ;;  %v4188_v36 = vmul.f32 %v13282_v31, %v4119_v39  ;;  %v4643_v11 = vadd.f32 %v4579_v0, %v4446_v6  ;;  %v13854_v19 = vmul.f32 %v13322_v13, %v3988_v50  ;;  %v13861_v29 = vld [vmem:[#allocation3 + $0x309] sm:$0xff]  ;;  %v4120_v0 = vld [vmem:[#allocation3 + $0x2f1] sm:$0xff] }
 0x35a   :  { %v13857_v1 = vmul.f32 %v13389_v22, %v4121_v28  ;;  %v5172_v47 = vmul.f32 %v13434_v27, %v3988_v50  ;;  %v5430_v46 = vadd.f32 %v5366_v12, %v5233_v61  ;;  %9136 = vpow2.f32 %v8257_v59 }
 0x35b   :  { %v4644_v9 = vadd.f32 %v4580_v24, %v4447_v5  ;;  %v4839_v23 = vadd.f32 %v13675_v57, %v4642_v63  ;;  %v13863_v35 = vadd.f32 %v5562_v54, %v5429_v14  ;;  %9138 = vpow2.f32 %v8258_v41  ;;  %v4318_v5 = vld [vmem:[#allocation3 + $0x302] sm:$0xff]  ;;  %v4316_v63 = vld [vmem:[#allocation3 + $0x2ea] sm:$0xff] }
 0x35c   :  { %v4254_v6 = vadd.f32 %v4190_v60, %v4057_v55  ;;  %v4581_v16 = vmul.f32 %v13322_v13, %v3987_v34  ;;  %v13867_v3 = vmul.f32 %v13458_v32, %v4121_v28  ;;  %v4252_v43 = vadd.f32 %v4188_v36, %v4055_v40  ;;  %v4319_v28 = vld [vmem:[#allocation3 + $0x30a] sm:$0xff]  ;;  %v4317_v36 = vld [vmem:[#allocation3 + $0x2f2] sm:$0xff] }
 0x35d   :  { %v4777_v12 = vmul.f32 %v13389_v22, %v4119_v39  ;;  %v5170_v50 = vmul.f32 %v13434_v27, %v3986_v17  ;;  %v4058_v57 = vmul.f32 %v13298_v52, %v3989_v10  ;;  %v4191_v54 = vmul.f32 %v13282_v31, %v13861_v29 }
 0x35e   :  { %v4645_v41 = vadd.f32 %v4581_v16, %v4448_v51  ;;  %v4840_v55 = vadd.f32 %v4776_v48, %v4643_v11  ;;  %v13874_v61 = vadd.f32 %v5563_v15, %v5430_v46  ;;  %v5036_v24 = vadd.f32 %v4972_v21, %v4839_v23 }
 0x35f   :  { %v4841_v59 = vadd.f32 %v4777_v12, %v4644_v9  ;;  %v4778_v14 = vmul.f32 %v13389_v22, %v4120_v0  ;;  %v4387_v60 = vmul.f32 %v13403_v42, %v4318_v5  ;;  %v4056_v17 = vmul.f32 %v13298_v52, %v3987_v34 }
 0x360   :  { %v4189_v40 = vmul.f32 %v13282_v31, %v4120_v0  ;;  %v5171_v4 = vmul.f32 %v13434_v27, %v3987_v34  ;;  %v5234_v20 = vadd.f32 %v5170_v50, %v5036_v24  ;;  %v5367_v16 = vmul.f32 %v13458_v32, %v4119_v39 }
 0x361   :  { %v4842_v48 = vadd.f32 %v4778_v14, %v4645_v41  ;;  %v4974_v51 = vmul.f32 %v13418_v58, %v4316_v63  ;;  %v4255_v15 = vadd.f32 %v4191_v54, %v4058_v57  ;;  %v4388_v21 = vmul.f32 %v13403_v42, %v4319_v28 }
 0x362   :  { %v4583_v11 = vmul.f32 %v13322_v13, %v3989_v10  ;;  %v5037_v46 = vadd.f32 %v13834_v7, %v4840_v55  ;;  %v4385_v52 = vmul.f32 %v13403_v42, %v4316_v63  ;;  %v4975_v31 = vmul.f32 %v13418_v58, %v4317_v36 }
 0x363   :  { %v5038_v9 = vadd.f32 %v4974_v51, %v4841_v59  ;;  %v3579_v34 = vadd.f32 1.0, %v13790_v30  ;;  %v13889_v23 = vadd.f32 %v4387_v60, %v4254_v6  ;;  %v13893_v39 = vmul.f32 %v13389_v22, %v13861_v29 }
 0x364   :  { %v4253_v12 = vadd.f32 %v4189_v40, %v4056_v17  ;;  %v5235_v50 = vadd.f32 %v5171_v4, %v5037_v46  ;;  %v9137_v57 = vpop.eup %9136  ;;  %v5039_v54 = vadd.f32 %v4975_v31, %v4842_v48  ;;  %v3582_v13 = vadd.f32 1.0, %v13796_v37 }
 0x365   :  { %9140 = vrcp.f32 %v3579_v34  ;;  %v3580_v7 = vadd.f32 1.0, %v13810_v49  ;;  %v9139_v41 = vpop.eup %9138  ;;  %v5431_v55 = vadd.f32 %v5367_v16, %v5234_v20  ;;  %v5173_v59 = vmul.f32 %v13434_v27, %v3989_v10 }
 0x366   :  { %v4386_v30 = vmul.f32 %v13403_v42, %v4317_v36  ;;  %v5368_v6 = vmul.f32 %v13458_v32, %v4120_v0  ;;  %v4449_v24 = vadd.f32 %v4385_v52, %v4252_v43  ;;  %v5236_v22 = vadd.f32 %v5172_v47, %v5038_v9 }
 0x367   :  { %v5564_v14 = vmul.f32 %v13557_v18, %v4316_v63  ;;  %9142 = vrcp.f32 %v3582_v13  ;;  %v6022_v4 = vadd.f32 1.0, %v9137_v57  ;;  %v6023_v37 = vadd.f32 1.0, %v9139_v41  ;;  %v4714_v41 = vld [vmem:[#allocation3 + $0x331] sm:$0xff] }
 0x368   :  { %v4450_v60 = vadd.f32 %v4386_v30, %v4253_v12  ;;  %v5432_v17 = vadd.f32 %v5368_v6, %v5235_v50  ;;  %9144 = vrcp.f32 %v3580_v7  ;;  %v13901_v40 = vadd.f32 %v4388_v21, %v4255_v15  ;;  %v4517_v7 = vld [vmem:[#allocation3 + $0x330] sm:$0xff] }
 0x369   :  { %v13904_v49 = vmul.f32 %v13418_v58, %v4318_v5  ;;  %v5237_v20 = vadd.f32 %v5173_v59, %v5039_v54  ;;  %v13907_v42 = vmul.f32 %v13418_v58, %v4319_v28  ;;  %v5370_v43 = vmul.f32 %v13458_v32, %v13861_v29  ;;  %v15350_v6 = vld [vmem:[#allocation65_spill] sm:$0xff] }
 0x36a   :  { %v5565_v47 = vmul.f32 %v13557_v18, %v4317_v36  ;;  %v5628_v10 = vadd.f32 %v5564_v14, %v5431_v55  ;;  %v5566_v0 = vmul.f32 %v13557_v18, %v4318_v5  ;;  %v5567_v63 = vmul.f32 %v13557_v18, %v4319_v28  ;;  %v15349_v55 = vld [vmem:[#allocation33_spill] sm:$0xff] }
 0x36b   :  { %v4646_v16 = vadd.f32 %v13854_v19, %v4449_v24  ;;  %v5433_v48 = vadd.f32 %v13867_v3, %v5236_v22  ;;  %9146 = vrcp.f32 %v6022_v4  ;;  %v4647_v51 = vadd.f32 %v4583_v11, %v4450_v60  ;;  %v15352_v4 = vld [vmem:[#allocation64_spill] sm:$0xff] }
 0x36c   :  { %v5629_v15 = vadd.f32 %v5565_v47, %v5432_v17  ;;  %v8229_v58 = vmul.f32 -1.442695, %v13755_v8  ;;  %9148 = vrcp.f32 %v6023_v37  ;;  %v5434_v21 = vadd.f32 %v5370_v43, %v5237_v20  ;;  %v15354_v20 = vld [vmem:[#allocation73_spill] sm:$0xff] }
 0x36d   :  { %v5697_v29 = vmul.f32 %v13581_v25, %v13863_v35  ;;  %v8230_v36 = vmul.f32 -1.442695, %v13758_v56  ;;  %v5699_v5 = vmul.f32 %v13581_v25, %v5628_v10  ;;  %v5698_v28 = vmul.f32 %v13581_v25, %v13874_v61  ;;  %v15345_v35 = vld [vmem:[#allocation8_spill] sm:$0xff] }
 0x36e   :  { %9150 = vpow2.f32 %v13805_v38  ;;  %v8231_v3 = vmul.f32 -1.442695, %v13761_v45  ;;  %v4843_v11 = vadd.f32 %v13857_v1, %v4646_v16  ;;  %v5630_v46 = vadd.f32 %v5566_v0, %v5433_v48  ;;  %v9553_v0 = vld [vmem:[%s14928_s4 + $0x4] ss:$0 sm:$0xff] }
 0x36f   :  { %v9141_v19 = vpop.eup %9140  ;;  %9152 = vpow2.f32 %v13808_v26  ;;  %v8232_v52 = vmul.f32 -1.442695, %v13764_v33  ;;  %v5700_v9 = vmul.f32 %v13581_v25, %v5629_v15  ;;  %v8233_v34 = vmul.f32 -1.442695, %v13769_v53  ;;  %v15347_v26 = vld [vmem:[#allocation32_spill] sm:$0xff] }
 0x370   :  { %v3771_v31 = vmul.f32 %v9141_v19, %v15345_v35  ;;  %9154 = vpow2.f32 %v8229_v58  ;;  %v5631_v12 = vadd.f32 %v5567_v63, %v5434_v21  ;;  %v13932_v38 = vadd.f32 %v13593_v44, %v5697_v29 }
 0x371   :  { %v9143_v61 = vpop.eup %9142  ;;  %9156 = vpow2.f32 %v8230_v36  ;;  %v8234_v1 = vmul.f32 -1.442695, %v13772_v2  ;;  %v13938_v54 = vadd.f32 %v13593_v44, %v5698_v28  ;;  %v8235_v13 = vmul.f32 -1.442695, %v13775_v62 }
 0x372   :  { %15346 = vst [vmem:[#allocation29_spill] sm:$0xff] %v13932_v38  ;;  %v9145_v50 = vpop.eup %9144  ;;  %3924 = vst.msk [vmem:[#allocation3 + $0x319] sm:$0xff] %vm3775_vm8, %v3771_v31  ;;  %v3774_v57 = vmul.f32 %v9143_v61, %v15347_v26  ;;  %9158 = vpow2.f32 %v8231_v3  ;;  %v5701_v30 = vmul.f32 %v13581_v25, %v5630_v46  ;;  %v8236_v24 = vmul.f32 -1.442695, %v15350_v6  ;;  %v9556_v61 = vld [vmem:[%s14928_s4 + $0x6] ss:$0 sm:$0xff] }
 0x373   :  { %15348 = vst [vmem:[#allocation74_spill] sm:$0xff] %v13938_v54  ;;  %v3772_v59 = vmul.f32 %v9145_v50, %v15349_v55  ;;  %9160 = vpow2.f32 %v8232_v52  ;;  %v4844_v22 = vadd.f32 %v13893_v39, %v4647_v51  ;;  %v13947_v14 = vadd.f32 %v13593_v44, %v5699_v5  ;;  %v9552_v39 = vld [vmem:[%s14928_s4 + $0x3] ss:$0 sm:$0xff]  ;;  %v9555_v52 = vld [vmem:[%s14928_s4 + $0x1] ss:$0 sm:$0xff] }
 0x374   :  { %3927 = vst.msk [vmem:[#allocation3 + $0x339] sm:$0xff] %vm3775_vm8, %v3774_v57  ;;  %9162 = vpow2.f32 %v8233_v34  ;;  %v8237_v60 = vmul.f32 -1.442695, %v15352_v4  ;;  %v5702_v17 = vmul.f32 %v13581_v25, %v5631_v12  ;;  %v13953_v37 = vadd.f32 %v13593_v44, %v5700_v9 }
 0x375   :  { %15351 = vst [vmem:[#allocation82_spill] sm:$0xff] %v13947_v14  ;;  %3925 = vst.msk [vmem:[#allocation3 + $0x321] sm:$0xff] %vm3775_vm8, %v3772_v59  ;;  %9164 = vpow2.f32 %v8234_v1  ;;  %v8238_v43 = vmul.f32 -1.442695, %v15354_v20  ;;  %v13956_v47 = vpop.eup %9146  ;;  %v13961_v10 = vmul.f32 %v9552_v39, %v4517_v7  ;;  %v13966_v63 = vmul.f32 %v9553_v0, %v4714_v41 }
 0x376   :  { %15353 = vst [vmem:[#allocation42_spill] sm:$0xff] %v13953_v37  ;;  %9166 = vpow2.f32 %v8235_v13  ;;  %v8259_v16 = vmul.f32 -1.442695, %v13932_v38  ;;  %v13969_v48 = vpop.eup %9148  ;;  %v13972_v51 = vmul.f32 %v13434_v27, %v4517_v7  ;;  %v13975_v15 = vadd.f32 %v13593_v44, %v5701_v30 }
 0x377   :  { %9168 = vpow2.f32 %v8236_v24  ;;  %v8260_v58 = vmul.f32 -1.442695, %v13938_v54  ;;  %v5040_v29 = vadd.f32 %v13904_v49, %v4843_v11  ;;  %v13982_v36 = vadd.f32 %v13907_v42, %v4844_v22 }
 0x378   :  { %15355 = vst [vmem:[#allocation19_spill] sm:$0xff] %v13975_v15  ;;  %v13978_v21 = vpop.eup %9150  ;;  %v13985_v5 = vmul.f32 %v13458_v32, %v4714_v41  ;;  %9170 = vpow2.f32 %v8237_v60  ;;  %v13990_v19 = vadd.f32 %v13593_v44, %v5702_v17  ;;  %v13993_v46 = vmul.f32 -1.442695, %v13947_v14  ;;  %v9554_v32 = vld [vmem:[%s14928_s4] ss:$0 sm:$0xff] }
 0x379   :  { %v13987_v28 = vpop.eup %9152  ;;  %v3990_v27 = vld [vmem:[#allocation3 + $0x318] sm:$0xff]  ;;  %9172 = vpow2.f32 %v8238_v43  ;;  %v13996_v49 = vmul.f32 -1.442695, %v13953_v37  ;;  %v14012_v26 = vmul.f32 -1.442695, %v13975_v15 }
 0x37a   :  { %v4123_v3 = vld [vmem:[#allocation3 + $0x319] sm:$0xff]  ;;  %v13998_v42 = vpop.eup %9154  ;;  %v4059_v11 = vmul.f32 %v9554_v32, %v3990_v27  ;;  %v4584_v31 = vmul.f32 %v9552_v39, %v3990_v27  ;;  %9174 = vpow2.f32 %v8259_v16  ;;  %v5174_v12 = vmul.f32 %v9556_v61, %v3990_v27  ;;  %v9557_v41 = vld [vmem:[%s14928_s4 + $0x7] ss:$0 sm:$0xff] }
 0x37b   :  { %v4192_v35 = vmul.f32 %v9555_v52, %v4123_v3  ;;  %v14006_v9 = vpop.eup %9156  ;;  %v4781_v34 = vmul.f32 %v9553_v0, %v4123_v3  ;;  %v4518_v1 = vld [vmem:[#allocation3 + $0x338] sm:$0xff]  ;;  %9176 = vpow2.f32 %v8260_v58  ;;  %v5371_v55 = vmul.f32 %v9557_v41, %v4123_v3  ;;  %v9558_v58 = vld [vmem:[%s14928_s4 + $0x2] ss:$0 sm:$0xff] }
 0x37c   :  { %v4715_v50 = vld [vmem:[#allocation3 + $0x339] sm:$0xff]  ;;  %v14014_v57 = vpop.eup %9158  ;;  %v4648_v7 = vadd.f32 %v4584_v31, %v13889_v23  ;;  %v4587_v59 = vmul.f32 %v9552_v39, %v4518_v1  ;;  %v4124_v24 = vld [vmem:[#allocation3 + $0x321] sm:$0xff]  ;;  %v5238_v31 = vadd.f32 %v5174_v12, %v5040_v29  ;;  %9178 = vpow2.f32 %v13993_v46 }
 0x37d   :  { %v4256_v13 = vadd.f32 %v4192_v35, %v4059_v11  ;;  %v3991_v30 = vld [vmem:[#allocation3 + $0x320] sm:$0xff]  ;;  %v14020_v60 = vpop.eup %9160  ;;  %v4193_v43 = vmul.f32 %v9555_v52, %v4124_v24  ;;  %v4784_v23 = vmul.f32 %v9553_v0, %v4715_v50  ;;  %v4911_v3 = vld [vmem:[#allocation3 + $0x332] sm:$0xff]  ;;  %v5372_v12 = vmul.f32 %v9557_v41, %v4124_v24 }
 0x37e   :  { %v4320_v22 = vld [vmem:[#allocation3 + $0x31a] sm:$0xff]  ;;  %v4060_v17 = vmul.f32 %v9554_v32, %v3991_v30  ;;  %v4321_v16 = vld [vmem:[#allocation3 + $0x322] sm:$0xff]  ;;  %v14025_v11 = vpop.eup %9162  ;;  %v4845_v35 = vadd.f32 %v4781_v34, %v4648_v7  ;;  %v4585_v15 = vmul.f32 %v9552_v39, %v3991_v30  ;;  %v4782_v32 = vmul.f32 %v9553_v0, %v4124_v24 }
 0x37f   :  { %v4389_v27 = vmul.f32 %v9558_v58, %v4320_v22  ;;  %v4390_v20 = vmul.f32 %v9558_v58, %v4321_v16  ;;  %v14027_v37 = vpop.eup %9164  ;;  %v9559_v52 = vld [vmem:[%s14928_s4 + $0x5] ss:$0 sm:$0xff]  ;;  %v4912_v38 = vld [vmem:[#allocation3 + $0x33a] sm:$0xff]  ;;  %v5175_v29 = vmul.f32 %v9556_v61, %v3991_v30  ;;  %v5568_v39 = vmul.f32 %v13557_v18, %v4320_v22 }
 0x380   :  { %v4257_v14 = vadd.f32 %v4193_v43, %v4060_v17  ;;  %v4978_v4 = vmul.f32 %v9559_v52, %v4320_v22  ;;  %v14032_v6 = vpop.eup %9166  ;;  %v4649_v62 = vadd.f32 %v4585_v15, %v13901_v40  ;;  %v4979_v34 = vmul.f32 %v9559_v52, %v4321_v16  ;;  %v15359_v46 = vld [vmem:[#allocation31_spill] sm:$0xff] }
 0x381   :  { %v4453_v54 = vadd.f32 %v4389_v27, %v4256_v13  ;;  %v14035_v7 = vpop.eup %9168  ;;  %v4980_v13 = vmul.f32 %v9559_v52, %v4911_v3  ;;  %v4981_v27 = vmul.f32 %v9559_v52, %v4912_v38  ;;  %v5239_v53 = vadd.f32 %v5175_v29, %v13982_v36 }
 0x382   :  { %v4454_v17 = vadd.f32 %v4390_v20, %v4257_v14  ;;  %v14039_v43 = vpop.eup %9170  ;;  %v4846_v58 = vadd.f32 %v4782_v32, %v4649_v62  ;;  %v5042_v2 = vadd.f32 %v4978_v4, %v4845_v35  ;;  %v5177_v30 = vmul.f32 %v9556_v61, %v4518_v1 }
 0x383   :  { %v4650_v0 = vadd.f32 %v13961_v10, %v4453_v54  ;;  %v14042_v33 = vpop.eup %9172  ;;  %v5435_v24 = vadd.f32 %v5371_v55, %v5238_v31  ;;  %v5436_v20 = vadd.f32 %v5372_v12, %v5239_v53  ;;  %v5569_v10 = vmul.f32 %v13557_v18, %v4321_v16  ;;  %v15356_v31 = vld [vmem:[#allocation87_spill] sm:$0xff] }
 0x384   :  { %v4651_v40 = vadd.f32 %v4587_v59, %v4454_v17  ;;  %v14045_v45 = vpop.eup %9174  ;;  %v5043_v14 = vadd.f32 %v4979_v34, %v4846_v58  ;;  %v5240_v54 = vadd.f32 %v13972_v51, %v5042_v2  ;;  %v5374_v36 = vmul.f32 %v9557_v41, %v4715_v50  ;;  %v15357_v41 = vld [vmem:[#allocation58_spill] sm:$0xff] }
 0x385   :  { %v4847_v15 = vadd.f32 %v13966_v63, %v4650_v0  ;;  %v14049_v62 = vpop.eup %9176  ;;  %v5570_v35 = vmul.f32 %v13557_v18, %v4911_v3  ;;  %v5632_v61 = vadd.f32 %v5568_v39, %v5435_v24  ;;  %v5633_v1 = vadd.f32 %v5569_v10, %v5436_v20  ;;  %v15358_v3 = vld [vmem:[#allocation46_spill] sm:$0xff]  ;;  %v15360_v39 = vld [vmem:[#allocation85_spill] sm:$0xff] }
 0x386   :  { %v4848_v4 = vadd.f32 %v4784_v23, %v4651_v40  ;;  %v5241_v59 = vadd.f32 %v5177_v30, %v5043_v14  ;;  %v5437_v63 = vadd.f32 %v13985_v5, %v5240_v54  ;;  %v5571_v2 = vmul.f32 %v13557_v18, %v4912_v38  ;;  %v15361_v0 = vld [vmem:[#allocation38_spill] sm:$0xff]  ;;  %v15363_v30 = vld [vmem:[#allocation72_spill] sm:$0xff] }
 0x387   :  { %v5044_v22 = vadd.f32 %v4980_v13, %v4847_v15  ;;  %v5703_v16 = vmul.f32 %v13581_v25, %v5632_v61  ;;  %v5704_v50 = vmul.f32 %v13581_v25, %v5633_v1  ;;  %9180 = vpow2.f32 %v13996_v49  ;;  %v15362_v13 = vld [vmem:[#allocation53_spill] sm:$0xff]  ;;  %v15364_v54 = vld [vmem:[#allocation70_spill] sm:$0xff] }
 0x388   :  { %v5045_v55 = vadd.f32 %v4981_v27, %v4848_v4  ;;  %v5438_v53 = vadd.f32 %v5374_v36, %v5241_v59  ;;  %v5634_v51 = vadd.f32 %v5570_v35, %v5437_v63  ;;  %v8264_v5 = vmul.f32 -1.442695, %v13990_v19  ;;  %v15365_v20 = vld [vmem:[#allocation62_spill] sm:$0xff]  ;;  %v15366_v59 = vld [vmem:[#allocation40_spill] sm:$0xff]  ;;  %v15367_v63 = vld [vmem:[#allocation55_spill] sm:$0xff] }
 0x389   :  { %v5242_v32 = vadd.f32 %v15356_v31, %v5044_v22  ;;  %v14064_v18 = vadd.f32 %v13593_v44, %v5703_v16  ;;  %v14067_v38 = vadd.f32 %v13593_v44, %v5704_v50  ;;  %9182 = vpow2.f32 %v14012_v26  ;;  %v9179_v31 = vpop.eup %9178  ;;  %v15370_v16 = vld [vmem:[#allocation71_spill] sm:$0xff]  ;;  %v15371_v50 = vld [vmem:[#allocation78_spill] sm:$0xff] }
 0x38a   :  { %v5243_v23 = vadd.f32 %v15357_v41, %v5045_v55  ;;  %v5635_v34 = vadd.f32 %v5571_v2, %v5438_v53  ;;  %v5705_v29 = vmul.f32 %v13581_v25, %v5634_v51  ;;  %v14074_v49 = vmul.f32 %v15362_v13, %v15361_v0  ;;  %v15369_v2 = vld [vmem:[#allocation84_spill] sm:$0xff]  ;;  %v15374_v0 = vld [vmem:[#allocation79_spill] sm:$0xff] }
 0x38b   :  { %v5439_v52 = vadd.f32 %v15358_v3, %v5242_v32  ;;  %v8265_v40 = vmul.f32 -1.442695, %v14064_v18  ;;  %v8266_v15 = vmul.f32 -1.442695, %v14067_v38  ;;  %9184 = vpow2.f32 %v8264_v5  ;;  %v15368_v32 = vld [vmem:[#allocation83_spill] sm:$0xff] }
 0x38c   :  { %v5440_v12 = vadd.f32 %v15359_v46, %v5243_v23  ;;  %v5706_v58 = vmul.f32 %v13581_v25, %v5635_v34  ;;  %v14078_v27 = vadd.f32 %v13593_v44, %v5705_v29  ;;  %v5992_v26 = vadd.f32 1.0, %v13978_v21  ;;  %v15372_v5 = vld [vmem:[#allocation11_spill] sm:$0xff] }
 0x38d   :  { %v5636_v17 = vadd.f32 %v15360_v39, %v5439_v52  ;;  %v14087_v10 = vmul.f32 %v15365_v20, %v15364_v54  ;;  %9186 = vpow2.f32 %v8265_v40  ;;  %v14099_v61 = vmul.f32 %v15367_v63, %v15366_v59  ;;  %v15376_v40 = vld [vmem:[#allocation59_spill] sm:$0xff] }
 0x38e   :  { %v5637_v24 = vadd.f32 %v15363_v30, %v5440_v12  ;;  %v14090_v4 = vadd.f32 %v13593_v44, %v5706_v58  ;;  %v8267_v22 = vmul.f32 -1.442695, %v14078_v27  ;;  %9188 = vpow2.f32 %v8266_v15 }
 0x38f   :  { %v5707_v14 = vmul.f32 %v13581_v25, %v5636_v17  ;;  %v5993_v1 = vadd.f32 1.0, %v13987_v28  ;;  %v6259_v55 = vsel %vm3775_vm8, %v14074_v49, 0.0  ;;  %v14113_v41 = vmul.f32 %v15371_v50, %v15370_v16 }
 0x390   :  { %v5708_v36 = vmul.f32 %v13581_v25, %v5637_v24  ;;  %9190 = vpow2.f32 %v8267_v22  ;;  %v8268_v21 = vmul.f32 -1.442695, %v14090_v4  ;;  %v6323_v25 = vadd.f32 %v15369_v2, %v15368_v32  ;;  %v15379_v22 = vld [vmem:[#allocation81_spill] sm:$0xff] }
 0x391   :  { %v14095_v35 = vadd.f32 %v13593_v44, %v5707_v14  ;;  %9192 = vrcp.f32 %v5992_v26  ;;  %v6324_v28 = vsel %vm3775_vm8, %v14087_v10, 0.0  ;;  %v5994_v23 = vadd.f32 1.0, %v13998_v42  ;;  %v9181_v3 = vpop.eup %9180  ;;  %v15373_v42 = vld [vmem:[#allocation20_spill] sm:$0xff] }
 0x392   :  { %v14108_v53 = vadd.f32 %v13593_v44, %v5708_v36  ;;  %9194 = vpow2.f32 %v8268_v21  ;;  %v5995_v44 = vadd.f32 1.0, %v14006_v9  ;;  %v6260_v34 = vadd.f32 %v6259_v55, %v15372_v5  ;;  %v15375_v9 = vld [vmem:[#allocation30_spill] sm:$0xff] }
 0x393   :  { %v8269_v51 = vmul.f32 -1.442695, %v14095_v35  ;;  %v5996_v29 = vadd.f32 1.0, %v14014_v57  ;;  %v6261_v46 = vsel %vm3775_vm8, %v14099_v61, 0.0  ;;  %v9183_v12 = vpop.eup %9182  ;;  %v6325_v39 = vadd.f32 %v6324_v28, %v6323_v25  ;;  %v15377_v57 = vld [vmem:[#allocation21_spill] sm:$0xff]  ;;  %v15380_v25 = vld [vmem:[#allocation80_spill] sm:$0xff] }
 0x394   :  { %v8270_v52 = vmul.f32 -1.442695, %v14108_v53  ;;  %v5997_v17 = vadd.f32 1.0, %v14020_v60  ;;  %v14127_v13 = vmul.f32 %v15374_v0, %v15373_v42  ;;  %v5998_v58 = vadd.f32 1.0, %v14025_v11  ;;  %v15378_v11 = vld [vmem:[#allocation57_spill] sm:$0xff]  ;;  %v15381_v28 = vld [vmem:[#allocation63_spill] sm:$0xff] }
 0x395   :  { %9196 = vpow2.f32 %v8269_v51  ;;  %v14132_v15 = vmul.f32 %v15376_v40, %v15375_v9  ;;  %v6263_v30 = vsel %vm3775_vm8, %v15377_v57, 0.0  ;;  %v9185_v24 = vpop.eup %9184  ;;  %v6326_v14 = vsel %vm3775_vm8, %v14113_v41, 0.0  ;;  %v15383_v42 = vld [vmem:[#allocation86_spill] sm:$0xff] }
 0x396   :  { %9198 = vrcp.f32 %v5993_v1  ;;  %v5999_v60 = vadd.f32 1.0, %v14027_v37  ;;  %v6262_v26 = vadd.f32 %v6261_v46, %v6260_v34  ;;  %v6000_v20 = vadd.f32 1.0, %v14032_v6 }
 0x397   :  { %9200 = vpow2.f32 %v8270_v52  ;;  %v9187_v54 = vpop.eup %9186  ;;  %v14142_v36 = vmul.f32 %v15379_v22, %v15378_v11  ;;  %v6001_v63 = vadd.f32 1.0, %v14035_v7  ;;  %v6328_v1 = vsel %vm3775_vm8, %v14127_v13, 0.0 }
 0x398   :  { %9202 = vrcp.f32 %v5994_v23  ;;  %v9189_v59 = vpop.eup %9188  ;;  %v6264_v21 = vadd.f32 %v6263_v30, %v6262_v26  ;;  %v6327_v37 = vadd.f32 %v6326_v14, %v6325_v39  ;;  %v6002_v32 = vadd.f32 1.0, %v14039_v43 }
 0x399   :  { %9204 = vrcp.f32 %v5995_v44  ;;  %v6265_v6 = vsel %vm3775_vm8, %v14132_v15, 0.0  ;;  %v14152_v51 = vmul.f32 %v13956_v47, %v15380_v25  ;;  %v6003_v7 = vadd.f32 1.0, %v14042_v33  ;;  %v15382_v33 = vld [vmem:[#allocation14_spill] sm:$0xff] }
 0x39a   :  { %9206 = vrcp.f32 %v5996_v29  ;;  %v9191_v55 = vpop.eup %9190  ;;  %v6024_v50 = vadd.f32 1.0, %v14045_v45  ;;  %v6329_v43 = vadd.f32 %v6328_v1, %v6327_v37  ;;  %v6025_v44 = vadd.f32 1.0, %v14049_v62  ;;  %v15385_v1 = vld [vmem:[#allocation15_spill] sm:$0xff] }
 0x39b   :  { %9208 = vrcp.f32 %v5997_v17  ;;  %v9193_v2 = vpop.eup %9192  ;;  %v6266_v5 = vadd.f32 %v6265_v6, %v6264_v21  ;;  %v6330_v47 = vsel %vm3775_vm8, %v14142_v36, 0.0  ;;  %v6026_v29 = vadd.f32 1.0, %v9179_v31  ;;  %v15386_v6 = vld [vmem:[#allocation54_spill] sm:$0xff] }
 0x39c   :  { %9210 = vrcp.f32 %v5998_v58  ;;  %v9195_v16 = vpop.eup %9194  ;;  %v14157_v23 = vmul.f32 %v9193_v2, %v15381_v28  ;;  %v14164_v46 = vmul.f32 %v13969_v48, %v15382_v33  ;;  %v6027_v17 = vadd.f32 1.0, %v9181_v3 }
 0x39d   :  { %9212 = vrcp.f32 %v5999_v60  ;;  %v6028_v9 = vadd.f32 1.0, %v9183_v12  ;;  %v6331_v40 = vadd.f32 %v6330_v47, %v6329_v43  ;;  %v6332_v31 = vsel %vm3775_vm8, %v14152_v51, 0.0 }
 0x39e   :  { %9214 = vrcp.f32 %v6000_v20  ;;  %v6267_v45 = vsel %vm3775_vm8, %v14157_v23, 0.0  ;;  %v6029_v48 = vadd.f32 1.0, %v9185_v24  ;;  %v6030_v26 = vadd.f32 1.0, %v9187_v54 }
 0x39f   :  { %v9197_v52 = vpop.eup %9196  ;;  %9216 = vrcp.f32 %v6001_v63  ;;  %v6268_v0 = vadd.f32 %v6267_v45, %v6266_v5  ;;  %v6031_v22 = vadd.f32 1.0, %v9189_v59  ;;  %v15384_v63 = vld [vmem:[#allocation88_spill] sm:$0xff]  ;;  %v6333_v28 = vadd.f32 %v6332_v31, %v6331_v40 }
 0x3a0   :  { %v9199_v34 = vpop.eup %9198  ;;  %9218 = vrcp.f32 %v6002_v32  ;;  %v6033_v33 = vadd.f32 1.0, %v9195_v16  ;;  %v15390_v16 = vld [vmem:[#allocation29_spill] sm:$0xff] }
 0x3a1   :  { %v9201_v39 = vpop.eup %9200  ;;  %9220 = vrcp.f32 %v6003_v7  ;;  %v14169_v62 = vmul.f32 %v9199_v34, %v15383_v42  ;;  %v6032_v7 = vadd.f32 1.0, %v9191_v55  ;;  %v6334_v34 = vsel %vm3775_vm8, %v14164_v46, 0.0  ;;  %v15388_v55 = vld [vmem:[#allocation45_spill] sm:$0xff] }
 0x3a2   :  { %v9203_v58 = vpop.eup %9202  ;;  %9222 = vrcp.f32 %v6024_v50  ;;  %v6034_v42 = vadd.f32 1.0, %v9197_v52  ;;  %v6335_v31 = vadd.f32 %v6334_v34, %v6333_v28 }
 0x3a3   :  { %v9205_v30 = vpop.eup %9204  ;;  %9224 = vrcp.f32 %v6025_v44  ;;  %v14174_v14 = vmul.f32 %v9203_v58, %v13755_v8  ;;  %v6269_v3 = vsel %vm3775_vm8, %v14169_v62, 0.0  ;;  %v15387_v44 = vld [vmem:[#allocation17_spill] sm:$0xff] }
 0x3a4   :  { %v9207_v60 = vpop.eup %9206  ;;  %9226 = vrcp.f32 %v6026_v29  ;;  %v14179_v20 = vmul.f32 %v9205_v30, %v13758_v56  ;;  %v6270_v12 = vadd.f32 %v6269_v3, %v6268_v0  ;;  %v15389_v3 = vld [vmem:[#allocation65_spill] sm:$0xff] }
 0x3a5   :  { %v9209_v11 = vpop.eup %9208  ;;  %9228 = vrcp.f32 %v6027_v17  ;;  %v14182_v21 = vmul.f32 %v9207_v60, %v15384_v63  ;;  %v6271_v8 = vsel %vm3775_vm8, %v14174_v14, 0.0  ;;  %v15392_v63 = vld [vmem:[#allocation74_spill] sm:$0xff] }
 0x3a6   :  { %v9211_v24 = vpop.eup %9210  ;;  %9230 = vrcp.f32 %v6028_v9  ;;  %v14187_v37 = vmul.f32 %v9209_v11, %v15385_v1  ;;  %v6272_v54 = vadd.f32 %v6271_v8, %v6270_v12  ;;  %v6273_v56 = vsel %vm3775_vm8, %v14179_v20, 0.0  ;;  %v15391_v11 = vld [vmem:[#allocation64_spill] sm:$0xff] }
 0x3a7   :  { %v9213_v32 = vpop.eup %9212  ;;  %9232 = vrcp.f32 %v6029_v48  ;;  %v14192_v59 = vmul.f32 %v9211_v24, %v15386_v6  ;;  %v6275_v2 = vsel %vm3775_vm8, %v14182_v21, 0.0  ;;  %v6035_v48 = vadd.f32 1.0, %v9201_v39  ;;  %v15393_v39 = vld [vmem:[#allocation82_spill] sm:$0xff] }
 0x3a8   :  { %v9215_v25 = vpop.eup %9214  ;;  %9234 = vrcp.f32 %v6030_v26  ;;  %v6274_v50 = vadd.f32 %v6273_v56, %v6272_v54  ;;  %v14197_v5 = vmul.f32 %v9213_v32, %v15387_v44  ;;  %v6277_v47 = vsel %vm3775_vm8, %v14187_v37, 0.0  ;;  %v15395_v44 = vld [vmem:[#allocation19_spill] sm:$0xff] }
 0x3a9   :  { %v9217_v43 = vpop.eup %9216  ;;  %9236 = vrcp.f32 %v6031_v22  ;;  %v14204_v0 = vmul.f32 %v9215_v25, %v15388_v55  ;;  %v6279_v58 = vsel %vm3775_vm8, %v14192_v59, 0.0  ;;  %v15396_v55 = vld [vmem:[#allocation73_spill] sm:$0xff] }
 0x3aa   :  { %v9219_v29 = vpop.eup %9218  ;;  %v6276_v45 = vadd.f32 %v6275_v2, %v6274_v50  ;;  %9238 = vrcp.f32 %v6032_v7  ;;  %v14209_v60 = vmul.f32 %v9217_v43, %v15389_v3  ;;  %v6281_v52 = vsel %vm3775_vm8, %v14197_v5, 0.0  ;;  %v15394_v2 = vld [vmem:[#allocation42_spill] sm:$0xff] }
 0x3ab   :  { %v9221_v17 = vpop.eup %9220  ;;  %9240 = vrcp.f32 %v6033_v33  ;;  %v14217_v22 = vmul.f32 %v9219_v29, %v15391_v11  ;;  %v6283_v56 = vsel %vm3775_vm8, %v14204_v0, 0.0 }
 0x3ac   :  { %v9223_v9 = vpop.eup %9222  ;;  %v6278_v40 = vadd.f32 %v6277_v47, %v6276_v45  ;;  %9242 = vrcp.f32 %v6034_v42  ;;  %v6285_v34 = vsel %vm3775_vm8, %v14209_v60, 0.0 }
 0x3ad   :  { %v9225_v30 = vpop.eup %9224  ;;  %v14212_v26 = vmul.f32 %v9223_v9, %v15390_v16  ;;  %9244 = vrcp.f32 %v6035_v48 }
 0x3ae   :  { %v9227_v12 = vpop.eup %9226  ;;  %v14220_v8 = vmul.f32 %v9225_v30, %v15392_v63  ;;  %v6280_v24 = vadd.f32 %v6279_v58, %v6278_v40  ;;  %v14242_v58 = vmul.f32 %v9221_v17, %v15396_v55  ;;  %v6287_v40 = vsel %vm3775_vm8, %v14217_v22, 0.0 }
 0x3af   :  { %v9229_v1 = vpop.eup %9228  ;;  %v14223_v54 = vmul.f32 %v9227_v12, %v15393_v39  ;;  %v6336_v32 = vsel %vm3775_vm8, %v14212_v26, 0.0 }
 0x3b0   :  { %v9231_v6 = vpop.eup %9230  ;;  %v14230_v25 = vmul.f32 %v9229_v1, %v15394_v2  ;;  %v6282_v7 = vadd.f32 %v6281_v52, %v6280_v24  ;;  %v6337_v50 = vadd.f32 %v6336_v32, %v6335_v31  ;;  %v6338_v28 = vsel %vm3775_vm8, %v14220_v8, 0.0 }
 0x3b1   :  { %v9233_v43 = vpop.eup %9232  ;;  %v14235_v47 = vmul.f32 %v9231_v6, %v15395_v44  ;;  %v6340_v29 = vsel %vm3775_vm8, %v14223_v54, 0.0  ;;  %v6289_v63 = vsel %vm3775_vm8, %v14242_v58, 0.0 }
 0x3b2   :  { %v9235_v33 = vpop.eup %9234  ;;  %v6284_v45 = vadd.f32 %v6283_v56, %v6282_v7  ;;  %v6339_v42 = vadd.f32 %v6338_v28, %v6337_v50  ;;  %v14245_v9 = vmul.f32 %v9233_v43, %v13990_v19  ;;  %v6342_v31 = vsel %vm3775_vm8, %v14230_v25, 0.0 }
 0x3b3   :  { %v9237_v30 = vpop.eup %9236  ;;  %v14252_v52 = vmul.f32 %v9235_v33, %v14064_v18  ;;  %v6344_v48 = vsel %vm3775_vm8, %v14235_v47, 0.0 }
 0x3b4   :  { %v6286_v3 = vadd.f32 %v6285_v34, %v6284_v45  ;;  %v6341_v16 = vadd.f32 %v6340_v29, %v6339_v42  ;;  %v9239_v17 = vpop.eup %9238  ;;  %v14257_v19 = vmul.f32 %v9237_v30, %v14067_v38  ;;  %v6346_v24 = vsel %vm3775_vm8, %v14245_v9, 0.0 }
 0x3b5   :  { %v9241_v1 = vpop.eup %9240  ;;  %v14264_v18 = vmul.f32 %v9239_v17, %v14078_v27  ;;  %v6348_v32 = vsel %vm3775_vm8, %v14252_v52, 0.0 }
 0x3b6   :  { %v6288_v12 = vadd.f32 %v6287_v40, %v6286_v3  ;;  %v6343_v11 = vadd.f32 %v6342_v31, %v6341_v16  ;;  %v9243_v56 = vpop.eup %9242  ;;  %v14269_v38 = vmul.f32 %v9241_v1, %v14090_v4  ;;  %v6350_v7 = vsel %vm3775_vm8, %v14257_v19, 0.0 }
 0x3b7   :  { %v9245_v50 = vpop.eup %9244  ;;  %v14274_v43 = vmul.f32 %v9243_v56, %v14095_v35  ;;  %v6352_v27 = vsel %vm3775_vm8, %v14264_v18, 0.0  ;;  %v15397_v56 = vmov 0.0  }
 0x3b8   :  { %v6345_v39 = vadd.f32 %v6344_v48, %v6343_v11  ;;  %v6290_v6 = vadd.f32 %v6289_v63, %v6288_v12  ;;  %v14279_v29 = vmul.f32 %v9245_v50, %v14108_v53  ;;  %v6354_v4 = vsel %vm3775_vm8, %v14269_v38, 0.0 }
 0x3b9   :  { %v6356_v45 = vsel %vm3775_vm8, %v14274_v43, 0.0 }
 0x3ba   :  { %v6347_v2 = vadd.f32 %v6346_v24, %v6345_v39  ;;  %v6291_v44 = vrot.slane %v6290_v6, 4  ;;  %v6358_v35 = vsel %vm3775_vm8, %v14279_v29, 0.0 }
 0x3bc   :  { %v6349_v28 = vadd.f32 %v6348_v32, %v6347_v2  ;;  %v6292_v42 = vadd.f32 %v6291_v44, %v6290_v6  ;;  %v6460_v32 = vld [vmem:[%s14933_s9] sm:$0xff] }
 0x3bd   :  { %v8271_v6 = vld [vmem:[%s14932_s8] ss:$0 sm:$0xff] }
 0x3be   :  { %v6351_v34 = vadd.f32 %v6350_v7, %v6349_v28  ;;  %v6293_v31 = vrot.slane %v6292_v42, 2 }
 0x3c0   :  { %v6353_v33 = vadd.f32 %v6352_v27, %v6351_v34  ;;  %v6294_v16 = vadd.f32 %v6293_v31, %v6292_v42  ;;  %v8274_v42 = vld [vmem:[%s14934_s10] ss:$0 sm:$0xff] }
 0x3c2   :  { %v6355_v55 = vadd.f32 %v6354_v4, %v6353_v33  ;;  %v6295_v17 = vrot.slane %v6294_v16, 1  ;;  %v8732_v33 = vld [vmem:[%s14935_s11] sm:$0xff]  }
 0x3c4   :  { %v6357_v40 = vadd.f32 %v6356_v45, %v6355_v55  ;;  %v6296_v63 = vadd.f32 %v6295_v17, %v6294_v16  ;;  %v8733_v45 = vld [vmem:[%s14935_s11 + $0x8] sm:$0xff]   ;;  %v9591_v16 = vmov 1966171168  }
 0x3c6   :  { %v6359_v30 = vadd.f32 %v6358_v35, %v6357_v40 }
 0x3c8   :  { %v6360_v3 = vrot.slane %v6359_v30, 4 }
 0x3ca   :  { %v6361_v48 = vadd.f32 %v6360_v3, %v6359_v30 }
 0x3cc   :  { %v6362_v53 = vrot.slane %v6361_v48, 2 }
 0x3ce   :  { %v6363_v12 = vadd.f32 %v6362_v53, %v6361_v48  ;;  %v6550_v48 = vunpack.c.l.s4 %v9591_v16  ;;  %v6552_v53 = vlaneseq  ;;  %v15406_v16 = vld [vmem:[#allocation27_spill] sm:$0xff] }
 0x3d0   :  { %v6364_v11 = vrot.slane %v6363_v12, 1  ;;  %v6551_v17 = vunpack.c.0.s8 %v6550_v48 }
 0x3d2   :  { %v6365_v24 = vadd.f32 %v6364_v11, %v6363_v12  ;;  %v14307_v12 = vshrl.u32 %v6552_v53, 7 }
 0x3d4   :  { %v6367_v1 = vsel %vm6366_vm12, %v6296_v63, %v6365_v24  ;;  %v6554_v11 = vsub.s32 %v6551_v17, %v14307_v12  ;;  %v15407_v17 = vld [vmem:[#allocation28_spill] sm:$0xff] }
 0x3d5   :  { %v6368_v39 = vmul.f32 0.00390625, %v6367_v1  ;;  %v6573_v1 = vsub.s32 0, %v14307_v12 }
 0x3d7   :  { %8542 = vmatmul.mubr.msk.f32.vlgmr.msra.gmra.mrb[0].mxu1 %vm3775_vm8, %v6368_v39 }
 0x3d8   :  { %8546 = vmatprep.mubr.msk.f32.mxu1 %vm9590_vm11, %v15397_v56  ;;  %8545 = vmatpush3.msra.mxu1 %v6460_v32  ;;  %v15398_v32 = vld [vmem:[#allocation12_spill] sm:$0xff] }
 0x3d9   :  { %8549 = vmatprep.subr.bf16.mxu1 %v8732_v33 }
 0x4aa   :  { %v6449_v2 = vpop.f32.mrb[0].mxu1 }
 0x4ab   :  { %v6450_v7 = vadd.f32 %v8271_v6, %v6449_v2  ;;  %v8543_v50 = vpop.f32.mrb[1].mxu1  ;;  %v15399_v2 = vld [vmem:[#allocation23_spill] sm:$0xff] }
 0x4ac   :  { %v15400_v50 = vld [vmem:[#allocation7_spill] sm:$0xff] }
 0x4ad   :  { %v8273_v28 = vmul.f32 -1.442695, %v6450_v7 }
 0x4af   :  { %9246 = vpow2.f32 %v8273_v28 }
 0x4b9   :  { %v9247_v27 = vpop.eup %9246 }
 0x4ba   :  { %v6456_v44 = vadd.f32 1.0, %v9247_v27  ;;  %v15401_v27 = vld [vmem:[#allocation9_spill] sm:$0xff] }
 0x4bc   :  { %9248 = vrcp.f32 %v6456_v44 }
 0x4c6   :  { %v9249_v34 = vpop.eup %9248 }
 0x4c7   :  { %v6459_v4 = vmul.f32 %v9249_v34, %v6450_v7  ;;  %v15402_v34 = vld [vmem:[#allocation24_spill] sm:$0xff] }
 0x4c9   :  { %8547 = vmatmul.mubr.msk.f32.vlgmr.msra.gmra.mrb[2].mxu1 %vm6468_vm13, %v6459_v4 }
 0x4ca   :  { %8550 = vmatpush3.bf16.msra.mxu1 %v8732_v33  ;;  %v15403_v33 = vld [vmem:[#allocation10_spill] sm:$0xff] }
 0x4cb   :  { %8551 = vmatprep.subr.bf16.mxu1 %v8733_v45 }
 0x4ce   :  { %8552 = vmatpush3.bf16.msra.mxu1 %v8733_v45 }
 0x59c   :  { %v6538_v55 = vpop.f32.mrb[2].mxu1 }
 0x59d   :  { %v6539_v35 = vadd.f32 %v8274_v42, %v6538_v55  ;;  %v8548_v40 = vpop.f32.mrb[3].mxu1 }
 0x59e   :  { %v15404_v40 = vld [vmem:[#allocation25_spill] sm:$0xff] }
 0x59f   :  { %v8276_v31 = vmul.f32 -1.442695, %v6539_v35 }
 0x5a1   :  { %9250 = vpow2.f32 %v8276_v31 }
 0x5ab   :  { %v9251_v30 = vpop.eup %9250 }
 0x5ac   :  { %v6545_v3 = vadd.f32 1.0, %v9251_v30  ;;  %v15405_v30 = vld [vmem:[#allocation26_spill] sm:$0xff] }
 0x5ae   :  { %9252 = vrcp.f32 %v6545_v3 }
 0x5b8   :  { %v9253_v63 = vpop.eup %9252 }
 0x5b9   :  { %v6555_v24 = vrot.slane %v9253_v63, %v6554_v11 }
 0x5bb   :  { %v6563_v39 = vrot.slane %v6555_v24, %v6554_v11 }
 0x5bd   :  { %v14311_v56 = vrot.slane %v6563_v39, %v6573_v1 }
 0x5bf   :  { %v6581_v6 = vmul.f32 %v14311_v56, %v15398_v32  ;;  %v6582_v7 = vmul.f32 %v14311_v56, %v15399_v2  ;;  %v6583_v28 = vmul.f32 %v14311_v56, %v15400_v50  ;;  %v6584_v44 = vmul.f32 %v14311_v56, %v15401_v27  ;;  %v15408_v32 = vld [vmem:[#allocation34_spill] sm:$0xff]  ;;  %v15409_v2 = vld [vmem:[#allocation36_spill] sm:$0xff]  ;;  %v15410_v50 = vld [vmem:[#allocation37_spill] sm:$0xff] }
 0x5c0   :  { %v6585_v4 = vmul.f32 %v14311_v56, %v15402_v34  ;;  %v6586_v45 = vmul.f32 %v14311_v56, %v15403_v33  ;;  %v6587_v31 = vmul.f32 %v14311_v56, %v15404_v40  ;;  %v6588_v3 = vmul.f32 %v14311_v56, %v15405_v30  ;;  %v15411_v27 = vld [vmem:[#allocation39_spill] sm:$0xff]  ;;  %v15412_v33 = vld [vmem:[#allocation50_spill] sm:$0xff] }
 0x5c1   :  { %v6645_v42 = vpack.c.bf16 %v6582_v7, %v6581_v6  ;;  %v6646_v55 = vpack.c.bf16 %v6584_v44, %v6583_v28  ;;  %v6589_v48 = vmul.f32 %v14311_v56, %v15406_v16  ;;  %v6590_v12 = vmul.f32 %v14311_v56, %v15407_v17 }
 0x5c2   :  { %v6647_v35 = vpack.c.bf16 %v6586_v45, %v6585_v4  ;;  %v6648_v63 = vpack.c.bf16 %v6588_v3, %v6587_v31  ;;  %v6591_v6 = vmul.f32 %v14311_v56, %v15408_v32  ;;  %v6592_v7 = vmul.f32 %v14311_v56, %v15409_v2 }
 0x5c3   :  { %8553 = vmatprep.mubr.msk.bf16.mxu1 %vm3775_vm8, %v6645_v42  ;;  %v6649_v39 = vpack.c.bf16 %v6590_v12, %v6589_v48  ;;  %v6593_v28 = vmul.f32 %v14311_v56, %v15410_v50  ;;  %v6594_v44 = vmul.f32 %v14311_v56, %v15411_v27  ;;  %v6595_v45 = vmul.f32 %v14311_v56, %v15412_v33  ;;  %v15413_v42 = vld [vmem:[#allocation52_spill] sm:$0xff] }
 0x5c4   :  { %8554 = vmatmul.mubr.msk.bf16.vlgmr.msra.gmra.mrb[4].mxu1 %vm3775_vm8, %v6646_v55  ;;  %v6650_v34 = vpack.c.bf16 %v6592_v7, %v6591_v6  ;;  %v6596_v55 = vmul.f32 %v14311_v56, %v15413_v42  ;;  %v6598_v40 = vmul.f32 %v14311_v56, %v14099_v61  ;;  %v6599_v3 = vmul.f32 %v14311_v56, %v15377_v57  ;;  %v15415_v7 = vld [vmem:[#allocation69_spill] sm:$0xff] }
 0x5c5   :  { %8557 = vmatprep.mubr.msk.bf16.mxu1 %vm3775_vm8, %v6647_v35  ;;  %v6651_v4 = vpack.c.bf16 %v6594_v44, %v6593_v28  ;;  %v6597_v35 = vmul.f32 %v14311_v56, %v14074_v49  ;;  %v6600_v16 = vmul.f32 %v14311_v56, %v14132_v15  ;;  %v6601_v48 = vmul.f32 %v14311_v56, %v14157_v23  ;;  %v15416_v28 = vld [vmem:[#allocation44_spill] sm:$0xff]  ;;  %v15417_v44 = vld [vmem:[#allocation75_spill] sm:$0xff]  ;;  %v15420_v42 = vld [vmem:[#allocation61_spill] sm:$0xff] }
 0x5c6   :  { %v6652_v31 = vpack.c.bf16 %v6596_v55, %v6595_v45  ;;  %v6602_v49 = vmul.f32 %v14311_v56, %v14169_v62  ;;  %v6603_v12 = vmul.f32 %v14311_v56, %v14174_v14  ;;  %v6604_v57 = vmul.f32 %v14311_v56, %v14179_v20 }
 0x5c7   :  { %v6653_v30 = vpack.c.bf16 %v6598_v40, %v6597_v35  ;;  %v6654_v17 = vpack.c.bf16 %v6600_v16, %v6599_v3  ;;  %v6605_v15 = vmul.f32 %v14311_v56, %v14182_v21  ;;  %v6606_v23 = vmul.f32 %v14311_v56, %v14187_v37  ;;  %v15421_v35 = vld [vmem:[#allocation66_spill] sm:$0xff]  ;;  %v15423_v3 = vld [vmem:[#allocation48_spill] sm:$0xff] }
 0x5c8   :  { %v6655_v61 = vpack.c.bf16 %v6602_v49, %v6601_v48  ;;  %v6556_v62 = vcombine.high %v6555_v24, %v6555_v24  ;;  %v6607_v32 = vmul.f32 %v14311_v56, %v14192_v59  ;;  %v6608_v14 = vmul.f32 %v14311_v56, %v14197_v5 }
 0x5c9   :  { %v6609_v21 = vmul.f32 %v14311_v56, %v14204_v0  ;;  %v6610_v37 = vmul.f32 %v14311_v56, %v14209_v60  ;;  %v6611_v59 = vmul.f32 %v14311_v56, %v14217_v22  ;;  %v6612_v5 = vmul.f32 %v14311_v56, %v14242_v58  ;;  %v15419_v56 = vld [vmem:[#allocation49_spill] sm:$0xff] }
 0x5ca   :  { %v6570_v20 = vrot.slane %v6556_v62, %v6554_v11  ;;  %v6658_v6 = vpack.c.bf16 %v6608_v14, %v6607_v32  ;;  %v15414_v11 = vld [vmem:[#allocation41_spill] sm:$0xff] }
 0x5cb   :  { %v6659_v2 = vpack.c.bf16 %v6610_v37, %v6609_v21  ;;  %v6660_v50 = vpack.c.bf16 %v6612_v5, %v6611_v59 }
 0x5cc   :  { %8558 = vmatmul.mubr.msk.bf16.gmra.mrb[8].mxu1 %vm3775_vm8, %v6648_v63  ;;  %v6656_v63 = vpack.c.bf16 %v6604_v57, %v6603_v12  ;;  %v14386_v24 = vrot.slane %v6570_v20, %v6573_v1  ;;  %v15425_v12 = vld [vmem:[#allocation43_spill] sm:$0xff] }
 0x5cd   :  { %8561 = vmatprep.mubr.msk.bf16.mxu1 %vm3775_vm8, %v6649_v39  ;;  %v6657_v39 = vpack.c.bf16 %v6606_v23, %v6605_v15  ;;  %v15426_v15 = vld [vmem:[#allocation60_spill] sm:$0xff] }
 0x5ce   :  { %v6613_v0 = vmul.f32 %v14386_v24, %v15414_v11  ;;  %v6614_v60 = vmul.f32 %v14386_v24, %v15415_v7  ;;  %v6615_v27 = vmul.f32 %v14386_v24, %v15416_v28  ;;  %v6616_v22 = vmul.f32 %v14386_v24, %v15417_v44 }
 0x5cf   :  { %v6619_v55 = vmul.f32 %v14386_v24, %v15420_v42  ;;  %v6620_v40 = vmul.f32 %v14386_v24, %v15421_v35  ;;  %v6622_v16 = vmul.f32 %v14386_v24, %v15423_v3  ;;  %v6624_v57 = vmul.f32 %v14386_v24, %v15425_v12 }
 0x5d0   :  { %v6661_v1 = vpack.c.bf16 %v6614_v60, %v6613_v0  ;;  %v6662_v33 = vpack.c.bf16 %v6616_v22, %v6615_v27  ;;  %v6625_v23 = vmul.f32 %v14386_v24, %v15426_v15  ;;  %v6627_v14 = vmul.f32 %v14386_v24, %v14087_v10  ;;  %v14492_v27 = vld [vmem:[%s14936_s12] ss:$0 sm:$0xff] }
 0x5d1   :  { %v6664_v48 = vpack.c.bf16 %v6620_v40, %v6619_v55  ;;  %v6628_v20 = vmul.f32 %v14386_v24, %v14113_v41  ;;  %v6629_v21 = vmul.f32 %v14386_v24, %v14127_v13  ;;  %v6630_v37 = vmul.f32 %v14386_v24, %v14142_v36 }
 0x5d2   :  { %v6631_v59 = vmul.f32 %v14386_v24, %v14152_v51  ;;  %v6632_v10 = vmul.f32 %v14386_v24, %v14164_v46  ;;  %v6633_v41 = vmul.f32 %v14386_v24, %v14212_v26  ;;  %v6634_v13 = vmul.f32 %v14386_v24, %v14220_v8 }
 0x5d3   :  { %v6635_v11 = vmul.f32 %v14386_v24, %v14223_v54  ;;  %v6636_v51 = vmul.f32 %v14386_v24, %v14230_v25  ;;  %v6637_v46 = vmul.f32 %v14386_v24, %v14235_v47  ;;  %v6638_v26 = vmul.f32 %v14386_v24, %v14245_v9 }
 0x5d4   :  { %8562 = vmatmul.mubr.msk.bf16.gmra.mrb[12].mxu1 %vm3775_vm8, %v6650_v34  ;;  %v15418_v34 = vld [vmem:[#allocation77_spill] sm:$0xff]  ;;  %v6670_v5 = vpack.c.bf16 %v6632_v10, %v6631_v59  ;;  %v6671_v36 = vpack.c.bf16 %v6634_v13, %v6633_v41  ;;  %v6639_v7 = vmul.f32 %v14386_v24, %v14252_v52  ;;  %v6640_v54 = vmul.f32 %v14386_v24, %v14257_v19  ;;  %v7674_v19 = vld [vmem:[%s14937_s13] sm:$0xff] }
 0x5d5   :  { %8565 = vmatprep.mubr.msk.bf16.mxu1 %vm3775_vm8, %v6651_v4  ;;  %v6617_v58 = vmul.f32 %v14386_v24, %v15418_v34  ;;  %v6618_v4 = vmul.f32 %v14386_v24, %v15419_v56  ;;  %v6672_v0 = vpack.c.bf16 %v6636_v51, %v6635_v11  ;;  %v6673_v8 = vpack.c.bf16 %v6638_v26, %v6637_v46  ;;  %v7678_v26 = vld [vmem:[%s14937_s13 + $0x20] sm:$0xff] }
 0x5d6   :  { %v6641_v25 = vmul.f32 %v14386_v24, %v14264_v18  ;;  %v6642_v47 = vmul.f32 %v14386_v24, %v14269_v38  ;;  %v6674_v60 = vpack.c.bf16 %v6640_v54, %v6639_v7  ;;  %v6644_v52 = vmul.f32 %v14386_v24, %v14279_v29  ;;  %v7675_v18 = vld [vmem:[%s14937_s13 + $0x8] sm:$0xff]  ;;  %v7677_v29 = vld [vmem:[%s14937_s13 + $0x18] sm:$0xff] }
 0x5d7   :  { %v6663_v45 = vpack.c.bf16 %v6618_v4, %v6617_v58  ;;  %v8643_v38 = vpack.c.bf16 %v7675_v18, %v7674_v19  ;;  %v15428_v28 = vmov 0.0|0.0  }
 0x5d8   :  { %v6675_v9 = vpack.c.bf16 %v6642_v47, %v6641_v25 }
 0x5d9   :  { %8644 = vmatpush3.bf16.msra.mxu0 %v8643_v38 }
 0x5da   :  { %8645 = vmatprep.subr.bf16.mxu0 %v15428_v28 }
 0x5dc   :  { %8566 = vmatmul.mubr.msk.bf16.gmra.mrb[16].mxu1 %vm3775_vm8, %v6652_v31  ;;  %v15422_v31 = vld [vmem:[#allocation67_spill] sm:$0xff] }
 0x5dd   :  { %8569 = vmatprep.mubr.msk.bf16.mxu1 %vm3775_vm8, %v6653_v30  ;;  %v6621_v30 = vmul.f32 %v14386_v24, %v15422_v31 }
 0x5df   :  { %v6665_v49 = vpack.c.bf16 %v6622_v16, %v6621_v30 }
 0x5e4   :  { %8570 = vmatmul.mubr.msk.bf16.gmra.mrb[20].mxu1 %vm3775_vm8, %v6654_v17  ;;  %v15424_v17 = vld [vmem:[#allocation13_spill] sm:$0xff] }
 0x5e5   :  { %8573 = vmatprep.mubr.msk.bf16.mxu1 %vm3775_vm8, %v6655_v61  ;;  %v6623_v61 = vmul.f32 %v14386_v24, %v15424_v17 }
 0x5ec   :  { %8574 = vmatmul.mubr.msk.bf16.gmra.mrb[24].mxu1 %vm3775_vm8, %v6656_v63  ;;  %v15427_v63 = vld [vmem:[#allocation68_spill] sm:$0xff] }
 0x5ed   :  { %8577 = vmatprep.mubr.msk.bf16.mxu1 %vm3775_vm8, %v6657_v39  ;;  %v6626_v62 = vmul.f32 %v14386_v24, %v15427_v63  ;;  %v6666_v39 = vpack.c.bf16 %v6624_v57, %v6623_v61 }
 0x5ef   :  { %v6667_v32 = vpack.c.bf16 %v6626_v62, %v6625_v23 }
 0x5f4   :  { %8578 = vmatmul.mubr.msk.bf16.gmra.mrb[28].mxu1 %vm3775_vm8, %v6658_v6  ;;  %v6668_v6 = vpack.c.bf16 %v6628_v20, %v6627_v14 }
 0x5f5   :  { %8581 = vmatprep.mubr.msk.bf16.mxu1 %vm3775_vm8, %v6659_v2  ;;  %v6669_v2 = vpack.c.bf16 %v6630_v37, %v6629_v21 }
 0x5fc   :  { %8582 = vmatmul.mubr.msk.bf16.gmra.mrb[32].mxu1 %vm3775_vm8, %v6660_v50  ;;  %v6643_v50 = vmul.f32 %v14386_v24, %v14274_v43  ;;  %v7676_v43 = vld [vmem:[%s14937_s13 + $0x10] sm:$0xff] }
 0x5fd   :  { %8585 = vmatprep.mubr.msk.bf16.mxu1 %vm3775_vm8, %v6661_v1  ;;  %v8646_v24 = vpack.c.bf16 %v7677_v29, %v7676_v43 }
 0x5fe   :  { %v6676_v1 = vpack.c.bf16 %v6644_v52, %v6643_v50 }
 0x5ff   :  { %8647 = vmatpush3.bf16.msra.mxu0 %v8646_v24 }
 0x600   :  { %8648 = vmatprep.subr.bf16.mxu0 %v15428_v28 }
 0x604   :  { %8586 = vmatmul.mubr.msk.bf16.gmra.mrb[36].mxu1 %vm3775_vm8, %v6662_v33 }
 0x605   :  { %8589 = vmatprep.mubr.msk.bf16.mxu1 %vm3775_vm8, %v6663_v45 }
 0x60c   :  { %8590 = vmatmul.mubr.msk.bf16.gmra.mrb[40].mxu1 %vm3775_vm8, %v6664_v48 }
 0x60d   :  { %8593 = vmatprep.mubr.msk.bf16.mxu1 %vm3775_vm8, %v6665_v49 }
 0x614   :  { %8594 = vmatmul.mubr.msk.bf16.gmra.mrb[44].mxu1 %vm3775_vm8, %v6666_v39 }
 0x615   :  { %8597 = vmatprep.mubr.msk.bf16.mxu1 %vm3775_vm8, %v6667_v32 }
 0x61c   :  { %8598 = vmatmul.mubr.msk.bf16.gmra.mrb[48].mxu1 %vm3775_vm8, %v6668_v6 }
 0x61d   :  { %8601 = vmatprep.mubr.msk.bf16.mxu1 %vm3775_vm8, %v6669_v2 }
 0x624   :  { %8602 = vmatmul.mubr.msk.bf16.gmra.mrb[52].mxu1 %vm3775_vm8, %v6670_v5 }
 0x625   :  { %8605 = vmatprep.mubr.msk.bf16.mxu1 %vm3775_vm8, %v6671_v36 }
 0x62c   :  { %8606 = vmatmul.mubr.msk.bf16.gmra.mrb[56].mxu1 %vm3775_vm8, %v6672_v0  ;;  %v7679_v0 = vld [vmem:[%s14937_s13 + $0x28] sm:$0xff] }
 0x62d   :  { %8609 = vmatprep.mubr.msk.bf16.mxu1 %vm3775_vm8, %v6673_v8  ;;  %v8649_v7 = vpack.c.bf16 %v7679_v0, %v7678_v26 }
 0x62f   :  { %8650 = vmatpush3.bf16.msra.mxu0 %v8649_v7 }
 0x630   :  { %8651 = vmatprep.subr.bf16.mxu0 %v15428_v28 }
 0x634   :  { %8610 = vmatmul.mubr.msk.bf16.gmra.mrb[60].mxu1 %vm3775_vm8, %v6674_v60 }
 0x635   :  { %8613 = vmatprep.mubr.msk.bf16.mxu1 %vm3775_vm8, %v6675_v9 }
 0x63c   :  { %8614 = vmatmul.mubr.msk.bf16.gmra.mrb[64].mxu1 %vm3775_vm8, %v6676_v1 }
 0x697   :  { %v8555_v44 = vpop.f32.mrb[4].mxu1 }
 0x698   :  { %v14495_v22 = vadd.f32 %v8555_v44, %v14492_v27  ;;  %v6830_v34 = vpop.f32.mrb[5].mxu1 }
 0x699   :  { %v14498_v58 = vadd.f32 %v14492_v27, %v6830_v34  ;;  %v8556_v56 = vpop.f32.mrb[6].mxu1 }
 0x69a   :  { %v8314_v4 = vmul.f32 -1.442695, %v14495_v22  ;;  %v14502_v33 = vadd.f32 %v8556_v56, %v14492_v27  ;;  %v6833_v45 = vpop.f32.mrb[7].mxu1 }
 0x69b   :  { %v8312_v42 = vmul.f32 -1.442695, %v14498_v58  ;;  %v14506_v55 = vadd.f32 %v14492_v27, %v6833_v45 }
 0x69c   :  { %9254 = vpow2.f32 %v8314_v4  ;;  %v8315_v35 = vmul.f32 -1.442695, %v14502_v33 }
 0x69d   :  { %9256 = vpow2.f32 %v8312_v42  ;;  %v8313_v40 = vmul.f32 -1.442695, %v14506_v55 }
 0x69e   :  { %9258 = vpow2.f32 %v8315_v35 }
 0x69f   :  { %9260 = vpow2.f32 %v8313_v40  ;;  %v8559_v31 = vpop.f32.mrb[8].mxu1 }
 0x6a0   :  { %v14511_v30 = vadd.f32 %v8559_v31, %v14492_v27  ;;  %v6846_v3 = vpop.f32.mrb[9].mxu1 }
 0x6a1   :  { %v14514_v16 = vadd.f32 %v14492_v27, %v6846_v3  ;;  %v8560_v48 = vpop.f32.mrb[10].mxu1 }
 0x6a2   :  { %v8318_v49 = vmul.f32 -1.442695, %v14511_v30  ;;  %v14518_v17 = vadd.f32 %v8560_v48, %v14492_v27  ;;  %v6849_v61 = vpop.f32.mrb[11].mxu1 }
 0x6a3   :  { %v8316_v12 = vmul.f32 -1.442695, %v14514_v16  ;;  %v14522_v57 = vadd.f32 %v14492_v27, %v6849_v61 }
 0x6a4   :  { %9262 = vpow2.f32 %v8318_v49  ;;  %v8319_v15 = vmul.f32 -1.442695, %v14518_v17 }
 0x6a5   :  { %9264 = vpow2.f32 %v8316_v12  ;;  %v8317_v23 = vmul.f32 -1.442695, %v14522_v57 }
 0x6a6   :  { %v9255_v63 = vpop.eup %9254  ;;  %9266 = vpow2.f32 %v8319_v15 }
 0x6a7   :  { %v9257_v62 = vpop.eup %9256  ;;  %v7279_v39 = vadd.f32 1.0, %v9255_v63  ;;  %9268 = vpow2.f32 %v8317_v23  ;;  %v8563_v32 = vpop.f32.mrb[12].mxu1 }
 0x6a8   :  { %v9259_v14 = vpop.eup %9258  ;;  %v7277_v20 = vadd.f32 1.0, %v9257_v62  ;;  %v14527_v21 = vadd.f32 %v8563_v32, %v14492_v27  ;;  %v6862_v37 = vpop.f32.mrb[13].mxu1 }
 0x6a9   :  { %v9261_v6 = vpop.eup %9260  ;;  %9270 = vrcp.f32 %v7279_v39  ;;  %v7280_v2 = vadd.f32 1.0, %v9259_v14  ;;  %v14530_v59 = vadd.f32 %v14492_v27, %v6862_v37  ;;  %v8564_v10 = vpop.f32.mrb[14].mxu1 }
 0x6aa   :  { %9272 = vrcp.f32 %v7277_v20  ;;  %v7278_v41 = vadd.f32 1.0, %v9261_v6  ;;  %v8322_v13 = vmul.f32 -1.442695, %v14527_v21  ;;  %v14534_v5 = vadd.f32 %v8564_v10, %v14492_v27  ;;  %v6865_v36 = vpop.f32.mrb[15].mxu1 }
 0x6ab   :  { %9274 = vrcp.f32 %v7280_v2  ;;  %v8320_v11 = vmul.f32 -1.442695, %v14530_v59  ;;  %v14538_v51 = vadd.f32 %v14492_v27, %v6865_v36 }
 0x6ac   :  { %9276 = vrcp.f32 %v7278_v41  ;;  %v8323_v46 = vmul.f32 -1.442695, %v14534_v5 }
 0x6ad   :  { %9278 = vpow2.f32 %v8322_v13  ;;  %v8321_v8 = vmul.f32 -1.442695, %v14538_v51 }
 0x6ae   :  { %v9263_v54 = vpop.eup %9262  ;;  %9280 = vpow2.f32 %v8320_v11 }
 0x6af   :  { %v9265_v25 = vpop.eup %9264  ;;  %v7283_v47 = vadd.f32 1.0, %v9263_v54  ;;  %9282 = vpow2.f32 %v8323_v46  ;;  %v8567_v60 = vpop.f32.mrb[16].mxu1 }
 0x6b0   :  { %v9267_v9 = vpop.eup %9266  ;;  %v7281_v50 = vadd.f32 1.0, %v9265_v25  ;;  %9284 = vpow2.f32 %v8321_v8  ;;  %v14549_v52 = vadd.f32 %v8567_v60, %v14492_v27  ;;  %v6878_v1 = vpop.f32.mrb[17].mxu1 }
 0x6b1   :  { %v9269_v19 = vpop.eup %9268  ;;  %9286 = vrcp.f32 %v7283_v47  ;;  %v7284_v18 = vadd.f32 1.0, %v9267_v9  ;;  %v14553_v38 = vadd.f32 %v14492_v27, %v6878_v1  ;;  %v8568_v43 = vpop.f32.mrb[18].mxu1 }
 0x6b2   :  { %9288 = vrcp.f32 %v7281_v50  ;;  %v7282_v29 = vadd.f32 1.0, %v9269_v19  ;;  %v8326_v24 = vmul.f32 -1.442695, %v14549_v52  ;;  %v14557_v44 = vadd.f32 %v8568_v43, %v14492_v27  ;;  %v6881_v34 = vpop.f32.mrb[19].mxu1 }
 0x6b3   :  { %v9271_v56 = vpop.eup %9270  ;;  %9290 = vrcp.f32 %v7284_v18  ;;  %v8324_v4 = vmul.f32 -1.442695, %v14553_v38  ;;  %v14561_v28 = vadd.f32 %v14492_v27, %v6881_v34 }
 0x6b4   :  { %v9273_v45 = vpop.eup %9272  ;;  %v7471_v42 = vmul.f32 %v9271_v56, %v14495_v22  ;;  %9292 = vrcp.f32 %v7282_v29  ;;  %v8327_v35 = vmul.f32 -1.442695, %v14557_v44 }
 0x6b5   :  { %v9275_v40 = vpop.eup %9274  ;;  %v7469_v31 = vmul.f32 %v9273_v45, %v14498_v58  ;;  %9294 = vpow2.f32 %v8326_v24  ;;  %v8325_v3 = vmul.f32 -1.442695, %v14561_v28 }
 0x6b6   :  { %v9277_v48 = vpop.eup %9276  ;;  %9296 = vpow2.f32 %v8324_v4  ;;  %v7537_v61 = vsel %vm7533_vm14, %v7471_v42, 0.0  ;;  %v7472_v23 = vmul.f32 %v9275_v40, %v14502_v33 }
 0x6b7   :  { %v9279_v49 = vpop.eup %9278  ;;  %v7470_v12 = vmul.f32 %v9277_v48, %v14506_v55  ;;  %9298 = vpow2.f32 %v8327_v35  ;;  %v8571_v15 = vpop.f32.mrb[20].mxu1  ;;  %v7534_v32 = vsel %vm7533_vm14, %v7469_v31, 0.0 }
 0x6b8   :  { %v9281_v22 = vpop.eup %9280  ;;  %v7287_v63 = vadd.f32 1.0, %v9279_v49  ;;  %9300 = vpow2.f32 %v8325_v3  ;;  %v14571_v62 = vadd.f32 %v8571_v15, %v14492_v27  ;;  %v6894_v58 = vpop.f32.mrb[21].mxu1  ;;  %v7539_v25 = vsel %vm7533_vm14, %v7472_v23, 0.0 }
 0x6b9   :  { %v9283_v39 = vpop.eup %9282  ;;  %v7535_v14 = vsel %vm7533_vm14, %v7470_v12, 0.0  ;;  %v7285_v20 = vadd.f32 1.0, %v9281_v22  ;;  %v14576_v37 = vadd.f32 %v14492_v27, %v6894_v58  ;;  %v8572_v55 = vpop.f32.mrb[22].mxu1 }
 0x6ba   :  { %v9285_v6 = vpop.eup %9284  ;;  %v7536_v2 = vadd.f32 %v7535_v14, %v7534_v32  ;;  %9302 = vrcp.f32 %v7287_v63  ;;  %v7288_v33 = vadd.f32 1.0, %v9283_v39  ;;  %v8330_v10 = vmul.f32 -1.442695, %v14571_v62  ;;  %v6897_v41 = vpop.f32.mrb[23].mxu1 }
 0x6bb   :  { %v9287_v13 = vpop.eup %9286  ;;  %9304 = vrcp.f32 %v7285_v20  ;;  %v7286_v36 = vadd.f32 1.0, %v9285_v6  ;;  %v8328_v11 = vmul.f32 -1.442695, %v14576_v37  ;;  %v14581_v46 = vadd.f32 %v8572_v55, %v14492_v27 }
 0x6bc   :  { %v9289_v26 = vpop.eup %9288  ;;  %v7538_v0 = vadd.f32 %v7537_v61, %v7536_v2  ;;  %v7475_v8 = vmul.f32 %v9287_v13, %v14511_v30  ;;  %9306 = vrcp.f32 %v7288_v33  ;;  %v14585_v7 = vadd.f32 %v14492_v27, %v6897_v41 }
 0x6bd   :  { %v9291_v54 = vpop.eup %9290  ;;  %v7473_v47 = vmul.f32 %v9289_v26, %v14514_v16  ;;  %9308 = vrcp.f32 %v7286_v36  ;;  %v8331_v60 = vmul.f32 -1.442695, %v14581_v46 }
 0x6be   :  { %v9293_v9 = vpop.eup %9292  ;;  %v7545_v50 = vsel %vm7533_vm14, %v7475_v8, 0.0  ;;  %v7540_v1 = vadd.f32 %v7539_v25, %v7538_v0  ;;  %9310 = vpow2.f32 %v8330_v10  ;;  %v8329_v43 = vmul.f32 -1.442695, %v14585_v7 }
 0x6bf   :  { %v9295_v19 = vpop.eup %9294  ;;  %v7541_v30 = vsel %vm7533_vm14, %v7473_v47, 0.0  ;;  %v7474_v18 = vmul.f32 %v9293_v9, %v14522_v57  ;;  %9312 = vpow2.f32 %v8328_v11  ;;  %v8575_v29 = vpop.f32.mrb[24].mxu1  ;;  %v7476_v16 = vmul.f32 %v9291_v54, %v14518_v17 }
 0x6c0   :  { %v9297_v24 = vpop.eup %9296  ;;  %v7542_v34 = vadd.f32 %v7541_v30, %v7540_v1  ;;  %v7291_v56 = vadd.f32 1.0, %v9295_v19  ;;  %9314 = vpow2.f32 %v8331_v60  ;;  %v6910_v4 = vpop.f32.mrb[25].mxu1  ;;  %v14597_v40 = vadd.f32 %v8575_v29, %v14492_v27 }
 0x6c1   :  { %v9299_v45 = vpop.eup %9298  ;;  %v7543_v42 = vsel %vm7533_vm14, %v7474_v18, 0.0  ;;  %v7289_v35 = vadd.f32 1.0, %v9297_v24  ;;  %9316 = vpow2.f32 %v8329_v43  ;;  %v8576_v57 = vpop.f32.mrb[26].mxu1  ;;  %v14600_v49 = vadd.f32 %v14492_v27, %v6910_v4  ;;  %v7680_v24 = vld [vmem:[%s14937_s13 + $0x30] sm:$0xff] }
 0x6c2   :  { %v9301_v31 = vpop.eup %9300  ;;  %v7544_v3 = vadd.f32 %v7543_v42, %v7542_v34  ;;  %9318 = vrcp.f32 %v7291_v56  ;;  %v7292_v48 = vadd.f32 1.0, %v9299_v45  ;;  %v6913_v17 = vpop.f32.mrb[27].mxu1  ;;  %v8334_v12 = vmul.f32 -1.442695, %v14597_v40  ;;  %v7681_v34 = vld [vmem:[%s14937_s13 + $0x38] sm:$0xff] }
 0x6c3   :  { %9320 = vrcp.f32 %v7289_v35  ;;  %v7290_v61 = vadd.f32 1.0, %v9301_v31  ;;  %v14604_v15 = vadd.f32 %v8576_v57, %v14492_v27  ;;  %v8332_v63 = vmul.f32 -1.442695, %v14600_v49 }
 0x6c4   :  { %v9303_v22 = vpop.eup %9302  ;;  %v7546_v23 = vadd.f32 %v7545_v50, %v7544_v3  ;;  %9322 = vrcp.f32 %v7292_v48  ;;  %v14608_v58 = vadd.f32 %v14492_v27, %v6913_v17  ;;  %v7547_v32 = vsel %vm7533_vm14, %v7476_v16, 0.0 }
 0x6c5   :  { %v9305_v39 = vpop.eup %9304  ;;  %v7479_v14 = vmul.f32 %v9303_v22, %v14527_v21  ;;  %9324 = vrcp.f32 %v7290_v61  ;;  %v8335_v20 = vmul.f32 -1.442695, %v14604_v15  ;;  %v8652_v61 = vpack.c.bf16 %v7681_v34, %v7680_v24 }
 0x6c6   :  { %v9307_v55 = vpop.eup %9306  ;;  %v7477_v6 = vmul.f32 %v9305_v39, %v14530_v59  ;;  %v7548_v2 = vadd.f32 %v7547_v32, %v7546_v23  ;;  %9326 = vpow2.f32 %v8334_v12  ;;  %v8333_v33 = vmul.f32 -1.442695, %v14608_v58 }
 0x6c7   :  { %v9309_v10 = vpop.eup %9308  ;;  %v7553_v41 = vsel %vm7533_vm14, %v7479_v14, 0.0  ;;  %v7480_v13 = vmul.f32 %v9307_v55, %v14534_v5  ;;  %9328 = vpow2.f32 %v8332_v63  ;;  %v8579_v36 = vpop.f32.mrb[28].mxu1  ;;  %8653 = vmatpush3.bf16.msra.mxu0 %v8652_v61 }
 0x6c8   :  { %v9311_v11 = vpop.eup %9310  ;;  %v7549_v21 = vsel %vm7533_vm14, %v7477_v6, 0.0  ;;  %v7478_v26 = vmul.f32 %v9309_v10, %v14538_v51  ;;  %9330 = vpow2.f32 %v8335_v20  ;;  %v14620_v0 = vadd.f32 %v8579_v36, %v14492_v27  ;;  %v6926_v59 = vpop.f32.mrb[29].mxu1 }
 0x6c9   :  { %v9313_v8 = vpop.eup %9312  ;;  %v7550_v54 = vadd.f32 %v7549_v21, %v7548_v2  ;;  %v7555_v25 = vsel %vm7533_vm14, %v7480_v13, 0.0  ;;  %v7295_v47 = vadd.f32 1.0, %v9311_v11  ;;  %9332 = vpow2.f32 %v8333_v33  ;;  %v8580_v60 = vpop.f32.mrb[30].mxu1 }
 0x6ca   :  { %v9315_v5 = vpop.eup %9314  ;;  %v7551_v9 = vsel %vm7533_vm14, %v7478_v26, 0.0  ;;  %v7293_v50 = vadd.f32 1.0, %v9313_v8  ;;  %v8338_v1 = vmul.f32 -1.442695, %v14620_v0  ;;  %v14626_v51 = vadd.f32 %v14492_v27, %v6926_v59  ;;  %v6929_v19 = vpop.f32.mrb[31].mxu1 }
 0x6cb   :  { %v9317_v30 = vpop.eup %9316  ;;  %v7552_v18 = vadd.f32 %v7551_v9, %v7550_v54  ;;  %9334 = vrcp.f32 %v7295_v47  ;;  %v7296_v43 = vadd.f32 1.0, %v9315_v5  ;;  %v14629_v29 = vadd.f32 %v8580_v60, %v14492_v27  ;;  %v7764_v47 = vld [vmem:[%s14925_s1] sm:$0x3] }
 0x6cc   :  { %v9319_v16 = vpop.eup %9318  ;;  %9336 = vrcp.f32 %v7293_v50  ;;  %v7294_v56 = vadd.f32 1.0, %v9317_v30  ;;  %v8336_v4 = vmul.f32 -1.442695, %v14626_v51  ;;  %v14639_v45 = vadd.f32 %v14492_v27, %v6929_v19 }
 0x6cd   :  { %v9321_v42 = vpop.eup %9320  ;;  %v7554_v35 = vadd.f32 %v7553_v41, %v7552_v18  ;;  %v7483_v57 = vmul.f32 %v9319_v16, %v14549_v52  ;;  %9338 = vrcp.f32 %v7296_v43  ;;  %v8339_v31 = vmul.f32 -1.442695, %v14629_v29 }
 0x6ce   :  { %v9323_v3 = vpop.eup %9322  ;;  %v7481_v48 = vmul.f32 %v9321_v42, %v14553_v38  ;;  %9340 = vrcp.f32 %v7294_v56  ;;  %v8337_v17 = vmul.f32 -1.442695, %v14639_v45  ;;  %v9592_v18 = vmov 0  }
 0x6cf   :  { %v9325_v12 = vpop.eup %9324  ;;  %v7561_v22 = vsel %vm7533_vm14, %v7483_v57, 0.0  ;;  %v7556_v23 = vadd.f32 %v7555_v25, %v7554_v35  ;;  %v7484_v63 = vmul.f32 %v9323_v3, %v14557_v44  ;;  %9342 = vpow2.f32 %v8338_v1  ;;  %v8583_v39 = vpop.f32.mrb[32].mxu1  ;;  %8663 = vset.pattern.permute.xlu1 %v9592_v18  ;;  %8664 = vset.pattern.permute.xlu0 %v9592_v18 }
 0x6d0   :  { %v9327_v32 = vpop.eup %9326  ;;  %v7557_v52 = vsel %vm7533_vm14, %v7481_v48, 0.0  ;;  %v7482_v14 = vmul.f32 %v9325_v12, %v14561_v28  ;;  %9344 = vpow2.f32 %v8336_v4  ;;  %v14650_v38 = vadd.f32 %v8583_v39, %v14492_v27  ;;  %v6942_v20 = vpop.f32.mrb[33].mxu1  ;;  %7780 = vperm.xlu1 %8663, %v7764_v47  }
 0x6d1   :  { %v9329_v55 = vpop.eup %9328  ;;  %v7558_v6 = vadd.f32 %v7557_v52, %v7556_v23  ;;  %v7563_v2 = vsel %vm7533_vm14, %v7484_v63, 0.0  ;;  %v7299_v33 = vadd.f32 1.0, %v9327_v32  ;;  %9346 = vpow2.f32 %v8339_v31  ;;  %v8584_v44 = vpop.f32.mrb[34].mxu1 }
 0x6d2   :  { %v9331_v10 = vpop.eup %9330  ;;  %v7559_v41 = vsel %vm7533_vm14, %v7482_v14, 0.0  ;;  %v7297_v13 = vadd.f32 1.0, %v9329_v55  ;;  %9348 = vpow2.f32 %v8337_v17  ;;  %v8342_v28 = vmul.f32 -1.442695, %v14650_v38  ;;  %v6945_v36 = vpop.f32.mrb[35].mxu1 }
 0x6d3   :  { %v9333_v11 = vpop.eup %9332  ;;  %v7560_v21 = vadd.f32 %v7559_v41, %v7558_v6  ;;  %9350 = vrcp.f32 %v7299_v33  ;;  %v7300_v26 = vadd.f32 1.0, %v9331_v10  ;;  %v14656_v59 = vadd.f32 %v14492_v27, %v6942_v20 }
 0x6d4   :  { %9352 = vrcp.f32 %v7297_v13  ;;  %v7298_v8 = vadd.f32 1.0, %v9333_v11  ;;  %v14659_v54 = vadd.f32 %v8584_v44, %v14492_v27  ;;  %v14662_v25 = vadd.f32 %v14492_v27, %v6945_v36 }
 0x6d5   :  { %v9335_v60 = vpop.eup %9334  ;;  %v7562_v5 = vadd.f32 %v7561_v22, %v7560_v21  ;;  %9354 = vrcp.f32 %v7300_v26  ;;  %v8340_v9 = vmul.f32 -1.442695, %v14656_v59 }
 0x6d6   :  { %v9337_v50 = vpop.eup %9336  ;;  %v7487_v1 = vmul.f32 %v9335_v60, %v14571_v62  ;;  %9356 = vrcp.f32 %v7298_v8  ;;  %v8343_v19 = vmul.f32 -1.442695, %v14659_v54  ;;  %v8341_v30 = vmul.f32 -1.442695, %v14662_v25 }
 0x6d7   :  { %v9339_v43 = vpop.eup %9338  ;;  %v7485_v24 = vmul.f32 %v9337_v50, %v14576_v37  ;;  %v7564_v34 = vadd.f32 %v7563_v2, %v7562_v5  ;;  %9358 = vpow2.f32 %v8342_v28  ;;  %v8587_v16 = vpop.f32.mrb[36].mxu1 }
 0x6d8   :  { %v9341_v56 = vpop.eup %9340  ;;  %9360 = vpow2.f32 %v8340_v9  ;;  %v14673_v4 = vadd.f32 %v8587_v16, %v14492_v27  ;;  %v6958_v62 = vpop.f32.mrb[37].mxu1  ;;  %v7569_v48 = vsel %vm7533_vm14, %v7487_v1, 0.0  ;;  %v7488_v23 = vmul.f32 %v9339_v43, %v14581_v46 }
 0x6d9   :  { %v9343_v42 = vpop.eup %9342  ;;  %v7565_v35 = vsel %vm7533_vm14, %v7485_v24, 0.0  ;;  %v7486_v57 = vmul.f32 %v9341_v56, %v14585_v7  ;;  %9362 = vpow2.f32 %v8343_v19  ;;  %v14678_v31 = vadd.f32 %v14492_v27, %v6958_v62  ;;  %v8588_v37 = vpop.f32.mrb[38].mxu1 }
 0x6da   :  { %v9345_v3 = vpop.eup %9344  ;;  %v7566_v17 = vadd.f32 %v7565_v35, %v7564_v34  ;;  %v7303_v61 = vadd.f32 1.0, %v9343_v42  ;;  %9364 = vpow2.f32 %v8341_v30  ;;  %v6961_v12 = vpop.f32.mrb[39].mxu1  ;;  %v8346_v7 = vmul.f32 -1.442695, %v14673_v4 }
 0x6db   :  { %v9347_v22 = vpop.eup %9346  ;;  %v7567_v63 = vsel %vm7533_vm14, %v7486_v57, 0.0  ;;  %v7301_v39 = vadd.f32 1.0, %v9345_v3  ;;  %v14685_v20 = vadd.f32 %v8588_v37, %v14492_v27  ;;  %v8344_v2 = vmul.f32 -1.442695, %v14678_v31 }
 0x6dc   :  { %v9349_v32 = vpop.eup %9348  ;;  %v7568_v52 = vadd.f32 %v7567_v63, %v7566_v17  ;;  %9366 = vrcp.f32 %v7303_v61  ;;  %v7304_v14 = vadd.f32 1.0, %v9347_v22  ;;  %v14689_v33 = vadd.f32 %v14492_v27, %v6961_v12 }
 0x6dd   :  { %v9351_v55 = vpop.eup %9350  ;;  %9368 = vrcp.f32 %v7301_v39  ;;  %v7302_v6 = vadd.f32 1.0, %v9349_v32  ;;  %v8347_v41 = vmul.f32 -1.442695, %v14685_v20  ;;  %v7571_v28 = vsel %vm7533_vm14, %v7488_v23, 0.0 }
 0x6de   :  { %v9353_v46 = vpop.eup %9352  ;;  %v7570_v44 = vadd.f32 %v7569_v48, %v7568_v52  ;;  %v7491_v10 = vmul.f32 %v9351_v55, %v14597_v40  ;;  %9370 = vrcp.f32 %v7304_v14  ;;  %v8345_v11 = vmul.f32 -1.442695, %v14689_v33 }
 0x6df   :  { %v9355_v13 = vpop.eup %9354  ;;  %v7489_v36 = vmul.f32 %v9353_v46, %v14600_v49  ;;  %9372 = vrcp.f32 %v7302_v6  ;;  %v8591_v21 = vpop.f32.mrb[40].mxu1 }
 0x6e0   :  { %v9357_v26 = vpop.eup %9356  ;;  %v7577_v8 = vsel %vm7533_vm14, %v7491_v10, 0.0  ;;  %v7572_v47 = vadd.f32 %v7571_v28, %v7570_v44  ;;  %9374 = vpow2.f32 %v8346_v7  ;;  %v6974_v60 = vpop.f32.mrb[41].mxu1  ;;  %v14700_v50 = vadd.f32 %v8591_v21, %v14492_v27 }
 0x6e1   :  { %v9359_v5 = vpop.eup %9358  ;;  %v7573_v40 = vsel %vm7533_vm14, %v7489_v36, 0.0  ;;  %v7490_v9 = vmul.f32 %v9357_v26, %v14608_v58  ;;  %9376 = vpow2.f32 %v8344_v2  ;;  %v8592_v49 = vpop.f32.mrb[42].mxu1  ;;  %v7492_v30 = vmul.f32 %v9355_v13, %v14604_v15 }
 0x6e2   :  { %v9361_v1 = vpop.eup %9360  ;;  %v7574_v19 = vadd.f32 %v7573_v40, %v7572_v47  ;;  %v7307_v18 = vadd.f32 1.0, %v9359_v5  ;;  %9378 = vpow2.f32 %v8347_v41  ;;  %v6977_v43 = vpop.f32.mrb[43].mxu1  ;;  %v8350_v56 = vmul.f32 -1.442695, %v14700_v50 }
 0x6e3   :  { %v9363_v24 = vpop.eup %9362  ;;  %v7575_v34 = vsel %vm7533_vm14, %v7490_v9, 0.0  ;;  %v7305_v16 = vadd.f32 1.0, %v9361_v1  ;;  %9380 = vpow2.f32 %v8345_v11  ;;  %v14706_v35 = vadd.f32 %v14492_v27, %v6974_v60 }
 0x6e4   :  { %v9365_v58 = vpop.eup %9364  ;;  %v7576_v62 = vadd.f32 %v7575_v34, %v7574_v19  ;;  %9382 = vrcp.f32 %v7307_v18  ;;  %v7308_v42 = vadd.f32 1.0, %v9363_v24  ;;  %v14709_v15 = vadd.f32 %v8592_v49, %v14492_v27 }
 0x6e5   :  { %9384 = vrcp.f32 %v7305_v16  ;;  %v7306_v57 = vadd.f32 1.0, %v9365_v58  ;;  %v14712_v37 = vadd.f32 %v14492_v27, %v6977_v43  ;;  %v7579_v48 = vsel %vm7533_vm14, %v7492_v30, 0.0 }
 0x6e6   :  { %v9367_v3 = vpop.eup %9366  ;;  %v7578_v17 = vadd.f32 %v7577_v8, %v7576_v62  ;;  %9386 = vrcp.f32 %v7308_v42  ;;  %v8348_v61 = vmul.f32 -1.442695, %v14706_v35  ;;  %v8351_v23 = vmul.f32 -1.442695, %v14709_v15 }
 0x6e7   :  { %v9369_v12 = vpop.eup %9368  ;;  %v7495_v22 = vmul.f32 %v9367_v3, %v14620_v0  ;;  %9388 = vrcp.f32 %v7306_v57  ;;  %v8349_v63 = vmul.f32 -1.442695, %v14712_v37  ;;  %v8595_v39 = vpop.f32.mrb[44].mxu1 }
 0x6e8   :  { %v9371_v7 = vpop.eup %9370  ;;  %v7493_v32 = vmul.f32 %v9369_v12, %v14626_v51  ;;  %v7580_v52 = vadd.f32 %v7579_v48, %v7578_v17  ;;  %9390 = vpow2.f32 %v8350_v56  ;;  %v14721_v14 = vadd.f32 %v8595_v39, %v14492_v27  ;;  %v6990_v55 = vpop.f32.mrb[45].mxu1 }
 0x6e9   :  { %v9373_v6 = vpop.eup %9372  ;;  %v7496_v2 = vmul.f32 %v9371_v7, %v14629_v29  ;;  %9392 = vpow2.f32 %v8348_v61  ;;  %v14725_v0 = vadd.f32 %v14492_v27, %v6990_v55  ;;  %v8596_v46 = vpop.f32.mrb[46].mxu1  ;;  %v7585_v36 = vsel %vm7533_vm14, %v7495_v22, 0.0 }
 0x6ea   :  { %v9375_v44 = vpop.eup %9374  ;;  %v7581_v10 = vsel %vm7533_vm14, %v7493_v32, 0.0  ;;  %v7494_v41 = vmul.f32 %v9373_v6, %v14639_v45  ;;  %9394 = vpow2.f32 %v8351_v23  ;;  %v8354_v51 = vmul.f32 -1.442695, %v14721_v14  ;;  %v6993_v13 = vpop.f32.mrb[47].mxu1 }
 0x6eb   :  { %v9377_v28 = vpop.eup %9376  ;;  %v7582_v11 = vadd.f32 %v7581_v10, %v7580_v52  ;;  %v7311_v21 = vadd.f32 1.0, %v9375_v44  ;;  %9396 = vpow2.f32 %v8349_v63  ;;  %v8352_v47 = vmul.f32 -1.442695, %v14725_v0 }
 0x6ec   :  { %v9379_v29 = vpop.eup %9378  ;;  %v7583_v26 = vsel %vm7533_vm14, %v7494_v41, 0.0  ;;  %v7309_v8 = vadd.f32 1.0, %v9377_v28  ;;  %9398 = vpow2.f32 %v8354_v51  ;;  %v14734_v40 = vadd.f32 %v8596_v46, %v14492_v27 }
 0x6ed   :  { %v9381_v60 = vpop.eup %9380  ;;  %v7584_v5 = vadd.f32 %v7583_v26, %v7582_v11  ;;  %9400 = vrcp.f32 %v7311_v21  ;;  %v7312_v45 = vadd.f32 1.0, %v9379_v29  ;;  %v7587_v49 = vsel %vm7533_vm14, %v7496_v2, 0.0 }
 0x6ee   :  { %v9383_v9 = vpop.eup %9382  ;;  %9402 = vrcp.f32 %v7309_v8  ;;  %v7310_v1 = vadd.f32 1.0, %v9381_v60  ;;  %v14738_v19 = vadd.f32 %v14492_v27, %v6993_v13  ;;  %v8355_v24 = vmul.f32 -1.442695, %v14734_v40 }
 0x6ef   :  { %v9385_v30 = vpop.eup %9384  ;;  %v7586_v18 = vadd.f32 %v7585_v36, %v7584_v5  ;;  %v7499_v43 = vmul.f32 %v9383_v9, %v14650_v38  ;;  %9404 = vrcp.f32 %v7312_v45  ;;  %v8599_v34 = vpop.f32.mrb[48].mxu1 }
 0x6f0   :  { %v9387_v16 = vpop.eup %9386  ;;  %v7497_v56 = vmul.f32 %v9385_v30, %v14656_v59  ;;  %9406 = vrcp.f32 %v7310_v1  ;;  %v8353_v58 = vmul.f32 -1.442695, %v14738_v19  ;;  %v14745_v62 = vadd.f32 %v8599_v34, %v14492_v27  ;;  %v7006_v42 = vpop.f32.mrb[49].mxu1 }
 0x6f1   :  { %v9389_v57 = vpop.eup %9388  ;;  %v7593_v3 = vsel %vm7533_vm14, %v7499_v43, 0.0  ;;  %v7588_v48 = vadd.f32 %v7587_v49, %v7586_v18  ;;  %9408 = vpow2.f32 %v8352_v47  ;;  %v8600_v38 = vpop.f32.mrb[50].mxu1  ;;  %v7500_v39 = vmul.f32 %v9387_v16, %v14659_v54 }
 0x6f2   :  { %v9391_v17 = vpop.eup %9390  ;;  %v7589_v61 = vsel %vm7533_vm14, %v7497_v56, 0.0  ;;  %v7498_v12 = vmul.f32 %v9389_v57, %v14662_v25  ;;  %9410 = vpow2.f32 %v8355_v24  ;;  %v8358_v59 = vmul.f32 -1.442695, %v14745_v62  ;;  %v7009_v22 = vpop.f32.mrb[51].mxu1 }
 0x6f3   :  { %v9393_v23 = vpop.eup %9392  ;;  %v7590_v63 = vadd.f32 %v7589_v61, %v7588_v48  ;;  %v7315_v7 = vadd.f32 1.0, %v9391_v17  ;;  %9412 = vpow2.f32 %v8353_v58  ;;  %v14754_v6 = vadd.f32 %v14492_v27, %v7006_v42 }
 0x6f4   :  { %v9395_v32 = vpop.eup %9394  ;;  %v7591_v52 = vsel %vm7533_vm14, %v7498_v12, 0.0  ;;  %v7313_v55 = vadd.f32 1.0, %v9393_v23  ;;  %9414 = vpow2.f32 %v8358_v59  ;;  %v14757_v44 = vadd.f32 %v8600_v38, %v14492_v27 }
 0x6f5   :  { %v9397_v2 = vpop.eup %9396  ;;  %v7592_v25 = vadd.f32 %v7591_v52, %v7590_v63  ;;  %9416 = vrcp.f32 %v7315_v7  ;;  %v7316_v46 = vadd.f32 1.0, %v9395_v32  ;;  %v8356_v41 = vmul.f32 -1.442695, %v14754_v6 }
 0x6f6   :  { %v9399_v10 = vpop.eup %9398  ;;  %9418 = vrcp.f32 %v7313_v55  ;;  %v7314_v54 = vadd.f32 1.0, %v9397_v2  ;;  %v14761_v51 = vadd.f32 %v14492_v27, %v7009_v22  ;;  %v8359_v11 = vmul.f32 -1.442695, %v14757_v44 }
 0x6f7   :  { %v9401_v13 = vpop.eup %9400  ;;  %v7594_v28 = vadd.f32 %v7593_v3, %v7592_v25  ;;  %9420 = vrcp.f32 %v7316_v46  ;;  %v7319_v36 = vadd.f32 1.0, %v9399_v10  ;;  %v8603_v21 = vpop.f32.mrb[52].mxu1  ;;  %v7595_v26 = vsel %vm7533_vm14, %v7500_v39, 0.0 }
 0x6f8   :  { %v9403_v29 = vpop.eup %9402  ;;  %9422 = vrcp.f32 %v7314_v54  ;;  %v8357_v8 = vmul.f32 -1.442695, %v14761_v51  ;;  %v14767_v47 = vadd.f32 %v8603_v21, %v14492_v27  ;;  %v7022_v60 = vpop.f32.mrb[53].mxu1  ;;  %v7503_v34 = vmul.f32 %v9401_v13, %v14673_v4 }
 0x6f9   :  { %v9405_v5 = vpop.eup %9404  ;;  %v14769_v45 = vadd.f32 %v7595_v26, %v7594_v28  ;;  %v7501_v9 = vmul.f32 %v9403_v29, %v14678_v31  ;;  %9424 = vrcp.f32 %v7319_v36  ;;  %v14773_v49 = vadd.f32 %v14492_v27, %v7022_v60  ;;  %v8604_v1 = vpop.f32.mrb[54].mxu1 }
 0x6fa   :  { %v9407_v30 = vpop.eup %9406  ;;  %9426 = vpow2.f32 %v8356_v41  ;;  %v8362_v18 = vmul.f32 -1.442695, %v14767_v47  ;;  %v7025_v43 = vpop.f32.mrb[55].mxu1  ;;  %v7504_v31 = vmul.f32 %v9405_v5, %v14685_v20  ;;  %v7606_v59 = vsel %vm7533_vm14, %v7503_v34, 0.0 }
 0x6fb   :  { %v9409_v24 = vpop.eup %9408  ;;  %v7502_v16 = vmul.f32 %v9407_v30, %v14689_v33  ;;  %9428 = vpow2.f32 %v8359_v11  ;;  %v7603_v58 = vsel %vm7533_vm14, %v7501_v9, 0.0  ;;  %v8360_v38 = vmul.f32 -1.442695, %v14773_v49 }
 0x6fc   :  { %v9411_v56 = vpop.eup %9410  ;;  %v7317_v42 = vadd.f32 1.0, %v9409_v24  ;;  %9430 = vpow2.f32 %v8357_v8  ;;  %v14783_v33 = vadd.f32 %v8604_v1, %v14492_v27  ;;  %v14787_v22 = vadd.f32 %v14492_v27, %v7025_v43 }
 0x6fd   :  { %v9413_v57 = vpop.eup %9412  ;;  %v7604_v3 = vsel %vm7533_vm14, %v7502_v16, 0.0  ;;  %v7320_v48 = vadd.f32 1.0, %v9411_v56  ;;  %9432 = vpow2.f32 %v8362_v18  ;;  %v7608_v2 = vsel %vm7533_vm14, %v7504_v31, 0.0 }
 0x6fe   :  { %v9415_v17 = vpop.eup %9414  ;;  %v7605_v61 = vadd.f32 %v7604_v3, %v7603_v58  ;;  %9434 = vrcp.f32 %v7317_v42  ;;  %v7318_v4 = vadd.f32 1.0, %v9413_v57  ;;  %v8363_v32 = vmul.f32 -1.442695, %v14783_v33 }
 0x6ff   :  { %v9417_v12 = vpop.eup %9416  ;;  %9436 = vrcp.f32 %v7320_v48  ;;  %v7323_v20 = vadd.f32 1.0, %v9415_v17  ;;  %v8607_v23 = vpop.f32.mrb[56].mxu1  ;;  %v8361_v46 = vmul.f32 -1.442695, %v14787_v22 }
 0x700   :  { %v9419_v63 = vpop.eup %9418  ;;  %v7607_v39 = vadd.f32 %v7606_v59, %v7605_v61  ;;  %v7507_v7 = vmul.f32 %v9417_v12, %v14700_v50  ;;  %9438 = vrcp.f32 %v7318_v4  ;;  %v7038_v52 = vpop.f32.mrb[57].mxu1 }
 0x701   :  { %v9421_v55 = vpop.eup %9420  ;;  %v7505_v25 = vmul.f32 %v9419_v63, %v14706_v35  ;;  %9440 = vrcp.f32 %v7323_v20  ;;  %v8608_v10 = vpop.f32.mrb[58].mxu1 }
 0x702   :  { %v9423_v27 = vpop.eup %9422  ;;  %v7609_v54 = vadd.f32 %v7608_v2, %v7607_v39  ;;  %v7508_v41 = vmul.f32 %v9421_v55, %v14709_v15  ;;  %9442 = vpow2.f32 %v8360_v38  ;;  %v7041_v13 = vpop.f32.mrb[59].mxu1  ;;  %v7614_v21 = vsel %vm7533_vm14, %v7507_v7, 0.0  ;;  %v14803_v15 = vld [vmem:[%s14936_s12] ss:$0 sm:$0xff] }
 0x703   :  { %v9425_v50 = vpop.eup %9424  ;;  %v7610_v28 = vsel %vm7533_vm14, %v7505_v25, 0.0  ;;  %v7506_v36 = vmul.f32 %v9423_v27, %v14712_v37  ;;  %9444 = vpow2.f32 %v8363_v32  ;;  %v14806_v5 = vadd.f32 %v14803_v15, %v8607_v23 }
 0x704   :  { %v9427_v11 = vpop.eup %9426  ;;  %v7611_v35 = vadd.f32 %v7610_v28, %v7609_v54  ;;  %9446 = vpow2.f32 %v8361_v46  ;;  %v7616_v26 = vsel %vm7533_vm14, %v7508_v41, 0.0  ;;  %v7511_v1 = vmul.f32 %v9425_v50, %v14721_v14 }
 0x705   :  { %v9429_v29 = vpop.eup %9428  ;;  %v7612_v8 = vsel %vm7533_vm14, %v7506_v36, 0.0  ;;  %v7321_v60 = vadd.f32 1.0, %v9427_v11  ;;  %v14810_v18 = vadd.f32 %v14803_v15, %v7038_v52  ;;  %v8366_v34 = vmul.f32 -1.442695, %v14806_v5 }
 0x706   :  { %v9431_v37 = vpop.eup %9430  ;;  %v7613_v9 = vadd.f32 %v7612_v8, %v7611_v35  ;;  %v7324_v30 = vadd.f32 1.0, %v9429_v29  ;;  %v14814_v16 = vadd.f32 %v14803_v15, %v8608_v10  ;;  %v14820_v17 = vadd.f32 %v14803_v15, %v7041_v13 }
 0x707   :  { %v9433_v43 = vpop.eup %9432  ;;  %9448 = vrcp.f32 %v7321_v60  ;;  %v7322_v24 = vadd.f32 1.0, %v9431_v37  ;;  %v8611_v56 = vpop.f32.mrb[60].mxu1  ;;  %v8364_v57 = vmul.f32 -1.442695, %v14810_v18  ;;  %v7622_v52 = vsel %vm7533_vm14, %v7511_v1, 0.0 }
 0x708   :  { %v9435_v58 = vpop.eup %9434  ;;  %v7615_v31 = vadd.f32 %v7614_v21, %v7613_v9  ;;  %9450 = vrcp.f32 %v7324_v30  ;;  %v7327_v42 = vadd.f32 1.0, %v9433_v43  ;;  %v7054_v14 = vpop.f32.mrb[61].mxu1  ;;  %v8367_v38 = vmul.f32 -1.442695, %v14814_v16 }
 0x709   :  { %v9437_v3 = vpop.eup %9436  ;;  %v7509_v48 = vmul.f32 %v9435_v58, %v14725_v0  ;;  %9452 = vrcp.f32 %v7322_v24  ;;  %v8612_v61 = vpop.f32.mrb[62].mxu1  ;;  %v14824_v20 = vadd.f32 %v14803_v15, %v8611_v56  ;;  %v8365_v7 = vmul.f32 -1.442695, %v14820_v17 }
 0x70a   :  { %v9439_v4 = vpop.eup %9438  ;;  %v7617_v12 = vadd.f32 %v7616_v26, %v7615_v31  ;;  %v7512_v59 = vmul.f32 %v9437_v3, %v14734_v40  ;;  %9454 = vrcp.f32 %v7327_v42  ;;  %v7057_v23 = vpop.f32.mrb[63].mxu1  ;;  %v14834_v13 = vadd.f32 %v14803_v15, %v7054_v14 }
 0x70b   :  { %v9441_v63 = vpop.eup %9440  ;;  %v7618_v39 = vsel %vm7533_vm14, %v7509_v48, 0.0  ;;  %v7510_v0 = vmul.f32 %v9439_v4, %v14738_v19  ;;  %9456 = vpow2.f32 %v8366_v34  ;;  %v8370_v19 = vmul.f32 -1.442695, %v14824_v20 }
 0x70c   :  { %v9443_v32 = vpop.eup %9442  ;;  %v7619_v55 = vadd.f32 %v7618_v39, %v7617_v12  ;;  %9458 = vpow2.f32 %v8364_v57  ;;  %v7624_v40 = vsel %vm7533_vm14, %v7512_v59, 0.0  ;;  %v14837_v50 = vadd.f32 %v14803_v15, %v8612_v61 }
 0x70d   :  { %v9445_v2 = vpop.eup %9444  ;;  %v7620_v25 = vsel %vm7533_vm14, %v7510_v0, 0.0  ;;  %v7325_v46 = vadd.f32 1.0, %v9443_v32  ;;  %9460 = vpow2.f32 %v8367_v38  ;;  %v14840_v11 = vadd.f32 %v14803_v15, %v7057_v23 }
 0x70e   :  { %v9447_v10 = vpop.eup %9446  ;;  %v7621_v27 = vadd.f32 %v7620_v25, %v7619_v55  ;;  %v7328_v54 = vadd.f32 1.0, %v9445_v2  ;;  %9462 = vpow2.f32 %v8365_v7  ;;  %v8368_v26 = vmul.f32 -1.442695, %v14834_v13 }
 0x70f   :  { %9464 = vrcp.f32 %v7325_v46  ;;  %v7326_v41 = vadd.f32 1.0, %v9447_v10  ;;  %v8615_v28 = vpop.f32.mrb[64].mxu1  ;;  %v8371_v8 = vmul.f32 -1.442695, %v14837_v50  ;;  %v8369_v43 = vmul.f32 -1.442695, %v14840_v11 }
 0x710   :  { %v7623_v36 = vadd.f32 %v7622_v52, %v7621_v27  ;;  %9466 = vrcp.f32 %v7328_v54  ;;  %v14843_v21 = vadd.f32 %v14803_v15, %v8615_v28  ;;  %v7070_v35 = vpop.f32.mrb[65].mxu1  ;;  %v7515_v56 = vmul.f32 %v9441_v63, %v14745_v62 }
 0x711   :  { %v9449_v29 = vpop.eup %9448  ;;  %9468 = vrcp.f32 %v7326_v41  ;;  %v14848_v60 = vadd.f32 %v14803_v15, %v7070_v35  ;;  %v8616_v37 = vpop.f32.mrb[66].mxu1 }
 0x712   :  { %v9451_v9 = vpop.eup %9450  ;;  %v7513_v1 = vmul.f32 %v9449_v29, %v14754_v6  ;;  %v7625_v30 = vadd.f32 %v7624_v40, %v7623_v36  ;;  %9470 = vpow2.f32 %v8370_v19  ;;  %v7073_v24 = vpop.f32.mrb[67].mxu1  ;;  %v8374_v58 = vmul.f32 -1.442695, %v14843_v21 }
 0x713   :  { %v9453_v34 = vpop.eup %9452  ;;  %9472 = vpow2.f32 %v8368_v26  ;;  %v8372_v31 = vmul.f32 -1.442695, %v14848_v60  ;;  %v14858_v6 = vadd.f32 %v14803_v15, %v8616_v37  ;;  %v7516_v62 = vmul.f32 %v9451_v9, %v14757_v44 }
 0x714   :  { %v9455_v42 = vpop.eup %9454  ;;  %v7626_v57 = vsel %vm7533_vm14, %v7513_v1, 0.0  ;;  %v7514_v14 = vmul.f32 %v9453_v34, %v14761_v51  ;;  %9474 = vpow2.f32 %v8371_v8  ;;  %v7630_v59 = vsel %vm7533_vm14, %v7515_v56, 0.0 }
 0x715   :  { %v9457_v3 = vpop.eup %9456  ;;  %v7627_v48 = vadd.f32 %v7626_v57, %v7625_v30  ;;  %9476 = vpow2.f32 %v8369_v43  ;;  %v8375_v0 = vmul.f32 -1.442695, %v14858_v6  ;;  %v14865_v7 = vadd.f32 %v14803_v15, %v7073_v24 }
 0x716   :  { %v9459_v38 = vpop.eup %9458  ;;  %v7628_v61 = vsel %vm7533_vm14, %v7514_v14, 0.0  ;;  %v7331_v4 = vadd.f32 1.0, %v9457_v3  ;;  %9478 = vpow2.f32 %v8374_v58  ;;  %v7632_v2 = vsel %vm7533_vm14, %v7516_v62, 0.0 }
 0x717   :  { %v9461_v12 = vpop.eup %9460  ;;  %v7629_v23 = vadd.f32 %v7628_v61, %v7627_v48  ;;  %v7329_v63 = vadd.f32 1.0, %v9459_v38  ;;  %9480 = vpow2.f32 %v8372_v31  ;;  %v8373_v25 = vmul.f32 -1.442695, %v14865_v7 }
 0x718   :  { %v9463_v51 = vpop.eup %9462  ;;  %9482 = vrcp.f32 %v7331_v4  ;;  %v7332_v39 = vadd.f32 1.0, %v9461_v12  ;;  %v7519_v54 = vmul.f32 %v9455_v42, %v14767_v47 }
 0x719   :  { %v9465_v32 = vpop.eup %9464  ;;  %v7631_v44 = vadd.f32 %v7630_v59, %v7629_v23  ;;  %9484 = vrcp.f32 %v7329_v63  ;;  %v7330_v52 = vadd.f32 1.0, %v9463_v51 }
 0x71a   :  { %v9467_v55 = vpop.eup %9466  ;;  %v7517_v40 = vmul.f32 %v9465_v32, %v14773_v49  ;;  %9486 = vrcp.f32 %v7332_v39  ;;  %v7638_v47 = vsel %vm7533_vm14, %v7519_v54, 0.0 }
 0x71b   :  { %v9469_v46 = vpop.eup %9468  ;;  %v7633_v10 = vadd.f32 %v7632_v2, %v7631_v44  ;;  %9488 = vrcp.f32 %v7330_v52  ;;  %v7520_v49 = vmul.f32 %v9467_v55, %v14783_v33 }
 0x71c   :  { %v9471_v27 = vpop.eup %9470  ;;  %v7634_v15 = vsel %vm7533_vm14, %v7517_v40, 0.0  ;;  %v7518_v19 = vmul.f32 %v9469_v46, %v14787_v22  ;;  %9490 = vpow2.f32 %v8375_v0 }
 0x71d   :  { %v9473_v41 = vpop.eup %9472  ;;  %v7635_v28 = vadd.f32 %v7634_v15, %v7633_v10  ;;  %v7335_v36 = vadd.f32 1.0, %v9471_v27  ;;  %9492 = vpow2.f32 %v8373_v25  ;;  %v7640_v34 = vsel %vm7533_vm14, %v7520_v49, 0.0 }
 0x71e   :  { %v9475_v35 = vpop.eup %9474  ;;  %v7636_v29 = vsel %vm7533_vm14, %v7518_v19, 0.0  ;;  %v7333_v26 = vadd.f32 1.0, %v9473_v41 }
 0x71f   :  { %v9477_v8 = vpop.eup %9476  ;;  %v7637_v37 = vadd.f32 %v7636_v29, %v7635_v28  ;;  %v7336_v9 = vadd.f32 1.0, %v9475_v35 }
 0x720   :  { %v9479_v1 = vpop.eup %9478  ;;  %9494 = vrcp.f32 %v7333_v26  ;;  %v7334_v30 = vadd.f32 1.0, %v9477_v8 }
 0x721   :  { %v9481_v22 = vpop.eup %9480  ;;  %v7639_v43 = vadd.f32 %v7638_v47, %v7637_v37  ;;  %9496 = vrcp.f32 %v7335_v36  ;;  %v7339_v14 = vadd.f32 1.0, %v9479_v1 }
 0x722   :  { %v9483_v24 = vpop.eup %9482  ;;  %9498 = vrcp.f32 %v7334_v30  ;;  %v7337_v56 = vadd.f32 1.0, %v9481_v22 }
 0x723   :  { %v9485_v33 = vpop.eup %9484  ;;  %v7641_v58 = vadd.f32 %v7640_v34, %v7639_v43  ;;  %9500 = vrcp.f32 %v7336_v9  ;;  %v7523_v48 = vmul.f32 %v9483_v24, %v14806_v5 }
 0x724   :  { %v9487_v31 = vpop.eup %9486  ;;  %v7521_v42 = vmul.f32 %v9485_v33, %v14810_v18  ;;  %9502 = vrcp.f32 %v7337_v56 }
 0x725   :  { %v9489_v57 = vpop.eup %9488  ;;  %v7524_v59 = vmul.f32 %v9487_v31, %v14814_v16  ;;  %9504 = vrcp.f32 %v7339_v14  ;;  %v7646_v39 = vsel %vm7533_vm14, %v7523_v48, 0.0  ;;  %v8376_v14 = vld [vmem:[%s14938_s14] ss:$0 sm:$0xff]  ;;  %s9593_s14 = smov [#allocation4]  }
 0x726   :  { %v9491_v3 = vpop.eup %9490  ;;  %v7642_v38 = vsel %vm7533_vm14, %v7521_v42, 0.0  ;;  %v7522_v62 = vmul.f32 %v9489_v57, %v14820_v17  ;;  %v7778_v57 = vand.u32 127, %v6552_v53  ;;  %s7796_s9 = sshll.u32 %s9593_s14, 4  ;;  %s7797_s9 = int_to_ptr.vmem [resolvable:$true] %s7796_s9 }
 0x727   :  { %v9493_v61 = vpop.eup %9492  ;;  %v7643_v4 = vadd.f32 %v7642_v38, %v7641_v58  ;;  %v7340_v12 = vadd.f32 1.0, %v9491_v3  ;;  %v7648_v44 = vsel %vm7533_vm14, %v7524_v59, 0.0  ;;  %s9561_s19 = scalar_lea.vmem %s7797_s9, 32  ;;  %p9566_p1 = scmp.lt.s32.totalorder %s7797_s9, %s7797_s9 }
 0x728   :  { %v7644_v23 = vsel %vm7533_vm14, %v7522_v62, 0.0  ;;  %v7338_v63 = vadd.f32 1.0, %v9493_v61  ;;  %p9562_p0 = scmp.ne.s32.totalorder %s7797_s9, %s9561_s19  ;;  %p9567_p2 = scmp.lt.s32.totalorder %s9561_s19, %s9561_s19 }
 0x729   :  { %v7645_v51 = vadd.f32 %v7644_v23, %v7643_v4 }
 0x72a   :  { %v9495_v18 = vpop.eup %9494  ;;  %9506 = vrcp.f32 %v7338_v63  ;;  %p9568_p3 = por %p9567_p2, %p9566_p1 }
 0x72b   :  { %v9497_v0 = vpop.eup %9496  ;;  %v7647_v5 = vadd.f32 %v7646_v39, %v7645_v51  ;;  %v7525_v32 = vmul.f32 %v9495_v18, %v14834_v13  ;;  %9508 = vrcp.f32 %v7340_v12 }
 0x72c   :  { %v9499_v17 = vpop.eup %9498  ;;  %v7527_v25 = vmul.f32 %v9497_v0, %v14824_v20  ;;  %v7597_v20 = vrot.slane %v14769_v45, 4  ;;  %p9569_p4 = pnand %p9568_p3, %p9562_p0 }
 0x72d   :  { %v9501_v52 = vpop.eup %9500  ;;  %v7649_v55 = vadd.f32 %v7648_v44, %v7647_v5  ;;  %v7650_v16 = vsel %vm7533_vm14, %v7525_v32, 0.0  ;;  %v7526_v2 = vmul.f32 %v9499_v17, %v14840_v11 }
 0x72e   :  { %v9503_v40 = vpop.eup %9502  ;;  %v7528_v27 = vmul.f32 %v9501_v52, %v14837_v50  ;;  %v7654_v15 = vsel %vm7533_vm14, %v7527_v25, 0.0  ;;  %v7598_v37 = vadd.f32 %v7597_v20, %v14769_v45 }
 0x72f   :  { %v7651_v46 = vadd.f32 %v7650_v16, %v7649_v55  ;;  %v7652_v10 = vsel %vm7533_vm14, %v7526_v2, 0.0  ;;  %v7529_v13 = vmul.f32 %v9503_v40, %v14848_v60  ;;  %v9505_v19 = vpop.eup %9504 }
 0x730   :  { %v7656_v36 = vsel %vm7533_vm14, %v7528_v27, 0.0  ;;  %v7531_v50 = vmul.f32 %v9505_v19, %v14843_v21  ;;  %v7599_v22 = vrot.slane %v7598_v37, 2 }
 0x731   :  { %v7653_v54 = vadd.f32 %v7652_v10, %v7651_v46  ;;  %v7658_v11 = vsel %vm7533_vm14, %v7529_v13, 0.0 }
 0x732   :  { %v7662_v1 = vsel %vm7533_vm14, %v7531_v50, 0.0  ;;  %v7600_v34 = vadd.f32 %v7599_v22, %v7598_v37 }
 0x733   :  { %v7655_v41 = vadd.f32 %v7654_v15, %v7653_v54 }
 0x734   :  { %v9507_v28 = vpop.eup %9506  ;;  %v7601_v21 = vrot.slane %v7600_v34, 1 }
 0x735   :  { %v9509_v35 = vpop.eup %9508  ;;  %v7657_v49 = vadd.f32 %v7656_v36, %v7655_v41  ;;  %v7530_v29 = vmul.f32 %v9507_v28, %v14865_v7 }
 0x736   :  { %v7532_v8 = vmul.f32 %v9509_v35, %v14858_v6  ;;  %v7602_v31 = vadd.f32 %v7601_v21, %v7600_v34 }
 0x737   :  { %v7659_v26 = vadd.f32 %v7658_v11, %v7657_v49  ;;  %v7660_v60 = vsel %vm7533_vm14, %v7530_v29, 0.0 }
 0x738   :  { %v7664_v30 = vsel %vm7533_vm14, %v7532_v8, 0.0 }
 0x739   :  { %v7661_v9 = vadd.f32 %v7660_v60, %v7659_v26 }
 0x73b   :  { %v7663_v47 = vadd.f32 %v7662_v1, %v7661_v9 }
 0x73d   :  { %v7665_v43 = vadd.f32 %v7664_v30, %v7663_v47 }
 0x73f   :  { %v7666_v24 = vrot.slane %v7665_v43, 4 }
 0x741   :  { %v7667_v7 = vadd.f32 %v7666_v24, %v7665_v43 }
 0x743   :  { %v7668_v56 = vrot.slane %v7667_v7, 2 }
 0x745   :  { %v7669_v33 = vadd.f32 %v7668_v56, %v7667_v7 }
 0x747   :  { %v7670_v58 = vrot.slane %v7669_v33, 1 }
 0x749   :  { %v7671_v42 = vadd.f32 %v7670_v58, %v7669_v33 }
 0x74b   :  { %v7672_v6 = vsel %vm6366_vm12, %v7602_v31, %v7671_v42 }
 0x74c   :  { %v7673_v45 = vmul.f32 0.00390625, %v7672_v6 }
 0x74e   :  { %8634 = vmatmul.mubr.msk.f32.vlgmr.msra.gmra.mrb[64].mxu0 %vm7533_vm14, %v7673_v45 }
 0x74f   :  { %v7781_v3 = vpop.permute.xlu1 %7780 }
 0x750   :  { %vm7782_vm0 = vcmp.eq.s32.totalorder %v7778_v57, %v7781_v3 }
 0x821   :  { %v7758_v48 = vpop.f32.mrb[64].mxu0 }
 0x822   :  { %v7759_v38 = vadd.f32 %v8376_v14, %v7758_v48  ;;  %v8635_v62 = vpop.f32.mrb[65].mxu0 }
 0x824   :  { %v7765_v61 = vsel %vm7762_vm15, %v7759_v38, -inf  ;;  %7763 = vst.msk [vmem:[#allocation4] sm:$0x3] %vm7762_vm15, %v7759_v38  ;;  %v7783_v4 = vsel %vm7782_vm0, %v7759_v38, 0.0 }
 0x825   :  { %7766 = vmax.xlane.f32.xlu0 %v7765_v61  ;;  %v7784_v12 = vsel %vm7762_vm15, %v7783_v4, 0.0 }
 0x829   :  { %7785 = vadd.xlane.f32.xlu0 %v7784_v12 }
 0x8b2   :  { %v7767_v59 = vpop.xlane.xlu0 %7766 }
 0x8b3   :  { %v7768_v23 = vsub.f32 %v7759_v38, %v7767_v59 }
 0x8b5   :  { %v7769_v63 = vmul.f32 1.442695, %v7768_v23 }
 0x8b7   :  { %9510 = vpow2.f32 %v7769_v63 }
 0x8c1   :  { %v9511_v53 = vpop.eup %9510 }
 0x8c2   :  { %v7771_v51 = vsel %vm7762_vm15, %v9511_v53, 0.0 }
 0x8c3   :  { %7772 = vadd.xlane.f32.xlu1 %v7771_v51 }
 0x8c4   :  { %9572 = shalt.err (!%p9569_p4)
}
 0x8c5   :  { %s9573_s10 = scalar_lea.hbm %s14939_s15, 32 }
 0x8c6   :  { %p9574_p5 = scmp.ne.s32.totalorder %s14939_s15, %s9573_s10  ;;  %p9577_p6 = scmp.lt.u32.totalorder %s9573_s10, %s14939_s15 }
 0x8c8   :  { %p9579_p7 = pnand %p9577_p6, %p9574_p5 }
 0x8ca   :  { %9582 = shalt.err (!%p9579_p7)
}
 0x8cb   :  { %7799 = dma.vmem_to_hbm [thread:$0]  %s7797_s9, 32, %s14939_s15, [#allocation5]   ;;  %v7786_v32 = vpop.xlane.xlu0 %7785  ;;  %vm7788_vm1 = vcmask 1024  }
 0x950   :  { %v7773_v18 = vpop.xlane.xlu1 %7772 }
 0x951   :  { %9512 = vlog2.f32 %v7773_v18 }
 0x95b   :  { %v9513_v39 = vpop.eup %9512 }
 0x95c   :  { %v7775_v0 = vmul.f32 0.6931472, %v9513_v39 }
 0x95e   :  { %v7776_v5 = vadd.f32 %v7775_v0, %v7767_v59 }
 0x960   :  { %v7787_v17 = vsub.f32 %v7776_v5, %v7786_v32 }
 0x962   :  { %7789 = vst.msk [vmem:[%s14940_s16] sm:$0x3] %vm7788_vm1, %v7787_v17 }
 0x963   :  { %9583 = dma.done.wait [#allocation5], 32  }
 0x964   :  { %9584 = vsyncadd [#allocation5], 4294967264 }
 0x965   :  { %7807 = vsyncpa [#allocation5], 1 }

</bundles_post_ra>
